<compile_context>
chip_gen: v7x
topology: tpu7x:2x2x1
jax: 0.10.0
libtpu: 0.0.40
codegen_flags: <defaults>
</compile_context>

<pallas_src>
import functools

import jax
import jax.numpy as jnp
from jax import lax
from jax.experimental import pallas as pl
from jax.experimental.pallas import tpu as pltpu


# ------------------------------------------------------------------ helpers
def _pick_tile(dim, cap, align):
    """Largest tile <= cap that divides dim and is a multiple of align
    (falls back to the full dim, which is always a legal block size)."""
    if dim <= cap:
        return dim
    for t in range(cap, 0, -align):
        if t % align == 0 and dim % t == 0:
            return t
    return dim


def _maybe_vmem_limit(bytes_needed, headroom=1.25):
    """Only raise the scoped-VMEM limit when the working set needs it
    (v5e default 16 MiB, v6e/v7x default 32 MiB); never request more than
    ~60 MiB so v7x's 64 MiB physical VMEM is respected."""
    need = int(bytes_needed * headroom) + (1 << 20)
    if need <= 16 * 1024 * 1024:
        return None
    return min(need, 60 * 1024 * 1024)


def _sigmoid(x):
    # One EUP transcendental (tanh) instead of exp + reciprocal.
    return 0.5 * (jnp.tanh(0.5 * x) + 1.0)


# ------------------------------------------------------ tiled matmul + bias
def _matmul_bias_k1_kernel(x_ref, w_ref, b_ref, o_ref):
    # Whole-K block: no accumulator scratch, no extra VPU copy.
    o_ref[...] = (jnp.dot(x_ref[...], w_ref[...],
                          preferred_element_type=jnp.float32)
                  + b_ref[...]).astype(o_ref.dtype)


def _matmul_bias_kernel(x_ref, w_ref, b_ref, o_ref, acc_ref):
    @pl.when(pl.program_id(2) == 0)
    def _():
        acc_ref[...] = jnp.zeros_like(acc_ref)

    acc_ref[...] += jnp.dot(x_ref[...], w_ref[...],
                            preferred_element_type=jnp.float32)

    @pl.when(pl.program_id(2) == pl.num_programs(2) - 1)
    def _():
        o_ref[...] = (acc_ref[...] + b_ref[...]).astype(o_ref.dtype)


def matmul_bias(x, w, b, out_dtype=jnp.float32, tm=256, tn=512, tk=512):
    """x: (M, K) bf16, w: (K, N) bf16, b: (1, N) f32 -> (M, N) out_dtype."""
    M, K = x.shape
    K2, N = w.shape
    assert K == K2
    tm = _pick_tile(M, tm, 8)
    tn = _pick_tile(N, tn, 128)
    tk = _pick_tile(K, tk, 128)
    nk = K // tk
    out_bytes = jnp.dtype(out_dtype).itemsize
    vmem_bytes = (2 * (tm * tk * x.dtype.itemsize
                       + tk * tn * w.dtype.itemsize
                       + tn * 4
                       + tm * tn * out_bytes)
                  + tm * tn * 4)
    vlimit = _maybe_vmem_limit(vmem_bytes)

    if nk == 1:
        # K fits a single block (true for E = H = 128 here): skip the
        # accumulator scratch entirely.
        return pl.pallas_call(
            _matmul_bias_k1_kernel,
            out_shape=jax.ShapeDtypeStruct((M, N), out_dtype),
            grid=(M // tm, N // tn),
            in_specs=[
                pl.BlockSpec((tm, K), lambda i, j: (i, 0)),
                pl.BlockSpec((K, tn), lambda i, j: (0, j)),
                pl.BlockSpec((1, tn), lambda i, j: (0, j)),
            ],
            out_specs=pl.BlockSpec((tm, tn), lambda i, j: (i, j)),
            compiler_params=pltpu.CompilerParams(
                dimension_semantics=("parallel", "parallel"),
                vmem_limit_bytes=vlimit),
        )(x, w, b)

    return pl.pallas_call(
        _matmul_bias_kernel,
        out_shape=jax.ShapeDtypeStruct((M, N), out_dtype),
        grid=(M // tm, N // tn, nk),
        in_specs=[
            pl.BlockSpec((tm, tk), lambda i, j, k: (i, k)),
            pl.BlockSpec((tk, tn), lambda i, j, k: (k, j)),
            pl.BlockSpec((1, tn), lambda i, j, k: (0, j)),
        ],
        out_specs=pl.BlockSpec((tm, tn), lambda i, j, k: (i, j)),
        scratch_shapes=[pltpu.VMEM((tm, tn), jnp.float32)],
        compiler_params=pltpu.CompilerParams(
            dimension_semantics=("parallel", "parallel", "arbitrary"),
            vmem_limit_bytes=vlimit),
    )(x, w, b)


# ------------------------------------------- fused LSTM layer (proj + recur)
def _lstm_layer_kernel(x_ref, wih_ref, whh_ref, b_ref, h0_ref, c0_ref,
                       y_ref, hn_ref, cn_ref,
                       h_sc, c_sc, gx_sc, y_sc,
                       *, hidden_dim, t_blk):
    t = pl.program_id(1)

    @pl.when(t == 0)
    def _():
        h_sc[...] = h0_ref[...]
        c_sc[...] = c0_ref[...]

    H = hidden_dim
    bb = h_sc.shape[0]
    E = x_ref.shape[-1]

    # Fused input projection for the whole (bb, t_blk) block: one MXU matmul,
    # result stays in VMEM (no HBM round trip of a (B, S, 4H) f32 tensor).
    x2 = x_ref[...].reshape(bb * t_blk, E)
    gx = jnp.dot(x2, wih_ref[...],
                 preferred_element_type=jnp.float32) + b_ref[...]
    gx_sc[...] = gx.reshape(bb, t_blk, 4 * H)

    # Load the recurrent weights once per grid step; reused every timestep.
    whh = whh_ref[...]

    h = h_sc[...]                                        # (bb, H) f32
    c = c_sc[...]                                        # (bb, H) f32

    # Serial recurrence over the timestep block. Only h @ W_hh is recomputed
    # per step. NOTE: gate slices are lane-aligned when H % 128 == 0 (true for
    # the shapes used here); other H remains correct but uses masked accesses.
    for k in range(t_blk):
        gates = gx_sc[:, k, :] + jnp.dot(
            h.astype(whh.dtype), whh,
            preferred_element_type=jnp.float32)          # (bb, 4H) f32
        i = _sigmoid(gates[:, 0 * H:1 * H])
        f = _sigmoid(gates[:, 1 * H:2 * H])
        g = jnp.tanh(gates[:, 2 * H:3 * H])
        o = _sigmoid(gates[:, 3 * H:4 * H])
        c = f * c + i * g
        h = o * jnp.tanh(c)
        y_sc[:, k, :] = h                                # f32 VMEM scratch

    # One dense cast + store for the whole block (no per-step bf16 stores).
    y_ref[...] = y_sc[...].astype(y_ref.dtype)
    h_sc[...] = h
    c_sc[...] = c

    @pl.when(t == pl.num_programs(1) - 1)
    def _():
        hn_ref[...] = h
        cn_ref[...] = c


def lstm_layer(x, wih, whh, b, h0, c0, *, t_blk=None, batch_block=None):
    """x: (B, S, E) bf16, wih: (E, 4H) bf16, whh: (H, 4H) bf16,
    b: (1, 4H) f32 (= b_ih + b_hh), h0/c0: (B, H) f32.
    Returns y (B, S, H) bf16, h_n, c_n (B, H) f32."""
    B, S, E = x.shape
    H = h0.shape[-1]
    assert wih.shape == (E, 4 * H) and whh.shape == (H, 4 * H)

    if t_blk is None:
        # Moderate block: amortizes the ~0.35us/grid-step overhead while the
        # statically-unrolled time loop keeps vreg pressure bounded.
        # TODO(synk): switch to lax.fori_loop + pl.ds over gx_sc/y_sc to grow
        #   t_blk further without code-size / live-range blowup.
        t_blk = S
        for cand in (32, 16, 8):
            if S % cand == 0:
                t_blk = cand
                break
    if batch_block is None:
        # Batch is the only free MXU M-fill dimension for the recurrence;
        # prefer up to 256 rows (v6e/v7x MXU height). For B > 256 this also
        # gives >= 2 blocks on the "parallel" axis (v7x: 2 TensorCores).
        bb = B
        if B > 256:
            for cand in range(256, 0, -8):
                if B % cand == 0:
                    bb = cand
                    break
    else:
        bb = batch_block
    assert B % bb == 0 and S % t_blk == 0

    grid = (B // bb, S // t_blk)
    kernel = functools.partial(_lstm_layer_kernel, hidden_dim=H, t_blk=t_blk)

    vmem_bytes = (2 * bb * t_blk * E * x.dtype.itemsize      # x blocks (2-buf)
                  + 2 * bb * t_blk * H * 2                   # y blocks (2-buf)
                  + E * 4 * H * 2 + H * 4 * H * 2            # wih, whh
                  + 4 * H * 4                                # bias
                  + 4 * bb * H * 4                           # h0/c0 + h/c scr
                  + bb * t_blk * 4 * H * 4                   # gx scratch
                  + bb * t_blk * H * 4)                      # y scratch
    vlimit = _maybe_vmem_limit(vmem_bytes)

    return pl.pallas_call(
        kernel,
        out_shape=(jax.ShapeDtypeStruct((B, S, H), jnp.bfloat16),
                   jax.ShapeDtypeStruct((B, H), jnp.float32),
                   jax.ShapeDtypeStruct((B, H), jnp.float32)),
        grid=grid,
        in_specs=[
            pl.BlockSpec((bb, t_blk, E), lambda bi, ti: (bi, ti, 0)),  # x
            pl.BlockSpec((E, 4 * H), lambda bi, ti: (0, 0)),           # W_ih^T
            pl.BlockSpec((H, 4 * H), lambda bi, ti: (0, 0)),           # W_hh^T
            pl.BlockSpec((1, 4 * H), lambda bi, ti: (0, 0)),           # bias
            pl.BlockSpec((bb, H), lambda bi, ti: (bi, 0)),             # h0
            pl.BlockSpec((bb, H), lambda bi, ti: (bi, 0)),             # c0
        ],
        out_specs=(
            pl.BlockSpec((bb, t_blk, H), lambda bi, ti: (bi, ti, 0)),  # y
            pl.BlockSpec((bb, H), lambda bi, ti: (bi, 0)),             # h_n
            pl.BlockSpec((bb, H), lambda bi, ti: (bi, 0)),             # c_n
        ),
        scratch_shapes=[
            pltpu.VMEM((bb, H), jnp.float32),                 # h state
            pltpu.VMEM((bb, H), jnp.float32),                 # c state
            pltpu.VMEM((bb, t_blk, 4 * H), jnp.float32),      # gx block
            pltpu.VMEM((bb, t_blk, H), jnp.float32),          # y block (f32)
        ],
        compiler_params=pltpu.CompilerParams(
            dimension_semantics=("parallel", "arbitrary"),
            vmem_limit_bytes=vlimit),
    )(x, wih, whh, b, h0, c0)


# ------------------------------------------------------------------ params
def init_params(key, vocab_size, embedding_dim, hidden_dim, num_layers):
    keys = jax.random.split(key, 2 + 4 * num_layers)
    k = hidden_dim ** -0.5
    params = {
        "embedding": jax.random.normal(
            keys[0], (vocab_size, embedding_dim), jnp.float32
        ).astype(jnp.bfloat16),
        "w_fc": jax.random.uniform(
            keys[1], (hidden_dim, vocab_size), jnp.float32, -k, k
        ).astype(jnp.bfloat16),
        "b_fc": jnp.zeros((1, vocab_size), jnp.float32),
        "wih": [], "whh": [], "b": [],
    }
    for l in range(num_layers):
        d_in = embedding_dim if l == 0 else hidden_dim
        kk = keys[2 + 4 * l: 2 + 4 * (l + 1)]
        # stored pre-transposed: (d_in, 4H) / (H, 4H); gate order i, f, g, o
        params["wih"].append(jax.random.uniform(
            kk[0], (d_in, 4 * hidden_dim), jnp.float32, -k, k
        ).astype(jnp.bfloat16))
        params["whh"].append(jax.random.uniform(
            kk[1], (hidden_dim, 4 * hidden_dim), jnp.float32, -k, k
        ).astype(jnp.bfloat16))
        b_ih = jax.random.uniform(kk[2], (4 * hidden_dim,), jnp.float32, -k, k)
        b_hh = jax.random.uniform(kk[3], (4 * hidden_dim,), jnp.float32, -k, k)
        params["b"].append((b_ih + b_hh).reshape(1, 4 * hidden_dim))
    return params


# ------------------------------------------------------------------ forward
def generator_forward(params, x_tokens, hidden):
    """x_tokens: (B, S) int32, hidden = (h0, c0) each (L, B, H) f32.
    Returns (out (B*S, V) f32, (h_n, c_n))  -- same as the torch module."""
    h0, c0 = hidden
    B, S = x_tokens.shape
    H = params["whh"][0].shape[0]
    num_layers = len(params["whh"])

    # Embedding lookup: data-dependent gather, left to XLA.
    layer_in = params["embedding"][x_tokens]               # (B, S, E) bf16

    h_n, c_n = [], []
    for l in range(num_layers):
        y, hl, cl = lstm_layer(layer_in, params["wih"][l], params["whh"][l],
                               params["b"][l], h0[l], c0[l])
        h_n.append(hl)
        c_n.append(cl)
        layer_in = y                                       # (B, S, H) bf16

    # Batch-first row-major flatten == torch's lstm_out.view(-1, H).
    out = matmul_bias(layer_in.reshape(B * S, H), params["w_fc"],
                      params["b_fc"], out_dtype=jnp.float32)   # (B*S, V)
    return out, (jnp.stack(h_n), jnp.stack(c_n))


# ------------------------------------------------------------------ reference
def _reference_forward(params, x_tokens, hidden):
    """Pure-JAX reference with the same bf16-weight / f32-accumulate recipe."""
    h0, c0 = hidden
    B, S = x_tokens.shape
    H = params["whh"][0].shape[0]
    num_layers = len(params["whh"])

    x = params["embedding"][x_tokens].reshape(B * S, -1)   # bf16
    h_n, c_n = [], []
    for l in range(num_layers):
        wih, whh, b = params["wih"][l], params["whh"][l], params["b"][l]
        gx = jnp.dot(x.astype(jnp.bfloat16), wih,
                     preferred_element_type=jnp.float32) + b
        gx = gx.reshape(B, S, 4 * H)

        def step(carry, g_t):
            h, c = carry
            gates = g_t + jnp.dot(h.astype(jnp.bfloat16), whh,
                                  preferred_element_type=jnp.float32)
            i = jax.nn.sigmoid(gates[:, 0 * H:1 * H])
            f = jax.nn.sigmoid(gates[:, 1 * H:2 * H])
            g = jnp.tanh(gates[:, 2 * H:3 * H])
            o = jax.nn.sigmoid(gates[:, 3 * H:4 * H])
            c = f * c + i * g
            h = o * jnp.tanh(c)
            return (h, c), h.astype(jnp.bfloat16)

        (hl, cl), ys = lax.scan(step, (h0[l], c0[l]),
                                jnp.transpose(gx, (1, 0, 2)))
        h_n.append(hl)
        c_n.append(cl)
        x = jnp.transpose(ys, (1, 0, 2)).reshape(B * S, H)

    out = (jnp.dot(x, params["w_fc"], preferred_element_type=jnp.float32)
           + params["b_fc"])
    return out, (jnp.stack(h_n), jnp.stack(c_n))


# ------------------------------------------------------------------ main
if __name__ == "__main__":
    vocab_size, embedding_dim, hidden_dim, num_layers = 256, 128, 128, 2
    batch, seq = 8, 16

    key = jax.random.PRNGKey(0)
    k_param, k_x = jax.random.split(key)
    params = init_params(k_param, vocab_size, embedding_dim, hidden_dim,
                         num_layers)

    x = jax.random.randint(k_x, (batch, seq), 0, vocab_size, jnp.int32)
    hidden = (jnp.zeros((num_layers, batch, hidden_dim), jnp.float32),
              jnp.zeros((num_layers, batch, hidden_dim), jnp.float32))

    fwd = jax.jit(generator_forward)
    out, (h_n, c_n) = fwd(params, x, hidden)
    jax.block_until_ready((out, h_n, c_n))

    ref_out, (ref_h, ref_c) = _reference_forward(params, x, hidden)

    assert out.shape == (batch * seq, vocab_size)
    assert h_n.shape == (num_layers, batch, hidden_dim)
    assert c_n.shape == (num_layers, batch, hidden_dim)
    assert jnp.allclose(out, ref_out, atol=5e-3, rtol=5e-3), \
        float(jnp.max(jnp.abs(out - ref_out)))
    assert jnp.allclose(h_n, ref_h, atol=5e-3, rtol=5e-3)
    assert jnp.allclose(c_n, ref_c, atol=5e-3, rtol=5e-3)

    print("KERNEL_OK")
</pallas_src>

<mosaic_0001>
module attributes {stable_mosaic.version = 11 : i64} {
  func.func @_matmul_bias_k1_kernel(%arg0: i32, %arg1: i32, %arg2: memref<128x128xbf16, #tpu.memory_space<vmem>>, %arg3: memref<128x256xbf16, #tpu.memory_space<vmem>>, %arg4: memref<1x256xf32, #tpu.memory_space<vmem>>, %arg5: memref<128x256xf32, #tpu.memory_space<vmem>>) attributes {dimension_semantics = [#tpu.dimension_semantics<parallel>, #tpu.dimension_semantics<parallel>], iteration_bounds = array<i64: 1, 1>, scalar_prefetch = 0 : i64, scratch_operands = 0 : i64, tpu.core_type = #tpu.core_type<tc>, window_params = [{transform_indices = @transform_0, window_bounds = array<i64: 128, 128>}, {transform_indices = @transform_1, window_bounds = array<i64: 128, 256>}, {transform_indices = @transform_2, window_bounds = array<i64: 1, 256>}, {transform_indices = @transform_3, window_bounds = array<i64: 128, 256>}]} {
    %c0 = arith.constant 0 : index
    %c0_0 = arith.constant 0 : index
    %0 = vector.load %arg2[%c0, %c0_0] : memref<128x128xbf16, #tpu.memory_space<vmem>>, vector<128x128xbf16>
    %c0_1 = arith.constant 0 : index
    %c0_2 = arith.constant 0 : index
    %1 = vector.load %arg3[%c0_1, %c0_2] : memref<128x256xbf16, #tpu.memory_space<vmem>>, vector<128x256xbf16>
    %cst = arith.constant dense<0.000000e+00> : vector<128x256xf32>
    %2 = tpu.matmul %0, %1, %cst {dimension_numbers = #tpu.dot_dimension_numbers<[1], [0], [0], [1], [0, 0, 1, 1], [], []>} : vector<128x128xbf16>, vector<128x256xbf16>, vector<128x256xf32> -> vector<128x256xf32>
    %c0_3 = arith.constant 0 : index
    %c0_4 = arith.constant 0 : index
    %3 = vector.load %arg4[%c0_3, %c0_4] : memref<1x256xf32, #tpu.memory_space<vmem>>, vector<1x256xf32>
    %4 = vector.broadcast %3 : vector<1x256xf32> to vector<128x256xf32>
    %5 = arith.addf %2, %4 : vector<128x256xf32>
    %c0_5 = arith.constant 0 : index
    %c0_6 = arith.constant 0 : index
    %6 = vector.load %arg5[%c0_5, %c0_6] : memref<128x256xf32, #tpu.memory_space<vmem>>, vector<128x256xf32>
    tpu.vector_store %arg5[%c0_5, %c0_6], %5 {strides = array<i32>} : memref<128x256xf32, #tpu.memory_space<vmem>>, vector<128x256xf32>,
    return
  }
  func.func @transform_0(%arg0: i32, %arg1: i32) -> (i32, i32) {
    %c0_i32 = arith.constant 0 : i32
    %c0_i32_0 = arith.constant 0 : i32
    return %arg0, %c0_i32 : i32, i32
  }
  func.func @transform_1(%arg0: i32, %arg1: i32) -> (i32, i32) {
    %c0_i32 = arith.constant 0 : i32
    %c0_i32_0 = arith.constant 0 : i32
    return %c0_i32, %arg1 : i32, i32
  }
  func.func @transform_2(%arg0: i32, %arg1: i32) -> (i32, i32) {
    %c0_i32 = arith.constant 0 : i32
    %c0_i32_0 = arith.constant 0 : i32
    return %c0_i32, %arg1 : i32, i32
  }
  func.func @transform_3(%arg0: i32, %arg1: i32) -> (i32, i32) {
    %c0_i32 = arith.constant 0 : i32
    return %arg0, %arg1 : i32, i32
  }
}

module attributes {stable_mosaic.version = 11 : i64} {
  func.func @_lstm_layer_kernel(%arg0: i32, %arg1: i32, %arg2: memref<8x16x128xbf16, #tpu.memory_space<vmem>>, %arg3: memref<128x512xbf16, #tpu.memory_space<vmem>>, %arg4: memref<128x512xbf16, #tpu.memory_space<vmem>>, %arg5: memref<1x512xf32, #tpu.memory_space<vmem>>, %arg6: memref<8x128xf32, #tpu.memory_space<vmem>>, %arg7: memref<8x128xf32, #tpu.memory_space<vmem>>, %arg8: memref<8x16x128xbf16, #tpu.memory_space<vmem>>, %arg9: memref<8x128xf32, #tpu.memory_space<vmem>>, %arg10: memref<8x128xf32, #tpu.memory_space<vmem>>, %arg11: memref<8x128xf32, #tpu.memory_space<vmem>>, %arg12: memref<8x128xf32, #tpu.memory_space<vmem>>, %arg13: memref<8x16x512xf32, #tpu.memory_space<vmem>>, %arg14: memref<8x16x128xf32, #tpu.memory_space<vmem>>) attributes {dimension_semantics = [#tpu.dimension_semantics<parallel>, #tpu.dimension_semantics<arbitrary>], iteration_bounds = array<i64: 1, 1>, scalar_prefetch = 0 : i64, scratch_operands = 4 : i64, tpu.core_type = #tpu.core_type<tc>, window_params = [{transform_indices = @transform_0, window_bounds = array<i64: 8, 16, 128>}, {pipeline_mode = #tpu.pipeline_mode<synchronous>, transform_indices = @transform_1, window_bounds = array<i64: 128, 512>}, {pipeline_mode = #tpu.pipeline_mode<synchronous>, transform_indices = @transform_2, window_bounds = array<i64: 128, 512>}, {pipeline_mode = #tpu.pipeline_mode<synchronous>, transform_indices = @transform_3, window_bounds = array<i64: 1, 512>}, {transform_indices = @transform_4, window_bounds = array<i64: 8, 128>}, {transform_indices = @transform_5, window_bounds = array<i64: 8, 128>}, {transform_indices = @transform_6, window_bounds = array<i64: 8, 16, 128>}, {transform_indices = @transform_7, window_bounds = array<i64: 8, 128>}, {transform_indices = @transform_8, window_bounds = array<i64: 8, 128>}]} {
    %c0_i32 = arith.constant 0 : i32
    %0 = arith.cmpi eq, %arg1, %c0_i32 : i32
    %1 = arith.extui %0 : i1 to i32
    %c0_i32_0 = arith.constant 0 : i32
    %2 = arith.cmpi ne, %1, %c0_i32_0 : i32
    scf.if %2 {
      %c0_269 = arith.constant 0 : index
      %c0_270 = arith.constant 0 : index
      %647 = vector.load %arg6[%c0_269, %c0_270] : memref<8x128xf32, #tpu.memory_space<vmem>>, vector<8x128xf32>
      %c0_271 = arith.constant 0 : index
      %c0_272 = arith.constant 0 : index
      %648 = vector.load %arg11[%c0_271, %c0_272] : memref<8x128xf32, #tpu.memory_space<vmem>>, vector<8x128xf32>
      tpu.vector_store %arg11[%c0_271, %c0_272], %647 {strides = array<i32>} : memref<8x128xf32, #tpu.memory_space<vmem>>, vector<8x128xf32>,
      %c0_273 = arith.constant 0 : index
      %c0_274 = arith.constant 0 : index
      %649 = vector.load %arg7[%c0_273, %c0_274] : memref<8x128xf32, #tpu.memory_space<vmem>>, vector<8x128xf32>
      %c0_275 = arith.constant 0 : index
      %c0_276 = arith.constant 0 : index
      %650 = vector.load %arg12[%c0_275, %c0_276] : memref<8x128xf32, #tpu.memory_space<vmem>>, vector<8x128xf32>
      tpu.vector_store %arg12[%c0_275, %c0_276], %649 {strides = array<i32>} : memref<8x128xf32, #tpu.memory_space<vmem>>, vector<8x128xf32>,
    } else {
    }
    %c0 = arith.constant 0 : index
    %c0_1 = arith.constant 0 : index
    %c0_2 = arith.constant 0 : index
    %3 = vector.load %arg2[%c0, %c0_1, %c0_2] : memref<8x16x128xbf16, #tpu.memory_space<vmem>>, vector<8x16x128xbf16>
    %4 = vector.shape_cast %3 : vector<8x16x128xbf16> to vector<128x128xbf16>
    %c0_3 = arith.constant 0 : index
    %c0_4 = arith.constant 0 : index
    %5 = vector.load %arg3[%c0_3, %c0_4] : memref<128x512xbf16, #tpu.memory_space<vmem>>, vector<128x512xbf16>
    %cst = arith.constant dense<0.000000e+00> : vector<128x512xf32>
    %6 = tpu.matmul %4, %5, %cst {dimension_numbers = #tpu.dot_dimension_numbers<[1], [0], [0], [1], [0, 0, 1, 1], [], []>} : vector<128x128xbf16>, vector<128x512xbf16>, vector<128x512xf32> -> vector<128x512xf32>
    %c0_5 = arith.constant 0 : index
    %c0_6 = arith.constant 0 : index
    %7 = vector.load %arg5[%c0_5, %c0_6] : memref<1x512xf32, #tpu.memory_space<vmem>>, vector<1x512xf32>
    %8 = vector.broadcast %7 : vector<1x512xf32> to vector<128x512xf32>
    %9 = arith.addf %6, %8 : vector<128x512xf32>
    %10 = vector.shape_cast %9 : vector<128x512xf32> to vector<8x16x512xf32>
    %c0_7 = arith.constant 0 : index
    %c0_8 = arith.constant 0 : index
    %c0_9 = arith.constant 0 : index
    %11 = vector.load %arg13[%c0_7, %c0_8, %c0_9] : memref<8x16x512xf32, #tpu.memory_space<vmem>>, vector<8x16x512xf32>
    tpu.vector_store %arg13[%c0_7, %c0_8, %c0_9], %10 {strides = array<i32>} : memref<8x16x512xf32, #tpu.memory_space<vmem>>, vector<8x16x512xf32>,
    %c0_10 = arith.constant 0 : index
    %c0_11 = arith.constant 0 : index
    %12 = vector.load %arg4[%c0_10, %c0_11] : memref<128x512xbf16, #tpu.memory_space<vmem>>, vector<128x512xbf16>
    %c0_12 = arith.constant 0 : index
    %c0_13 = arith.constant 0 : index
    %13 = vector.load %arg11[%c0_12, %c0_13] : memref<8x128xf32, #tpu.memory_space<vmem>>, vector<8x128xf32>
    %c0_14 = arith.constant 0 : index
    %c0_15 = arith.constant 0 : index
    %14 = vector.load %arg12[%c0_14, %c0_15] : memref<8x128xf32, #tpu.memory_space<vmem>>, vector<8x128xf32>
    %c0_16 = arith.constant 0 : index
    %c0_17 = arith.constant 0 : index
    %c0_18 = arith.constant 0 : index
    %15 = vector.load %arg13[%c0_16, %c0_17, %c0_18] : memref<8x16x512xf32, #tpu.memory_space<vmem>>, vector<8x1x512xf32>
    %16 = vector.shape_cast %15 : vector<8x1x512xf32> to vector<8x512xf32>
    %17 = arith.truncf %13 : vector<8x128xf32> to vector<8x128xbf16>
    %cst_19 = arith.constant dense<0.000000e+00> : vector<8x512xf32>
    %18 = tpu.matmul %17, %12, %cst_19 {dimension_numbers = #tpu.dot_dimension_numbers<[1], [0], [0], [1], [0, 0, 1, 1], [], []>} : vector<8x128xbf16>, vector<128x512xbf16>, vector<8x512xf32> -> vector<8x512xf32>
    %19 = arith.addf %16, %18 : vector<8x512xf32>
    %20 = vector.extract_strided_slice %19 {offsets = [0, 0], sizes = [8, 128], strides = [1, 1]} : vector<8x512xf32> to vector<8x128xf32>
    %cst_20 = arith.constant 5.000000e-01 : f32
    %21 = vector.broadcast %cst_20 : f32 to vector<8x128xf32>
    %22 = arith.mulf %21, %20 : vector<8x128xf32>
    %23 = math.tanh %22 : vector<8x128xf32>
    %cst_21 = arith.constant 1.000000e+00 : f32
    %24 = vector.broadcast %cst_21 : f32 to vector<8x128xf32>
    %25 = arith.addf %23, %24 : vector<8x128xf32>
    %cst_22 = arith.constant 5.000000e-01 : f32
    %26 = vector.broadcast %cst_22 : f32 to vector<8x128xf32>
    %27 = arith.mulf %26, %25 : vector<8x128xf32>
    %28 = vector.extract_strided_slice %19 {offsets = [0, 128], sizes = [8, 128], strides = [1, 1]} : vector<8x512xf32> to vector<8x128xf32>
    %cst_23 = arith.constant 5.000000e-01 : f32
    %29 = vector.broadcast %cst_23 : f32 to vector<8x128xf32>
    %30 = arith.mulf %29, %28 : vector<8x128xf32>
    %31 = math.tanh %30 : vector<8x128xf32>
    %cst_24 = arith.constant 1.000000e+00 : f32
    %32 = vector.broadcast %cst_24 : f32 to vector<8x128xf32>
    %33 = arith.addf %31, %32 : vector<8x128xf32>
    %cst_25 = arith.constant 5.000000e-01 : f32
    %34 = vector.broadcast %cst_25 : f32 to vector<8x128xf32>
    %35 = arith.mulf %34, %33 : vector<8x128xf32>
    %36 = vector.extract_strided_slice %19 {offsets = [0, 256], sizes = [8, 128], strides = [1, 1]} : vector<8x512xf32> to vector<8x128xf32>
    %37 = math.tanh %36 : vector<8x128xf32>
    %38 = vector.extract_strided_slice %19 {offsets = [0, 384], sizes = [8, 128], strides = [1, 1]} : vector<8x512xf32> to vector<8x128xf32>
    %cst_26 = arith.constant 5.000000e-01 : f32
    %39 = vector.broadcast %cst_26 : f32 to vector<8x128xf32>
    %40 = arith.mulf %39, %38 : vector<8x128xf32>
    %41 = math.tanh %40 : vector<8x128xf32>
    %cst_27 = arith.constant 1.000000e+00 : f32
    %42 = vector.broadcast %cst_27 : f32 to vector<8x128xf32>
    %43 = arith.addf %41, %42 : vector<8x128xf32>
    %cst_28 = arith.constant 5.000000e-01 : f32
    %44 = vector.broadcast %cst_28 : f32 to vector<8x128xf32>
    %45 = arith.mulf %44, %43 : vector<8x128xf32>
    %46 = arith.mulf %35, %14 : vector<8x128xf32>
    %47 = arith.mulf %27, %37 : vector<8x128xf32>
    %48 = arith.addf %46, %47 : vector<8x128xf32>
    %49 = math.tanh %48 : vector<8x128xf32>
    %50 = arith.mulf %45, %49 : vector<8x128xf32>
    %c0_29 = arith.constant 0 : index
    %c0_30 = arith.constant 0 : index
    %c0_31 = arith.constant 0 : index
    %51 = vector.load %arg14[%c0_29, %c0_30, %c0_31] : memref<8x16x128xf32, #tpu.memory_space<vmem>>, vector<8x1x128xf32>
    %52 = vector.shape_cast %51 : vector<8x1x128xf32> to vector<8x128xf32>
    %53 = vector.shape_cast %50 : vector<8x128xf32> to vector<8x1x128xf32>
    tpu.vector_store %arg14[%c0_29, %c0_30, %c0_31], %53 {strides = array<i32>} : memref<8x16x128xf32, #tpu.memory_space<vmem>>, vector<8x1x128xf32>,
    %c0_32 = arith.constant 0 : index
    %c1 = arith.constant 1 : index
    %c0_33 = arith.constant 0 : index
    %54 = vector.load %arg13[%c0_32, %c1, %c0_33] : memref<8x16x512xf32, #tpu.memory_space<vmem>>, vector<8x1x512xf32>
    %55 = vector.shape_cast %54 : vector<8x1x512xf32> to vector<8x512xf32>
    %56 = arith.truncf %50 : vector<8x128xf32> to vector<8x128xbf16>
    %cst_34 = arith.constant dense<0.000000e+00> : vector<8x512xf32>
    %57 = tpu.matmul %56, %12, %cst_34 {dimension_numbers = #tpu.dot_dimension_numbers<[1], [0], [0], [1], [0, 0, 1, 1], [], []>} : vector<8x128xbf16>, vector<128x512xbf16>, vector<8x512xf32> -> vector<8x512xf32>
    %58 = arith.addf %55, %57 : vector<8x512xf32>
    %59 = vector.extract_strided_slice %58 {offsets = [0, 0], sizes = [8, 128], strides = [1, 1]} : vector<8x512xf32> to vector<8x128xf32>
    %cst_35 = arith.constant 5.000000e-01 : f32
    %60 = vector.broadcast %cst_35 : f32 to vector<8x128xf32>
    %61 = arith.mulf %60, %59 : vector<8x128xf32>
    %62 = math.tanh %61 : vector<8x128xf32>
    %cst_36 = arith.constant 1.000000e+00 : f32
    %63 = vector.broadcast %cst_36 : f32 to vector<8x128xf32>
    %64 = arith.addf %62, %63 : vector<8x128xf32>
    %cst_37 = arith.constant 5.000000e-01 : f32
    %65 = vector.broadcast %cst_37 : f32 to vector<8x128xf32>
    %66 = arith.mulf %65, %64 : vector<8x128xf32>
    %67 = vector.extract_strided_slice %58 {offsets = [0, 128], sizes = [8, 128], strides = [1, 1]} : vector<8x512xf32> to vector<8x128xf32>
    %cst_38 = arith.constant 5.000000e-01 : f32
    %68 = vector.broadcast %cst_38 : f32 to vector<8x128xf32>
    %69 = arith.mulf %68, %67 : vector<8x128xf32>
    %70 = math.tanh %69 : vector<8x128xf32>
    %cst_39 = arith.constant 1.000000e+00 : f32
    %71 = vector.broadcast %cst_39 : f32 to vector<8x128xf32>
    %72 = arith.addf %70, %71 : vector<8x128xf32>
    %cst_40 = arith.constant 5.000000e-01 : f32
    %73 = vector.broadcast %cst_40 : f32 to vector<8x128xf32>
    %74 = arith.mulf %73, %72 : vector<8x128xf32>
    %75 = vector.extract_strided_slice %58 {offsets = [0, 256], sizes = [8, 128], strides = [1, 1]} : vector<8x512xf32> to vector<8x128xf32>
    %76 = math.tanh %75 : vector<8x128xf32>
    %77 = vector.extract_strided_slice %58 {offsets = [0, 384], sizes = [8, 128], strides = [1, 1]} : vector<8x512xf32> to vector<8x128xf32>
    %cst_41 = arith.constant 5.000000e-01 : f32
    %78 = vector.broadcast %cst_41 : f32 to vector<8x128xf32>
    %79 = arith.mulf %78, %77 : vector<8x128xf32>
    %80 = math.tanh %79 : vector<8x128xf32>
    %cst_42 = arith.constant 1.000000e+00 : f32
    %81 = vector.broadcast %cst_42 : f32 to vector<8x128xf32>
    %82 = arith.addf %80, %81 : vector<8x128xf32>
    %cst_43 = arith.constant 5.000000e-01 : f32
    %83 = vector.broadcast %cst_43 : f32 to vector<8x128xf32>
    %84 = arith.mulf %83, %82 : vector<8x128xf32>
    %85 = arith.mulf %74, %48 : vector<8x128xf32>
    %86 = arith.mulf %66, %76 : vector<8x128xf32>
    %87 = arith.addf %85, %86 : vector<8x128xf32>
    %88 = math.tanh %87 : vector<8x128xf32>
    %89 = arith.mulf %84, %88 : vector<8x128xf32>
    %c0_44 = arith.constant 0 : index
    %c1_45 = arith.constant 1 : index
    %c0_46 = arith.constant 0 : index
    %90 = vector.load %arg14[%c0_44, %c1_45, %c0_46] : memref<8x16x128xf32, #tpu.memory_space<vmem>>, vector<8x1x128xf32>
    %91 = vector.shape_cast %90 : vector<8x1x128xf32> to vector<8x128xf32>
    %92 = vector.shape_cast %89 : vector<8x128xf32> to vector<8x1x128xf32>
    tpu.vector_store %arg14[%c0_44, %c1_45, %c0_46], %92 {strides = array<i32>} : memref<8x16x128xf32, #tpu.memory_space<vmem>>, vector<8x1x128xf32>,
    %c0_47 = arith.constant 0 : index
    %c2 = arith.constant 2 : index
    %c0_48 = arith.constant 0 : index
    %93 = vector.load %arg13[%c0_47, %c2, %c0_48] : memref<8x16x512xf32, #tpu.memory_space<vmem>>, vector<8x1x512xf32>
    %94 = vector.shape_cast %93 : vector<8x1x512xf32> to vector<8x512xf32>
    %95 = arith.truncf %89 : vector<8x128xf32> to vector<8x128xbf16>
    %cst_49 = arith.constant dense<0.000000e+00> : vector<8x512xf32>
    %96 = tpu.matmul %95, %12, %cst_49 {dimension_numbers = #tpu.dot_dimension_numbers<[1], [0], [0], [1], [0, 0, 1, 1], [], []>} : vector<8x128xbf16>, vector<128x512xbf16>, vector<8x512xf32> -> vector<8x512xf32>
    %97 = arith.addf %94, %96 : vector<8x512xf32>
    %98 = vector.extract_strided_slice %97 {offsets = [0, 0], sizes = [8, 128], strides = [1, 1]} : vector<8x512xf32> to vector<8x128xf32>
    %cst_50 = arith.constant 5.000000e-01 : f32
    %99 = vector.broadcast %cst_50 : f32 to vector<8x128xf32>
    %100 = arith.mulf %99, %98 : vector<8x128xf32>
    %101 = math.tanh %100 : vector<8x128xf32>
    %cst_51 = arith.constant 1.000000e+00 : f32
    %102 = vector.broadcast %cst_51 : f32 to vector<8x128xf32>
    %103 = arith.addf %101, %102 : vector<8x128xf32>
    %cst_52 = arith.constant 5.000000e-01 : f32
    %104 = vector.broadcast %cst_52 : f32 to vector<8x128xf32>
    %105 = arith.mulf %104, %103 : vector<8x128xf32>
    %106 = vector.extract_strided_slice %97 {offsets = [0, 128], sizes = [8, 128], strides = [1, 1]} : vector<8x512xf32> to vector<8x128xf32>
    %cst_53 = arith.constant 5.000000e-01 : f32
    %107 = vector.broadcast %cst_53 : f32 to vector<8x128xf32>
    %108 = arith.mulf %107, %106 : vector<8x128xf32>
    %109 = math.tanh %108 : vector<8x128xf32>
    %cst_54 = arith.constant 1.000000e+00 : f32
    %110 = vector.broadcast %cst_54 : f32 to vector<8x128xf32>
    %111 = arith.addf %109, %110 : vector<8x128xf32>
    %cst_55 = arith.constant 5.000000e-01 : f32
    %112 = vector.broadcast %cst_55 : f32 to vector<8x128xf32>
    %113 = arith.mulf %112, %111 : vector<8x128xf32>
    %114 = vector.extract_strided_slice %97 {offsets = [0, 256], sizes = [8, 128], strides = [1, 1]} : vector<8x512xf32> to vector<8x128xf32>
    %115 = math.tanh %114 : vector<8x128xf32>
    %116 = vector.extract_strided_slice %97 {offsets = [0, 384], sizes = [8, 128], strides = [1, 1]} : vector<8x512xf32> to vector<8x128xf32>
    %cst_56 = arith.constant 5.000000e-01 : f32
    %117 = vector.broadcast %cst_56 : f32 to vector<8x128xf32>
    %118 = arith.mulf %117, %116 : vector<8x128xf32>
    %119 = math.tanh %118 : vector<8x128xf32>
    %cst_57 = arith.constant 1.000000e+00 : f32
    %120 = vector.broadcast %cst_57 : f32 to vector<8x128xf32>
    %121 = arith.addf %119, %120 : vector<8x128xf32>
    %cst_58 = arith.constant 5.000000e-01 : f32
    %122 = vector.broadcast %cst_58 : f32 to vector<8x128xf32>
    %123 = arith.mulf %122, %121 : vector<8x128xf32>
    %124 = arith.mulf %113, %87 : vector<8x128xf32>
    %125 = arith.mulf %105, %115 : vector<8x128xf32>
    %126 = arith.addf %124, %125 : vector<8x128xf32>
    %127 = math.tanh %126 : vector<8x128xf32>
    %128 = arith.mulf %123, %127 : vector<8x128xf32>
    %c0_59 = arith.constant 0 : index
    %c2_60 = arith.constant 2 : index
    %c0_61 = arith.constant 0 : index
    %129 = vector.load %arg14[%c0_59, %c2_60, %c0_61] : memref<8x16x128xf32, #tpu.memory_space<vmem>>, vector<8x1x128xf32>
    %130 = vector.shape_cast %129 : vector<8x1x128xf32> to vector<8x128xf32>
    %131 = vector.shape_cast %128 : vector<8x128xf32> to vector<8x1x128xf32>
    tpu.vector_store %arg14[%c0_59, %c2_60, %c0_61], %131 {strides = array<i32>} : memref<8x16x128xf32, #tpu.memory_space<vmem>>, vector<8x1x128xf32>,
    %c0_62 = arith.constant 0 : index
    %c3 = arith.constant 3 : index
    %c0_63 = arith.constant 0 : index
    %132 = vector.load %arg13[%c0_62, %c3, %c0_63] : memref<8x16x512xf32, #tpu.memory_space<vmem>>, vector<8x1x512xf32>
    %133 = vector.shape_cast %132 : vector<8x1x512xf32> to vector<8x512xf32>
    %134 = arith.truncf %128 : vector<8x128xf32> to vector<8x128xbf16>
    %cst_64 = arith.constant dense<0.000000e+00> : vector<8x512xf32>
    %135 = tpu.matmul %134, %12, %cst_64 {dimension_numbers = #tpu.dot_dimension_numbers<[1], [0], [0], [1], [0, 0, 1, 1], [], []>} : vector<8x128xbf16>, vector<128x512xbf16>, vector<8x512xf32> -> vector<8x512xf32>
    %136 = arith.addf %133, %135 : vector<8x512xf32>
    %137 = vector.extract_strided_slice %136 {offsets = [0, 0], sizes = [8, 128], strides = [1, 1]} : vector<8x512xf32> to vector<8x128xf32>
    %cst_65 = arith.constant 5.000000e-01 : f32
    %138 = vector.broadcast %cst_65 : f32 to vector<8x128xf32>
    %139 = arith.mulf %138, %137 : vector<8x128xf32>
    %140 = math.tanh %139 : vector<8x128xf32>
    %cst_66 = arith.constant 1.000000e+00 : f32
    %141 = vector.broadcast %cst_66 : f32 to vector<8x128xf32>
    %142 = arith.addf %140, %141 : vector<8x128xf32>
    %cst_67 = arith.constant 5.000000e-01 : f32
    %143 = vector.broadcast %cst_67 : f32 to vector<8x128xf32>
    %144 = arith.mulf %143, %142 : vector<8x128xf32>
    %145 = vector.extract_strided_slice %136 {offsets = [0, 128], sizes = [8, 128], strides = [1, 1]} : vector<8x512xf32> to vector<8x128xf32>
    %cst_68 = arith.constant 5.000000e-01 : f32
    %146 = vector.broadcast %cst_68 : f32 to vector<8x128xf32>
    %147 = arith.mulf %146, %145 : vector<8x128xf32>
    %148 = math.tanh %147 : vector<8x128xf32>
    %cst_69 = arith.constant 1.000000e+00 : f32
    %149 = vector.broadcast %cst_69 : f32 to vector<8x128xf32>
    %150 = arith.addf %148, %149 : vector<8x128xf32>
    %cst_70 = arith.constant 5.000000e-01 : f32
    %151 = vector.broadcast %cst_70 : f32 to vector<8x128xf32>
    %152 = arith.mulf %151, %150 : vector<8x128xf32>
    %153 = vector.extract_strided_slice %136 {offsets = [0, 256], sizes = [8, 128], strides = [1, 1]} : vector<8x512xf32> to vector<8x128xf32>
    %154 = math.tanh %153 : vector<8x128xf32>
    %155 = vector.extract_strided_slice %136 {offsets = [0, 384], sizes = [8, 128], strides = [1, 1]} : vector<8x512xf32> to vector<8x128xf32>
    %cst_71 = arith.constant 5.000000e-01 : f32
    %156 = vector.broadcast %cst_71 : f32 to vector<8x128xf32>
    %157 = arith.mulf %156, %155 : vector<8x128xf32>
    %158 = math.tanh %157 : vector<8x128xf32>
    %cst_72 = arith.constant 1.000000e+00 : f32
    %159 = vector.broadcast %cst_72 : f32 to vector<8x128xf32>
    %160 = arith.addf %158, %159 : vector<8x128xf32>
    %cst_73 = arith.constant 5.000000e-01 : f32
    %161 = vector.broadcast %cst_73 : f32 to vector<8x128xf32>
    %162 = arith.mulf %161, %160 : vector<8x128xf32>
    %163 = arith.mulf %152, %126 : vector<8x128xf32>
    %164 = arith.mulf %144, %154 : vector<8x128xf32>
    %165 = arith.addf %163, %164 : vector<8x128xf32>
    %166 = math.tanh %165 : vector<8x128xf32>
    %167 = arith.mulf %162, %166 : vector<8x128xf32>
    %c0_74 = arith.constant 0 : index
    %c3_75 = arith.constant 3 : index
    %c0_76 = arith.constant 0 : index
    %168 = vector.load %arg14[%c0_74, %c3_75, %c0_76] : memref<8x16x128xf32, #tpu.memory_space<vmem>>, vector<8x1x128xf32>
    %169 = vector.shape_cast %168 : vector<8x1x128xf32> to vector<8x128xf32>
    %170 = vector.shape_cast %167 : vector<8x128xf32> to vector<8x1x128xf32>
    tpu.vector_store %arg14[%c0_74, %c3_75, %c0_76], %170 {strides = array<i32>} : memref<8x16x128xf32, #tpu.memory_space<vmem>>, vector<8x1x128xf32>,
    %c0_77 = arith.constant 0 : index
    %c4 = arith.constant 4 : index
    %c0_78 = arith.constant 0 : index
    %171 = vector.load %arg13[%c0_77, %c4, %c0_78] : memref<8x16x512xf32, #tpu.memory_space<vmem>>, vector<8x1x512xf32>
    %172 = vector.shape_cast %171 : vector<8x1x512xf32> to vector<8x512xf32>
    %173 = arith.truncf %167 : vector<8x128xf32> to vector<8x128xbf16>
    %cst_79 = arith.constant dense<0.000000e+00> : vector<8x512xf32>
    %174 = tpu.matmul %173, %12, %cst_79 {dimension_numbers = #tpu.dot_dimension_numbers<[1], [0], [0], [1], [0, 0, 1, 1], [], []>} : vector<8x128xbf16>, vector<128x512xbf16>, vector<8x512xf32> -> vector<8x512xf32>
    %175 = arith.addf %172, %174 : vector<8x512xf32>
    %176 = vector.extract_strided_slice %175 {offsets = [0, 0], sizes = [8, 128], strides = [1, 1]} : vector<8x512xf32> to vector<8x128xf32>
    %cst_80 = arith.constant 5.000000e-01 : f32
    %177 = vector.broadcast %cst_80 : f32 to vector<8x128xf32>
    %178 = arith.mulf %177, %176 : vector<8x128xf32>
    %179 = math.tanh %178 : vector<8x128xf32>
    %cst_81 = arith.constant 1.000000e+00 : f32
    %180 = vector.broadcast %cst_81 : f32 to vector<8x128xf32>
    %181 = arith.addf %179, %180 : vector<8x128xf32>
    %cst_82 = arith.constant 5.000000e-01 : f32
    %182 = vector.broadcast %cst_82 : f32 to vector<8x128xf32>
    %183 = arith.mulf %182, %181 : vector<8x128xf32>
    %184 = vector.extract_strided_slice %175 {offsets = [0, 128], sizes = [8, 128], strides = [1, 1]} : vector<8x512xf32> to vector<8x128xf32>
    %cst_83 = arith.constant 5.000000e-01 : f32
    %185 = vector.broadcast %cst_83 : f32 to vector<8x128xf32>
    %186 = arith.mulf %185, %184 : vector<8x128xf32>
    %187 = math.tanh %186 : vector<8x128xf32>
    %cst_84 = arith.constant 1.000000e+00 : f32
    %188 = vector.broadcast %cst_84 : f32 to vector<8x128xf32>
    %189 = arith.addf %187, %188 : vector<8x128xf32>
    %cst_85 = arith.constant 5.000000e-01 : f32
    %190 = vector.broadcast %cst_85 : f32 to vector<8x128xf32>
    %191 = arith.mulf %190, %189 : vector<8x128xf32>
    %192 = vector.extract_strided_slice %175 {offsets = [0, 256], sizes = [8, 128], strides = [1, 1]} : vector<8x512xf32> to vector<8x128xf32>
    %193 = math.tanh %192 : vector<8x128xf32>
    %194 = vector.extract_strided_slice %175 {offsets = [0, 384], sizes = [8, 128], strides = [1, 1]} : vector<8x512xf32> to vector<8x128xf32>
    %cst_86 = arith.constant 5.000000e-01 : f32
    %195 = vector.broadcast %cst_86 : f32 to vector<8x128xf32>
    %196 = arith.mulf %195, %194 : vector<8x128xf32>
    %197 = math.tanh %196 : vector<8x128xf32>
    %cst_87 = arith.constant 1.000000e+00 : f32
    %198 = vector.broadcast %cst_87 : f32 to vector<8x128xf32>
    %199 = arith.addf %197, %198 : vector<8x128xf32>
    %cst_88 = arith.constant 5.000000e-01 : f32
    %200 = vector.broadcast %cst_88 : f32 to vector<8x128xf32>
    %201 = arith.mulf %200, %199 : vector<8x128xf32>
    %202 = arith.mulf %191, %165 : vector<8x128xf32>
    %203 = arith.mulf %183, %193 : vector<8x128xf32>
    %204 = arith.addf %202, %203 : vector<8x128xf32>
    %205 = math.tanh %204 : vector<8x128xf32>
    %206 = arith.mulf %201, %205 : vector<8x128xf32>
    %c0_89 = arith.constant 0 : index
    %c4_90 = arith.constant 4 : index
    %c0_91 = arith.constant 0 : index
    %207 = vector.load %arg14[%c0_89, %c4_90, %c0_91] : memref<8x16x128xf32, #tpu.memory_space<vmem>>, vector<8x1x128xf32>
    %208 = vector.shape_cast %207 : vector<8x1x128xf32> to vector<8x128xf32>
    %209 = vector.shape_cast %206 : vector<8x128xf32> to vector<8x1x128xf32>
    tpu.vector_store %arg14[%c0_89, %c4_90, %c0_91], %209 {strides = array<i32>} : memref<8x16x128xf32, #tpu.memory_space<vmem>>, vector<8x1x128xf32>,
    %c0_92 = arith.constant 0 : index
    %c5 = arith.constant 5 : index
    %c0_93 = arith.constant 0 : index
    %210 = vector.load %arg13[%c0_92, %c5, %c0_93] : memref<8x16x512xf32, #tpu.memory_space<vmem>>, vector<8x1x512xf32>
    %211 = vector.shape_cast %210 : vector<8x1x512xf32> to vector<8x512xf32>
    %212 = arith.truncf %206 : vector<8x128xf32> to vector<8x128xbf16>
    %cst_94 = arith.constant dense<0.000000e+00> : vector<8x512xf32>
    %213 = tpu.matmul %212, %12, %cst_94 {dimension_numbers = #tpu.dot_dimension_numbers<[1], [0], [0], [1], [0, 0, 1, 1], [], []>} : vector<8x128xbf16>, vector<128x512xbf16>, vector<8x512xf32> -> vector<8x512xf32>
    %214 = arith.addf %211, %213 : vector<8x512xf32>
    %215 = vector.extract_strided_slice %214 {offsets = [0, 0], sizes = [8, 128], strides = [1, 1]} : vector<8x512xf32> to vector<8x128xf32>
    %cst_95 = arith.constant 5.000000e-01 : f32
    %216 = vector.broadcast %cst_95 : f32 to vector<8x128xf32>
    %217 = arith.mulf %216, %215 : vector<8x128xf32>
    %218 = math.tanh %217 : vector<8x128xf32>
    %cst_96 = arith.constant 1.000000e+00 : f32
    %219 = vector.broadcast %cst_96 : f32 to vector<8x128xf32>
    %220 = arith.addf %218, %219 : vector<8x128xf32>
    %cst_97 = arith.constant 5.000000e-01 : f32
    %221 = vector.broadcast %cst_97 : f32 to vector<8x128xf32>
    %222 = arith.mulf %221, %220 : vector<8x128xf32>
    %223 = vector.extract_strided_slice %214 {offsets = [0, 128], sizes = [8, 128], strides = [1, 1]} : vector<8x512xf32> to vector<8x128xf32>
    %cst_98 = arith.constant 5.000000e-01 : f32
    %224 = vector.broadcast %cst_98 : f32 to vector<8x128xf32>
    %225 = arith.mulf %224, %223 : vector<8x128xf32>
    %226 = math.tanh %225 : vector<8x128xf32>
    %cst_99 = arith.constant 1.000000e+00 : f32
    %227 = vector.broadcast %cst_99 : f32 to vector<8x128xf32>
    %228 = arith.addf %226, %227 : vector<8x128xf32>
    %cst_100 = arith.constant 5.000000e-01 : f32
    %229 = vector.broadcast %cst_100 : f32 to vector<8x128xf32>
    %230 = arith.mulf %229, %228 : vector<8x128xf32>
    %231 = vector.extract_strided_slice %214 {offsets = [0, 256], sizes = [8, 128], strides = [1, 1]} : vector<8x512xf32> to vector<8x128xf32>
    %232 = math.tanh %231 : vector<8x128xf32>
    %233 = vector.extract_strided_slice %214 {offsets = [0, 384], sizes = [8, 128], strides = [1, 1]} : vector<8x512xf32> to vector<8x128xf32>
    %cst_101 = arith.constant 5.000000e-01 : f32
    %234 = vector.broadcast %cst_101 : f32 to vector<8x128xf32>
    %235 = arith.mulf %234, %233 : vector<8x128xf32>
    %236 = math.tanh %235 : vector<8x128xf32>
    %cst_102 = arith.constant 1.000000e+00 : f32
    %237 = vector.broadcast %cst_102 : f32 to vector<8x128xf32>
    %238 = arith.addf %236, %237 : vector<8x128xf32>
    %cst_103 = arith.constant 5.000000e-01 : f32
    %239 = vector.broadcast %cst_103 : f32 to vector<8x128xf32>
    %240 = arith.mulf %239, %238 : vector<8x128xf32>
    %241 = arith.mulf %230, %204 : vector<8x128xf32>
    %242 = arith.mulf %222, %232 : vector<8x128xf32>
    %243 = arith.addf %241, %242 : vector<8x128xf32>
    %244 = math.tanh %243 : vector<8x128xf32>
    %245 = arith.mulf %240, %244 : vector<8x128xf32>
    %c0_104 = arith.constant 0 : index
    %c5_105 = arith.constant 5 : index
    %c0_106 = arith.constant 0 : index
    %246 = vector.load %arg14[%c0_104, %c5_105, %c0_106] : memref<8x16x128xf32, #tpu.memory_space<vmem>>, vector<8x1x128xf32>
    %247 = vector.shape_cast %246 : vector<8x1x128xf32> to vector<8x128xf32>
    %248 = vector.shape_cast %245 : vector<8x128xf32> to vector<8x1x128xf32>
    tpu.vector_store %arg14[%c0_104, %c5_105, %c0_106], %248 {strides = array<i32>} : memref<8x16x128xf32, #tpu.memory_space<vmem>>, vector<8x1x128xf32>,
    %c0_107 = arith.constant 0 : index
    %c6 = arith.constant 6 : index
    %c0_108 = arith.constant 0 : index
    %249 = vector.load %arg13[%c0_107, %c6, %c0_108] : memref<8x16x512xf32, #tpu.memory_space<vmem>>, vector<8x1x512xf32>
    %250 = vector.shape_cast %249 : vector<8x1x512xf32> to vector<8x512xf32>
    %251 = arith.truncf %245 : vector<8x128xf32> to vector<8x128xbf16>
    %cst_109 = arith.constant dense<0.000000e+00> : vector<8x512xf32>
    %252 = tpu.matmul %251, %12, %cst_109 {dimension_numbers = #tpu.dot_dimension_numbers<[1], [0], [0], [1], [0, 0, 1, 1], [], []>} : vector<8x128xbf16>, vector<128x512xbf16>, vector<8x512xf32> -> vector<8x512xf32>
    %253 = arith.addf %250, %252 : vector<8x512xf32>
    %254 = vector.extract_strided_slice %253 {offsets = [0, 0], sizes = [8, 128], strides = [1, 1]} : vector<8x512xf32> to vector<8x128xf32>
    %cst_110 = arith.constant 5.000000e-01 : f32
    %255 = vector.broadcast %cst_110 : f32 to vector<8x128xf32>
    %256 = arith.mulf %255, %254 : vector<8x128xf32>
    %257 = math.tanh %256 : vector<8x128xf32>
    %cst_111 = arith.constant 1.000000e+00 : f32
    %258 = vector.broadcast %cst_111 : f32 to vector<8x128xf32>
    %259 = arith.addf %257, %258 : vector<8x128xf32>
    %cst_112 = arith.constant 5.000000e-01 : f32
    %260 = vector.broadcast %cst_112 : f32 to vector<8x128xf32>
    %261 = arith.mulf %260, %259 : vector<8x128xf32>
    %262 = vector.extract_strided_slice %253 {offsets = [0, 128], sizes = [8, 128], strides = [1, 1]} : vector<8x512xf32> to vector<8x128xf32>
    %cst_113 = arith.constant 5.000000e-01 : f32
    %263 = vector.broadcast %cst_113 : f32 to vector<8x128xf32>
    %264 = arith.mulf %263, %262 : vector<8x128xf32>
    %265 = math.tanh %264 : vector<8x128xf32>
    %cst_114 = arith.constant 1.000000e+00 : f32
    %266 = vector.broadcast %cst_114 : f32 to vector<8x128xf32>
    %267 = arith.addf %265, %266 : vector<8x128xf32>
    %cst_115 = arith.constant 5.000000e-01 : f32
    %268 = vector.broadcast %cst_115 : f32 to vector<8x128xf32>
    %269 = arith.mulf %268, %267 : vector<8x128xf32>
    %270 = vector.extract_strided_slice %253 {offsets = [0, 256], sizes = [8, 128], strides = [1, 1]} : vector<8x512xf32> to vector<8x128xf32>
    %271 = math.tanh %270 : vector<8x128xf32>
    %272 = vector.extract_strided_slice %253 {offsets = [0, 384], sizes = [8, 128], strides = [1, 1]} : vector<8x512xf32> to vector<8x128xf32>
    %cst_116 = arith.constant 5.000000e-01 : f32
    %273 = vector.broadcast %cst_116 : f32 to vector<8x128xf32>
    %274 = arith.mulf %273, %272 : vector<8x128xf32>
    %275 = math.tanh %274 : vector<8x128xf32>
    %cst_117 = arith.constant 1.000000e+00 : f32
    %276 = vector.broadcast %cst_117 : f32 to vector<8x128xf32>
    %277 = arith.addf %275, %276 : vector<8x128xf32>
    %cst_118 = arith.constant 5.000000e-01 : f32
    %278 = vector.broadcast %cst_118 : f32 to vector<8x128xf32>
    %279 = arith.mulf %278, %277 : vector<8x128xf32>
    %280 = arith.mulf %269, %243 : vector<8x128xf32>
    %281 = arith.mulf %261, %271 : vector<8x128xf32>
    %282 = arith.addf %280, %281 : vector<8x128xf32>
    %283 = math.tanh %282 : vector<8x128xf32>
    %284 = arith.mulf %279, %283 : vector<8x128xf32>
    %c0_119 = arith.constant 0 : index
    %c6_120 = arith.constant 6 : index
    %c0_121 = arith.constant 0 : index
    %285 = vector.load %arg14[%c0_119, %c6_120, %c0_121] : memref<8x16x128xf32, #tpu.memory_space<vmem>>, vector<8x1x128xf32>
    %286 = vector.shape_cast %285 : vector<8x1x128xf32> to vector<8x128xf32>
    %287 = vector.shape_cast %284 : vector<8x128xf32> to vector<8x1x128xf32>
    tpu.vector_store %arg14[%c0_119, %c6_120, %c0_121], %287 {strides = array<i32>} : memref<8x16x128xf32, #tpu.memory_space<vmem>>, vector<8x1x128xf32>,
    %c0_122 = arith.constant 0 : index
    %c7 = arith.constant 7 : index
    %c0_123 = arith.constant 0 : index
    %288 = vector.load %arg13[%c0_122, %c7, %c0_123] : memref<8x16x512xf32, #tpu.memory_space<vmem>>, vector<8x1x512xf32>
    %289 = vector.shape_cast %288 : vector<8x1x512xf32> to vector<8x512xf32>
    %290 = arith.truncf %284 : vector<8x128xf32> to vector<8x128xbf16>
    %cst_124 = arith.constant dense<0.000000e+00> : vector<8x512xf32>
    %291 = tpu.matmul %290, %12, %cst_124 {dimension_numbers = #tpu.dot_dimension_numbers<[1], [0], [0], [1], [0, 0, 1, 1], [], []>} : vector<8x128xbf16>, vector<128x512xbf16>, vector<8x512xf32> -> vector<8x512xf32>
    %292 = arith.addf %289, %291 : vector<8x512xf32>
    %293 = vector.extract_strided_slice %292 {offsets = [0, 0], sizes = [8, 128], strides = [1, 1]} : vector<8x512xf32> to vector<8x128xf32>
    %cst_125 = arith.constant 5.000000e-01 : f32
    %294 = vector.broadcast %cst_125 : f32 to vector<8x128xf32>
    %295 = arith.mulf %294, %293 : vector<8x128xf32>
    %296 = math.tanh %295 : vector<8x128xf32>
    %cst_126 = arith.constant 1.000000e+00 : f32
    %297 = vector.broadcast %cst_126 : f32 to vector<8x128xf32>
    %298 = arith.addf %296, %297 : vector<8x128xf32>
    %cst_127 = arith.constant 5.000000e-01 : f32
    %299 = vector.broadcast %cst_127 : f32 to vector<8x128xf32>
    %300 = arith.mulf %299, %298 : vector<8x128xf32>
    %301 = vector.extract_strided_slice %292 {offsets = [0, 128], sizes = [8, 128], strides = [1, 1]} : vector<8x512xf32> to vector<8x128xf32>
    %cst_128 = arith.constant 5.000000e-01 : f32
    %302 = vector.broadcast %cst_128 : f32 to vector<8x128xf32>
    %303 = arith.mulf %302, %301 : vector<8x128xf32>
    %304 = math.tanh %303 : vector<8x128xf32>
    %cst_129 = arith.constant 1.000000e+00 : f32
    %305 = vector.broadcast %cst_129 : f32 to vector<8x128xf32>
    %306 = arith.addf %304, %305 : vector<8x128xf32>
    %cst_130 = arith.constant 5.000000e-01 : f32
    %307 = vector.broadcast %cst_130 : f32 to vector<8x128xf32>
    %308 = arith.mulf %307, %306 : vector<8x128xf32>
    %309 = vector.extract_strided_slice %292 {offsets = [0, 256], sizes = [8, 128], strides = [1, 1]} : vector<8x512xf32> to vector<8x128xf32>
    %310 = math.tanh %309 : vector<8x128xf32>
    %311 = vector.extract_strided_slice %292 {offsets = [0, 384], sizes = [8, 128], strides = [1, 1]} : vector<8x512xf32> to vector<8x128xf32>
    %cst_131 = arith.constant 5.000000e-01 : f32
    %312 = vector.broadcast %cst_131 : f32 to vector<8x128xf32>
    %313 = arith.mulf %312, %311 : vector<8x128xf32>
    %314 = math.tanh %313 : vector<8x128xf32>
    %cst_132 = arith.constant 1.000000e+00 : f32
    %315 = vector.broadcast %cst_132 : f32 to vector<8x128xf32>
    %316 = arith.addf %314, %315 : vector<8x128xf32>
    %cst_133 = arith.constant 5.000000e-01 : f32
    %317 = vector.broadcast %cst_133 : f32 to vector<8x128xf32>
    %318 = arith.mulf %317, %316 : vector<8x128xf32>
    %319 = arith.mulf %308, %282 : vector<8x128xf32>
    %320 = arith.mulf %300, %310 : vector<8x128xf32>
    %321 = arith.addf %319, %320 : vector<8x128xf32>
    %322 = math.tanh %321 : vector<8x128xf32>
    %323 = arith.mulf %318, %322 : vector<8x128xf32>
    %c0_134 = arith.constant 0 : index
    %c7_135 = arith.constant 7 : index
    %c0_136 = arith.constant 0 : index
    %324 = vector.load %arg14[%c0_134, %c7_135, %c0_136] : memref<8x16x128xf32, #tpu.memory_space<vmem>>, vector<8x1x128xf32>
    %325 = vector.shape_cast %324 : vector<8x1x128xf32> to vector<8x128xf32>
    %326 = vector.shape_cast %323 : vector<8x128xf32> to vector<8x1x128xf32>
    tpu.vector_store %arg14[%c0_134, %c7_135, %c0_136], %326 {strides = array<i32>} : memref<8x16x128xf32, #tpu.memory_space<vmem>>, vector<8x1x128xf32>,
    %c0_137 = arith.constant 0 : index
    %c8 = arith.constant 8 : index
    %c0_138 = arith.constant 0 : index
    %327 = vector.load %arg13[%c0_137, %c8, %c0_138] : memref<8x16x512xf32, #tpu.memory_space<vmem>>, vector<8x1x512xf32>
    %328 = vector.shape_cast %327 : vector<8x1x512xf32> to vector<8x512xf32>
    %329 = arith.truncf %323 : vector<8x128xf32> to vector<8x128xbf16>
    %cst_139 = arith.constant dense<0.000000e+00> : vector<8x512xf32>
    %330 = tpu.matmul %329, %12, %cst_139 {dimension_numbers = #tpu.dot_dimension_numbers<[1], [0], [0], [1], [0, 0, 1, 1], [], []>} : vector<8x128xbf16>, vector<128x512xbf16>, vector<8x512xf32> -> vector<8x512xf32>
    %331 = arith.addf %328, %330 : vector<8x512xf32>
    %332 = vector.extract_strided_slice %331 {offsets = [0, 0], sizes = [8, 128], strides = [1, 1]} : vector<8x512xf32> to vector<8x128xf32>
    %cst_140 = arith.constant 5.000000e-01 : f32
    %333 = vector.broadcast %cst_140 : f32 to vector<8x128xf32>
    %334 = arith.mulf %333, %332 : vector<8x128xf32>
    %335 = math.tanh %334 : vector<8x128xf32>
    %cst_141 = arith.constant 1.000000e+00 : f32
    %336 = vector.broadcast %cst_141 : f32 to vector<8x128xf32>
    %337 = arith.addf %335, %336 : vector<8x128xf32>
    %cst_142 = arith.constant 5.000000e-01 : f32
    %338 = vector.broadcast %cst_142 : f32 to vector<8x128xf32>
    %339 = arith.mulf %338, %337 : vector<8x128xf32>
    %340 = vector.extract_strided_slice %331 {offsets = [0, 128], sizes = [8, 128], strides = [1, 1]} : vector<8x512xf32> to vector<8x128xf32>
    %cst_143 = arith.constant 5.000000e-01 : f32
    %341 = vector.broadcast %cst_143 : f32 to vector<8x128xf32>
    %342 = arith.mulf %341, %340 : vector<8x128xf32>
    %343 = math.tanh %342 : vector<8x128xf32>
    %cst_144 = arith.constant 1.000000e+00 : f32
    %344 = vector.broadcast %cst_144 : f32 to vector<8x128xf32>
    %345 = arith.addf %343, %344 : vector<8x128xf32>
    %cst_145 = arith.constant 5.000000e-01 : f32
    %346 = vector.broadcast %cst_145 : f32 to vector<8x128xf32>
    %347 = arith.mulf %346, %345 : vector<8x128xf32>
    %348 = vector.extract_strided_slice %331 {offsets = [0, 256], sizes = [8, 128], strides = [1, 1]} : vector<8x512xf32> to vector<8x128xf32>
    %349 = math.tanh %348 : vector<8x128xf32>
    %350 = vector.extract_strided_slice %331 {offsets = [0, 384], sizes = [8, 128], strides = [1, 1]} : vector<8x512xf32> to vector<8x128xf32>
    %cst_146 = arith.constant 5.000000e-01 : f32
    %351 = vector.broadcast %cst_146 : f32 to vector<8x128xf32>
    %352 = arith.mulf %351, %350 : vector<8x128xf32>
    %353 = math.tanh %352 : vector<8x128xf32>
    %cst_147 = arith.constant 1.000000e+00 : f32
    %354 = vector.broadcast %cst_147 : f32 to vector<8x128xf32>
    %355 = arith.addf %353, %354 : vector<8x128xf32>
    %cst_148 = arith.constant 5.000000e-01 : f32
    %356 = vector.broadcast %cst_148 : f32 to vector<8x128xf32>
    %357 = arith.mulf %356, %355 : vector<8x128xf32>
    %358 = arith.mulf %347, %321 : vector<8x128xf32>
    %359 = arith.mulf %339, %349 : vector<8x128xf32>
    %360 = arith.addf %358, %359 : vector<8x128xf32>
    %361 = math.tanh %360 : vector<8x128xf32>
    %362 = arith.mulf %357, %361 : vector<8x128xf32>
    %c0_149 = arith.constant 0 : index
    %c8_150 = arith.constant 8 : index
    %c0_151 = arith.constant 0 : index
    %363 = vector.load %arg14[%c0_149, %c8_150, %c0_151] : memref<8x16x128xf32, #tpu.memory_space<vmem>>, vector<8x1x128xf32>
    %364 = vector.shape_cast %363 : vector<8x1x128xf32> to vector<8x128xf32>
    %365 = vector.shape_cast %362 : vector<8x128xf32> to vector<8x1x128xf32>
    tpu.vector_store %arg14[%c0_149, %c8_150, %c0_151], %365 {strides = array<i32>} : memref<8x16x128xf32, #tpu.memory_space<vmem>>, vector<8x1x128xf32>,
    %c0_152 = arith.constant 0 : index
    %c9 = arith.constant 9 : index
    %c0_153 = arith.constant 0 : index
    %366 = vector.load %arg13[%c0_152, %c9, %c0_153] : memref<8x16x512xf32, #tpu.memory_space<vmem>>, vector<8x1x512xf32>
    %367 = vector.shape_cast %366 : vector<8x1x512xf32> to vector<8x512xf32>
    %368 = arith.truncf %362 : vector<8x128xf32> to vector<8x128xbf16>
    %cst_154 = arith.constant dense<0.000000e+00> : vector<8x512xf32>
    %369 = tpu.matmul %368, %12, %cst_154 {dimension_numbers = #tpu.dot_dimension_numbers<[1], [0], [0], [1], [0, 0, 1, 1], [], []>} : vector<8x128xbf16>, vector<128x512xbf16>, vector<8x512xf32> -> vector<8x512xf32>
    %370 = arith.addf %367, %369 : vector<8x512xf32>
    %371 = vector.extract_strided_slice %370 {offsets = [0, 0], sizes = [8, 128], strides = [1, 1]} : vector<8x512xf32> to vector<8x128xf32>
    %cst_155 = arith.constant 5.000000e-01 : f32
    %372 = vector.broadcast %cst_155 : f32 to vector<8x128xf32>
    %373 = arith.mulf %372, %371 : vector<8x128xf32>
    %374 = math.tanh %373 : vector<8x128xf32>
    %cst_156 = arith.constant 1.000000e+00 : f32
    %375 = vector.broadcast %cst_156 : f32 to vector<8x128xf32>
    %376 = arith.addf %374, %375 : vector<8x128xf32>
    %cst_157 = arith.constant 5.000000e-01 : f32
    %377 = vector.broadcast %cst_157 : f32 to vector<8x128xf32>
    %378 = arith.mulf %377, %376 : vector<8x128xf32>
    %379 = vector.extract_strided_slice %370 {offsets = [0, 128], sizes = [8, 128], strides = [1, 1]} : vector<8x512xf32> to vector<8x128xf32>
    %cst_158 = arith.constant 5.000000e-01 : f32
    %380 = vector.broadcast %cst_158 : f32 to vector<8x128xf32>
    %381 = arith.mulf %380, %379 : vector<8x128xf32>
    %382 = math.tanh %381 : vector<8x128xf32>
    %cst_159 = arith.constant 1.000000e+00 : f32
    %383 = vector.broadcast %cst_159 : f32 to vector<8x128xf32>
    %384 = arith.addf %382, %383 : vector<8x128xf32>
    %cst_160 = arith.constant 5.000000e-01 : f32
    %385 = vector.broadcast %cst_160 : f32 to vector<8x128xf32>
    %386 = arith.mulf %385, %384 : vector<8x128xf32>
    %387 = vector.extract_strided_slice %370 {offsets = [0, 256], sizes = [8, 128], strides = [1, 1]} : vector<8x512xf32> to vector<8x128xf32>
    %388 = math.tanh %387 : vector<8x128xf32>
    %389 = vector.extract_strided_slice %370 {offsets = [0, 384], sizes = [8, 128], strides = [1, 1]} : vector<8x512xf32> to vector<8x128xf32>
    %cst_161 = arith.constant 5.000000e-01 : f32
    %390 = vector.broadcast %cst_161 : f32 to vector<8x128xf32>
    %391 = arith.mulf %390, %389 : vector<8x128xf32>
    %392 = math.tanh %391 : vector<8x128xf32>
    %cst_162 = arith.constant 1.000000e+00 : f32
    %393 = vector.broadcast %cst_162 : f32 to vector<8x128xf32>
    %394 = arith.addf %392, %393 : vector<8x128xf32>
    %cst_163 = arith.constant 5.000000e-01 : f32
    %395 = vector.broadcast %cst_163 : f32 to vector<8x128xf32>
    %396 = arith.mulf %395, %394 : vector<8x128xf32>
    %397 = arith.mulf %386, %360 : vector<8x128xf32>
    %398 = arith.mulf %378, %388 : vector<8x128xf32>
    %399 = arith.addf %397, %398 : vector<8x128xf32>
    %400 = math.tanh %399 : vector<8x128xf32>
    %401 = arith.mulf %396, %400 : vector<8x128xf32>
    %c0_164 = arith.constant 0 : index
    %c9_165 = arith.constant 9 : index
    %c0_166 = arith.constant 0 : index
    %402 = vector.load %arg14[%c0_164, %c9_165, %c0_166] : memref<8x16x128xf32, #tpu.memory_space<vmem>>, vector<8x1x128xf32>
    %403 = vector.shape_cast %402 : vector<8x1x128xf32> to vector<8x128xf32>
    %404 = vector.shape_cast %401 : vector<8x128xf32> to vector<8x1x128xf32>
    tpu.vector_store %arg14[%c0_164, %c9_165, %c0_166], %404 {strides = array<i32>} : memref<8x16x128xf32, #tpu.memory_space<vmem>>, vector<8x1x128xf32>,
    %c0_167 = arith.constant 0 : index
    %c10 = arith.constant 10 : index
    %c0_168 = arith.constant 0 : index
    %405 = vector.load %arg13[%c0_167, %c10, %c0_168] : memref<8x16x512xf32, #tpu.memory_space<vmem>>, vector<8x1x512xf32>
    %406 = vector.shape_cast %405 : vector<8x1x512xf32> to vector<8x512xf32>
    %407 = arith.truncf %401 : vector<8x128xf32> to vector<8x128xbf16>
    %cst_169 = arith.constant dense<0.000000e+00> : vector<8x512xf32>
    %408 = tpu.matmul %407, %12, %cst_169 {dimension_numbers = #tpu.dot_dimension_numbers<[1], [0], [0], [1], [0, 0, 1, 1], [], []>} : vector<8x128xbf16>, vector<128x512xbf16>, vector<8x512xf32> -> vector<8x512xf32>
    %409 = arith.addf %406, %408 : vector<8x512xf32>
    %410 = vector.extract_strided_slice %409 {offsets = [0, 0], sizes = [8, 128], strides = [1, 1]} : vector<8x512xf32> to vector<8x128xf32>
    %cst_170 = arith.constant 5.000000e-01 : f32
    %411 = vector.broadcast %cst_170 : f32 to vector<8x128xf32>
    %412 = arith.mulf %411, %410 : vector<8x128xf32>
    %413 = math.tanh %412 : vector<8x128xf32>
    %cst_171 = arith.constant 1.000000e+00 : f32
    %414 = vector.broadcast %cst_171 : f32 to vector<8x128xf32>
    %415 = arith.addf %413, %414 : vector<8x128xf32>
    %cst_172 = arith.constant 5.000000e-01 : f32
    %416 = vector.broadcast %cst_172 : f32 to vector<8x128xf32>
    %417 = arith.mulf %416, %415 : vector<8x128xf32>
    %418 = vector.extract_strided_slice %409 {offsets = [0, 128], sizes = [8, 128], strides = [1, 1]} : vector<8x512xf32> to vector<8x128xf32>
    %cst_173 = arith.constant 5.000000e-01 : f32
    %419 = vector.broadcast %cst_173 : f32 to vector<8x128xf32>
    %420 = arith.mulf %419, %418 : vector<8x128xf32>
    %421 = math.tanh %420 : vector<8x128xf32>
    %cst_174 = arith.constant 1.000000e+00 : f32
    %422 = vector.broadcast %cst_174 : f32 to vector<8x128xf32>
    %423 = arith.addf %421, %422 : vector<8x128xf32>
    %cst_175 = arith.constant 5.000000e-01 : f32
    %424 = vector.broadcast %cst_175 : f32 to vector<8x128xf32>
    %425 = arith.mulf %424, %423 : vector<8x128xf32>
    %426 = vector.extract_strided_slice %409 {offsets = [0, 256], sizes = [8, 128], strides = [1, 1]} : vector<8x512xf32> to vector<8x128xf32>
    %427 = math.tanh %426 : vector<8x128xf32>
    %428 = vector.extract_strided_slice %409 {offsets = [0, 384], sizes = [8, 128], strides = [1, 1]} : vector<8x512xf32> to vector<8x128xf32>
    %cst_176 = arith.constant 5.000000e-01 : f32
    %429 = vector.broadcast %cst_176 : f32 to vector<8x128xf32>
    %430 = arith.mulf %429, %428 : vector<8x128xf32>
    %431 = math.tanh %430 : vector<8x128xf32>
    %cst_177 = arith.constant 1.000000e+00 : f32
    %432 = vector.broadcast %cst_177 : f32 to vector<8x128xf32>
    %433 = arith.addf %431, %432 : vector<8x128xf32>
    %cst_178 = arith.constant 5.000000e-01 : f32
    %434 = vector.broadcast %cst_178 : f32 to vector<8x128xf32>
    %435 = arith.mulf %434, %433 : vector<8x128xf32>
    %436 = arith.mulf %425, %399 : vector<8x128xf32>
    %437 = arith.mulf %417, %427 : vector<8x128xf32>
    %438 = arith.addf %436, %437 : vector<8x128xf32>
    %439 = math.tanh %438 : vector<8x128xf32>
    %440 = arith.mulf %435, %439 : vector<8x128xf32>
    %c0_179 = arith.constant 0 : index
    %c10_180 = arith.constant 10 : index
    %c0_181 = arith.constant 0 : index
    %441 = vector.load %arg14[%c0_179, %c10_180, %c0_181] : memref<8x16x128xf32, #tpu.memory_space<vmem>>, vector<8x1x128xf32>
    %442 = vector.shape_cast %441 : vector<8x1x128xf32> to vector<8x128xf32>
    %443 = vector.shape_cast %440 : vector<8x128xf32> to vector<8x1x128xf32>
    tpu.vector_store %arg14[%c0_179, %c10_180, %c0_181], %443 {strides = array<i32>} : memref<8x16x128xf32, #tpu.memory_space<vmem>>, vector<8x1x128xf32>,
    %c0_182 = arith.constant 0 : index
    %c11 = arith.constant 11 : index
    %c0_183 = arith.constant 0 : index
    %444 = vector.load %arg13[%c0_182, %c11, %c0_183] : memref<8x16x512xf32, #tpu.memory_space<vmem>>, vector<8x1x512xf32>
    %445 = vector.shape_cast %444 : vector<8x1x512xf32> to vector<8x512xf32>
    %446 = arith.truncf %440 : vector<8x128xf32> to vector<8x128xbf16>
    %cst_184 = arith.constant dense<0.000000e+00> : vector<8x512xf32>
    %447 = tpu.matmul %446, %12, %cst_184 {dimension_numbers = #tpu.dot_dimension_numbers<[1], [0], [0], [1], [0, 0, 1, 1], [], []>} : vector<8x128xbf16>, vector<128x512xbf16>, vector<8x512xf32> -> vector<8x512xf32>
    %448 = arith.addf %445, %447 : vector<8x512xf32>
    %449 = vector.extract_strided_slice %448 {offsets = [0, 0], sizes = [8, 128], strides = [1, 1]} : vector<8x512xf32> to vector<8x128xf32>
    %cst_185 = arith.constant 5.000000e-01 : f32
    %450 = vector.broadcast %cst_185 : f32 to vector<8x128xf32>
    %451 = arith.mulf %450, %449 : vector<8x128xf32>
    %452 = math.tanh %451 : vector<8x128xf32>
    %cst_186 = arith.constant 1.000000e+00 : f32
    %453 = vector.broadcast %cst_186 : f32 to vector<8x128xf32>
    %454 = arith.addf %452, %453 : vector<8x128xf32>
    %cst_187 = arith.constant 5.000000e-01 : f32
    %455 = vector.broadcast %cst_187 : f32 to vector<8x128xf32>
    %456 = arith.mulf %455, %454 : vector<8x128xf32>
    %457 = vector.extract_strided_slice %448 {offsets = [0, 128], sizes = [8, 128], strides = [1, 1]} : vector<8x512xf32> to vector<8x128xf32>
    %cst_188 = arith.constant 5.000000e-01 : f32
    %458 = vector.broadcast %cst_188 : f32 to vector<8x128xf32>
    %459 = arith.mulf %458, %457 : vector<8x128xf32>
    %460 = math.tanh %459 : vector<8x128xf32>
    %cst_189 = arith.constant 1.000000e+00 : f32
    %461 = vector.broadcast %cst_189 : f32 to vector<8x128xf32>
    %462 = arith.addf %460, %461 : vector<8x128xf32>
    %cst_190 = arith.constant 5.000000e-01 : f32
    %463 = vector.broadcast %cst_190 : f32 to vector<8x128xf32>
    %464 = arith.mulf %463, %462 : vector<8x128xf32>
    %465 = vector.extract_strided_slice %448 {offsets = [0, 256], sizes = [8, 128], strides = [1, 1]} : vector<8x512xf32> to vector<8x128xf32>
    %466 = math.tanh %465 : vector<8x128xf32>
    %467 = vector.extract_strided_slice %448 {offsets = [0, 384], sizes = [8, 128], strides = [1, 1]} : vector<8x512xf32> to vector<8x128xf32>
    %cst_191 = arith.constant 5.000000e-01 : f32
    %468 = vector.broadcast %cst_191 : f32 to vector<8x128xf32>
    %469 = arith.mulf %468, %467 : vector<8x128xf32>
    %470 = math.tanh %469 : vector<8x128xf32>
    %cst_192 = arith.constant 1.000000e+00 : f32
    %471 = vector.broadcast %cst_192 : f32 to vector<8x128xf32>
    %472 = arith.addf %470, %471 : vector<8x128xf32>
    %cst_193 = arith.constant 5.000000e-01 : f32
    %473 = vector.broadcast %cst_193 : f32 to vector<8x128xf32>
    %474 = arith.mulf %473, %472 : vector<8x128xf32>
    %475 = arith.mulf %464, %438 : vector<8x128xf32>
    %476 = arith.mulf %456, %466 : vector<8x128xf32>
    %477 = arith.addf %475, %476 : vector<8x128xf32>
    %478 = math.tanh %477 : vector<8x128xf32>
    %479 = arith.mulf %474, %478 : vector<8x128xf32>
    %c0_194 = arith.constant 0 : index
    %c11_195 = arith.constant 11 : index
    %c0_196 = arith.constant 0 : index
    %480 = vector.load %arg14[%c0_194, %c11_195, %c0_196] : memref<8x16x128xf32, #tpu.memory_space<vmem>>, vector<8x1x128xf32>
    %481 = vector.shape_cast %480 : vector<8x1x128xf32> to vector<8x128xf32>
    %482 = vector.shape_cast %479 : vector<8x128xf32> to vector<8x1x128xf32>
    tpu.vector_store %arg14[%c0_194, %c11_195, %c0_196], %482 {strides = array<i32>} : memref<8x16x128xf32, #tpu.memory_space<vmem>>, vector<8x1x128xf32>,
    %c0_197 = arith.constant 0 : index
    %c12 = arith.constant 12 : index
    %c0_198 = arith.constant 0 : index
    %483 = vector.load %arg13[%c0_197, %c12, %c0_198] : memref<8x16x512xf32, #tpu.memory_space<vmem>>, vector<8x1x512xf32>
    %484 = vector.shape_cast %483 : vector<8x1x512xf32> to vector<8x512xf32>
    %485 = arith.truncf %479 : vector<8x128xf32> to vector<8x128xbf16>
    %cst_199 = arith.constant dense<0.000000e+00> : vector<8x512xf32>
    %486 = tpu.matmul %485, %12, %cst_199 {dimension_numbers = #tpu.dot_dimension_numbers<[1], [0], [0], [1], [0, 0, 1, 1], [], []>} : vector<8x128xbf16>, vector<128x512xbf16>, vector<8x512xf32> -> vector<8x512xf32>
    %487 = arith.addf %484, %486 : vector<8x512xf32>
    %488 = vector.extract_strided_slice %487 {offsets = [0, 0], sizes = [8, 128], strides = [1, 1]} : vector<8x512xf32> to vector<8x128xf32>
    %cst_200 = arith.constant 5.000000e-01 : f32
    %489 = vector.broadcast %cst_200 : f32 to vector<8x128xf32>
    %490 = arith.mulf %489, %488 : vector<8x128xf32>
    %491 = math.tanh %490 : vector<8x128xf32>
    %cst_201 = arith.constant 1.000000e+00 : f32
    %492 = vector.broadcast %cst_201 : f32 to vector<8x128xf32>
    %493 = arith.addf %491, %492 : vector<8x128xf32>
    %cst_202 = arith.constant 5.000000e-01 : f32
    %494 = vector.broadcast %cst_202 : f32 to vector<8x128xf32>
    %495 = arith.mulf %494, %493 : vector<8x128xf32>
    %496 = vector.extract_strided_slice %487 {offsets = [0, 128], sizes = [8, 128], strides = [1, 1]} : vector<8x512xf32> to vector<8x128xf32>
    %cst_203 = arith.constant 5.000000e-01 : f32
    %497 = vector.broadcast %cst_203 : f32 to vector<8x128xf32>
    %498 = arith.mulf %497, %496 : vector<8x128xf32>
    %499 = math.tanh %498 : vector<8x128xf32>
    %cst_204 = arith.constant 1.000000e+00 : f32
    %500 = vector.broadcast %cst_204 : f32 to vector<8x128xf32>
    %501 = arith.addf %499, %500 : vector<8x128xf32>
    %cst_205 = arith.constant 5.000000e-01 : f32
    %502 = vector.broadcast %cst_205 : f32 to vector<8x128xf32>
    %503 = arith.mulf %502, %501 : vector<8x128xf32>
    %504 = vector.extract_strided_slice %487 {offsets = [0, 256], sizes = [8, 128], strides = [1, 1]} : vector<8x512xf32> to vector<8x128xf32>
    %505 = math.tanh %504 : vector<8x128xf32>
    %506 = vector.extract_strided_slice %487 {offsets = [0, 384], sizes = [8, 128], strides = [1, 1]} : vector<8x512xf32> to vector<8x128xf32>
    %cst_206 = arith.constant 5.000000e-01 : f32
    %507 = vector.broadcast %cst_206 : f32 to vector<8x128xf32>
    %508 = arith.mulf %507, %506 : vector<8x128xf32>
    %509 = math.tanh %508 : vector<8x128xf32>
    %cst_207 = arith.constant 1.000000e+00 : f32
    %510 = vector.broadcast %cst_207 : f32 to vector<8x128xf32>
    %511 = arith.addf %509, %510 : vector<8x128xf32>
    %cst_208 = arith.constant 5.000000e-01 : f32
    %512 = vector.broadcast %cst_208 : f32 to vector<8x128xf32>
    %513 = arith.mulf %512, %511 : vector<8x128xf32>
    %514 = arith.mulf %503, %477 : vector<8x128xf32>
    %515 = arith.mulf %495, %505 : vector<8x128xf32>
    %516 = arith.addf %514, %515 : vector<8x128xf32>
    %517 = math.tanh %516 : vector<8x128xf32>
    %518 = arith.mulf %513, %517 : vector<8x128xf32>
    %c0_209 = arith.constant 0 : index
    %c12_210 = arith.constant 12 : index
    %c0_211 = arith.constant 0 : index
    %519 = vector.load %arg14[%c0_209, %c12_210, %c0_211] : memref<8x16x128xf32, #tpu.memory_space<vmem>>, vector<8x1x128xf32>
    %520 = vector.shape_cast %519 : vector<8x1x128xf32> to vector<8x128xf32>
    %521 = vector.shape_cast %518 : vector<8x128xf32> to vector<8x1x128xf32>
    tpu.vector_store %arg14[%c0_209, %c12_210, %c0_211], %521 {strides = array<i32>} : memref<8x16x128xf32, #tpu.memory_space<vmem>>, vector<8x1x128xf32>,
    %c0_212 = arith.constant 0 : index
    %c13 = arith.constant 13 : index
    %c0_213 = arith.constant 0 : index
    %522 = vector.load %arg13[%c0_212, %c13, %c0_213] : memref<8x16x512xf32, #tpu.memory_space<vmem>>, vector<8x1x512xf32>
    %523 = vector.shape_cast %522 : vector<8x1x512xf32> to vector<8x512xf32>
    %524 = arith.truncf %518 : vector<8x128xf32> to vector<8x128xbf16>
    %cst_214 = arith.constant dense<0.000000e+00> : vector<8x512xf32>
    %525 = tpu.matmul %524, %12, %cst_214 {dimension_numbers = #tpu.dot_dimension_numbers<[1], [0], [0], [1], [0, 0, 1, 1], [], []>} : vector<8x128xbf16>, vector<128x512xbf16>, vector<8x512xf32> -> vector<8x512xf32>
    %526 = arith.addf %523, %525 : vector<8x512xf32>
    %527 = vector.extract_strided_slice %526 {offsets = [0, 0], sizes = [8, 128], strides = [1, 1]} : vector<8x512xf32> to vector<8x128xf32>
    %cst_215 = arith.constant 5.000000e-01 : f32
    %528 = vector.broadcast %cst_215 : f32 to vector<8x128xf32>
    %529 = arith.mulf %528, %527 : vector<8x128xf32>
    %530 = math.tanh %529 : vector<8x128xf32>
    %cst_216 = arith.constant 1.000000e+00 : f32
    %531 = vector.broadcast %cst_216 : f32 to vector<8x128xf32>
    %532 = arith.addf %530, %531 : vector<8x128xf32>
    %cst_217 = arith.constant 5.000000e-01 : f32
    %533 = vector.broadcast %cst_217 : f32 to vector<8x128xf32>
    %534 = arith.mulf %533, %532 : vector<8x128xf32>
    %535 = vector.extract_strided_slice %526 {offsets = [0, 128], sizes = [8, 128], strides = [1, 1]} : vector<8x512xf32> to vector<8x128xf32>
    %cst_218 = arith.constant 5.000000e-01 : f32
    %536 = vector.broadcast %cst_218 : f32 to vector<8x128xf32>
    %537 = arith.mulf %536, %535 : vector<8x128xf32>
    %538 = math.tanh %537 : vector<8x128xf32>
    %cst_219 = arith.constant 1.000000e+00 : f32
    %539 = vector.broadcast %cst_219 : f32 to vector<8x128xf32>
    %540 = arith.addf %538, %539 : vector<8x128xf32>
    %cst_220 = arith.constant 5.000000e-01 : f32
    %541 = vector.broadcast %cst_220 : f32 to vector<8x128xf32>
    %542 = arith.mulf %541, %540 : vector<8x128xf32>
    %543 = vector.extract_strided_slice %526 {offsets = [0, 256], sizes = [8, 128], strides = [1, 1]} : vector<8x512xf32> to vector<8x128xf32>
    %544 = math.tanh %543 : vector<8x128xf32>
    %545 = vector.extract_strided_slice %526 {offsets = [0, 384], sizes = [8, 128], strides = [1, 1]} : vector<8x512xf32> to vector<8x128xf32>
    %cst_221 = arith.constant 5.000000e-01 : f32
    %546 = vector.broadcast %cst_221 : f32 to vector<8x128xf32>
    %547 = arith.mulf %546, %545 : vector<8x128xf32>
    %548 = math.tanh %547 : vector<8x128xf32>
    %cst_222 = arith.constant 1.000000e+00 : f32
    %549 = vector.broadcast %cst_222 : f32 to vector<8x128xf32>
    %550 = arith.addf %548, %549 : vector<8x128xf32>
    %cst_223 = arith.constant 5.000000e-01 : f32
    %551 = vector.broadcast %cst_223 : f32 to vector<8x128xf32>
    %552 = arith.mulf %551, %550 : vector<8x128xf32>
    %553 = arith.mulf %542, %516 : vector<8x128xf32>
    %554 = arith.mulf %534, %544 : vector<8x128xf32>
    %555 = arith.addf %553, %554 : vector<8x128xf32>
    %556 = math.tanh %555 : vector<8x128xf32>
    %557 = arith.mulf %552, %556 : vector<8x128xf32>
    %c0_224 = arith.constant 0 : index
    %c13_225 = arith.constant 13 : index
    %c0_226 = arith.constant 0 : index
    %558 = vector.load %arg14[%c0_224, %c13_225, %c0_226] : memref<8x16x128xf32, #tpu.memory_space<vmem>>, vector<8x1x128xf32>
    %559 = vector.shape_cast %558 : vector<8x1x128xf32> to vector<8x128xf32>
    %560 = vector.shape_cast %557 : vector<8x128xf32> to vector<8x1x128xf32>
    tpu.vector_store %arg14[%c0_224, %c13_225, %c0_226], %560 {strides = array<i32>} : memref<8x16x128xf32, #tpu.memory_space<vmem>>, vector<8x1x128xf32>,
    %c0_227 = arith.constant 0 : index
    %c14 = arith.constant 14 : index
    %c0_228 = arith.constant 0 : index
    %561 = vector.load %arg13[%c0_227, %c14, %c0_228] : memref<8x16x512xf32, #tpu.memory_space<vmem>>, vector<8x1x512xf32>
    %562 = vector.shape_cast %561 : vector<8x1x512xf32> to vector<8x512xf32>
    %563 = arith.truncf %557 : vector<8x128xf32> to vector<8x128xbf16>
    %cst_229 = arith.constant dense<0.000000e+00> : vector<8x512xf32>
    %564 = tpu.matmul %563, %12, %cst_229 {dimension_numbers = #tpu.dot_dimension_numbers<[1], [0], [0], [1], [0, 0, 1, 1], [], []>} : vector<8x128xbf16>, vector<128x512xbf16>, vector<8x512xf32> -> vector<8x512xf32>
    %565 = arith.addf %562, %564 : vector<8x512xf32>
    %566 = vector.extract_strided_slice %565 {offsets = [0, 0], sizes = [8, 128], strides = [1, 1]} : vector<8x512xf32> to vector<8x128xf32>
    %cst_230 = arith.constant 5.000000e-01 : f32
    %567 = vector.broadcast %cst_230 : f32 to vector<8x128xf32>
    %568 = arith.mulf %567, %566 : vector<8x128xf32>
    %569 = math.tanh %568 : vector<8x128xf32>
    %cst_231 = arith.constant 1.000000e+00 : f32
    %570 = vector.broadcast %cst_231 : f32 to vector<8x128xf32>
    %571 = arith.addf %569, %570 : vector<8x128xf32>
    %cst_232 = arith.constant 5.000000e-01 : f32
    %572 = vector.broadcast %cst_232 : f32 to vector<8x128xf32>
    %573 = arith.mulf %572, %571 : vector<8x128xf32>
    %574 = vector.extract_strided_slice %565 {offsets = [0, 128], sizes = [8, 128], strides = [1, 1]} : vector<8x512xf32> to vector<8x128xf32>
    %cst_233 = arith.constant 5.000000e-01 : f32
    %575 = vector.broadcast %cst_233 : f32 to vector<8x128xf32>
    %576 = arith.mulf %575, %574 : vector<8x128xf32>
    %577 = math.tanh %576 : vector<8x128xf32>
    %cst_234 = arith.constant 1.000000e+00 : f32
    %578 = vector.broadcast %cst_234 : f32 to vector<8x128xf32>
    %579 = arith.addf %577, %578 : vector<8x128xf32>
    %cst_235 = arith.constant 5.000000e-01 : f32
    %580 = vector.broadcast %cst_235 : f32 to vector<8x128xf32>
    %581 = arith.mulf %580, %579 : vector<8x128xf32>
    %582 = vector.extract_strided_slice %565 {offsets = [0, 256], sizes = [8, 128], strides = [1, 1]} : vector<8x512xf32> to vector<8x128xf32>
    %583 = math.tanh %582 : vector<8x128xf32>
    %584 = vector.extract_strided_slice %565 {offsets = [0, 384], sizes = [8, 128], strides = [1, 1]} : vector<8x512xf32> to vector<8x128xf32>
    %cst_236 = arith.constant 5.000000e-01 : f32
    %585 = vector.broadcast %cst_236 : f32 to vector<8x128xf32>
    %586 = arith.mulf %585, %584 : vector<8x128xf32>
    %587 = math.tanh %586 : vector<8x128xf32>
    %cst_237 = arith.constant 1.000000e+00 : f32
    %588 = vector.broadcast %cst_237 : f32 to vector<8x128xf32>
    %589 = arith.addf %587, %588 : vector<8x128xf32>
    %cst_238 = arith.constant 5.000000e-01 : f32
    %590 = vector.broadcast %cst_238 : f32 to vector<8x128xf32>
    %591 = arith.mulf %590, %589 : vector<8x128xf32>
    %592 = arith.mulf %581, %555 : vector<8x128xf32>
    %593 = arith.mulf %573, %583 : vector<8x128xf32>
    %594 = arith.addf %592, %593 : vector<8x128xf32>
    %595 = math.tanh %594 : vector<8x128xf32>
    %596 = arith.mulf %591, %595 : vector<8x128xf32>
    %c0_239 = arith.constant 0 : index
    %c14_240 = arith.constant 14 : index
    %c0_241 = arith.constant 0 : index
    %597 = vector.load %arg14[%c0_239, %c14_240, %c0_241] : memref<8x16x128xf32, #tpu.memory_space<vmem>>, vector<8x1x128xf32>
    %598 = vector.shape_cast %597 : vector<8x1x128xf32> to vector<8x128xf32>
    %599 = vector.shape_cast %596 : vector<8x128xf32> to vector<8x1x128xf32>
    tpu.vector_store %arg14[%c0_239, %c14_240, %c0_241], %599 {strides = array<i32>} : memref<8x16x128xf32, #tpu.memory_space<vmem>>, vector<8x1x128xf32>,
    %c0_242 = arith.constant 0 : index
    %c15 = arith.constant 15 : index
    %c0_243 = arith.constant 0 : index
    %600 = vector.load %arg13[%c0_242, %c15, %c0_243] : memref<8x16x512xf32, #tpu.memory_space<vmem>>, vector<8x1x512xf32>
    %601 = vector.shape_cast %600 : vector<8x1x512xf32> to vector<8x512xf32>
    %602 = arith.truncf %596 : vector<8x128xf32> to vector<8x128xbf16>
    %cst_244 = arith.constant dense<0.000000e+00> : vector<8x512xf32>
    %603 = tpu.matmul %602, %12, %cst_244 {dimension_numbers = #tpu.dot_dimension_numbers<[1], [0], [0], [1], [0, 0, 1, 1], [], []>} : vector<8x128xbf16>, vector<128x512xbf16>, vector<8x512xf32> -> vector<8x512xf32>
    %604 = arith.addf %601, %603 : vector<8x512xf32>
    %605 = vector.extract_strided_slice %604 {offsets = [0, 0], sizes = [8, 128], strides = [1, 1]} : vector<8x512xf32> to vector<8x128xf32>
    %cst_245 = arith.constant 5.000000e-01 : f32
    %606 = vector.broadcast %cst_245 : f32 to vector<8x128xf32>
    %607 = arith.mulf %606, %605 : vector<8x128xf32>
    %608 = math.tanh %607 : vector<8x128xf32>
    %cst_246 = arith.constant 1.000000e+00 : f32
    %609 = vector.broadcast %cst_246 : f32 to vector<8x128xf32>
    %610 = arith.addf %608, %609 : vector<8x128xf32>
    %cst_247 = arith.constant 5.000000e-01 : f32
    %611 = vector.broadcast %cst_247 : f32 to vector<8x128xf32>
    %612 = arith.mulf %611, %610 : vector<8x128xf32>
    %613 = vector.extract_strided_slice %604 {offsets = [0, 128], sizes = [8, 128], strides = [1, 1]} : vector<8x512xf32> to vector<8x128xf32>
    %cst_248 = arith.constant 5.000000e-01 : f32
    %614 = vector.broadcast %cst_248 : f32 to vector<8x128xf32>
    %615 = arith.mulf %614, %613 : vector<8x128xf32>
    %616 = math.tanh %615 : vector<8x128xf32>
    %cst_249 = arith.constant 1.000000e+00 : f32
    %617 = vector.broadcast %cst_249 : f32 to vector<8x128xf32>
    %618 = arith.addf %616, %617 : vector<8x128xf32>
    %cst_250 = arith.constant 5.000000e-01 : f32
    %619 = vector.broadcast %cst_250 : f32 to vector<8x128xf32>
    %620 = arith.mulf %619, %618 : vector<8x128xf32>
    %621 = vector.extract_strided_slice %604 {offsets = [0, 256], sizes = [8, 128], strides = [1, 1]} : vector<8x512xf32> to vector<8x128xf32>
    %622 = math.tanh %621 : vector<8x128xf32>
    %623 = vector.extract_strided_slice %604 {offsets = [0, 384], sizes = [8, 128], strides = [1, 1]} : vector<8x512xf32> to vector<8x128xf32>
    %cst_251 = arith.constant 5.000000e-01 : f32
    %624 = vector.broadcast %cst_251 : f32 to vector<8x128xf32>
    %625 = arith.mulf %624, %623 : vector<8x128xf32>
    %626 = math.tanh %625 : vector<8x128xf32>
    %cst_252 = arith.constant 1.000000e+00 : f32
    %627 = vector.broadcast %cst_252 : f32 to vector<8x128xf32>
    %628 = arith.addf %626, %627 : vector<8x128xf32>
    %cst_253 = arith.constant 5.000000e-01 : f32
    %629 = vector.broadcast %cst_253 : f32 to vector<8x128xf32>
    %630 = arith.mulf %629, %628 : vector<8x128xf32>
    %631 = arith.mulf %620, %594 : vector<8x128xf32>
    %632 = arith.mulf %612, %622 : vector<8x128xf32>
    %633 = arith.addf %631, %632 : vector<8x128xf32>
    %634 = math.tanh %633 : vector<8x128xf32>
    %635 = arith.mulf %630, %634 : vector<8x128xf32>
    %c0_254 = arith.constant 0 : index
    %c15_255 = arith.constant 15 : index
    %c0_256 = arith.constant 0 : index
    %636 = vector.load %arg14[%c0_254, %c15_255, %c0_256] : memref<8x16x128xf32, #tpu.memory_space<vmem>>, vector<8x1x128xf32>
    %637 = vector.shape_cast %636 : vector<8x1x128xf32> to vector<8x128xf32>
    %638 = vector.shape_cast %635 : vector<8x128xf32> to vector<8x1x128xf32>
    tpu.vector_store %arg14[%c0_254, %c15_255, %c0_256], %638 {strides = array<i32>} : memref<8x16x128xf32, #tpu.memory_space<vmem>>, vector<8x1x128xf32>,
    %c0_257 = arith.constant 0 : index
    %c0_258 = arith.constant 0 : index
    %c0_259 = arith.constant 0 : index
    %639 = vector.load %arg14[%c0_257, %c0_258, %c0_259] : memref<8x16x128xf32, #tpu.memory_space<vmem>>, vector<8x16x128xf32>
    %640 = arith.truncf %639 : vector<8x16x128xf32> to vector<8x16x128xbf16>
    %c0_260 = arith.constant 0 : index
    %c0_261 = arith.constant 0 : index
    %c0_262 = arith.constant 0 : index
    %641 = vector.load %arg8[%c0_260, %c0_261, %c0_262] : memref<8x16x128xbf16, #tpu.memory_space<vmem>>, vector<8x16x128xbf16>
    tpu.vector_store %arg8[%c0_260, %c0_261, %c0_262], %640 {strides = array<i32>} : memref<8x16x128xbf16, #tpu.memory_space<vmem>>, vector<8x16x128xbf16>,
    %c0_263 = arith.constant 0 : index
    %c0_264 = arith.constant 0 : index
    %642 = vector.load %arg11[%c0_263, %c0_264] : memref<8x128xf32, #tpu.memory_space<vmem>>, vector<8x128xf32>
    tpu.vector_store %arg11[%c0_263, %c0_264], %635 {strides = array<i32>} : memref<8x128xf32, #tpu.memory_space<vmem>>, vector<8x128xf32>,
    %c0_265 = arith.constant 0 : index
    %c0_266 = arith.constant 0 : index
    %643 = vector.load %arg12[%c0_265, %c0_266] : memref<8x128xf32, #tpu.memory_space<vmem>>, vector<8x128xf32>
    tpu.vector_store %arg12[%c0_265, %c0_266], %633 {strides = array<i32>} : memref<8x128xf32, #tpu.memory_space<vmem>>, vector<8x128xf32>,
    %c0_i32_267 = arith.constant 0 : i32
    %644 = arith.cmpi eq, %arg1, %c0_i32_267 : i32
    %645 = arith.extui %644 : i1 to i32
    %c0_i32_268 = arith.constant 0 : i32
    %646 = arith.cmpi ne, %645, %c0_i32_268 : i32
    scf.if %646 {
      %c0_269 = arith.constant 0 : index
      %c0_270 = arith.constant 0 : index
      %647 = vector.load %arg9[%c0_269, %c0_270] : memref<8x128xf32, #tpu.memory_space<vmem>>, vector<8x128xf32>
      tpu.vector_store %arg9[%c0_269, %c0_270], %635 {strides = array<i32>} : memref<8x128xf32, #tpu.memory_space<vmem>>, vector<8x128xf32>,
      %c0_271 = arith.constant 0 : index
      %c0_272 = arith.constant 0 : index
      %648 = vector.load %arg10[%c0_271, %c0_272] : memref<8x128xf32, #tpu.memory_space<vmem>>, vector<8x128xf32>
      tpu.vector_store %arg10[%c0_271, %c0_272], %633 {strides = array<i32>} : memref<8x128xf32, #tpu.memory_space<vmem>>, vector<8x128xf32>,
    } else {
    }
    return
  }
  func.func @transform_0(%arg0: i32, %arg1: i32) -> (i32, i32, i32) {
    %c0_i32 = arith.constant 0 : i32
    %c0_i32_0 = arith.constant 0 : i32
    return %arg0, %arg1, %c0_i32 : i32, i32, i32
  }
  func.func @transform_1(%arg0: i32, %arg1: i32) -> (i32, i32) {
    %c0_i32 = arith.constant 0 : i32
    %c0_i32_0 = arith.constant 0 : i32
    %c0_i32_1 = arith.constant 0 : i32
    return %c0_i32, %c0_i32_0 : i32, i32
  }
  func.func @transform_2(%arg0: i32, %arg1: i32) -> (i32, i32) {
    %c0_i32 = arith.constant 0 : i32
    %c0_i32_0 = arith.constant 0 : i32
    %c0_i32_1 = arith.constant 0 : i32
    return %c0_i32, %c0_i32_0 : i32, i32
  }
  func.func @transform_3(%arg0: i32, %arg1: i32) -> (i32, i32) {
    %c0_i32 = arith.constant 0 : i32
    %c0_i32_0 = arith.constant 0 : i32
    %c0_i32_1 = arith.constant 0 : i32
    return %c0_i32, %c0_i32_0 : i32, i32
  }
  func.func @transform_4(%arg0: i32, %arg1: i32) -> (i32, i32) {
    %c0_i32 = arith.constant 0 : i32
    %c0_i32_0 = arith.constant 0 : i32
    return %arg0, %c0_i32 : i32, i32
  }
  func.func @transform_5(%arg0: i32, %arg1: i32) -> (i32, i32) {
    %c0_i32 = arith.constant 0 : i32
    %c0_i32_0 = arith.constant 0 : i32
    return %arg0, %c0_i32 : i32, i32
  }
  func.func @transform_6(%arg0: i32, %arg1: i32) -> (i32, i32, i32) {
    %c0_i32 = arith.constant 0 : i32
    %c0_i32_0 = arith.constant 0 : i32
    return %arg0, %arg1, %c0_i32 : i32, i32, i32
  }
  func.func @transform_7(%arg0: i32, %arg1: i32) -> (i32, i32) {
    %c0_i32 = arith.constant 0 : i32
    %c0_i32_0 = arith.constant 0 : i32
    return %arg0, %c0_i32 : i32, i32
  }
  func.func @transform_8(%arg0: i32, %arg1: i32) -> (i32, i32) {
    %c0_i32 = arith.constant 0 : i32
    %c0_i32_0 = arith.constant 0 : i32
    return %arg0, %c0_i32 : i32, i32
  }
}

</mosaic_0001>

<bundles_post_ra>
// kernel: generator_forward.5
= control target key start
LH: loop header
LB: loop body
LE: loop exit
PB: predicated region body
PF: predicated region fallthrough
CT: control target
= control target key end

     0   :  { %v449_v2 = vmov 0   ;;  %s604_s0 = inlined_call_operand.vmem [shape: bf16[128,128], index: 0, kind: input, shape index: {}]   ;;  %s605_s1 = inlined_call_operand.vmem [shape: bf16[128,256], index: 1, kind: input, shape index: {}]   ;;  %s606_s2 = inlined_call_operand.vmem [shape: f32[1,256], index: 2, kind: input, shape index: {}]   ;;  %s607_s3 = inlined_call_operand.hbm [shape: f32[128,256], index: 3, kind: output, shape index: {}]  }
   0x1   :  { %v393_v0 = vld [vmem:[%s605_s1 + $0x4] ss:$8 sps:$4 sm:$0xff]   ;;  %v395_v1 = vld [vmem:[%s605_s1] ss:$8 sps:$4 sm:$0xff]   ;;  %220 = vmatprep.mubr.bf16.mxu0 %v449_v2  ;;  %260 = vmatprep.mubr.bf16.mxu1 %v449_v2  ;;  %v396_v3 = vld [vmem:[%s605_s1 + $0x14] ss:$8 sps:$4 sm:$0xff]  }
   0x2   :  { %188 = vmatprep.subr.bf16.mxu0 %v393_v0  ;;  %373 = vmatprep.subr.bf16.mxu1 %v393_v0  ;;  %v398_v4 = vld [vmem:[%s605_s1 + $0x10] ss:$8 sps:$4 sm:$0xff]   ;;  %v399_v5 = vld [vmem:[%s605_s1 + $0x24] ss:$8 sps:$4 sm:$0xff]   ;;  %v401_v6 = vld [vmem:[%s605_s1 + $0x20] ss:$8 sps:$4 sm:$0xff]  }
   0x3   :  { %189 = vmatpush1.bf16.msra.mxu0 %v395_v1  ;;  %381 = vmatpush1.bf16.msra.mxu1 %v395_v1  ;;  %v402_v7 = vld [vmem:[%s605_s1 + $0x34] ss:$8 sps:$4 sm:$0xff]   ;;  %v404_v8 = vld [vmem:[%s605_s1 + $0x30] ss:$8 sps:$4 sm:$0xff]   ;;  %v405_v9 = vld [vmem:[%s605_s1 + $0x44] ss:$8 sps:$4 sm:$0xff]  }
   0x4   :  { %190 = vmatprep.subr.bf16.mxu0 %v396_v3  ;;  %374 = vmatprep.subr.bf16.mxu1 %v396_v3  ;;  %v407_v10 = vld [vmem:[%s605_s1 + $0x40] ss:$8 sps:$4 sm:$0xff]   ;;  %v408_v11 = vld [vmem:[%s605_s1 + $0x54] ss:$8 sps:$4 sm:$0xff]   ;;  %v410_v12 = vld [vmem:[%s605_s1 + $0x50] ss:$8 sps:$4 sm:$0xff]  }
   0x7   :  { %191 = vmatpush1.bf16.msra.mxu0 %v398_v4  ;;  %382 = vmatpush1.bf16.msra.mxu1 %v398_v4 }
   0x8   :  { %192 = vmatprep.subr.bf16.mxu0 %v399_v5  ;;  %375 = vmatprep.subr.bf16.mxu1 %v399_v5 }
   0xb   :  { %193 = vmatpush1.bf16.msra.mxu0 %v401_v6  ;;  %383 = vmatpush1.bf16.msra.mxu1 %v401_v6 }
   0xc   :  { %194 = vmatprep.subr.bf16.mxu0 %v402_v7  ;;  %376 = vmatprep.subr.bf16.mxu1 %v402_v7 }
   0xf   :  { %195 = vmatpush1.bf16.msra.mxu0 %v404_v8  ;;  %384 = vmatpush1.bf16.msra.mxu1 %v404_v8 }
  0x10   :  { %196 = vmatprep.subr.bf16.mxu0 %v405_v9  ;;  %377 = vmatprep.subr.bf16.mxu1 %v405_v9 }
  0x13   :  { %197 = vmatpush1.bf16.msra.mxu0 %v407_v10  ;;  %385 = vmatpush1.bf16.msra.mxu1 %v407_v10 }
  0x14   :  { %8 = vsyncpa [#allocation3], 0  ;;  %198 = vmatprep.subr.bf16.mxu0 %v408_v11  ;;  %378 = vmatprep.subr.bf16.mxu1 %v408_v11  ;;  %v411_v13 = vld [vmem:[%s605_s1 + $0x64] ss:$8 sps:$4 sm:$0xff]   ;;  %v413_v14 = vld [vmem:[%s605_s1 + $0x60] ss:$8 sps:$4 sm:$0xff]   ;;  %v50_v25 = vlaneseq }
  0x15   :  { %v414_v15 = vld [vmem:[%s605_s1 + $0x74] ss:$8 sps:$4 sm:$0xff]   ;;  %v416_v16 = vld [vmem:[%s605_s1 + $0x70] ss:$8 sps:$4 sm:$0xff]   ;;  %v417_v17 = vld [vmem:[%s604_s0] sm:$0xff]  }
  0x16   :  { %v418_v18 = vld [vmem:[%s604_s0 + $0x20] sm:$0xff]   ;;  %v419_v19 = vld [vmem:[%s604_s0 + $0x8] sm:$0xff]   ;;  %v421_v21 = vld [vmem:[%s604_s0 + $0x10] sm:$0xff]   ;;  %v51_v26 = vshrl.u32 %v50_v25, 7 }
  0x17   :  { %199 = vmatpush1.bf16.msra.mxu0 %v410_v12  ;;  %386 = vmatpush1.bf16.msra.mxu1 %v410_v12  ;;  %v420_v20 = vld [vmem:[%s604_s0 + $0x28] sm:$0xff]   ;;  %v422_v22 = vld [vmem:[%s604_s0 + $0x30] sm:$0xff]   ;;  %v423_v23 = vld [vmem:[%s604_s0 + $0x18] sm:$0xff]  }
  0x18   :  { %200 = vmatprep.subr.bf16.mxu0 %v411_v13  ;;  %379 = vmatprep.subr.bf16.mxu1 %v411_v13  ;;  %v424_v24 = vld [vmem:[%s604_s0 + $0x38] sm:$0xff]   ;;  %v52_v27 = vsub.s32 0, %v51_v26  ;;  %v48_v28 = vld [vmem:[%s606_s2] sm:$0x3]  ;;  %v56_v29 = vsub.s32 1, %v51_v26  ;;  %s450_s0 = smov [#allocation2]  }
  0x19   :  { %s338_s2 = sshll.u32 %s450_s0, 4  ;;  %s339_s2 = int_to_ptr.vmem [resolvable:$true] %s338_s2 }
  0x1a   :  { %v556_v30 = vrot.slane %v48_v28, %v52_v27  ;;  %v558_v31 = vrot.slane %v48_v28, %v56_v29  ;;  %s425_s7 = scalar_lea.vmem %s339_s2, 4096  ;;  %p430_p1 = scmp.lt.s32.totalorder %s339_s2, %s339_s2 }
  0x1b   :  { %201 = vmatpush1.bf16.msra.mxu0 %v413_v14  ;;  %387 = vmatpush1.bf16.msra.mxu1 %v413_v14  ;;  %p426_p0 = scmp.ne.s32.totalorder %s339_s2, %s425_s7  ;;  %p431_p2 = scmp.lt.s32.totalorder %s425_s7, %s425_s7 }
  0x1c   :  { %202 = vmatprep.subr.bf16.mxu0 %v414_v15  ;;  %380 = vmatprep.subr.bf16.mxu1 %v414_v15 }
  0x1d   :  { %p432_p3 = por %p431_p2, %p430_p1 }
  0x1f   :  { %203 = vmatpush1.bf16.msra.mxu0 %v416_v16  ;;  %388 = vmatpush1.bf16.msra.mxu1 %v416_v16  ;;  %p433_p4 = pnand %p432_p3, %p426_p0 }
  0x22   :  { %221 = vmatmul.mubr.bf16.vlgmr.msra.gmra.mrb[0].mxu0 %v417_v17  ;;  %261 = vmatmul.mubr.bf16.vlgmr.msra.gmra.mrb[0].mxu1 %v418_v18 }
  0x23   :  { %230 = vmatprep.mubr.bf16.mxu0 %v449_v2  ;;  %270 = vmatprep.mubr.bf16.mxu1 %v449_v2 }
  0x2a   :  { %231 = vmatmul.mubr.bf16.gmra.mrb[4].mxu0 %v419_v19  ;;  %271 = vmatmul.mubr.bf16.gmra.mrb[4].mxu1 %v420_v20 }
  0x2b   :  { %240 = vmatprep.mubr.bf16.mxu0 %v449_v2  ;;  %280 = vmatprep.mubr.bf16.mxu1 %v449_v2 }
  0x32   :  { %241 = vmatmul.mubr.bf16.gmra.mrb[8].mxu0 %v421_v21  ;;  %281 = vmatmul.mubr.bf16.gmra.mrb[8].mxu1 %v422_v22 }
  0x33   :  { %250 = vmatprep.mubr.bf16.mxu0 %v449_v2  ;;  %290 = vmatprep.mubr.bf16.mxu1 %v449_v2 }
  0x3a   :  { %251 = vmatmul.mubr.bf16.gmra.mrb[12].mxu0 %v423_v23  ;;  %291 = vmatmul.mubr.bf16.gmra.mrb[12].mxu1 %v424_v24 }
  0xf5   :  { %v222_v32 = vpop.f32.mrb[0].mxu0  ;;  %v262_v33 = vpop.f32.mrb[0].mxu1 }
  0xf6   :  { %v223_v34 = vadd.f32 %v222_v32, %v556_v30  ;;  %v263_v35 = vadd.f32 %v262_v33, %v556_v30  ;;  %v224_v36 = vpop.f32.mrb[1].mxu0  ;;  %v264_v37 = vpop.f32.mrb[1].mxu1 }
  0xf7   :  { %v225_v38 = vadd.f32 %v224_v36, %v558_v31  ;;  %v265_v39 = vadd.f32 %v264_v37, %v558_v31  ;;  %v226_v40 = vpop.f32.mrb[2].mxu0  ;;  %v266_v41 = vpop.f32.mrb[2].mxu1 }
  0xf8   :  { %301 = vst [vmem:[#allocation2] sm:$0xff] %v223_v34  ;;  %317 = vst [vmem:[#allocation2 + $0x80] sm:$0xff] %v263_v35  ;;  %v227_v42 = vadd.f32 %v226_v40, %v556_v30  ;;  %v267_v43 = vadd.f32 %v266_v41, %v556_v30  ;;  %v228_v44 = vpop.f32.mrb[3].mxu0  ;;  %v268_v45 = vpop.f32.mrb[3].mxu1 }
  0xf9   :  { %302 = vst [vmem:[#allocation2 + $0x8] sm:$0xff] %v225_v38  ;;  %318 = vst [vmem:[#allocation2 + $0x88] sm:$0xff] %v265_v39  ;;  %v229_v46 = vadd.f32 %v228_v44, %v558_v31  ;;  %v269_v47 = vadd.f32 %v268_v45, %v558_v31 }
  0xfa   :  { %303 = vst [vmem:[#allocation2 + $0x10] sm:$0xff] %v227_v42  ;;  %319 = vst [vmem:[#allocation2 + $0x90] sm:$0xff] %v267_v43 }
  0xfb   :  { %304 = vst [vmem:[#allocation2 + $0x18] sm:$0xff] %v229_v46  ;;  %320 = vst [vmem:[#allocation2 + $0x98] sm:$0xff] %v269_v47 }
  0xfd   :  { %v232_v48 = vpop.f32.mrb[4].mxu0  ;;  %v272_v49 = vpop.f32.mrb[4].mxu1 }
  0xfe   :  { %v233_v50 = vadd.f32 %v232_v48, %v556_v30  ;;  %v273_v51 = vadd.f32 %v272_v49, %v556_v30  ;;  %v234_v52 = vpop.f32.mrb[5].mxu0  ;;  %v274_v53 = vpop.f32.mrb[5].mxu1 }
  0xff   :  { %v235_v54 = vadd.f32 %v234_v52, %v558_v31  ;;  %v275_v55 = vadd.f32 %v274_v53, %v558_v31  ;;  %v236_v56 = vpop.f32.mrb[6].mxu0  ;;  %v276_v57 = vpop.f32.mrb[6].mxu1 }
 0x100   :  { %305 = vst [vmem:[#allocation2 + $0x20] sm:$0xff] %v233_v50  ;;  %321 = vst [vmem:[#allocation2 + $0xa0] sm:$0xff] %v273_v51  ;;  %v237_v58 = vadd.f32 %v236_v56, %v556_v30  ;;  %v277_v59 = vadd.f32 %v276_v57, %v556_v30  ;;  %v238_v60 = vpop.f32.mrb[7].mxu0  ;;  %v278_v61 = vpop.f32.mrb[7].mxu1 }
 0x101   :  { %306 = vst [vmem:[#allocation2 + $0x28] sm:$0xff] %v235_v54  ;;  %322 = vst [vmem:[#allocation2 + $0xa8] sm:$0xff] %v275_v55  ;;  %v239_v62 = vadd.f32 %v238_v60, %v558_v31  ;;  %v279_v63 = vadd.f32 %v278_v61, %v558_v31 }
 0x102   :  { %307 = vst [vmem:[#allocation2 + $0x30] sm:$0xff] %v237_v58  ;;  %323 = vst [vmem:[#allocation2 + $0xb0] sm:$0xff] %v277_v59 }
 0x103   :  { %308 = vst [vmem:[#allocation2 + $0x38] sm:$0xff] %v239_v62  ;;  %324 = vst [vmem:[#allocation2 + $0xb8] sm:$0xff] %v279_v63 }
 0x105   :  { %v242_v0 = vpop.f32.mrb[8].mxu0  ;;  %v282_v1 = vpop.f32.mrb[8].mxu1 }
 0x106   :  { %v243_v2 = vadd.f32 %v242_v0, %v556_v30  ;;  %v283_v3 = vadd.f32 %v282_v1, %v556_v30  ;;  %v244_v4 = vpop.f32.mrb[9].mxu0  ;;  %v284_v5 = vpop.f32.mrb[9].mxu1 }
 0x107   :  { %v245_v6 = vadd.f32 %v244_v4, %v558_v31  ;;  %v285_v7 = vadd.f32 %v284_v5, %v558_v31  ;;  %v246_v8 = vpop.f32.mrb[10].mxu0  ;;  %v286_v9 = vpop.f32.mrb[10].mxu1 }
 0x108   :  { %309 = vst [vmem:[#allocation2 + $0x40] sm:$0xff] %v243_v2  ;;  %325 = vst [vmem:[#allocation2 + $0xc0] sm:$0xff] %v283_v3  ;;  %v247_v10 = vadd.f32 %v246_v8, %v556_v30  ;;  %v287_v11 = vadd.f32 %v286_v9, %v556_v30  ;;  %v248_v12 = vpop.f32.mrb[11].mxu0  ;;  %v288_v13 = vpop.f32.mrb[11].mxu1 }
 0x109   :  { %310 = vst [vmem:[#allocation2 + $0x48] sm:$0xff] %v245_v6  ;;  %326 = vst [vmem:[#allocation2 + $0xc8] sm:$0xff] %v285_v7  ;;  %v249_v14 = vadd.f32 %v248_v12, %v558_v31  ;;  %v289_v15 = vadd.f32 %v288_v13, %v558_v31 }
 0x10a   :  { %311 = vst [vmem:[#allocation2 + $0x50] sm:$0xff] %v247_v10  ;;  %327 = vst [vmem:[#allocation2 + $0xd0] sm:$0xff] %v287_v11 }
 0x10b   :  { %312 = vst [vmem:[#allocation2 + $0x58] sm:$0xff] %v249_v14  ;;  %328 = vst [vmem:[#allocation2 + $0xd8] sm:$0xff] %v289_v15 }
 0x10d   :  { %v252_v16 = vpop.f32.mrb[12].mxu0  ;;  %v292_v17 = vpop.f32.mrb[12].mxu1 }
 0x10e   :  { %v253_v18 = vadd.f32 %v252_v16, %v556_v30  ;;  %v293_v19 = vadd.f32 %v292_v17, %v556_v30  ;;  %v254_v20 = vpop.f32.mrb[13].mxu0  ;;  %v294_v21 = vpop.f32.mrb[13].mxu1 }
 0x10f   :  { %v255_v22 = vadd.f32 %v254_v20, %v558_v31  ;;  %v295_v23 = vadd.f32 %v294_v21, %v558_v31  ;;  %v256_v24 = vpop.f32.mrb[14].mxu0  ;;  %v296_v25 = vpop.f32.mrb[14].mxu1 }
 0x110   :  { %313 = vst [vmem:[#allocation2 + $0x60] sm:$0xff] %v253_v18  ;;  %329 = vst [vmem:[#allocation2 + $0xe0] sm:$0xff] %v293_v19  ;;  %v257_v26 = vadd.f32 %v256_v24, %v556_v30  ;;  %v297_v27 = vadd.f32 %v296_v25, %v556_v30  ;;  %v258_v28 = vpop.f32.mrb[15].mxu0  ;;  %v298_v29 = vpop.f32.mrb[15].mxu1 }
 0x111   :  { %314 = vst [vmem:[#allocation2 + $0x68] sm:$0xff] %v255_v22  ;;  %330 = vst [vmem:[#allocation2 + $0xe8] sm:$0xff] %v295_v23  ;;  %v259_v32 = vadd.f32 %v258_v28, %v558_v31  ;;  %v299_v33 = vadd.f32 %v298_v29, %v558_v31 }
 0x112   :  { %315 = vst [vmem:[#allocation2 + $0x70] sm:$0xff] %v257_v26  ;;  %331 = vst [vmem:[#allocation2 + $0xf0] sm:$0xff] %v297_v27 }
 0x113   :  { %316 = vst [vmem:[#allocation2 + $0x78] sm:$0xff] %v259_v32  ;;  %332 = vst [vmem:[#allocation2 + $0xf8] sm:$0xff] %v299_v33 }
 0x114   :  { %436 = shalt.err (!%p433_p4)
}
 0x115   :  { %s437_s10 = scalar_lea.hbm %s607_s3, 4096 }
 0x116   :  { %p438_p5 = scmp.ne.s32.totalorder %s607_s3, %s437_s10  ;;  %p441_p6 = scmp.lt.u32.totalorder %s437_s10, %s607_s3 }
 0x118   :  { %p443_p7 = pnand %p441_p6, %p438_p5 }
 0x11a   :  { %446 = shalt.err (!%p443_p7)
}
 0x11b   :  { %s451_s15 = smov 256   ;;  %s452_s16 = smov 16  }
 0x11c   :  { %344 = dma.vmem_to_hbm [thread:$0]  %s339_s2, 4096, %s607_s3, [#allocation3], %s451_s15, %s451_s15, %s452_s16  }
 0x11d   :  { %447 = dma.done.wait [#allocation3], 4096  }
 0x11e   :  { %448 = vsyncadd [#allocation3], 4294963200 }
 0x11f   :  { %348 = vsyncpa [#allocation3], 1 }

// kernel: generator_forward.3
= control target key start
LH: loop header
LB: loop body
LE: loop exit
PB: predicated region body
PF: predicated region fallthrough
CT: control target
= control target key end

     0   :  { %v13442_v1 = vmov 0   ;;  %vm1290_vm0 = vcmask 1041409   ;;  %vm1293_vm1 = vcmask 1042434   ;;  %vm1296_vm2 = vcmask 1043459   ;;  %s13433_s1 = inlined_call_operand.vmem [shape: bf16[128,512], index: 1, kind: input, shape index: {}]   ;;  %s13434_s0 = inlined_call_operand.vmem [shape: bf16[8,16,128], index: 0, kind: input, shape index: {}]   ;;  %s13435_s2 = inlined_call_operand.vmem [shape: bf16[128,512], index: 2, kind: input, shape index: {}]   ;;  %s13436_s4 = inlined_call_operand.vmem [shape: f32[8,128], index: 4, kind: input, shape index: {}]   ;;  %s13437_s3 = inlined_call_operand.vmem [shape: f32[1,512], index: 3, kind: input, shape index: {}]   ;;  %s13438_s5 = inlined_call_operand.vmem [shape: f32[8,128], index: 5, kind: input, shape index: {}]   ;;  %s13439_s8 = inlined_call_operand.vmem [shape: f32[8,128], index: 8, kind: output, shape index: {2}]   ;;  %s13440_s6 = inlined_call_operand.vmem [shape: bf16[8,16,128], index: 6, kind: output, shape index: {0}]   ;;  %s13441_s7 = inlined_call_operand.vmem [shape: f32[8,128], index: 7, kind: output, shape index: {1}]  }
   0x1   :  { %v8150_v0 = vld [vmem:[%s13433_s1 + $0x4] ss:$16 sps:$4 sm:$0xff]   ;;  %345 = vmatprep.mubr.bf16.mxu0 %v13442_v1  ;;  %458 = vmatprep.mubr.bf16.mxu1 %v13442_v1  ;;  %v8152_v2 = vld [vmem:[%s13433_s1 + $0xc] ss:$16 sps:$4 sm:$0xff]   ;;  %v8154_v3 = vld [vmem:[%s13433_s1] ss:$16 sps:$4 sm:$0xff]  }
   0x2   :  { %313 = vmatprep.subr.bf16.mxu0 %v8150_v0  ;;  %v8155_v4 = vld [vmem:[%s13433_s1 + $0x8] ss:$16 sps:$4 sm:$0xff]   ;;  %426 = vmatprep.subr.bf16.mxu1 %v8152_v2  ;;  %v8156_v5 = vld [vmem:[%s13433_s1 + $0x24] ss:$16 sps:$4 sm:$0xff]   ;;  %v8158_v6 = vld [vmem:[%s13433_s1 + $0x2c] ss:$16 sps:$4 sm:$0xff]  }
   0x3   :  { %314 = vmatpush1.bf16.msra.mxu0 %v8154_v3  ;;  %427 = vmatpush1.bf16.msra.mxu1 %v8155_v4  ;;  %v8160_v7 = vld [vmem:[%s13433_s1 + $0x20] ss:$16 sps:$4 sm:$0xff]   ;;  %v8161_v8 = vld [vmem:[%s13433_s1 + $0x28] ss:$16 sps:$4 sm:$0xff]   ;;  %v8162_v9 = vld [vmem:[%s13433_s1 + $0x44] ss:$16 sps:$4 sm:$0xff]  }
   0x4   :  { %315 = vmatprep.subr.bf16.mxu0 %v8156_v5  ;;  %428 = vmatprep.subr.bf16.mxu1 %v8158_v6  ;;  %v8164_v10 = vld [vmem:[%s13433_s1 + $0x4c] ss:$16 sps:$4 sm:$0xff]   ;;  %v8166_v11 = vld [vmem:[%s13433_s1 + $0x40] ss:$16 sps:$4 sm:$0xff]   ;;  %v8167_v12 = vld [vmem:[%s13433_s1 + $0x48] ss:$16 sps:$4 sm:$0xff]  }
   0x5   :  { %v8168_v13 = vld [vmem:[%s13433_s1 + $0x64] ss:$16 sps:$4 sm:$0xff]   ;;  %v8170_v14 = vld [vmem:[%s13433_s1 + $0x6c] ss:$16 sps:$4 sm:$0xff]   ;;  %v8172_v15 = vld [vmem:[%s13433_s1 + $0x60] ss:$16 sps:$4 sm:$0xff]  }
   0x6   :  { %v8173_v16 = vld [vmem:[%s13433_s1 + $0x68] ss:$16 sps:$4 sm:$0xff]   ;;  %v8174_v17 = vld [vmem:[%s13433_s1 + $0x84] ss:$16 sps:$4 sm:$0xff]   ;;  %v8176_v18 = vld [vmem:[%s13433_s1 + $0x8c] ss:$16 sps:$4 sm:$0xff]  }
   0x7   :  { %316 = vmatpush1.bf16.msra.mxu0 %v8160_v7  ;;  %429 = vmatpush1.bf16.msra.mxu1 %v8161_v8  ;;  %v8178_v19 = vld [vmem:[%s13433_s1 + $0x80] ss:$16 sps:$4 sm:$0xff]   ;;  %v8179_v20 = vld [vmem:[%s13433_s1 + $0x88] ss:$16 sps:$4 sm:$0xff]   ;;  %v8180_v21 = vld [vmem:[%s13433_s1 + $0xa4] ss:$16 sps:$4 sm:$0xff]  }
   0x8   :  { %317 = vmatprep.subr.bf16.mxu0 %v8162_v9  ;;  %430 = vmatprep.subr.bf16.mxu1 %v8164_v10  ;;  %v8182_v22 = vld [vmem:[%s13433_s1 + $0xac] ss:$16 sps:$4 sm:$0xff]   ;;  %v8184_v23 = vld [vmem:[%s13433_s1 + $0xa0] ss:$16 sps:$4 sm:$0xff]   ;;  %v8185_v24 = vld [vmem:[%s13433_s1 + $0xa8] ss:$16 sps:$4 sm:$0xff]  }
   0x9   :  { %v8186_v25 = vld [vmem:[%s13433_s1 + $0xc4] ss:$16 sps:$4 sm:$0xff]   ;;  %v8188_v26 = vld [vmem:[%s13433_s1 + $0xcc] ss:$16 sps:$4 sm:$0xff]   ;;  %v8190_v27 = vld [vmem:[%s13433_s1 + $0xc0] ss:$16 sps:$4 sm:$0xff]  }
   0xa   :  { %v8191_v28 = vld [vmem:[%s13433_s1 + $0xc8] ss:$16 sps:$4 sm:$0xff]   ;;  %v8192_v29 = vld [vmem:[%s13433_s1 + $0xe4] ss:$16 sps:$4 sm:$0xff]   ;;  %v8194_v30 = vld [vmem:[%s13433_s1 + $0xec] ss:$16 sps:$4 sm:$0xff]  }
   0xb   :  { %318 = vmatpush1.bf16.msra.mxu0 %v8166_v11  ;;  %431 = vmatpush1.bf16.msra.mxu1 %v8167_v12  ;;  %v8196_v31 = vld [vmem:[%s13433_s1 + $0xe0] ss:$16 sps:$4 sm:$0xff]   ;;  %v8197_v32 = vld [vmem:[%s13433_s1 + $0xe8] ss:$16 sps:$4 sm:$0xff]   ;;  %v9907_v33 = vld [vmem:[%s13435_s2 + $0x4] ss:$16 sps:$4 sm:$0xff]   ;;  %v85_v12 = vlaneseq }
   0xc   :  { %319 = vmatprep.subr.bf16.mxu0 %v8168_v13  ;;  %432 = vmatprep.subr.bf16.mxu1 %v8170_v14  ;;  %v9912_v34 = vld [vmem:[%s13435_s2 + $0xc] ss:$16 sps:$4 sm:$0xff]   ;;  %v8198_v35 = vld [vmem:[%s13434_s0] sm:$0xff]   ;;  %v9925_v37 = vld [vmem:[%s13435_s2 + $0x8] ss:$16 sps:$4 sm:$0xff]   ;;  %vm1299_vm3 = vcmask 1044484  }
   0xd   :  { %v9920_v36 = vld [vmem:[%s13435_s2] ss:$16 sps:$4 sm:$0xff]   ;;  %v9932_v38 = vld [vmem:[%s13435_s2 + $0x24] ss:$16 sps:$4 sm:$0xff]   ;;  %v9937_v39 = vld [vmem:[%s13435_s2 + $0x2c] ss:$16 sps:$4 sm:$0xff]  }
   0xe   :  { %v9942_v40 = vld [vmem:[%s13435_s2 + $0x20] ss:$16 sps:$4 sm:$0xff]   ;;  %v9947_v41 = vld [vmem:[%s13435_s2 + $0x28] ss:$16 sps:$4 sm:$0xff]   ;;  %v9954_v42 = vld [vmem:[%s13435_s2 + $0x44] ss:$16 sps:$4 sm:$0xff]  }
   0xf   :  { %320 = vmatpush1.bf16.msra.mxu0 %v8172_v15  ;;  %433 = vmatpush1.bf16.msra.mxu1 %v8173_v16  ;;  %v9961_v43 = vld [vmem:[%s13435_s2 + $0x4c] ss:$16 sps:$4 sm:$0xff]   ;;  %v9973_v45 = vld [vmem:[%s13435_s2 + $0x40] ss:$16 sps:$4 sm:$0xff]   ;;  %v9980_v46 = vld [vmem:[%s13435_s2 + $0x48] ss:$16 sps:$4 sm:$0xff]  }
  0x10   :  { %321 = vmatprep.subr.bf16.mxu0 %v8174_v17  ;;  %434 = vmatprep.subr.bf16.mxu1 %v8176_v18  ;;  %v8205_v44 = vld [vmem:[%s13434_s0 + $0x8] sm:$0xff]   ;;  %v9985_v47 = vld [vmem:[%s13435_s2 + $0x64] ss:$16 sps:$4 sm:$0xff]   ;;  %v9997_v49 = vld [vmem:[%s13435_s2 + $0x60] ss:$16 sps:$4 sm:$0xff]   ;;  %v10167_v13 = vshrl.u32 %v85_v12, 7 }
  0x11   :  { %v9990_v48 = vld [vmem:[%s13435_s2 + $0x6c] ss:$16 sps:$4 sm:$0xff]   ;;  %v10004_v50 = vld [vmem:[%s13435_s2 + $0x68] ss:$16 sps:$4 sm:$0xff]   ;;  %v10011_v51 = vld [vmem:[%s13435_s2 + $0x84] ss:$16 sps:$4 sm:$0xff]  }
  0x12   :  { %v10016_v52 = vld [vmem:[%s13435_s2 + $0x8c] ss:$16 sps:$4 sm:$0xff]   ;;  %v8212_v53 = vld [vmem:[%s13434_s0 + $0x10] sm:$0xff]   ;;  %v10031_v55 = vld [vmem:[%s13435_s2 + $0x88] ss:$16 sps:$4 sm:$0xff]   ;;  %v87_v14 = vsub.s32 0, %v10167_v13 }
  0x13   :  { %322 = vmatpush1.bf16.msra.mxu0 %v8178_v19  ;;  %435 = vmatpush1.bf16.msra.mxu1 %v8179_v20  ;;  %v10024_v54 = vld [vmem:[%s13435_s2 + $0x80] ss:$16 sps:$4 sm:$0xff]   ;;  %v10038_v56 = vld [vmem:[%s13435_s2 + $0xa4] ss:$16 sps:$4 sm:$0xff]   ;;  %v10043_v57 = vld [vmem:[%s13435_s2 + $0xac] ss:$16 sps:$4 sm:$0xff]  }
  0x14   :  { %323 = vmatprep.subr.bf16.mxu0 %v8180_v21  ;;  %436 = vmatprep.subr.bf16.mxu1 %v8182_v22  ;;  %v10052_v58 = vld [vmem:[%s13435_s2 + $0xa0] ss:$16 sps:$4 sm:$0xff]   ;;  %v10057_v59 = vld [vmem:[%s13435_s2 + $0xa8] ss:$16 sps:$4 sm:$0xff]   ;;  %v10064_v60 = vld [vmem:[%s13435_s2 + $0xc4] ss:$16 sps:$4 sm:$0xff]  }
  0x15   :  { %v10069_v61 = vld [vmem:[%s13435_s2 + $0xcc] ss:$16 sps:$4 sm:$0xff]   ;;  %v10079_v63 = vld [vmem:[%s13435_s2 + $0xc0] ss:$16 sps:$4 sm:$0xff]   ;;  %v10084_v0 = vld [vmem:[%s13435_s2 + $0xc8] ss:$16 sps:$4 sm:$0xff]  }
  0x16   :  { %v8219_v62 = vld [vmem:[%s13434_s0 + $0x18] sm:$0xff]   ;;  %v10091_v2 = vld [vmem:[%s13435_s2 + $0xe4] ss:$16 sps:$4 sm:$0xff]   ;;  %v8252_v4 = vld [vmem:[%s13435_s2 + $0xe0] ss:$16 sps:$4 sm:$0xff]   ;;  %v95_v15 = vsub.s32 2, %v10167_v13 }
  0x17   :  { %324 = vmatpush1.bf16.msra.mxu0 %v8184_v23  ;;  %437 = vmatpush1.bf16.msra.mxu1 %v8185_v24  ;;  %v10096_v3 = vld [vmem:[%s13435_s2 + $0xec] ss:$16 sps:$4 sm:$0xff]   ;;  %v8253_v5 = vld [vmem:[%s13435_s2 + $0xe8] ss:$16 sps:$4 sm:$0xff]   ;;  %v8226_v6 = vld [vmem:[%s13434_s0 + $0x20] sm:$0xff]   ;;  %v91_v17 = vsub.s32 1, %v10167_v13 }
  0x18   :  { %325 = vmatprep.subr.bf16.mxu0 %v8186_v25  ;;  %438 = vmatprep.subr.bf16.mxu1 %v8188_v26  ;;  %v8233_v7 = vld [vmem:[%s13434_s0 + $0x28] sm:$0xff]   ;;  %v8240_v8 = vld [vmem:[%s13434_s0 + $0x30] sm:$0xff]   ;;  %v8247_v9 = vld [vmem:[%s13434_s0 + $0x38] sm:$0xff]   ;;  %v99_v18 = vsub.s32 3, %v10167_v13  ;;  %vm1302_vm4 = vcmask 1045509   ;;  %vm1305_vm5 = vcmask 1046534  }
  0x19   :  { %v31_v10 = vld [vmem:[%s13436_s4] sm:$0xff]  ;;  %vm1308_vm6 = vcmask 1047559  }
  0x1a   :  { %v652_v11 = vpack.c.bf16 %v31_v10, %v31_v10  ;;  %v83_v16 = vld [vmem:[%s13437_s3] sm:$0xf] }
  0x1b   :  { %326 = vmatpush1.bf16.msra.mxu0 %v8190_v27  ;;  %439 = vmatpush1.bf16.msra.mxu1 %v8191_v28  ;;  %v10176_v19 = vrot.slane %v83_v16, %v87_v14  ;;  %v10178_v20 = vrot.slane %v83_v16, %v95_v15  ;;  %v10180_v21 = vrot.slane %v83_v16, %v91_v17 }
  0x1c   :  { %327 = vmatprep.subr.bf16.mxu0 %v8192_v29  ;;  %440 = vmatprep.subr.bf16.mxu1 %v8194_v30  ;;  %v10182_v22 = vrot.slane %v83_v16, %v99_v18 }
  0x1f   :  { %328 = vmatpush1.bf16.msra.mxu0 %v8196_v31  ;;  %441 = vmatpush1.bf16.msra.mxu1 %v8197_v32 }
  0x20   :  { %813 = vmatprep.subr.bf16.mxu0 %v9907_v33  ;;  %854 = vmatprep.subr.bf16.mxu1 %v9912_v34 }
  0x22   :  { %346 = vmatmul.mubr.bf16.vlgmr.msra.gmra.mrb[0].mxu0 %v8198_v35  ;;  %459 = vmatmul.mubr.bf16.vlgmr.msra.gmra.mrb[0].mxu1 %v8198_v35 }
  0x23   :  { %814 = vmatpush1.bf16.msra.mxu0 %v9920_v36  ;;  %855 = vmatpush1.bf16.msra.mxu1 %v9925_v37 }
  0x24   :  { %355 = vmatprep.mubr.bf16.mxu0 %v13442_v1  ;;  %468 = vmatprep.mubr.bf16.mxu1 %v13442_v1 }
  0x25   :  { %815 = vmatprep.subr.bf16.mxu0 %v9932_v38  ;;  %856 = vmatprep.subr.bf16.mxu1 %v9937_v39 }
  0x27   :  { %816 = vmatpush1.bf16.msra.mxu0 %v9942_v40  ;;  %857 = vmatpush1.bf16.msra.mxu1 %v9947_v41 }
  0x28   :  { %817 = vmatprep.subr.bf16.mxu0 %v9954_v42  ;;  %858 = vmatprep.subr.bf16.mxu1 %v9961_v43 }
  0x2a   :  { %356 = vmatmul.mubr.bf16.gmra.mrb[4].mxu0 %v8205_v44  ;;  %469 = vmatmul.mubr.bf16.gmra.mrb[4].mxu1 %v8205_v44 }
  0x2b   :  { %365 = vmatprep.mubr.bf16.mxu0 %v13442_v1  ;;  %478 = vmatprep.mubr.bf16.mxu1 %v13442_v1 }
  0x2c   :  { %818 = vmatpush1.bf16.msra.mxu0 %v9973_v45  ;;  %859 = vmatpush1.bf16.msra.mxu1 %v9980_v46 }
  0x2d   :  { %819 = vmatprep.subr.bf16.mxu0 %v9985_v47  ;;  %860 = vmatprep.subr.bf16.mxu1 %v9990_v48 }
  0x30   :  { %820 = vmatpush1.bf16.msra.mxu0 %v9997_v49  ;;  %861 = vmatpush1.bf16.msra.mxu1 %v10004_v50 }
  0x31   :  { %821 = vmatprep.subr.bf16.mxu0 %v10011_v51  ;;  %862 = vmatprep.subr.bf16.mxu1 %v10016_v52 }
  0x32   :  { %366 = vmatmul.mubr.bf16.gmra.mrb[8].mxu0 %v8212_v53  ;;  %479 = vmatmul.mubr.bf16.gmra.mrb[8].mxu1 %v8212_v53 }
  0x33   :  { %375 = vmatprep.mubr.bf16.mxu0 %v13442_v1  ;;  %488 = vmatprep.mubr.bf16.mxu1 %v13442_v1 }
  0x34   :  { %822 = vmatpush1.bf16.msra.mxu0 %v10024_v54  ;;  %863 = vmatpush1.bf16.msra.mxu1 %v10031_v55 }
  0x35   :  { %823 = vmatprep.subr.bf16.mxu0 %v10038_v56  ;;  %864 = vmatprep.subr.bf16.mxu1 %v10043_v57 }
  0x38   :  { %824 = vmatpush1.bf16.msra.mxu0 %v10052_v58  ;;  %865 = vmatpush1.bf16.msra.mxu1 %v10057_v59 }
  0x39   :  { %825 = vmatprep.subr.bf16.mxu0 %v10064_v60  ;;  %866 = vmatprep.subr.bf16.mxu1 %v10069_v61 }
  0x3a   :  { %376 = vmatmul.mubr.bf16.gmra.mrb[12].mxu0 %v8219_v62  ;;  %489 = vmatmul.mubr.bf16.gmra.mrb[12].mxu1 %v8219_v62 }
  0x3b   :  { %385 = vmatprep.mubr.bf16.mxu0 %v13442_v1  ;;  %498 = vmatprep.mubr.bf16.mxu1 %v13442_v1 }
  0x3c   :  { %826 = vmatpush1.bf16.msra.mxu0 %v10079_v63  ;;  %867 = vmatpush1.bf16.msra.mxu1 %v10084_v0 }
  0x3d   :  { %827 = vmatprep.subr.bf16.mxu0 %v10091_v2  ;;  %868 = vmatprep.subr.bf16.mxu1 %v10096_v3 }
  0x40   :  { %828 = vmatpush1.bf16.msra.mxu0 %v8252_v4  ;;  %869 = vmatpush1.bf16.msra.mxu1 %v8253_v5 }
  0x41   :  { %1312 = vmatprep.subr.bf16.mxu0 %v9907_v33  ;;  %1353 = vmatprep.subr.bf16.mxu1 %v9912_v34 }
  0x42   :  { %386 = vmatmul.mubr.bf16.gmra.mrb[16].mxu0 %v8226_v6  ;;  %499 = vmatmul.mubr.bf16.gmra.mrb[16].mxu1 %v8226_v6 }
  0x43   :  { %395 = vmatprep.mubr.bf16.mxu0 %v13442_v1  ;;  %508 = vmatprep.mubr.bf16.mxu1 %v13442_v1 }
  0x4a   :  { %396 = vmatmul.mubr.bf16.gmra.mrb[20].mxu0 %v8233_v7  ;;  %509 = vmatmul.mubr.bf16.gmra.mrb[20].mxu1 %v8233_v7 }
  0x4b   :  { %405 = vmatprep.mubr.bf16.mxu0 %v13442_v1  ;;  %518 = vmatprep.mubr.bf16.mxu1 %v13442_v1 }
  0x52   :  { %406 = vmatmul.mubr.bf16.gmra.mrb[24].mxu0 %v8240_v8  ;;  %519 = vmatmul.mubr.bf16.gmra.mrb[24].mxu1 %v8240_v8 }
  0x53   :  { %415 = vmatprep.mubr.bf16.mxu0 %v13442_v1  ;;  %528 = vmatprep.mubr.bf16.mxu1 %v13442_v1 }
  0x5a   :  { %416 = vmatmul.mubr.bf16.gmra.mrb[28].mxu0 %v8247_v9  ;;  %529 = vmatmul.mubr.bf16.gmra.mrb[28].mxu1 %v8247_v9 }
  0x5b   :  { %845 = vmatprep.mubr.bf16.mxu0 %v13442_v1  ;;  %886 = vmatprep.mubr.bf16.mxu1 %v13442_v1 }
  0x62   :  { %846 = vmatmul.mubr.bf16.vlgmr.msra.gmra.mrb[32].mxu0 %v652_v11  ;;  %887 = vmatmul.mubr.bf16.vlgmr.msra.gmra.mrb[32].mxu1 %v652_v11 }
  0x63   :  { %1313 = vmatpush1.bf16.msra.mxu0 %v9920_v36  ;;  %1354 = vmatpush1.bf16.msra.mxu1 %v9925_v37 }
  0x64   :  { %1314 = vmatprep.subr.bf16.mxu0 %v9932_v38  ;;  %1355 = vmatprep.subr.bf16.mxu1 %v9937_v39 }
  0x65   :  { %1344 = vmatprep.mubr.bf16.mxu0 %v13442_v1  ;;  %1385 = vmatprep.mubr.bf16.mxu1 %v13442_v1 }
  0x67   :  { %1315 = vmatpush1.bf16.msra.mxu0 %v9942_v40  ;;  %1356 = vmatpush1.bf16.msra.mxu1 %v9947_v41 }
  0x68   :  { %1316 = vmatprep.subr.bf16.mxu0 %v9954_v42  ;;  %1357 = vmatprep.subr.bf16.mxu1 %v9961_v43 }
  0x6b   :  { %1317 = vmatpush1.bf16.msra.mxu0 %v9973_v45  ;;  %1358 = vmatpush1.bf16.msra.mxu1 %v9980_v46 }
  0x6c   :  { %1318 = vmatprep.subr.bf16.mxu0 %v9985_v47  ;;  %1359 = vmatprep.subr.bf16.mxu1 %v9990_v48 }
  0x6f   :  { %1319 = vmatpush1.bf16.msra.mxu0 %v9997_v49  ;;  %1360 = vmatpush1.bf16.msra.mxu1 %v10004_v50 }
  0x70   :  { %1320 = vmatprep.subr.bf16.mxu0 %v10011_v51  ;;  %1361 = vmatprep.subr.bf16.mxu1 %v10016_v52 }
  0x73   :  { %1321 = vmatpush1.bf16.msra.mxu0 %v10024_v54  ;;  %1362 = vmatpush1.bf16.msra.mxu1 %v10031_v55 }
  0x74   :  { %1322 = vmatprep.subr.bf16.mxu0 %v10038_v56  ;;  %1363 = vmatprep.subr.bf16.mxu1 %v10043_v57 }
  0x77   :  { %1323 = vmatpush1.bf16.msra.mxu0 %v10052_v58  ;;  %1364 = vmatpush1.bf16.msra.mxu1 %v10057_v59 }
  0x78   :  { %1324 = vmatprep.subr.bf16.mxu0 %v10064_v60  ;;  %1365 = vmatprep.subr.bf16.mxu1 %v10069_v61 }
  0x7b   :  { %1325 = vmatpush1.bf16.msra.mxu0 %v10079_v63  ;;  %1366 = vmatpush1.bf16.msra.mxu1 %v10084_v0 }
  0x7c   :  { %1326 = vmatprep.subr.bf16.mxu0 %v10091_v2  ;;  %1367 = vmatprep.subr.bf16.mxu1 %v10096_v3 }
  0x7f   :  { %1327 = vmatpush1.bf16.msra.mxu0 %v8252_v4  ;;  %1368 = vmatpush1.bf16.msra.mxu1 %v8253_v5 }
  0x80   :  { %1746 = vmatprep.subr.bf16.mxu0 %v9907_v33  ;;  %1787 = vmatprep.subr.bf16.mxu1 %v9912_v34 }
  0xf5   :  { %v347_v23 = vpop.f32.mrb[0].mxu0  ;;  %v460_v24 = vpop.f32.mrb[0].mxu1 }
  0xf6   :  { %v348_v25 = vadd.f32 %v347_v23, %v10176_v19  ;;  %v461_v26 = vadd.f32 %v460_v24, %v10178_v20  ;;  %v349_v27 = vpop.f32.mrb[1].mxu0  ;;  %v462_v28 = vpop.f32.mrb[1].mxu1 }
  0xf7   :  { %v350_v29 = vadd.f32 %v349_v27, %v10180_v21  ;;  %v463_v30 = vadd.f32 %v462_v28, %v10182_v22  ;;  %v351_v31 = vpop.f32.mrb[2].mxu0  ;;  %v464_v32 = vpop.f32.mrb[2].mxu1 }
  0xf8   :  { %539 = vst [vmem:[#allocation4] sm:$0xff] %v348_v25  ;;  %541 = vst [vmem:[#allocation4 + $0x10] sm:$0xff] %v461_v26  ;;  %v352_v33 = vadd.f32 %v351_v31, %v10176_v19  ;;  %v465_v34 = vadd.f32 %v464_v32, %v10178_v20  ;;  %v353_v35 = vpop.f32.mrb[3].mxu0  ;;  %v466_v36 = vpop.f32.mrb[3].mxu1 }
  0xf9   :  { %540 = vst [vmem:[#allocation4 + $0x8] sm:$0xff] %v350_v29  ;;  %542 = vst [vmem:[#allocation4 + $0x18] sm:$0xff] %v463_v30  ;;  %v354_v37 = vadd.f32 %v353_v35, %v10180_v21  ;;  %v467_v38 = vadd.f32 %v466_v36, %v10182_v22 }
  0xfa   :  { %543 = vst [vmem:[#allocation4 + $0x20] sm:$0xff] %v352_v33  ;;  %545 = vst [vmem:[#allocation4 + $0x30] sm:$0xff] %v465_v34 }
  0xfb   :  { %544 = vst [vmem:[#allocation4 + $0x28] sm:$0xff] %v354_v37  ;;  %546 = vst [vmem:[#allocation4 + $0x38] sm:$0xff] %v467_v38 }
  0xfd   :  { %v357_v39 = vpop.f32.mrb[4].mxu0  ;;  %v470_v40 = vpop.f32.mrb[4].mxu1 }
  0xfe   :  { %v358_v41 = vadd.f32 %v357_v39, %v10176_v19  ;;  %v471_v42 = vadd.f32 %v470_v40, %v10178_v20  ;;  %v359_v43 = vpop.f32.mrb[5].mxu0  ;;  %v472_v44 = vpop.f32.mrb[5].mxu1 }
  0xff   :  { %v360_v45 = vadd.f32 %v359_v43, %v10180_v21  ;;  %v473_v46 = vadd.f32 %v472_v44, %v10182_v22  ;;  %v361_v47 = vpop.f32.mrb[6].mxu0  ;;  %v474_v48 = vpop.f32.mrb[6].mxu1 }
 0x100   :  { %547 = vst [vmem:[#allocation4 + $0x40] sm:$0xff] %v358_v41  ;;  %549 = vst [vmem:[#allocation4 + $0x50] sm:$0xff] %v471_v42  ;;  %v362_v49 = vadd.f32 %v361_v47, %v10176_v19  ;;  %v475_v50 = vadd.f32 %v474_v48, %v10178_v20  ;;  %v363_v51 = vpop.f32.mrb[7].mxu0  ;;  %v476_v52 = vpop.f32.mrb[7].mxu1 }
 0x101   :  { %548 = vst [vmem:[#allocation4 + $0x48] sm:$0xff] %v360_v45  ;;  %550 = vst [vmem:[#allocation4 + $0x58] sm:$0xff] %v473_v46  ;;  %v364_v53 = vadd.f32 %v363_v51, %v10180_v21  ;;  %v477_v54 = vadd.f32 %v476_v52, %v10182_v22 }
 0x102   :  { %551 = vst [vmem:[#allocation4 + $0x60] sm:$0xff] %v362_v49  ;;  %553 = vst [vmem:[#allocation4 + $0x70] sm:$0xff] %v475_v50 }
 0x103   :  { %552 = vst [vmem:[#allocation4 + $0x68] sm:$0xff] %v364_v53  ;;  %554 = vst [vmem:[#allocation4 + $0x78] sm:$0xff] %v477_v54 }
 0x105   :  { %v367_v55 = vpop.f32.mrb[8].mxu0  ;;  %v480_v56 = vpop.f32.mrb[8].mxu1 }
 0x106   :  { %v368_v57 = vadd.f32 %v367_v55, %v10176_v19  ;;  %v481_v58 = vadd.f32 %v480_v56, %v10178_v20  ;;  %v369_v59 = vpop.f32.mrb[9].mxu0  ;;  %v482_v60 = vpop.f32.mrb[9].mxu1 }
 0x107   :  { %v370_v61 = vadd.f32 %v369_v59, %v10180_v21  ;;  %v483_v62 = vadd.f32 %v482_v60, %v10182_v22  ;;  %v371_v63 = vpop.f32.mrb[10].mxu0  ;;  %v484_v0 = vpop.f32.mrb[10].mxu1 }
 0x108   :  { %555 = vst [vmem:[#allocation4 + $0x80] sm:$0xff] %v368_v57  ;;  %557 = vst [vmem:[#allocation4 + $0x90] sm:$0xff] %v481_v58  ;;  %v372_v2 = vadd.f32 %v371_v63, %v10176_v19  ;;  %v485_v3 = vadd.f32 %v484_v0, %v10178_v20  ;;  %v373_v4 = vpop.f32.mrb[11].mxu0  ;;  %v486_v5 = vpop.f32.mrb[11].mxu1 }
 0x109   :  { %556 = vst [vmem:[#allocation4 + $0x88] sm:$0xff] %v370_v61  ;;  %558 = vst [vmem:[#allocation4 + $0x98] sm:$0xff] %v483_v62  ;;  %v374_v6 = vadd.f32 %v373_v4, %v10180_v21  ;;  %v487_v7 = vadd.f32 %v486_v5, %v10182_v22 }
 0x10a   :  { %559 = vst [vmem:[#allocation4 + $0xa0] sm:$0xff] %v372_v2  ;;  %561 = vst [vmem:[#allocation4 + $0xb0] sm:$0xff] %v485_v3 }
 0x10b   :  { %560 = vst [vmem:[#allocation4 + $0xa8] sm:$0xff] %v374_v6  ;;  %562 = vst [vmem:[#allocation4 + $0xb8] sm:$0xff] %v487_v7 }
 0x10d   :  { %v377_v8 = vpop.f32.mrb[12].mxu0  ;;  %v490_v9 = vpop.f32.mrb[12].mxu1 }
 0x10e   :  { %v378_v10 = vadd.f32 %v377_v8, %v10176_v19  ;;  %v491_v11 = vadd.f32 %v490_v9, %v10178_v20  ;;  %v379_v12 = vpop.f32.mrb[13].mxu0  ;;  %v492_v14 = vpop.f32.mrb[13].mxu1 }
 0x10f   :  { %v380_v15 = vadd.f32 %v379_v12, %v10180_v21  ;;  %v493_v16 = vadd.f32 %v492_v14, %v10182_v22  ;;  %v381_v17 = vpop.f32.mrb[14].mxu0  ;;  %v494_v18 = vpop.f32.mrb[14].mxu1 }
 0x110   :  { %563 = vst [vmem:[#allocation4 + $0xc0] sm:$0xff] %v378_v10  ;;  %565 = vst [vmem:[#allocation4 + $0xd0] sm:$0xff] %v491_v11  ;;  %v382_v23 = vadd.f32 %v381_v17, %v10176_v19  ;;  %v495_v24 = vadd.f32 %v494_v18, %v10178_v20  ;;  %v383_v25 = vpop.f32.mrb[15].mxu0  ;;  %v496_v26 = vpop.f32.mrb[15].mxu1  ;;  %v9760_v17 = vmov 1966171168  }
 0x111   :  { %564 = vst [vmem:[#allocation4 + $0xc8] sm:$0xff] %v380_v15  ;;  %566 = vst [vmem:[#allocation4 + $0xd8] sm:$0xff] %v493_v16  ;;  %v384_v27 = vadd.f32 %v383_v25, %v10180_v21  ;;  %v497_v28 = vadd.f32 %v496_v26, %v10182_v22  ;;  %v904_v18 = vunpack.c.l.s4 %v9760_v17 }
 0x112   :  { %567 = vst [vmem:[#allocation4 + $0xe0] sm:$0xff] %v382_v23  ;;  %569 = vst [vmem:[#allocation4 + $0xf0] sm:$0xff] %v495_v24 }
 0x113   :  { %568 = vst [vmem:[#allocation4 + $0xe8] sm:$0xff] %v384_v27  ;;  %570 = vst [vmem:[#allocation4 + $0xf8] sm:$0xff] %v497_v28 }
 0x115   :  { %v387_v29 = vpop.f32.mrb[16].mxu0  ;;  %v500_v30 = vpop.f32.mrb[16].mxu1 }
 0x116   :  { %v388_v31 = vadd.f32 %v387_v29, %v10176_v19  ;;  %v501_v32 = vadd.f32 %v500_v30, %v10178_v20  ;;  %v389_v33 = vpop.f32.mrb[17].mxu0  ;;  %v502_v34 = vpop.f32.mrb[17].mxu1 }
 0x117   :  { %v390_v35 = vadd.f32 %v389_v33, %v10180_v21  ;;  %v503_v36 = vadd.f32 %v502_v34, %v10182_v22  ;;  %v391_v37 = vpop.f32.mrb[18].mxu0  ;;  %v504_v38 = vpop.f32.mrb[18].mxu1 }
 0x118   :  { %571 = vst [vmem:[#allocation4 + $0x100] sm:$0xff] %v388_v31  ;;  %573 = vst [vmem:[#allocation4 + $0x110] sm:$0xff] %v501_v32  ;;  %v392_v39 = vadd.f32 %v391_v37, %v10176_v19  ;;  %v505_v40 = vadd.f32 %v504_v38, %v10178_v20  ;;  %v393_v41 = vpop.f32.mrb[19].mxu0  ;;  %v506_v42 = vpop.f32.mrb[19].mxu1  ;;  %v905_v37 = vunpack.c.0.s8 %v904_v18 }
 0x119   :  { %572 = vst [vmem:[#allocation4 + $0x108] sm:$0xff] %v390_v35  ;;  %574 = vst [vmem:[#allocation4 + $0x118] sm:$0xff] %v503_v36  ;;  %v394_v43 = vadd.f32 %v393_v41, %v10180_v21  ;;  %v507_v44 = vadd.f32 %v506_v42, %v10182_v22 }
 0x11a   :  { %575 = vst [vmem:[#allocation4 + $0x120] sm:$0xff] %v392_v39  ;;  %577 = vst [vmem:[#allocation4 + $0x130] sm:$0xff] %v505_v40  ;;  %v10249_v40 = vsub.s32 %v905_v37, %v10167_v13 }
 0x11b   :  { %576 = vst [vmem:[#allocation4 + $0x128] sm:$0xff] %v394_v43  ;;  %578 = vst [vmem:[#allocation4 + $0x138] sm:$0xff] %v507_v44 }
 0x11c   :  { %13561 = vst [vmem:[#allocation6_spill] sm:$0xff] %v10249_v40 }
 0x11d   :  { %v397_v45 = vpop.f32.mrb[20].mxu0  ;;  %v510_v46 = vpop.f32.mrb[20].mxu1 }
 0x11e   :  { %v398_v47 = vadd.f32 %v397_v45, %v10176_v19  ;;  %v511_v48 = vadd.f32 %v510_v46, %v10178_v20  ;;  %v399_v49 = vpop.f32.mrb[21].mxu0  ;;  %v512_v50 = vpop.f32.mrb[21].mxu1 }
 0x11f   :  { %v400_v51 = vadd.f32 %v399_v49, %v10180_v21  ;;  %v513_v52 = vadd.f32 %v512_v50, %v10182_v22  ;;  %v401_v53 = vpop.f32.mrb[22].mxu0  ;;  %v514_v54 = vpop.f32.mrb[22].mxu1 }
 0x120   :  { %579 = vst [vmem:[#allocation4 + $0x140] sm:$0xff] %v398_v47  ;;  %581 = vst [vmem:[#allocation4 + $0x150] sm:$0xff] %v511_v48  ;;  %v402_v55 = vadd.f32 %v401_v53, %v10176_v19  ;;  %v515_v56 = vadd.f32 %v514_v54, %v10178_v20  ;;  %v403_v57 = vpop.f32.mrb[23].mxu0  ;;  %v516_v58 = vpop.f32.mrb[23].mxu1 }
 0x121   :  { %580 = vst [vmem:[#allocation4 + $0x148] sm:$0xff] %v400_v51  ;;  %582 = vst [vmem:[#allocation4 + $0x158] sm:$0xff] %v513_v52  ;;  %v404_v59 = vadd.f32 %v403_v57, %v10180_v21  ;;  %v517_v60 = vadd.f32 %v516_v58, %v10182_v22 }
 0x122   :  { %583 = vst [vmem:[#allocation4 + $0x160] sm:$0xff] %v402_v55  ;;  %585 = vst [vmem:[#allocation4 + $0x170] sm:$0xff] %v515_v56 }
 0x123   :  { %584 = vst [vmem:[#allocation4 + $0x168] sm:$0xff] %v404_v59  ;;  %586 = vst [vmem:[#allocation4 + $0x178] sm:$0xff] %v517_v60 }
 0x125   :  { %v407_v61 = vpop.f32.mrb[24].mxu0  ;;  %v520_v62 = vpop.f32.mrb[24].mxu1 }
 0x126   :  { %v408_v63 = vadd.f32 %v407_v61, %v10176_v19  ;;  %v521_v0 = vadd.f32 %v520_v62, %v10178_v20  ;;  %v409_v2 = vpop.f32.mrb[25].mxu0  ;;  %v522_v3 = vpop.f32.mrb[25].mxu1  ;;  %v637_v62 = vld [vmem:[#allocation4] ss:$8 sm:$0xf] }
 0x127   :  { %v410_v4 = vadd.f32 %v409_v2, %v10180_v21  ;;  %v523_v5 = vadd.f32 %v522_v3, %v10182_v22  ;;  %v411_v6 = vpop.f32.mrb[26].mxu0  ;;  %v524_v7 = vpop.f32.mrb[26].mxu1  ;;  %v645_v2 = vld [vmem:[#allocation4 + $0x100] ss:$8 sm:$0xf] }
 0x128   :  { %587 = vst [vmem:[#allocation4 + $0x180] sm:$0xff] %v408_v63  ;;  %589 = vst [vmem:[#allocation4 + $0x190] sm:$0xff] %v521_v0  ;;  %v412_v8 = vadd.f32 %v411_v6, %v10176_v19  ;;  %v525_v9 = vadd.f32 %v524_v7, %v10178_v20  ;;  %v413_v10 = vpop.f32.mrb[27].mxu0  ;;  %v526_v11 = vpop.f32.mrb[27].mxu1 }
 0x129   :  { %588 = vst [vmem:[#allocation4 + $0x188] sm:$0xff] %v410_v4  ;;  %590 = vst [vmem:[#allocation4 + $0x198] sm:$0xff] %v523_v5  ;;  %v414_v12 = vadd.f32 %v413_v10, %v10180_v21  ;;  %v527_v14 = vadd.f32 %v526_v11, %v10182_v22  ;;  %v639_v63 = vld [vmem:[#allocation4 + $0x40] ss:$8 sm:$0xf] }
 0x12a   :  { %591 = vst [vmem:[#allocation4 + $0x1a0] sm:$0xff] %v412_v8  ;;  %593 = vst [vmem:[#allocation4 + $0x1b0] sm:$0xff] %v525_v9  ;;  %v641_v0 = vld [vmem:[#allocation4 + $0x80] ss:$8 sm:$0xf] }
 0x12b   :  { %592 = vst [vmem:[#allocation4 + $0x1a8] sm:$0xff] %v414_v12  ;;  %594 = vst [vmem:[#allocation4 + $0x1b8] sm:$0xff] %v527_v14  ;;  %v643_v7 = vld [vmem:[#allocation4 + $0xc0] ss:$8 sm:$0xf] }
 0x12c   :  { %v647_v8 = vld [vmem:[#allocation4 + $0x140] ss:$8 sm:$0xf] }
 0x12d   :  { %v417_v15 = vpop.f32.mrb[28].mxu0  ;;  %v530_v16 = vpop.f32.mrb[28].mxu1 }
 0x12e   :  { %v418_v23 = vadd.f32 %v417_v15, %v10176_v19  ;;  %v531_v24 = vadd.f32 %v530_v16, %v10178_v20  ;;  %v419_v25 = vpop.f32.mrb[29].mxu0  ;;  %v532_v26 = vpop.f32.mrb[29].mxu1 }
 0x12f   :  { %v420_v27 = vadd.f32 %v419_v25, %v10180_v21  ;;  %v533_v28 = vadd.f32 %v532_v26, %v10182_v22  ;;  %v421_v29 = vpop.f32.mrb[30].mxu0  ;;  %v534_v30 = vpop.f32.mrb[30].mxu1 }
 0x130   :  { %595 = vst [vmem:[#allocation4 + $0x1c0] sm:$0xff] %v418_v23  ;;  %597 = vst [vmem:[#allocation4 + $0x1d0] sm:$0xff] %v531_v24  ;;  %v422_v31 = vadd.f32 %v421_v29, %v10176_v19  ;;  %v535_v32 = vadd.f32 %v534_v30, %v10178_v20  ;;  %v423_v33 = vpop.f32.mrb[31].mxu0  ;;  %v536_v34 = vpop.f32.mrb[31].mxu1  ;;  %v33_v19 = vld [vmem:[%s13438_s5] sm:$0xff] }
 0x131   :  { %596 = vst [vmem:[#allocation4 + $0x1c8] sm:$0xff] %v420_v27  ;;  %598 = vst [vmem:[#allocation4 + $0x1d8] sm:$0xff] %v533_v28  ;;  %v424_v35 = vadd.f32 %v423_v33, %v10180_v21  ;;  %v537_v36 = vadd.f32 %v536_v34, %v10182_v22  ;;  %v1144_v46 = vcombine.high %v33_v19, %v33_v19  ;;  %v649_v14 = vld [vmem:[#allocation4 + $0x180] ss:$8 sm:$0xf] }
 0x132   :  { %599 = vst [vmem:[#allocation4 + $0x1e0] sm:$0xff] %v422_v31  ;;  %601 = vst [vmem:[#allocation4 + $0x1f0] sm:$0xff] %v535_v32  ;;  %v1151_v56 = vrot.slane %v33_v19, %v10249_v40 }
 0x133   :  { %600 = vst [vmem:[#allocation4 + $0x1e8] sm:$0xff] %v424_v35  ;;  %602 = vst [vmem:[#allocation4 + $0x1f8] sm:$0xff] %v537_v36  ;;  %v1158_v57 = vrot.slane %v1144_v46, %v10249_v40 }
 0x134   :  { %v1159_v12 = vcombine.high %v1151_v56, %v1151_v56  ;;  %v10285_v30 = vrot.slane %v1151_v56, %v10249_v40 }
 0x135   :  { %v847_v38 = vpop.f32.mrb[32].mxu0  ;;  %v888_v39 = vpop.f32.mrb[32].mxu1  ;;  %v1160_v23 = vcombine.high %v1158_v57, %v1158_v57  ;;  %v10288_v31 = vrot.slane %v1158_v57, %v10249_v40 }
 0x136   :  { %v849_v20 = vpop.f32.mrb[33].mxu0  ;;  %v890_v41 = vpop.f32.mrb[33].mxu1  ;;  %v10293_v34 = vrot.slane %v1159_v12, %v10249_v40 }
 0x137   :  { %v899_v42 = vcombine.low %v847_v38, %v849_v20  ;;  %v900_v21 = vcombine.high %v847_v38, %v849_v20  ;;  %v901_v43 = vcombine.low %v888_v39, %v890_v41  ;;  %v902_v22 = vcombine.high %v888_v39, %v890_v41  ;;  %v851_v44 = vpop.f32.mrb[34].mxu0  ;;  %v892_v45 = vpop.f32.mrb[34].mxu1 }
 0x138   :  { %v852_v47 = vpop.f32.mrb[35].mxu0  ;;  %v893_v48 = vpop.f32.mrb[35].mxu1  ;;  %v651_v15 = vld [vmem:[#allocation4 + $0x1c0] ss:$8 sm:$0xf]  ;;  %v10298_v37 = vrot.slane %v1160_v23, %v10249_v40  ;;  %v1189_v45 = vcombine.high %v10285_v30, %v10285_v30  ;;  %v1190_v46 = vcombine.high %v10288_v31, %v10288_v31 }
 0x139   :  { %v909_v49 = vrot.slane %v899_v42, %v10249_v40  ;;  %v916_v13 = vrot.slane %v900_v21, %v10249_v40  ;;  %v923_v50 = vrot.slane %v901_v43, %v10249_v40  ;;  %v930_v51 = vrot.slane %v902_v22, %v10249_v40 }
 0x13a   :  { %v1191_v48 = vcombine.high %v10293_v34, %v10293_v34 }
 0x13b   :  { %v931_v52 = vcombine.low %v909_v49, %v923_v50  ;;  %v932_v53 = vcombine.high %v909_v49, %v923_v50  ;;  %v933_v54 = vcombine.low %v916_v13, %v930_v51  ;;  %v934_v55 = vcombine.high %v916_v13, %v930_v51 }
 0x13c   :  { %v1192_v49 = vcombine.high %v10298_v37, %v10298_v37 }
 0x13d   :  { %v941_v58 = vrot.slane %v931_v52, %v10249_v40  ;;  %v948_v59 = vrot.slane %v933_v54, %v10249_v40  ;;  %v955_v60 = vrot.slane %v932_v53, %v10249_v40  ;;  %v962_v61 = vrot.slane %v934_v55, %v10249_v40 }
 0x13f   :  { %v963_v3 = vcombine.high %v941_v58, %v941_v58  ;;  %v964_v4 = vcombine.high %v948_v59, %v948_v59  ;;  %v965_v5 = vcombine.high %v955_v60, %v955_v60  ;;  %v966_v6 = vcombine.high %v962_v61, %v962_v61 }
 0x140   :  { %v10264_v9 = vadd.f32 %v941_v58, %v637_v62  ;;  %v10266_v10 = vadd.f32 %v955_v60, %v639_v63  ;;  %v10268_v11 = vadd.f32 %v948_v59, %v645_v2  ;;  %v10274_v18 = vadd.f32 %v962_v61, %v647_v8 }
 0x141   :  { %v10270_v16 = vadd.f32 %v963_v3, %v641_v0  ;;  %v10272_v17 = vadd.f32 %v965_v5, %v643_v7  ;;  %v10276_v24 = vadd.f32 %v964_v4, %v649_v14  ;;  %v10278_v25 = vadd.f32 %v966_v6, %v651_v15 }
 0x142   :  { %v983_v26 = vmul.f32 0.5, %v10264_v9  ;;  %v984_v27 = vmul.f32 0.5, %v10266_v10  ;;  %v987_v32 = vmul.f32 0.5, %v10268_v11  ;;  %v1023_v33 = vrot.slane %v10264_v9, 1 }
 0x143   :  { %v985_v28 = vmul.f32 0.5, %v10270_v16  ;;  %v986_v29 = vmul.f32 0.5, %v10272_v17  ;;  %v988_v35 = vmul.f32 0.5, %v10274_v18  ;;  %v1024_v36 = vrot.slane %v10266_v10, 1 }
 0x144   :  { %8255 = vtanh.f32 %v983_v26  ;;  %v989_v38 = vmul.f32 0.5, %v10276_v24  ;;  %v990_v39 = vmul.f32 0.5, %v10278_v25  ;;  %v1025_v19 = vrot.slane %v10270_v16, 1 }
 0x145   :  { %8257 = vtanh.f32 %v984_v27  ;;  %v1026_v20 = vrot.slane %v10272_v17, 1  ;;  %v1027_v41 = vrot.slane %v10268_v11, 1  ;;  %v1028_v42 = vrot.slane %v10274_v18, 1 }
 0x146   :  { %8259 = vtanh.f32 %v985_v28  ;;  %v1029_v21 = vrot.slane %v10276_v24, 1  ;;  %v1030_v43 = vrot.slane %v10278_v25, 1  ;;  %v1039_v22 = vmul.f32 0.5, %v1023_v33 }
 0x147   :  { %8261 = vtanh.f32 %v986_v29  ;;  %v1040_v44 = vmul.f32 0.5, %v1024_v36  ;;  %v1041_v47 = vmul.f32 0.5, %v1025_v19  ;;  %v1042_v13 = vmul.f32 0.5, %v1026_v20 }
 0x148   :  { %8263 = vtanh.f32 %v987_v32  ;;  %v1043_v50 = vmul.f32 0.5, %v1027_v41  ;;  %v1044_v51 = vmul.f32 0.5, %v1028_v42  ;;  %v1045_v52 = vmul.f32 0.5, %v1029_v21 }
 0x149   :  { %8265 = vtanh.f32 %v988_v35  ;;  %v1046_v53 = vmul.f32 0.5, %v1030_v43  ;;  %v1071_v54 = vrot.slane %v10264_v9, 2  ;;  %v1072_v55 = vrot.slane %v10266_v10, 2 }
 0x14a   :  { %8267 = vtanh.f32 %v989_v38  ;;  %v1073_v56 = vrot.slane %v10270_v16, 2  ;;  %v1074_v57 = vrot.slane %v10272_v17, 2  ;;  %v1075_v59 = vrot.slane %v10268_v11, 2 }
 0x14b   :  { %8269 = vtanh.f32 %v990_v39  ;;  %v1076_v60 = vrot.slane %v10274_v18, 2  ;;  %v1095_v61 = vrot.slane %v10264_v9, 3  ;;  %v1077_v63 = vrot.slane %v10276_v24, 2 }
 0x14c   :  { %8271 = vtanh.f32 %v1039_v22  ;;  %v1096_v0 = vrot.slane %v10266_v10, 3  ;;  %v1097_v2 = vrot.slane %v10270_v16, 3  ;;  %v1078_v4 = vrot.slane %v10278_v25, 2 }
 0x14d   :  { %8273 = vtanh.f32 %v1040_v44  ;;  %v1098_v5 = vrot.slane %v10272_v17, 3  ;;  %v1099_v6 = vrot.slane %v10268_v11, 3  ;;  %v1100_v9 = vrot.slane %v10274_v18, 3 }
 0x14e   :  { %v8256_v58 = vpop.eup %8255  ;;  %8275 = vtanh.f32 %v1041_v47  ;;  %v1101_v12 = vrot.slane %v10276_v24, 3  ;;  %v1102_v10 = vrot.slane %v10278_v25, 3  ;;  %v1111_v16 = vmul.f32 0.5, %v1095_v61 }
 0x14f   :  { %v8258_v62 = vpop.eup %8257  ;;  %8277 = vtanh.f32 %v1042_v13  ;;  %v999_v8 = vadd.f32 1.0, %v8256_v58  ;;  %v1112_v27 = vmul.f32 0.5, %v1096_v0  ;;  %v1113_v17 = vmul.f32 0.5, %v1097_v2 }
 0x150   :  { %v8260_v3 = vpop.eup %8259  ;;  %8279 = vtanh.f32 %v1043_v50  ;;  %v1000_v15 = vadd.f32 1.0, %v8258_v62  ;;  %v1114_v29 = vmul.f32 0.5, %v1098_v5  ;;  %v1115_v32 = vmul.f32 0.5, %v1099_v6 }
 0x151   :  { %v8262_v7 = vpop.eup %8261  ;;  %8281 = vtanh.f32 %v1044_v51  ;;  %v1001_v26 = vadd.f32 1.0, %v8260_v3  ;;  %v1007_v35 = vmul.f32 0.5, %v999_v8  ;;  %v1116_v24 = vmul.f32 0.5, %v1100_v9 }
 0x152   :  { %v8264_v14 = vpop.eup %8263  ;;  %8283 = vtanh.f32 %v1045_v52  ;;  %v1002_v11 = vadd.f32 1.0, %v8262_v7  ;;  %v1008_v39 = vmul.f32 0.5, %v1000_v15  ;;  %v1117_v19 = vmul.f32 0.5, %v1101_v12 }
 0x153   :  { %v8266_v23 = vpop.eup %8265  ;;  %8285 = vtanh.f32 %v1046_v53  ;;  %v1003_v18 = vadd.f32 1.0, %v8264_v14  ;;  %v1009_v42 = vmul.f32 0.5, %v1001_v26 }
 0x154   :  { %v8268_v28 = vpop.eup %8267  ;;  %8287 = vtanh.f32 %v1071_v54  ;;  %v1004_v38 = vadd.f32 1.0, %v8266_v23  ;;  %v1010_v44 = vmul.f32 0.5, %v1002_v11 }
 0x155   :  { %v8270_v33 = vpop.eup %8269  ;;  %8289 = vtanh.f32 %v1072_v55  ;;  %v1005_v41 = vadd.f32 1.0, %v8268_v28  ;;  %v1011_v50 = vmul.f32 0.5, %v1003_v18 }
 0x156   :  { %v8272_v36 = vpop.eup %8271  ;;  %8291 = vtanh.f32 %v1073_v56  ;;  %v1006_v22 = vadd.f32 1.0, %v8270_v33  ;;  %v1012_v54 = vmul.f32 0.5, %v1004_v38 }
 0x157   :  { %v8274_v20 = vpop.eup %8273  ;;  %v1055_v21 = vadd.f32 1.0, %v8272_v36  ;;  %8293 = vtanh.f32 %v1074_v57  ;;  %v1013_v61 = vmul.f32 0.5, %v1005_v41 }
 0x158   :  { %v8276_v43 = vpop.eup %8275  ;;  %v1056_v47 = vadd.f32 1.0, %v8274_v20  ;;  %8295 = vtanh.f32 %v1075_v59  ;;  %v1014_v2 = vmul.f32 0.5, %v1006_v22 }
 0x159   :  { %v8278_v13 = vpop.eup %8277  ;;  %v1057_v51 = vadd.f32 1.0, %v8276_v43  ;;  %v1063_v52 = vmul.f32 0.5, %v1055_v21  ;;  %8297 = vtanh.f32 %v1076_v60 }
 0x15a   :  { %v8280_v53 = vpop.eup %8279  ;;  %v1058_v55 = vadd.f32 1.0, %v8278_v13  ;;  %v1064_v56 = vmul.f32 0.5, %v1056_v47  ;;  %8299 = vtanh.f32 %v1077_v63 }
 0x15b   :  { %v8282_v58 = vpop.eup %8281  ;;  %v1059_v62 = vadd.f32 1.0, %v8280_v53  ;;  %v1065_v0 = vmul.f32 0.5, %v1057_v51  ;;  %8301 = vtanh.f32 %v1078_v4  ;;  %v1201_v60 = vmul.f32 %v10285_v30, %v1063_v52 }
 0x15c   :  { %v8284_v57 = vpop.eup %8283  ;;  %v1060_v3 = vadd.f32 1.0, %v8282_v58  ;;  %v1066_v5 = vmul.f32 0.5, %v1058_v55  ;;  %8303 = vtanh.f32 %v1111_v16  ;;  %v1202_v63 = vmul.f32 %v10293_v34, %v1064_v56 }
 0x15d   :  { %v8286_v59 = vpop.eup %8285  ;;  %v1061_v6 = vadd.f32 1.0, %v8284_v57  ;;  %v1067_v7 = vmul.f32 0.5, %v1059_v62  ;;  %8305 = vtanh.f32 %v1112_v27  ;;  %v1203_v4 = vmul.f32 %v1189_v45, %v1065_v0 }
 0x15e   :  { %v8288_v8 = vpop.eup %8287  ;;  %v1062_v9 = vadd.f32 1.0, %v8286_v59  ;;  %v1068_v12 = vmul.f32 0.5, %v1060_v3  ;;  %8307 = vtanh.f32 %v1113_v17  ;;  %v1204_v27 = vmul.f32 %v1191_v48, %v1066_v5 }
 0x15f   :  { %v8290_v14 = vpop.eup %8289  ;;  %v1069_v15 = vmul.f32 0.5, %v1061_v6  ;;  %8309 = vtanh.f32 %v1114_v29  ;;  %v1209_v16 = vmul.f32 %v8288_v8, %v1007_v35  ;;  %v1205_v17 = vmul.f32 %v10288_v31, %v1067_v7 }
 0x160   :  { %v8292_v23 = vpop.eup %8291  ;;  %v1070_v26 = vmul.f32 0.5, %v1062_v9  ;;  %8311 = vtanh.f32 %v1115_v32  ;;  %v1210_v28 = vmul.f32 %v8290_v14, %v1008_v39  ;;  %v1206_v30 = vmul.f32 %v10298_v37, %v1068_v12 }
 0x161   :  { %v8294_v11 = vpop.eup %8293  ;;  %8313 = vtanh.f32 %v1116_v24  ;;  %v1211_v33 = vmul.f32 %v8292_v23, %v1009_v42  ;;  %v10341_v18 = vadd.f32 %v1209_v16, %v1201_v60  ;;  %v1207_v34 = vmul.f32 %v1190_v46, %v1069_v15 }
 0x162   :  { %v8296_v29 = vpop.eup %8295  ;;  %8315 = vtanh.f32 %v1117_v19  ;;  %v1212_v45 = vmul.f32 %v8294_v11, %v1010_v44  ;;  %v10344_v35 = vadd.f32 %v1210_v28, %v1202_v63  ;;  %v1208_v38 = vmul.f32 %v1192_v49, %v1070_v26 }
 0x163   :  { %v8298_v32 = vpop.eup %8297  ;;  %v1213_v48 = vmul.f32 %v8296_v29, %v1011_v50  ;;  %v10349_v36 = vadd.f32 %v1211_v33, %v1203_v4  ;;  %8317 = vtanh.f32 %v10341_v18  ;;  %v1118_v31 = vmul.f32 0.5, %v1102_v10 }
 0x164   :  { %v8300_v24 = vpop.eup %8299  ;;  %v1214_v39 = vmul.f32 %v8298_v32, %v1012_v54  ;;  %v10355_v19 = vadd.f32 %v1212_v45, %v1204_v27  ;;  %8319 = vtanh.f32 %v10344_v35 }
 0x165   :  { %v8302_v20 = vpop.eup %8301  ;;  %v1215_v46 = vmul.f32 %v8300_v24, %v1013_v61  ;;  %v10360_v41 = vadd.f32 %v1213_v48, %v1205_v17  ;;  %8321 = vtanh.f32 %v10349_v36 }
 0x166   :  { %v8304_v42 = vpop.eup %8303  ;;  %v1216_v21 = vmul.f32 %v8302_v20, %v1014_v2  ;;  %v10363_v43 = vadd.f32 %v1214_v39, %v1206_v30  ;;  %8323 = vtanh.f32 %v10355_v19 }
 0x167   :  { %v8306_v37 = vpop.eup %8305  ;;  %v10366_v49 = vadd.f32 %v1215_v46, %v1207_v34  ;;  %8325 = vtanh.f32 %v10360_v41  ;;  %v1127_v44 = vadd.f32 1.0, %v8304_v42 }
 0x168   :  { %v8308_v22 = vpop.eup %8307  ;;  %v10369_v25 = vadd.f32 %v1216_v21, %v1208_v38  ;;  %8327 = vtanh.f32 %v10363_v43  ;;  %v1128_v47 = vadd.f32 1.0, %v8306_v37 }
 0x169   :  { %v8310_v10 = vpop.eup %8309  ;;  %8329 = vtanh.f32 %v1118_v31  ;;  %v1129_v50 = vadd.f32 1.0, %v8308_v22  ;;  %v1135_v55 = vmul.f32 0.5, %v1127_v44 }
 0x16a   :  { %v8312_v13 = vpop.eup %8311  ;;  %8331 = vtanh.f32 %v10366_v49  ;;  %v1130_v52 = vadd.f32 1.0, %v8310_v10  ;;  %v1136_v61 = vmul.f32 0.5, %v1128_v47 }
 0x16b   :  { %v8314_v51 = vpop.eup %8313  ;;  %8333 = vtanh.f32 %v10369_v25  ;;  %v1131_v54 = vadd.f32 1.0, %v8312_v13  ;;  %v1137_v0 = vmul.f32 0.5, %v1129_v50 }
 0x16c   :  { %v8316_v53 = vpop.eup %8315  ;;  %v1132_v58 = vadd.f32 1.0, %v8314_v51  ;;  %v1138_v3 = vmul.f32 0.5, %v1130_v52 }
 0x16d   :  { %v8318_v56 = vpop.eup %8317  ;;  %v1133_v59 = vadd.f32 1.0, %v8316_v53  ;;  %v1139_v7 = vmul.f32 0.5, %v1131_v54 }
 0x16e   :  { %v8320_v62 = vpop.eup %8319  ;;  %v1233_v57 = vmul.f32 %v8318_v56, %v1135_v55  ;;  %v1140_v63 = vmul.f32 0.5, %v1132_v58 }
 0x16f   :  { %v8322_v2 = vpop.eup %8321  ;;  %v1234_v5 = vmul.f32 %v8320_v62, %v1136_v61  ;;  %v1141_v26 = vmul.f32 0.5, %v1133_v59  ;;  %v10416_v59 = vld [vmem:[%s13435_s2 + $0x28] ss:$16 sps:$4 sm:$0xff]  }
 0x170   :  { %v8324_v6 = vpop.eup %8323  ;;  %v1235_v60 = vmul.f32 %v8322_v2, %v1137_v0  ;;  %1241 = vst [vmem:[#allocation5] sm:$0x1] %v1233_v57  ;;  %v1265_v8 = vpack.c.bf16 %v1233_v57, %v1233_v57  ;;  %v10384_v0 = vld [vmem:[%s13435_s2] ss:$16 sps:$4 sm:$0xff]   ;;  %v10390_v57 = vld [vmem:[%s13435_s2 + $0x8] ss:$16 sps:$4 sm:$0xff]  }
 0x171   :  { %v8326_v9 = vpop.eup %8325  ;;  %1242 = vst [vmem:[#allocation5 + $0x10] sm:$0x1] %v1234_v5  ;;  %v1266_v12 = vpack.c.bf16 %v1234_v5, %v1234_v5  ;;  %v1236_v14 = vmul.f32 %v8324_v6, %v1138_v3  ;;  %v10396_v2 = vld [vmem:[%s13435_s2 + $0x24] ss:$16 sps:$4 sm:$0xff]   ;;  %v10402_v3 = vld [vmem:[%s13435_s2 + $0x2c] ss:$16 sps:$4 sm:$0xff]  }
 0x172   :  { %v8328_v15 = vpop.eup %8327  ;;  %1243 = vst [vmem:[#allocation5 + $0x20] sm:$0x1] %v1235_v60  ;;  %v1237_v4 = vmul.f32 %v8326_v9, %v1139_v7  ;;  %v1267_v16 = vpack.c.bf16 %v1235_v60, %v1235_v60  ;;  %v1281_v30 = vunpack.c.l.b16 %v1265_v8  ;;  %v10410_v5 = vld [vmem:[%s13435_s2 + $0x20] ss:$16 sps:$4 sm:$0xff]   ;;  %v10422_v6 = vld [vmem:[%s13435_s2 + $0x44] ss:$16 sps:$4 sm:$0xff]  }
 0x173   :  { %v8330_v23 = vpop.eup %8329  ;;  %v1238_v27 = vmul.f32 %v8328_v15, %v1140_v63  ;;  %1244 = vst [vmem:[#allocation5 + $0x30] sm:$0x1] %v1236_v14  ;;  %v1268_v28 = vpack.c.bf16 %v1236_v14, %v1236_v14  ;;  %v1282_v11 = vunpack.c.l.b16 %v1266_v12  ;;  %v10428_v7 = vld [vmem:[%s13435_s2 + $0x4c] ss:$16 sps:$4 sm:$0xff]   ;;  %v10434_v60 = vld [vmem:[%s13435_s2 + $0x40] ss:$16 sps:$4 sm:$0xff]  }
 0x174   :  { %v8332_v17 = vpop.eup %8331  ;;  %v1134_v33 = vadd.f32 1.0, %v8330_v23  ;;  %1245 = vst [vmem:[#allocation5 + $0x40] sm:$0x1] %v1237_v4  ;;  %v1269_v29 = vpack.c.bf16 %v1237_v4, %v1237_v4  ;;  %v1283_v45 = vunpack.c.l.b16 %v1267_v16  ;;  %v10440_v8 = vld [vmem:[%s13435_s2 + $0x48] ss:$16 sps:$4 sm:$0xff]  }
 0x175   :  { %v8334_v32 = vpop.eup %8333  ;;  %v1239_v34 = vmul.f32 %v8332_v17, %v1141_v26  ;;  %1246 = vst [vmem:[#allocation5 + $0x50] sm:$0x1] %v1238_v27  ;;  %v1270_v48 = vpack.c.bf16 %v1238_v27, %v1238_v27  ;;  %v1284_v24 = vunpack.c.l.b16 %v1268_v28  ;;  %v1289_v38 = vrot.slane %v1282_v11, 7  ;;  %v10446_v9 = vld [vmem:[%s13435_s2 + $0x64] ss:$16 sps:$4 sm:$0xff]  }
 0x176   :  { %v1142_v39 = vmul.f32 0.5, %v1134_v33  ;;  %v1285_v20 = vunpack.c.l.b16 %v1269_v29  ;;  %v1292_v31 = vrot.slane %v1283_v45, 6  ;;  %v10452_v12 = vld [vmem:[%s13435_s2 + $0x6c] ss:$16 sps:$4 sm:$0xff]   ;;  %v10458_v63 = vld [vmem:[%s13435_s2 + $0x60] ss:$16 sps:$4 sm:$0xff]  }
 0x177   :  { %1247 = vst [vmem:[#allocation5 + $0x60] sm:$0x1] %v1239_v34  ;;  %v1271_v46 = vpack.c.bf16 %v1239_v34, %v1239_v34  ;;  %v1286_v42 = vunpack.c.l.b16 %v1270_v48  ;;  %v1291_v21 = vsel %vm1290_vm0, %v1289_v38, %v1281_v30  ;;  %v1295_v37 = vrot.slane %v1284_v24, 5  ;;  %v10464_v14 = vld [vmem:[%s13435_s2 + $0x68] ss:$16 sps:$4 sm:$0xff]  }
 0x178   :  { %v1240_v22 = vmul.f32 %v8334_v32, %v1142_v39  ;;  %v1294_v44 = vsel %vm1293_vm1, %v1292_v31, %v1291_v21  ;;  %v1298_v10 = vrot.slane %v1285_v20, 4  ;;  %v10470_v15 = vld [vmem:[%s13435_s2 + $0x84] ss:$16 sps:$4 sm:$0xff]   ;;  %v10476_v4 = vld [vmem:[%s13435_s2 + $0x8c] ss:$16 sps:$4 sm:$0xff]  }
 0x179   :  { %v1287_v47 = vunpack.c.l.b16 %v1271_v46  ;;  %v1297_v13 = vsel %vm1296_vm2, %v1295_v37, %v1294_v44  ;;  %v1301_v50 = vrot.slane %v1286_v42, 3  ;;  %v10482_v16 = vld [vmem:[%s13435_s2 + $0x80] ss:$16 sps:$4 sm:$0xff]   ;;  %v10488_v23 = vld [vmem:[%s13435_s2 + $0x88] ss:$16 sps:$4 sm:$0xff]  }
 0x17a   :  { %1248 = vst [vmem:[#allocation5 + $0x70] sm:$0x1] %v1240_v22  ;;  %v1272_v51 = vpack.c.bf16 %v1240_v22, %v1240_v22  ;;  %v1300_v52 = vsel %vm1299_vm3, %v1298_v10, %v1297_v13  ;;  %13562 = vst [vmem:[#allocation7_spill] sm:$0xff] %v10488_v23  ;;  %v10494_v26 = vld [vmem:[%s13435_s2 + $0xa4] ss:$16 sps:$4 sm:$0xff]  }
 0x17b   :  { %v1303_v53 = vsel %vm1302_vm4, %v1301_v50, %v1300_v52  ;;  %v1304_v54 = vrot.slane %v1287_v47, 2  ;;  %13563 = vst [vmem:[#allocation8_spill] sm:$0xff] %v10494_v26  ;;  %v10500_v27 = vld [vmem:[%s13435_s2 + $0xac] ss:$16 sps:$4 sm:$0xff]   ;;  %v10506_v28 = vld [vmem:[%s13435_s2 + $0xa0] ss:$16 sps:$4 sm:$0xff]  }
 0x17c   :  { %v1288_v55 = vunpack.c.l.b16 %v1272_v51  ;;  %13564 = vst [vmem:[#allocation9_spill] sm:$0xff] %v10500_v27  ;;  %13565 = vst [vmem:[#allocation10_spill] sm:$0xff] %v10506_v28  ;;  %v10512_v11 = vld [vmem:[%s13435_s2 + $0xa8] ss:$16 sps:$4 sm:$0xff]   ;;  %v10518_v17 = vld [vmem:[%s13435_s2 + $0xc4] ss:$16 sps:$4 sm:$0xff]  }
 0x17d   :  { %v1306_v56 = vsel %vm1305_vm5, %v1304_v54, %v1303_v53  ;;  %13566 = vst [vmem:[#allocation11_spill] sm:$0xff] %v10512_v11  ;;  %13567 = vst [vmem:[#allocation12_spill] sm:$0xff] %v10518_v17  ;;  %v10524_v33 = vld [vmem:[%s13435_s2 + $0xcc] ss:$16 sps:$4 sm:$0xff]   ;;  %v10530_v29 = vld [vmem:[%s13435_s2 + $0xc0] ss:$16 sps:$4 sm:$0xff]  }
 0x17e   :  { %v1307_v58 = vrot.slane %v1288_v55, 1  ;;  %13568 = vst [vmem:[#allocation13_spill] sm:$0xff] %v10524_v33  ;;  %13569 = vst [vmem:[#allocation14_spill] sm:$0xff] %v10530_v29  ;;  %v10536_v30 = vld [vmem:[%s13435_s2 + $0xc8] ss:$16 sps:$4 sm:$0xff]  }
 0x17f   :  { %13570 = vst [vmem:[#allocation15_spill] sm:$0xff] %v10536_v30  ;;  %v10542_v45 = vld [vmem:[%s13435_s2 + $0xe4] ss:$16 sps:$4 sm:$0xff]   ;;  %v10548_v32 = vld [vmem:[%s13435_s2 + $0xec] ss:$16 sps:$4 sm:$0xff]  }
 0x180   :  { %v1309_v61 = vsel %vm1308_vm6, %v1307_v58, %v1306_v56  ;;  %13571 = vst [vmem:[#allocation16_spill] sm:$0xff] %v10542_v45  ;;  %13572 = vst [vmem:[#allocation17_spill] sm:$0xff] %v10548_v32  ;;  %v10554_v34 = vld [vmem:[%s13435_s2 + $0xe0] ss:$16 sps:$4 sm:$0xff]   ;;  %v10560_v48 = vld [vmem:[%s13435_s2 + $0xe8] ss:$16 sps:$4 sm:$0xff]  }
 0x181   :  { %v1310_v62 = vpack.c.b16 %v1309_v61, %v1309_v61  ;;  %13573 = vst [vmem:[#allocation18_spill] sm:$0xff] %v10554_v34  ;;  %13574 = vst [vmem:[#allocation19_spill] sm:$0xff] %v10560_v48  ;;  %v10566_v24 = vld [vmem:[%s13435_s2 + $0x4] ss:$16 sps:$4 sm:$0xff]   ;;  %v10572_v38 = vld [vmem:[%s13435_s2 + $0xc] ss:$16 sps:$4 sm:$0xff]  }
 0x182   :  { %13575 = vst [vmem:[#allocation20_spill] sm:$0xff] %v10566_v24  ;;  %13576 = vst [vmem:[#allocation21_spill] sm:$0xff] %v10572_v38 }
 0x183   :  { %1345 = vmatmul.mubr.bf16.vlgmr.msra.gmra.mrb[36].mxu0 %v1310_v62  ;;  %1386 = vmatmul.mubr.bf16.vlgmr.msra.gmra.mrb[36].mxu1 %v1310_v62 }
 0x184   :  { %1747 = vmatpush1.bf16.msra.mxu0 %v10384_v0  ;;  %1788 = vmatpush1.bf16.msra.mxu1 %v10390_v57 }
 0x185   :  { %1748 = vmatprep.subr.bf16.mxu0 %v10396_v2  ;;  %1789 = vmatprep.subr.bf16.mxu1 %v10402_v3 }
 0x186   :  { %1778 = vmatprep.mubr.bf16.mxu0 %v13442_v1  ;;  %1819 = vmatprep.mubr.bf16.mxu1 %v13442_v1 }
 0x188   :  { %1749 = vmatpush1.bf16.msra.mxu0 %v10410_v5  ;;  %1790 = vmatpush1.bf16.msra.mxu1 %v10416_v59 }
 0x189   :  { %1750 = vmatprep.subr.bf16.mxu0 %v10422_v6  ;;  %1791 = vmatprep.subr.bf16.mxu1 %v10428_v7 }
 0x18c   :  { %1751 = vmatpush1.bf16.msra.mxu0 %v10434_v60  ;;  %1792 = vmatpush1.bf16.msra.mxu1 %v10440_v8 }
 0x18d   :  { %1752 = vmatprep.subr.bf16.mxu0 %v10446_v9  ;;  %1793 = vmatprep.subr.bf16.mxu1 %v10452_v12 }
 0x190   :  { %1753 = vmatpush1.bf16.msra.mxu0 %v10458_v63  ;;  %1794 = vmatpush1.bf16.msra.mxu1 %v10464_v14 }
 0x191   :  { %1754 = vmatprep.subr.bf16.mxu0 %v10470_v15  ;;  %1795 = vmatprep.subr.bf16.mxu1 %v10476_v4 }
 0x194   :  { %1755 = vmatpush1.bf16.msra.mxu0 %v10482_v16  ;;  %1796 = vmatpush1.bf16.msra.mxu1 %v10488_v23 }
 0x195   :  { %1756 = vmatprep.subr.bf16.mxu0 %v10494_v26  ;;  %1797 = vmatprep.subr.bf16.mxu1 %v10500_v27 }
 0x198   :  { %1757 = vmatpush1.bf16.msra.mxu0 %v10506_v28  ;;  %1798 = vmatpush1.bf16.msra.mxu1 %v10512_v11 }
 0x199   :  { %1758 = vmatprep.subr.bf16.mxu0 %v10518_v17  ;;  %1799 = vmatprep.subr.bf16.mxu1 %v10524_v33 }
 0x19c   :  { %1759 = vmatpush1.bf16.msra.mxu0 %v10530_v29  ;;  %1800 = vmatpush1.bf16.msra.mxu1 %v10536_v30 }
 0x19d   :  { %1760 = vmatprep.subr.bf16.mxu0 %v10542_v45  ;;  %1801 = vmatprep.subr.bf16.mxu1 %v10548_v32 }
 0x1a0   :  { %1761 = vmatpush1.bf16.msra.mxu0 %v10554_v34  ;;  %1802 = vmatpush1.bf16.msra.mxu1 %v10560_v48 }
 0x1a1   :  { %2180 = vmatprep.subr.bf16.mxu0 %v10566_v24  ;;  %2221 = vmatprep.subr.bf16.mxu1 %v10572_v38 }
 0x256   :  { %v1346_v39 = vpop.f32.mrb[36].mxu0  ;;  %v1387_v20 = vpop.f32.mrb[36].mxu1 }
 0x257   :  { %v1348_v31 = vpop.f32.mrb[37].mxu0  ;;  %v1389_v46 = vpop.f32.mrb[37].mxu1 }
 0x258   :  { %v1398_v42 = vcombine.low %v1346_v39, %v1348_v31  ;;  %v1399_v21 = vcombine.high %v1346_v39, %v1348_v31  ;;  %v1400_v37 = vcombine.low %v1387_v20, %v1389_v46  ;;  %v1401_v22 = vcombine.high %v1387_v20, %v1389_v46  ;;  %v1350_v44 = vpop.f32.mrb[38].mxu0  ;;  %v1391_v10 = vpop.f32.mrb[38].mxu1  ;;  %v1250_v31 = vld [vmem:[#allocation4 + $0x1] ss:$8 sm:$0xf] }
 0x259   :  { %v1351_v47 = vpop.f32.mrb[39].mxu0  ;;  %v1392_v13 = vpop.f32.mrb[39].mxu1  ;;  %v1252_v46 = vld [vmem:[#allocation4 + $0x41] ss:$8 sm:$0xf] }
 0x25a   :  { %v1408_v50 = vrot.slane %v1398_v42, %v10249_v40  ;;  %v1415_v51 = vrot.slane %v1399_v21, %v10249_v40  ;;  %v1422_v52 = vrot.slane %v1400_v37, %v10249_v40  ;;  %v1429_v53 = vrot.slane %v1401_v22, %v10249_v40  ;;  %v1254_v42 = vld [vmem:[#allocation4 + $0x81] ss:$8 sm:$0xf] }
 0x25b   :  { %v1258_v21 = vld [vmem:[#allocation4 + $0x101] ss:$8 sm:$0xf] }
 0x25c   :  { %v1430_v54 = vcombine.low %v1408_v50, %v1422_v52  ;;  %v1431_v55 = vcombine.high %v1408_v50, %v1422_v52  ;;  %v1432_v56 = vcombine.low %v1415_v51, %v1429_v53  ;;  %v1433_v58 = vcombine.high %v1415_v51, %v1429_v53  ;;  %v1256_v47 = vld [vmem:[#allocation4 + $0xc1] ss:$8 sm:$0xf] }
 0x25d   :  { %v1260_v13 = vld [vmem:[#allocation4 + $0x141] ss:$8 sm:$0xf] }
 0x25e   :  { %v1440_v61 = vrot.slane %v1430_v54, %v10249_v40  ;;  %v1447_v62 = vrot.slane %v1432_v56, %v10249_v40  ;;  %v1454_v39 = vrot.slane %v1431_v55, %v10249_v40  ;;  %v1461_v20 = vrot.slane %v1433_v58, %v10249_v40  ;;  %v1262_v53 = vld [vmem:[#allocation4 + $0x181] ss:$8 sm:$0xf] }
 0x25f   :  { %v1264_v54 = vld [vmem:[#allocation4 + $0x1c1] ss:$8 sm:$0xf] }
 0x260   :  { %v1462_v44 = vcombine.high %v1440_v61, %v1440_v61  ;;  %v1463_v37 = vcombine.high %v1447_v62, %v1447_v62  ;;  %v1464_v10 = vcombine.high %v1454_v39, %v1454_v39  ;;  %v1465_v22 = vcombine.high %v1461_v20, %v1461_v20 }
 0x261   :  { %v10583_v50 = vadd.f32 %v1440_v61, %v1250_v31  ;;  %v10585_v51 = vadd.f32 %v1454_v39, %v1252_v46  ;;  %v10587_v52 = vadd.f32 %v1447_v62, %v1258_v21  ;;  %v10593_v58 = vadd.f32 %v1461_v20, %v1260_v13 }
 0x262   :  { %v10589_v55 = vadd.f32 %v1462_v44, %v1254_v42  ;;  %v10591_v56 = vadd.f32 %v1464_v10, %v1256_v47  ;;  %v10595_v1 = vadd.f32 %v1463_v37, %v1262_v53  ;;  %v10597_v40 = vadd.f32 %v1465_v22, %v1264_v54 }
 0x263   :  { %v1482_v38 = vmul.f32 0.5, %v10583_v50  ;;  %v1483_v61 = vmul.f32 0.5, %v10585_v51  ;;  %v1486_v31 = vmul.f32 0.5, %v10587_v52  ;;  %v1522_v46 = vrot.slane %v10583_v50, 1 }
 0x264   :  { %v1484_v39 = vmul.f32 0.5, %v10589_v55  ;;  %v1485_v62 = vmul.f32 0.5, %v10591_v56  ;;  %v1487_v20 = vmul.f32 0.5, %v10593_v58  ;;  %v1523_v42 = vrot.slane %v10585_v51, 1 }
 0x265   :  { %8335 = vtanh.f32 %v1482_v38  ;;  %v1488_v21 = vmul.f32 0.5, %v10595_v1  ;;  %v1489_v44 = vmul.f32 0.5, %v10597_v40  ;;  %v1524_v37 = vrot.slane %v10589_v55, 1 }
 0x266   :  { %8337 = vtanh.f32 %v1483_v61  ;;  %v1525_v10 = vrot.slane %v10591_v56, 1  ;;  %v1526_v22 = vrot.slane %v10587_v52, 1  ;;  %v1527_v38 = vrot.slane %v10593_v58, 1 }
 0x267   :  { %8339 = vtanh.f32 %v1484_v39  ;;  %v1528_v47 = vrot.slane %v10595_v1, 1  ;;  %v1529_v13 = vrot.slane %v10597_v40, 1  ;;  %v1538_v53 = vmul.f32 0.5, %v1522_v46 }
 0x268   :  { %8341 = vtanh.f32 %v1485_v62  ;;  %v1539_v54 = vmul.f32 0.5, %v1523_v42  ;;  %v1540_v61 = vmul.f32 0.5, %v1524_v37  ;;  %v1541_v39 = vmul.f32 0.5, %v1525_v10 }
 0x269   :  { %8343 = vtanh.f32 %v1486_v31  ;;  %v1542_v24 = vmul.f32 0.5, %v1526_v22  ;;  %v1543_v62 = vmul.f32 0.5, %v1527_v38  ;;  %v1544_v48 = vmul.f32 0.5, %v1528_v47 }
 0x26a   :  { %8345 = vtanh.f32 %v1487_v20  ;;  %v1545_v34 = vmul.f32 0.5, %v1529_v13  ;;  %v1570_v32 = vrot.slane %v10583_v50, 2  ;;  %v1571_v31 = vrot.slane %v10585_v51, 2 }
 0x26b   :  { %8347 = vtanh.f32 %v1488_v21  ;;  %v1572_v45 = vrot.slane %v10589_v55, 2  ;;  %v1573_v46 = vrot.slane %v10591_v56, 2  ;;  %v1574_v42 = vrot.slane %v10587_v52, 2 }
 0x26c   :  { %8349 = vtanh.f32 %v1489_v44  ;;  %v1575_v21 = vrot.slane %v10593_v58, 2  ;;  %v1594_v44 = vrot.slane %v10583_v50, 3  ;;  %v1576_v10 = vrot.slane %v10595_v1, 2 }
 0x26d   :  { %8351 = vtanh.f32 %v1538_v53  ;;  %v1595_v22 = vrot.slane %v10585_v51, 3  ;;  %v1596_v38 = vrot.slane %v10589_v55, 3  ;;  %v1577_v13 = vrot.slane %v10597_v40, 2 }
 0x26e   :  { %8353 = vtanh.f32 %v1539_v54  ;;  %v1597_v53 = vrot.slane %v10591_v56, 3  ;;  %v1598_v54 = vrot.slane %v10587_v52, 3  ;;  %v1599_v50 = vrot.slane %v10593_v58, 3 }
 0x26f   :  { %v8336_v20 = vpop.eup %8335  ;;  %8355 = vtanh.f32 %v1540_v61  ;;  %v1610_v55 = vmul.f32 0.5, %v1594_v44  ;;  %v1611_v11 = vmul.f32 0.5, %v1595_v22  ;;  %v1612_v56 = vmul.f32 0.5, %v1596_v38 }
 0x270   :  { %v8338_v37 = vpop.eup %8337  ;;  %8357 = vtanh.f32 %v1541_v39  ;;  %v1498_v30 = vadd.f32 1.0, %v8336_v20  ;;  %v1600_v39 = vrot.slane %v10595_v1, 3  ;;  %v1613_v20 = vmul.f32 0.5, %v1597_v53 }
 0x271   :  { %v8340_v47 = vpop.eup %8339  ;;  %8359 = vtanh.f32 %v1542_v24  ;;  %v1499_v33 = vadd.f32 1.0, %v8338_v37  ;;  %v1615_v1 = vmul.f32 0.5, %v1599_v50 }
 0x272   :  { %v8342_v61 = vpop.eup %8341  ;;  %8361 = vtanh.f32 %v1543_v62  ;;  %v1500_v17 = vadd.f32 1.0, %v8340_v47  ;;  %v1614_v62 = vmul.f32 0.5, %v1598_v54  ;;  %v1506_v26 = vmul.f32 0.5, %v1498_v30 }
 0x273   :  { %v8344_v29 = vpop.eup %8343  ;;  %8363 = vtanh.f32 %v1544_v48  ;;  %v1501_v52 = vadd.f32 1.0, %v8342_v61  ;;  %v1507_v23 = vmul.f32 0.5, %v1499_v33  ;;  %v1616_v44 = vmul.f32 0.5, %v1600_v39 }
 0x274   :  { %v8346_v24 = vpop.eup %8345  ;;  %8365 = vtanh.f32 %v1545_v34  ;;  %v1502_v58 = vadd.f32 1.0, %v8344_v29  ;;  %v1508_v34 = vmul.f32 0.5, %v1500_v17 }
 0x275   :  { %v8348_v28 = vpop.eup %8347  ;;  %8367 = vtanh.f32 %v1570_v32  ;;  %v1503_v48 = vadd.f32 1.0, %v8346_v24  ;;  %v1509_v32 = vmul.f32 0.5, %v1501_v52 }
 0x276   :  { %v8350_v27 = vpop.eup %8349  ;;  %8369 = vtanh.f32 %v1571_v31  ;;  %v1504_v47 = vadd.f32 1.0, %v8348_v28  ;;  %v1510_v29 = vmul.f32 0.5, %v1502_v58 }
 0x277   :  { %v8352_v37 = vpop.eup %8351  ;;  %8371 = vtanh.f32 %v1572_v45  ;;  %v1505_v61 = vadd.f32 1.0, %v8350_v27  ;;  %v1511_v24 = vmul.f32 0.5, %v1503_v48 }
 0x278   :  { %v8354_v51 = vpop.eup %8353  ;;  %v1554_v22 = vadd.f32 1.0, %v8352_v37  ;;  %8373 = vtanh.f32 %v1573_v46  ;;  %v1512_v28 = vmul.f32 0.5, %v1504_v47 }
 0x279   :  { %v8356_v38 = vpop.eup %8355  ;;  %v1555_v53 = vadd.f32 1.0, %v8354_v51  ;;  %8375 = vtanh.f32 %v1574_v42  ;;  %v1513_v27 = vmul.f32 0.5, %v1505_v61 }
 0x27a   :  { %v8358_v54 = vpop.eup %8357  ;;  %v1556_v30 = vadd.f32 1.0, %v8356_v38  ;;  %v1562_v31 = vmul.f32 0.5, %v1554_v22  ;;  %8377 = vtanh.f32 %v1575_v21 }
 0x27b   :  { %v8360_v50 = vpop.eup %8359  ;;  %v1557_v33 = vadd.f32 1.0, %v8358_v54  ;;  %v1563_v45 = vmul.f32 0.5, %v1555_v53  ;;  %8379 = vtanh.f32 %v1576_v10 }
 0x27c   :  { %v8362_v39 = vpop.eup %8361  ;;  %v1558_v17 = vadd.f32 1.0, %v8360_v50  ;;  %v1564_v37 = vmul.f32 0.5, %v1556_v30  ;;  %8381 = vtanh.f32 %v1577_v13  ;;  %v1642_v21 = vmul.f32 %v1562_v31, %v10341_v18 }
 0x27d   :  { %v8364_v46 = vpop.eup %8363  ;;  %v1559_v52 = vadd.f32 1.0, %v8362_v39  ;;  %v1565_v51 = vmul.f32 0.5, %v1557_v33  ;;  %8383 = vtanh.f32 %v1610_v55  ;;  %v1643_v10 = vmul.f32 %v1563_v45, %v10344_v35 }
 0x27e   :  { %v8366_v42 = vpop.eup %8365  ;;  %v1560_v58 = vadd.f32 1.0, %v8364_v46  ;;  %v1566_v38 = vmul.f32 0.5, %v1558_v17  ;;  %8385 = vtanh.f32 %v1611_v11  ;;  %v1644_v13 = vmul.f32 %v1564_v37, %v10349_v36 }
 0x27f   :  { %v8368_v48 = vpop.eup %8367  ;;  %v1561_v22 = vadd.f32 1.0, %v8366_v42  ;;  %v1567_v53 = vmul.f32 0.5, %v1559_v52  ;;  %8387 = vtanh.f32 %v1612_v56  ;;  %v1645_v50 = vmul.f32 %v1565_v51, %v10355_v19 }
 0x280   :  { %v8370_v47 = vpop.eup %8369  ;;  %v1568_v54 = vmul.f32 0.5, %v1560_v58  ;;  %8389 = vtanh.f32 %v1613_v20  ;;  %v1650_v61 = vmul.f32 %v8368_v48, %v1506_v26  ;;  %v1646_v18 = vmul.f32 %v1566_v38, %v10360_v41 }
 0x281   :  { %v8372_v30 = vpop.eup %8371  ;;  %v1569_v55 = vmul.f32 0.5, %v1561_v22  ;;  %8391 = vtanh.f32 %v1614_v62  ;;  %v1651_v11 = vmul.f32 %v8370_v47, %v1507_v23  ;;  %v1647_v20 = vmul.f32 %v1567_v53, %v10363_v43 }
 0x282   :  { %v8374_v33 = vpop.eup %8373  ;;  %8393 = vtanh.f32 %v1615_v1  ;;  %v1652_v31 = vmul.f32 %v8372_v30, %v1508_v34  ;;  %v10636_v56 = vadd.f32 %v1650_v61, %v1642_v21  ;;  %v1648_v62 = vmul.f32 %v1568_v54, %v10366_v49 }
 0x283   :  { %v8376_v35 = vpop.eup %8375  ;;  %8395 = vtanh.f32 %v1616_v44  ;;  %v1653_v45 = vmul.f32 %v8374_v33, %v1509_v32  ;;  %v10639_v36 = vadd.f32 %v1651_v11, %v1643_v10  ;;  %v1649_v41 = vmul.f32 %v1569_v55, %v10369_v25 }
 0x284   :  { %v8378_v26 = vpop.eup %8377  ;;  %v1654_v39 = vmul.f32 %v8376_v35, %v1510_v29  ;;  %v10642_v19 = vadd.f32 %v1652_v31, %v1644_v13  ;;  %8397 = vtanh.f32 %v10636_v56  ;;  %v13577_v44 = vrot.slane %v10597_v40, 3 }
 0x285   :  { %v8380_v23 = vpop.eup %8379  ;;  %v1655_v1 = vmul.f32 %v8378_v26, %v1511_v24  ;;  %v10646_v34 = vadd.f32 %v1653_v45, %v1645_v50  ;;  %8399 = vtanh.f32 %v10639_v36 }
 0x286   :  { %v8382_v43 = vpop.eup %8381  ;;  %v1617_v32 = vmul.f32 0.5, %v13577_v44  ;;  %v1656_v17 = vmul.f32 %v8380_v23, %v1512_v28  ;;  %v10651_v37 = vadd.f32 %v1654_v39, %v1646_v18  ;;  %8401 = vtanh.f32 %v10642_v19 }
 0x287   :  { %v8384_v49 = vpop.eup %8383  ;;  %v1657_v29 = vmul.f32 %v8382_v43, %v1513_v27  ;;  %v10654_v46 = vadd.f32 %v1655_v1, %v1647_v20  ;;  %8403 = vtanh.f32 %v10646_v34 }
 0x288   :  { %v8386_v25 = vpop.eup %8385  ;;  %v10657_v24 = vadd.f32 %v1656_v17, %v1648_v62  ;;  %8405 = vtanh.f32 %v10651_v37  ;;  %v1626_v51 = vadd.f32 1.0, %v8384_v49 }
 0x289   :  { %v8388_v52 = vpop.eup %8387  ;;  %v10660_v40 = vadd.f32 %v1657_v29, %v1649_v41  ;;  %8407 = vtanh.f32 %v10654_v46  ;;  %v1627_v42 = vadd.f32 1.0, %v8386_v25 }
 0x28a   :  { %v8390_v28 = vpop.eup %8389  ;;  %8409 = vtanh.f32 %v1617_v32  ;;  %v1628_v27 = vadd.f32 1.0, %v8388_v52  ;;  %v1634_v53 = vmul.f32 0.5, %v1626_v51 }
 0x28b   :  { %v8392_v58 = vpop.eup %8391  ;;  %8411 = vtanh.f32 %v10657_v24  ;;  %v1629_v21 = vadd.f32 1.0, %v8390_v28  ;;  %v1635_v54 = vmul.f32 0.5, %v1627_v42 }
 0x28c   :  { %v8394_v38 = vpop.eup %8393  ;;  %8413 = vtanh.f32 %v10660_v40  ;;  %v1630_v22 = vadd.f32 1.0, %v8392_v58  ;;  %v1636_v61 = vmul.f32 0.5, %v1628_v27 }
 0x28d   :  { %v8396_v48 = vpop.eup %8395  ;;  %v1631_v47 = vadd.f32 1.0, %v8394_v38  ;;  %v1637_v50 = vmul.f32 0.5, %v1629_v21 }
 0x28e   :  { %v8398_v10 = vpop.eup %8397  ;;  %v1632_v33 = vadd.f32 1.0, %v8396_v48  ;;  %v1638_v31 = vmul.f32 0.5, %v1630_v22 }
 0x28f   :  { %v8400_v13 = vpop.eup %8399  ;;  %v1674_v30 = vmul.f32 %v8398_v10, %v1634_v53  ;;  %v1639_v62 = vmul.f32 0.5, %v1631_v47 }
 0x290   :  { %v8402_v55 = vpop.eup %8401  ;;  %v1675_v11 = vmul.f32 %v8400_v13, %v1635_v54  ;;  %v1640_v44 = vmul.f32 0.5, %v1632_v33 }
 0x291   :  { %v8404_v18 = vpop.eup %8403  ;;  %v1676_v35 = vmul.f32 %v8402_v55, %v1636_v61  ;;  %1682 = vst [vmem:[#allocation5 + $0x1] sm:$0x1] %v1674_v30  ;;  %v1706_v20 = vpack.c.bf16 %v1674_v30, %v1674_v30 }
 0x292   :  { %v8406_v45 = vpop.eup %8405  ;;  %1683 = vst [vmem:[#allocation5 + $0x11] sm:$0x1] %v1675_v11  ;;  %v1707_v26 = vpack.c.bf16 %v1675_v11, %v1675_v11  ;;  %v1677_v39 = vmul.f32 %v8404_v18, %v1637_v50 }
 0x293   :  { %v8408_v23 = vpop.eup %8407  ;;  %1684 = vst [vmem:[#allocation5 + $0x21] sm:$0x1] %v1676_v35  ;;  %v1678_v41 = vmul.f32 %v8406_v45, %v1638_v31  ;;  %v1708_v1 = vpack.c.bf16 %v1676_v35, %v1676_v35  ;;  %v1722_v51 = vunpack.c.l.b16 %v1706_v20 }
 0x294   :  { %v8410_v43 = vpop.eup %8409  ;;  %v1679_v32 = vmul.f32 %v8408_v23, %v1639_v62  ;;  %1685 = vst [vmem:[#allocation5 + $0x31] sm:$0x1] %v1677_v39  ;;  %v1709_v17 = vpack.c.bf16 %v1677_v39, %v1677_v39  ;;  %v1723_v49 = vunpack.c.l.b16 %v1707_v26 }
 0x295   :  { %v8412_v29 = vpop.eup %8411  ;;  %v1633_v25 = vadd.f32 1.0, %v8410_v43  ;;  %1686 = vst [vmem:[#allocation5 + $0x41] sm:$0x1] %v1678_v41  ;;  %v1710_v52 = vpack.c.bf16 %v1678_v41, %v1678_v41  ;;  %v1724_v28 = vunpack.c.l.b16 %v1708_v1  ;;  %v13578_v41 = vmov 0  }
 0x296   :  { %v8414_v42 = vpop.eup %8413  ;;  %v1680_v58 = vmul.f32 %v8412_v29, %v1640_v44  ;;  %1687 = vst [vmem:[#allocation5 + $0x51] sm:$0x1] %v1679_v32  ;;  %v1711_v27 = vpack.c.bf16 %v1679_v32, %v1679_v32  ;;  %v1725_v38 = vunpack.c.l.b16 %v1709_v17  ;;  %v1730_v21 = vrot.slane %v1723_v49, 7 }
 0x297   :  { %v1641_v48 = vmul.f32 0.5, %v1633_v25  ;;  %v1726_v22 = vunpack.c.l.b16 %v1710_v52  ;;  %v1732_v53 = vrot.slane %v1724_v28, 6  ;;  %v13594_v28 = vld [vmem:[#allocation6_spill] sm:$0xff] }
 0x298   :  { %1688 = vst [vmem:[#allocation5 + $0x61] sm:$0x1] %v1680_v58  ;;  %v1712_v10 = vpack.c.bf16 %v1680_v58, %v1680_v58  ;;  %v1727_v47 = vunpack.c.l.b16 %v1711_v27  ;;  %v1731_v54 = vsel %vm1290_vm0, %v1730_v21, %v1722_v51  ;;  %v1734_v13 = vrot.slane %v1725_v38, 5 }
 0x299   :  { %v1681_v61 = vmul.f32 %v8414_v42, %v1641_v48  ;;  %v1733_v30 = vsel %vm1293_vm1, %v1732_v53, %v1731_v54  ;;  %v1736_v55 = vrot.slane %v1726_v22, 4 }
 0x29a   :  { %v1728_v50 = vunpack.c.l.b16 %v1712_v10  ;;  %v1735_v11 = vsel %vm1296_vm2, %v1734_v13, %v1733_v30  ;;  %v1738_v33 = vrot.slane %v1727_v47, 3  ;;  %v1693_v30 = vld [vmem:[#allocation4 + $0x42] ss:$8 sm:$0xf] }
 0x29b   :  { %1689 = vst [vmem:[#allocation5 + $0x71] sm:$0x1] %v1681_v61  ;;  %v1713_v18 = vpack.c.bf16 %v1681_v61, %v1681_v61  ;;  %v1737_v31 = vsel %vm1299_vm3, %v1736_v55, %v1735_v11  ;;  %v1691_v61 = vld [vmem:[#allocation4 + $0x2] ss:$8 sm:$0xf] }
 0x29c   :  { %v1739_v35 = vsel %vm1302_vm4, %v1738_v33, %v1737_v31  ;;  %v1740_v20 = vrot.slane %v1728_v50, 2  ;;  %v1695_v55 = vld [vmem:[#allocation4 + $0x82] ss:$8 sm:$0xf] }
 0x29d   :  { %v1729_v45 = vunpack.c.l.b16 %v1713_v18  ;;  %v1699_v50 = vld [vmem:[#allocation4 + $0x102] ss:$8 sm:$0xf] }
 0x29e   :  { %v1741_v26 = vsel %vm1305_vm5, %v1740_v20, %v1739_v35  ;;  %v1697_v35 = vld [vmem:[#allocation4 + $0xc2] ss:$8 sm:$0xf] }
 0x29f   :  { %v1742_v62 = vrot.slane %v1729_v45, 1  ;;  %v1701_v20 = vld [vmem:[#allocation4 + $0x142] ss:$8 sm:$0xf] }
 0x2a1   :  { %v1743_v39 = vsel %vm1308_vm6, %v1742_v62, %v1741_v26 }
 0x2a2   :  { %v1744_v23 = vpack.c.b16 %v1743_v39, %v1743_v39  ;;  %v1703_v39 = vld [vmem:[#allocation4 + $0x182] ss:$8 sm:$0xf] }
 0x2a4   :  { %1779 = vmatmul.mubr.bf16.vlgmr.msra.gmra.mrb[40].mxu0 %v1744_v23  ;;  %1820 = vmatmul.mubr.bf16.vlgmr.msra.gmra.mrb[40].mxu1 %v1744_v23  ;;  %v1705_v23 = vld [vmem:[#allocation4 + $0x1c2] ss:$8 sm:$0xf] }
 0x2a5   :  { %2181 = vmatpush1.bf16.msra.mxu0 %v10384_v0  ;;  %2222 = vmatpush1.bf16.msra.mxu1 %v10390_v57  ;;  %v13579_v0 = vld [vmem:[#allocation7_spill] sm:$0xff]  ;;  %v13580_v57 = vld [vmem:[#allocation8_spill] sm:$0xff] }
 0x2a6   :  { %2182 = vmatprep.subr.bf16.mxu0 %v10396_v2  ;;  %2223 = vmatprep.subr.bf16.mxu1 %v10402_v3  ;;  %v13581_v2 = vld [vmem:[#allocation9_spill] sm:$0xff]  ;;  %v13582_v3 = vld [vmem:[#allocation10_spill] sm:$0xff] }
 0x2a7   :  { %2212 = vmatprep.mubr.bf16.mxu0 %v13578_v41  ;;  %2253 = vmatprep.mubr.bf16.mxu1 %v13578_v41 }
 0x2a9   :  { %2183 = vmatpush1.bf16.msra.mxu0 %v10410_v5  ;;  %2224 = vmatpush1.bf16.msra.mxu1 %v10416_v59  ;;  %v13583_v5 = vld [vmem:[#allocation11_spill] sm:$0xff]  ;;  %v13584_v59 = vld [vmem:[#allocation12_spill] sm:$0xff] }
 0x2aa   :  { %2184 = vmatprep.subr.bf16.mxu0 %v10422_v6  ;;  %2225 = vmatprep.subr.bf16.mxu1 %v10428_v7  ;;  %v13585_v6 = vld [vmem:[#allocation13_spill] sm:$0xff]  ;;  %v13586_v7 = vld [vmem:[#allocation14_spill] sm:$0xff] }
 0x2ad   :  { %2185 = vmatpush1.bf16.msra.mxu0 %v10434_v60  ;;  %2226 = vmatpush1.bf16.msra.mxu1 %v10440_v8  ;;  %v13587_v60 = vld [vmem:[#allocation15_spill] sm:$0xff]  ;;  %v13588_v8 = vld [vmem:[#allocation16_spill] sm:$0xff] }
 0x2ae   :  { %2186 = vmatprep.subr.bf16.mxu0 %v10446_v9  ;;  %2227 = vmatprep.subr.bf16.mxu1 %v10452_v12  ;;  %v13589_v9 = vld [vmem:[#allocation17_spill] sm:$0xff]  ;;  %v13590_v12 = vld [vmem:[#allocation18_spill] sm:$0xff] }
 0x2b1   :  { %2187 = vmatpush1.bf16.msra.mxu0 %v10458_v63  ;;  %2228 = vmatpush1.bf16.msra.mxu1 %v10464_v14  ;;  %v13591_v63 = vld [vmem:[#allocation19_spill] sm:$0xff]  ;;  %v13592_v14 = vld [vmem:[#allocation20_spill] sm:$0xff] }
 0x2b2   :  { %2188 = vmatprep.subr.bf16.mxu0 %v10470_v15  ;;  %2229 = vmatprep.subr.bf16.mxu1 %v10476_v4  ;;  %v13593_v15 = vld [vmem:[#allocation21_spill] sm:$0xff] }
 0x2b5   :  { %2189 = vmatpush1.bf16.msra.mxu0 %v10482_v16  ;;  %2230 = vmatpush1.bf16.msra.mxu1 %v13579_v0 }
 0x2b6   :  { %2190 = vmatprep.subr.bf16.mxu0 %v13580_v57  ;;  %2231 = vmatprep.subr.bf16.mxu1 %v13581_v2 }
 0x2b9   :  { %2191 = vmatpush1.bf16.msra.mxu0 %v13582_v3  ;;  %2232 = vmatpush1.bf16.msra.mxu1 %v13583_v5 }
 0x2ba   :  { %2192 = vmatprep.subr.bf16.mxu0 %v13584_v59  ;;  %2233 = vmatprep.subr.bf16.mxu1 %v13585_v6 }
 0x2bd   :  { %2193 = vmatpush1.bf16.msra.mxu0 %v13586_v7  ;;  %2234 = vmatpush1.bf16.msra.mxu1 %v13587_v60 }
 0x2be   :  { %2194 = vmatprep.subr.bf16.mxu0 %v13588_v8  ;;  %2235 = vmatprep.subr.bf16.mxu1 %v13589_v9 }
 0x2c1   :  { %2195 = vmatpush1.bf16.msra.mxu0 %v13590_v12  ;;  %2236 = vmatpush1.bf16.msra.mxu1 %v13591_v63 }
 0x2c2   :  { %2614 = vmatprep.subr.bf16.mxu0 %v13592_v14  ;;  %2655 = vmatprep.subr.bf16.mxu1 %v13593_v15 }
 0x377   :  { %v1780_v4 = vpop.f32.mrb[40].mxu0  ;;  %v1821_v16 = vpop.f32.mrb[40].mxu1 }
 0x378   :  { %v1782_v1 = vpop.f32.mrb[41].mxu0  ;;  %v1823_v43 = vpop.f32.mrb[41].mxu1 }
 0x379   :  { %v1832_v44 = vcombine.low %v1780_v4, %v1782_v1  ;;  %v1833_v32 = vcombine.high %v1780_v4, %v1782_v1  ;;  %v1834_v17 = vcombine.low %v1821_v16, %v1823_v43  ;;  %v1835_v49 = vcombine.high %v1821_v16, %v1823_v43  ;;  %v1784_v29 = vpop.f32.mrb[42].mxu0  ;;  %v1825_v25 = vpop.f32.mrb[42].mxu1 }
 0x37a   :  { %v1785_v52 = vpop.f32.mrb[43].mxu0  ;;  %v1826_v51 = vpop.f32.mrb[43].mxu1 }
 0x37b   :  { %v1842_v42 = vrot.slane %v1832_v44, %v13594_v28  ;;  %v1849_v58 = vrot.slane %v1833_v32, %v13594_v28  ;;  %v1856_v27 = vrot.slane %v1834_v17, %v13594_v28  ;;  %v1863_v38 = vrot.slane %v1835_v49, %v13594_v28 }
 0x37d   :  { %v1864_v21 = vcombine.low %v1842_v42, %v1856_v27  ;;  %v1865_v48 = vcombine.high %v1842_v42, %v1856_v27  ;;  %v1866_v22 = vcombine.low %v1849_v58, %v1863_v38  ;;  %v1867_v53 = vcombine.high %v1849_v58, %v1863_v38 }
 0x37f   :  { %v1874_v10 = vrot.slane %v1864_v21, %v13594_v28  ;;  %v1881_v47 = vrot.slane %v1866_v22, %v13594_v28  ;;  %v1888_v54 = vrot.slane %v1865_v48, %v13594_v28  ;;  %v1895_v13 = vrot.slane %v1867_v53, %v13594_v28 }
 0x381   :  { %v1896_v11 = vcombine.high %v1874_v10, %v1874_v10  ;;  %v1897_v33 = vcombine.high %v1881_v47, %v1881_v47  ;;  %v1898_v18 = vcombine.high %v1888_v54, %v1888_v54  ;;  %v1899_v31 = vcombine.high %v1895_v13, %v1895_v13 }
 0x382   :  { %v10714_v45 = vadd.f32 %v1874_v10, %v1691_v61  ;;  %v10716_v26 = vadd.f32 %v1888_v54, %v1693_v30  ;;  %v10718_v62 = vadd.f32 %v1881_v47, %v1699_v50  ;;  %v10724_v2 = vadd.f32 %v1895_v13, %v1701_v20 }
 0x383   :  { %v10720_v0 = vadd.f32 %v1896_v11, %v1695_v55  ;;  %v10722_v57 = vadd.f32 %v1898_v18, %v1697_v35  ;;  %v10726_v3 = vadd.f32 %v1897_v33, %v1703_v39  ;;  %v10728_v5 = vadd.f32 %v1899_v31, %v1705_v23 }
 0x384   :  { %v1916_v59 = vmul.f32 0.5, %v10714_v45  ;;  %v1917_v6 = vmul.f32 0.5, %v10716_v26  ;;  %v1920_v8 = vmul.f32 0.5, %v10718_v62  ;;  %v1956_v9 = vrot.slane %v10714_v45, 1 }
 0x385   :  { %v1918_v7 = vmul.f32 0.5, %v10720_v0  ;;  %v1919_v60 = vmul.f32 0.5, %v10722_v57  ;;  %v1921_v12 = vmul.f32 0.5, %v10724_v2  ;;  %v1957_v63 = vrot.slane %v10716_v26, 1 }
 0x386   :  { %8415 = vtanh.f32 %v1916_v59  ;;  %v1922_v14 = vmul.f32 0.5, %v10726_v3  ;;  %v1923_v15 = vmul.f32 0.5, %v10728_v5  ;;  %v1958_v4 = vrot.slane %v10720_v0, 1 }
 0x387   :  { %8417 = vtanh.f32 %v1917_v6  ;;  %v1959_v16 = vrot.slane %v10722_v57, 1  ;;  %v1960_v1 = vrot.slane %v10718_v62, 1  ;;  %v1961_v43 = vrot.slane %v10724_v2, 1 }
 0x388   :  { %8419 = vtanh.f32 %v1918_v7  ;;  %v1962_v44 = vrot.slane %v10726_v3, 1  ;;  %v1963_v32 = vrot.slane %v10728_v5, 1  ;;  %v1972_v17 = vmul.f32 0.5, %v1956_v9 }
 0x389   :  { %8421 = vtanh.f32 %v1919_v60  ;;  %v1973_v49 = vmul.f32 0.5, %v1957_v63  ;;  %v1974_v29 = vmul.f32 0.5, %v1958_v4  ;;  %v1975_v25 = vmul.f32 0.5, %v1959_v16 }
 0x38a   :  { %8423 = vtanh.f32 %v1920_v8  ;;  %v1976_v52 = vmul.f32 0.5, %v1960_v1  ;;  %v1977_v51 = vmul.f32 0.5, %v1961_v43  ;;  %v1978_v42 = vmul.f32 0.5, %v1962_v44 }
 0x38b   :  { %8425 = vtanh.f32 %v1921_v12  ;;  %v1979_v58 = vmul.f32 0.5, %v1963_v32  ;;  %v2004_v27 = vrot.slane %v10714_v45, 2  ;;  %v2005_v38 = vrot.slane %v10716_v26, 2 }
 0x38c   :  { %8427 = vtanh.f32 %v1922_v14  ;;  %v2006_v21 = vrot.slane %v10720_v0, 2  ;;  %v2007_v48 = vrot.slane %v10722_v57, 2  ;;  %v2008_v53 = vrot.slane %v10718_v62, 2 }
 0x38d   :  { %8429 = vtanh.f32 %v1923_v15  ;;  %v2009_v10 = vrot.slane %v10724_v2, 2  ;;  %v2028_v47 = vrot.slane %v10714_v45, 3  ;;  %v2010_v13 = vrot.slane %v10726_v3, 2 }
 0x38e   :  { %8431 = vtanh.f32 %v1972_v17  ;;  %v2029_v61 = vrot.slane %v10716_v26, 3  ;;  %v2030_v30 = vrot.slane %v10720_v0, 3  ;;  %v2011_v50 = vrot.slane %v10728_v5, 2 }
 0x38f   :  { %8433 = vtanh.f32 %v1973_v49  ;;  %v2031_v11 = vrot.slane %v10722_v57, 3  ;;  %v2032_v33 = vrot.slane %v10718_v62, 3  ;;  %v2033_v35 = vrot.slane %v10724_v2, 3 }
 0x390   :  { %v8416_v22 = vpop.eup %8415  ;;  %8435 = vtanh.f32 %v1974_v29  ;;  %v2034_v20 = vrot.slane %v10726_v3, 3  ;;  %v2035_v26 = vrot.slane %v10728_v5, 3  ;;  %v2044_v23 = vmul.f32 0.5, %v2028_v47 }
 0x391   :  { %v8418_v54 = vpop.eup %8417  ;;  %8437 = vtanh.f32 %v1975_v25  ;;  %v1932_v31 = vadd.f32 1.0, %v8416_v22  ;;  %v2045_v6 = vmul.f32 0.5, %v2029_v61  ;;  %v2046_v57 = vmul.f32 0.5, %v2030_v30 }
 0x392   :  { %v8420_v55 = vpop.eup %8419  ;;  %8439 = vtanh.f32 %v1976_v52  ;;  %v1933_v39 = vadd.f32 1.0, %v8418_v54  ;;  %v2047_v60 = vmul.f32 0.5, %v2031_v11  ;;  %v2048_v8 = vmul.f32 0.5, %v2032_v33 }
 0x393   :  { %v8422_v18 = vpop.eup %8421  ;;  %8441 = vtanh.f32 %v1977_v51  ;;  %v1934_v59 = vadd.f32 1.0, %v8420_v55  ;;  %v1940_v12 = vmul.f32 0.5, %v1932_v31  ;;  %v2049_v3 = vmul.f32 0.5, %v2033_v35 }
 0x394   :  { %v8424_v45 = vpop.eup %8423  ;;  %8443 = vtanh.f32 %v1978_v42  ;;  %v1935_v62 = vadd.f32 1.0, %v8422_v18  ;;  %v1941_v15 = vmul.f32 0.5, %v1933_v39  ;;  %v2050_v4 = vmul.f32 0.5, %v2034_v20 }
 0x395   :  { %v8426_v0 = vpop.eup %8425  ;;  %8445 = vtanh.f32 %v1979_v58  ;;  %v1936_v2 = vadd.f32 1.0, %v8424_v45  ;;  %v1942_v43 = vmul.f32 0.5, %v1934_v59 }
 0x396   :  { %v8428_v7 = vpop.eup %8427  ;;  %8447 = vtanh.f32 %v2004_v27  ;;  %v1937_v14 = vadd.f32 1.0, %v8426_v0  ;;  %v1943_v49 = vmul.f32 0.5, %v1935_v62 }
 0x397   :  { %v8430_v9 = vpop.eup %8429  ;;  %8449 = vtanh.f32 %v2005_v38  ;;  %v1938_v1 = vadd.f32 1.0, %v8428_v7  ;;  %v1944_v52 = vmul.f32 0.5, %v1936_v2 }
 0x398   :  { %v8432_v63 = vpop.eup %8431  ;;  %8451 = vtanh.f32 %v2006_v21  ;;  %v1939_v17 = vadd.f32 1.0, %v8430_v9  ;;  %v1945_v27 = vmul.f32 0.5, %v1937_v14 }
 0x399   :  { %v8434_v16 = vpop.eup %8433  ;;  %v1988_v44 = vadd.f32 1.0, %v8432_v63  ;;  %8453 = vtanh.f32 %v2007_v48  ;;  %v1946_v47 = vmul.f32 0.5, %v1938_v1 }
 0x39a   :  { %v8436_v32 = vpop.eup %8435  ;;  %v1989_v29 = vadd.f32 1.0, %v8434_v16  ;;  %8455 = vtanh.f32 %v2008_v53  ;;  %v1947_v30 = vmul.f32 0.5, %v1939_v17 }
 0x39b   :  { %v8438_v25 = vpop.eup %8437  ;;  %v1990_v51 = vadd.f32 1.0, %v8436_v32  ;;  %v1996_v42 = vmul.f32 0.5, %v1988_v44  ;;  %8457 = vtanh.f32 %v2009_v10 }
 0x39c   :  { %v8440_v58 = vpop.eup %8439  ;;  %v1991_v38 = vadd.f32 1.0, %v8438_v25  ;;  %v1997_v21 = vmul.f32 0.5, %v1989_v29  ;;  %8459 = vtanh.f32 %v2010_v13 }
 0x39d   :  { %v8442_v22 = vpop.eup %8441  ;;  %v1992_v54 = vadd.f32 1.0, %v8440_v58  ;;  %v1998_v61 = vmul.f32 0.5, %v1990_v51  ;;  %8461 = vtanh.f32 %v2011_v50  ;;  %v2076_v10 = vmul.f32 %v1996_v42, %v10636_v56 }
 0x39e   :  { %v8444_v48 = vpop.eup %8443  ;;  %v1993_v55 = vadd.f32 1.0, %v8442_v22  ;;  %v1999_v11 = vmul.f32 0.5, %v1991_v38  ;;  %8463 = vtanh.f32 %v2044_v23  ;;  %v2077_v13 = vmul.f32 %v1997_v21, %v10639_v36 }
 0x39f   :  { %v8446_v53 = vpop.eup %8445  ;;  %v1994_v33 = vadd.f32 1.0, %v8444_v48  ;;  %v2000_v18 = vmul.f32 0.5, %v1992_v54  ;;  %8465 = vtanh.f32 %v2045_v6  ;;  %v2078_v50 = vmul.f32 %v1998_v61, %v10642_v19 }
 0x3a0   :  { %v8448_v31 = vpop.eup %8447  ;;  %v1995_v35 = vadd.f32 1.0, %v8446_v53  ;;  %v2001_v20 = vmul.f32 0.5, %v1993_v55  ;;  %8467 = vtanh.f32 %v2046_v57  ;;  %v2079_v7 = vmul.f32 %v1999_v11, %v10646_v34 }
 0x3a1   :  { %v8450_v45 = vpop.eup %8449  ;;  %v2002_v39 = vmul.f32 0.5, %v1994_v33  ;;  %8469 = vtanh.f32 %v2047_v60  ;;  %v2084_v0 = vmul.f32 %v8448_v31, %v1940_v12  ;;  %v2080_v56 = vmul.f32 %v2000_v18, %v10651_v37 }
 0x3a2   :  { %v8452_v59 = vpop.eup %8451  ;;  %v2003_v23 = vmul.f32 0.5, %v1995_v35  ;;  %8471 = vtanh.f32 %v2048_v8  ;;  %v2085_v6 = vmul.f32 %v8450_v45, %v1941_v15  ;;  %v2081_v60 = vmul.f32 %v2001_v20, %v10654_v46 }
 0x3a3   :  { %v8454_v62 = vpop.eup %8453  ;;  %8473 = vtanh.f32 %v2049_v3  ;;  %v2086_v9 = vmul.f32 %v8452_v59, %v1942_v43  ;;  %v10767_v57 = vadd.f32 %v2084_v0, %v2076_v10  ;;  %v2082_v8 = vmul.f32 %v2002_v39, %v10657_v24 }
 0x3a4   :  { %v8456_v36 = vpop.eup %8455  ;;  %8475 = vtanh.f32 %v2050_v4  ;;  %v2087_v2 = vmul.f32 %v8454_v62, %v1943_v49  ;;  %v10770_v19 = vadd.f32 %v2085_v6, %v2077_v13  ;;  %v2083_v37 = vmul.f32 %v2003_v23, %v10660_v40 }
 0x3a5   :  { %v8458_v12 = vpop.eup %8457  ;;  %v2088_v63 = vmul.f32 %v8456_v36, %v1944_v52  ;;  %v10773_v34 = vadd.f32 %v2086_v9, %v2078_v50  ;;  %8477 = vtanh.f32 %v10767_v57  ;;  %v2051_v4 = vmul.f32 0.5, %v2035_v26 }
 0x3a6   :  { %v8460_v3 = vpop.eup %8459  ;;  %v2089_v14 = vmul.f32 %v8458_v12, %v1945_v27  ;;  %v10777_v15 = vadd.f32 %v2087_v2, %v2079_v7  ;;  %8479 = vtanh.f32 %v10770_v19 }
 0x3a7   :  { %v8462_v46 = vpop.eup %8461  ;;  %v2090_v16 = vmul.f32 %v8460_v3, %v1946_v47  ;;  %v10782_v1 = vadd.f32 %v2088_v63, %v2080_v56  ;;  %8481 = vtanh.f32 %v10773_v34 }
 0x3a8   :  { %v8464_v24 = vpop.eup %8463  ;;  %v2091_v43 = vmul.f32 %v8462_v46, %v1947_v30  ;;  %v10785_v44 = vadd.f32 %v2089_v14, %v2081_v60  ;;  %8483 = vtanh.f32 %v10777_v15 }
 0x3a9   :  { %v8466_v40 = vpop.eup %8465  ;;  %v10788_v32 = vadd.f32 %v2090_v16, %v2082_v8  ;;  %8485 = vtanh.f32 %v10782_v1  ;;  %v2060_v49 = vadd.f32 1.0, %v8464_v24 }
 0x3aa   :  { %v8468_v17 = vpop.eup %8467  ;;  %v10791_v5 = vadd.f32 %v2091_v43, %v2083_v37  ;;  %8487 = vtanh.f32 %v10785_v44  ;;  %v2061_v29 = vadd.f32 1.0, %v8466_v40 }
 0x3ab   :  { %v8470_v26 = vpop.eup %8469  ;;  %8489 = vtanh.f32 %v2051_v4  ;;  %v2062_v52 = vadd.f32 1.0, %v8468_v17  ;;  %v2068_v38 = vmul.f32 0.5, %v2060_v49 }
 0x3ac   :  { %v8472_v25 = vpop.eup %8471  ;;  %8491 = vtanh.f32 %v10788_v32  ;;  %v2063_v42 = vadd.f32 1.0, %v8470_v26  ;;  %v2069_v47 = vmul.f32 0.5, %v2061_v29 }
 0x3ad   :  { %v8474_v51 = vpop.eup %8473  ;;  %8493 = vtanh.f32 %v10791_v5  ;;  %v2064_v27 = vadd.f32 1.0, %v8472_v25  ;;  %v2070_v61 = vmul.f32 0.5, %v2062_v52 }
 0x3ae   :  { %v8476_v58 = vpop.eup %8475  ;;  %v2065_v22 = vadd.f32 1.0, %v8474_v51  ;;  %v2071_v55 = vmul.f32 0.5, %v2063_v42 }
 0x3af   :  { %v8478_v21 = vpop.eup %8477  ;;  %v2066_v53 = vadd.f32 1.0, %v8476_v58  ;;  %v2072_v18 = vmul.f32 0.5, %v2064_v27 }
 0x3b0   :  { %v8480_v54 = vpop.eup %8479  ;;  %v2108_v48 = vmul.f32 %v8478_v21, %v2068_v38  ;;  %v2073_v13 = vmul.f32 0.5, %v2065_v22 }
 0x3b1   :  { %v8482_v30 = vpop.eup %8481  ;;  %v2109_v11 = vmul.f32 %v8480_v54, %v2069_v47  ;;  %v2074_v23 = vmul.f32 0.5, %v2066_v53  ;;  %v10838_v53 = vld [vmem:[%s13435_s2 + $0x28] ss:$16 sps:$4 sm:$0xff]  }
 0x3b2   :  { %v8484_v33 = vpop.eup %8483  ;;  %v2110_v10 = vmul.f32 %v8482_v30, %v2070_v61  ;;  %2116 = vst [vmem:[#allocation5 + $0x2] sm:$0x1] %v2108_v48  ;;  %v2140_v31 = vpack.c.bf16 %v2108_v48, %v2108_v48  ;;  %v10806_v61 = vld [vmem:[%s13435_s2] ss:$16 sps:$4 sm:$0xff]   ;;  %v10812_v48 = vld [vmem:[%s13435_s2 + $0x8] ss:$16 sps:$4 sm:$0xff]  }
 0x3b3   :  { %v8486_v35 = vpop.eup %8485  ;;  %2117 = vst [vmem:[#allocation5 + $0x12] sm:$0x1] %v2109_v11  ;;  %v2141_v20 = vpack.c.bf16 %v2109_v11, %v2109_v11  ;;  %v2111_v45 = vmul.f32 %v8484_v33, %v2071_v55  ;;  %v10818_v30 = vld [vmem:[%s13435_s2 + $0x24] ss:$16 sps:$4 sm:$0xff]   ;;  %v10824_v55 = vld [vmem:[%s13435_s2 + $0x2c] ss:$16 sps:$4 sm:$0xff]  }
 0x3b4   :  { %v8488_v39 = vpop.eup %8487  ;;  %2118 = vst [vmem:[#allocation5 + $0x22] sm:$0x1] %v2110_v10  ;;  %v2112_v50 = vmul.f32 %v8486_v35, %v2072_v18  ;;  %v2142_v0 = vpack.c.bf16 %v2110_v10, %v2110_v10  ;;  %v2156_v60 = vunpack.c.l.b16 %v2140_v31  ;;  %v10832_v11 = vld [vmem:[%s13435_s2 + $0x20] ss:$16 sps:$4 sm:$0xff]   ;;  %v10844_v33 = vld [vmem:[%s13435_s2 + $0x44] ss:$16 sps:$4 sm:$0xff]  }
 0x3b5   :  { %v8490_v59 = vpop.eup %8489  ;;  %v2113_v7 = vmul.f32 %v8488_v39, %v2073_v13  ;;  %2119 = vst [vmem:[#allocation5 + $0x32] sm:$0x1] %v2111_v45  ;;  %v2143_v6 = vpack.c.bf16 %v2111_v45, %v2111_v45  ;;  %v2157_v62 = vunpack.c.l.b16 %v2141_v20  ;;  %v10850_v18 = vld [vmem:[%s13435_s2 + $0x4c] ss:$16 sps:$4 sm:$0xff]   ;;  %v10856_v10 = vld [vmem:[%s13435_s2 + $0x40] ss:$16 sps:$4 sm:$0xff]  }
 0x3b6   :  { %v8492_v56 = vpop.eup %8491  ;;  %v2067_v9 = vadd.f32 1.0, %v8490_v59  ;;  %2120 = vst [vmem:[#allocation5 + $0x42] sm:$0x1] %v2112_v50  ;;  %v2144_v36 = vpack.c.bf16 %v2112_v50, %v2112_v50  ;;  %v2158_v2 = vunpack.c.l.b16 %v2142_v0  ;;  %v10862_v31 = vld [vmem:[%s13435_s2 + $0x48] ss:$16 sps:$4 sm:$0xff]  }
 0x3b7   :  { %v8494_v12 = vpop.eup %8493  ;;  %v2114_v8 = vmul.f32 %v8492_v56, %v2074_v23  ;;  %2121 = vst [vmem:[#allocation5 + $0x52] sm:$0x1] %v2113_v7  ;;  %v2145_v63 = vpack.c.bf16 %v2113_v7, %v2113_v7  ;;  %v2159_v3 = vunpack.c.l.b16 %v2143_v6  ;;  %v2164_v37 = vrot.slane %v2157_v62, 7  ;;  %v10868_v35 = vld [vmem:[%s13435_s2 + $0x64] ss:$16 sps:$4 sm:$0xff]  }
 0x3b8   :  { %v2075_v14 = vmul.f32 0.5, %v2067_v9  ;;  %v2160_v46 = vunpack.c.l.b16 %v2144_v36  ;;  %v2166_v4 = vrot.slane %v2158_v2, 6  ;;  %v10874_v20 = vld [vmem:[%s13435_s2 + $0x6c] ss:$16 sps:$4 sm:$0xff]   ;;  %v10880_v13 = vld [vmem:[%s13435_s2 + $0x60] ss:$16 sps:$4 sm:$0xff]  }
 0x3b9   :  { %2122 = vst [vmem:[#allocation5 + $0x62] sm:$0x1] %v2114_v8  ;;  %v2146_v16 = vpack.c.bf16 %v2114_v8, %v2114_v8  ;;  %v2161_v24 = vunpack.c.l.b16 %v2145_v63  ;;  %v2165_v43 = vsel %vm1290_vm0, %v2164_v37, %v2156_v60  ;;  %v2168_v40 = vrot.slane %v2159_v3, 5  ;;  %v10886_v45 = vld [vmem:[%s13435_s2 + $0x68] ss:$16 sps:$4 sm:$0xff]  }
 0x3ba   :  { %v2115_v17 = vmul.f32 %v8494_v12, %v2075_v14  ;;  %v2167_v49 = vsel %vm1293_vm1, %v2166_v4, %v2165_v43  ;;  %v2170_v26 = vrot.slane %v2160_v46, 4  ;;  %v10892_v39 = vld [vmem:[%s13435_s2 + $0x84] ss:$16 sps:$4 sm:$0xff]   ;;  %v10898_v50 = vld [vmem:[%s13435_s2 + $0x8c] ss:$16 sps:$4 sm:$0xff]  }
 0x3bb   :  { %v2162_v29 = vunpack.c.l.b16 %v2146_v16  ;;  %v2169_v25 = vsel %vm1296_vm2, %v2168_v40, %v2167_v49  ;;  %v2172_v52 = vrot.slane %v2161_v24, 3  ;;  %v10904_v0 = vld [vmem:[%s13435_s2 + $0x80] ss:$16 sps:$4 sm:$0xff]   ;;  %v10910_v59 = vld [vmem:[%s13435_s2 + $0x88] ss:$16 sps:$4 sm:$0xff]  }
 0x3bc   :  { %2123 = vst [vmem:[#allocation5 + $0x72] sm:$0x1] %v2115_v17  ;;  %v2147_v51 = vpack.c.bf16 %v2115_v17, %v2115_v17  ;;  %v2171_v42 = vsel %vm1299_vm3, %v2170_v26, %v2169_v25  ;;  %13595 = vst [vmem:[#allocation7_spill] sm:$0xff] %v10904_v0  ;;  %v10916_v23 = vld [vmem:[%s13435_s2 + $0xa4] ss:$16 sps:$4 sm:$0xff]  }
 0x3bd   :  { %v2173_v58 = vsel %vm1302_vm4, %v2172_v52, %v2171_v42  ;;  %v2174_v27 = vrot.slane %v2162_v29, 2  ;;  %13596 = vst [vmem:[#allocation8_spill] sm:$0xff] %v10910_v59  ;;  %13597 = vst [vmem:[#allocation9_spill] sm:$0xff] %v10916_v23  ;;  %v10922_v7 = vld [vmem:[%s13435_s2 + $0xac] ss:$16 sps:$4 sm:$0xff]  }
 0x3be   :  { %v2163_v38 = vunpack.c.l.b16 %v2147_v51  ;;  %13598 = vst [vmem:[#allocation10_spill] sm:$0xff] %v10922_v7  ;;  %v10928_v6 = vld [vmem:[%s13435_s2 + $0xa0] ss:$16 sps:$4 sm:$0xff]   ;;  %v10934_v62 = vld [vmem:[%s13435_s2 + $0xa8] ss:$16 sps:$4 sm:$0xff]  }
 0x3bf   :  { %v2175_v21 = vsel %vm1305_vm5, %v2174_v27, %v2173_v58  ;;  %13599 = vst [vmem:[#allocation11_spill] sm:$0xff] %v10928_v6  ;;  %13600 = vst [vmem:[#allocation12_spill] sm:$0xff] %v10934_v62  ;;  %v10940_v56 = vld [vmem:[%s13435_s2 + $0xc4] ss:$16 sps:$4 sm:$0xff]   ;;  %v10946_v9 = vld [vmem:[%s13435_s2 + $0xcc] ss:$16 sps:$4 sm:$0xff]  }
 0x3c0   :  { %v2176_v22 = vrot.slane %v2163_v38, 1  ;;  %13601 = vst [vmem:[#allocation13_spill] sm:$0xff] %v10940_v56  ;;  %13602 = vst [vmem:[#allocation14_spill] sm:$0xff] %v10946_v9  ;;  %v10952_v36 = vld [vmem:[%s13435_s2 + $0xc0] ss:$16 sps:$4 sm:$0xff]  }
 0x3c1   :  { %13603 = vst [vmem:[#allocation15_spill] sm:$0xff] %v10952_v36  ;;  %v10958_v60 = vld [vmem:[%s13435_s2 + $0xc8] ss:$16 sps:$4 sm:$0xff]   ;;  %v10964_v2 = vld [vmem:[%s13435_s2 + $0xe4] ss:$16 sps:$4 sm:$0xff]  }
 0x3c2   :  { %v2177_v47 = vsel %vm1308_vm6, %v2176_v22, %v2175_v21  ;;  %13604 = vst [vmem:[#allocation16_spill] sm:$0xff] %v10958_v60  ;;  %13605 = vst [vmem:[#allocation17_spill] sm:$0xff] %v10964_v2  ;;  %v10970_v12 = vld [vmem:[%s13435_s2 + $0xec] ss:$16 sps:$4 sm:$0xff]   ;;  %v10976_v8 = vld [vmem:[%s13435_s2 + $0xe0] ss:$16 sps:$4 sm:$0xff]  }
 0x3c3   :  { %v2178_v54 = vpack.c.b16 %v2177_v47, %v2177_v47  ;;  %13606 = vst [vmem:[#allocation18_spill] sm:$0xff] %v10970_v12  ;;  %13607 = vst [vmem:[#allocation19_spill] sm:$0xff] %v10976_v8  ;;  %v10982_v63 = vld [vmem:[%s13435_s2 + $0xe8] ss:$16 sps:$4 sm:$0xff]   ;;  %v10988_v3 = vld [vmem:[%s13435_s2 + $0x4] ss:$16 sps:$4 sm:$0xff]  }
 0x3c4   :  { %13608 = vst [vmem:[#allocation20_spill] sm:$0xff] %v10982_v63  ;;  %13609 = vst [vmem:[#allocation21_spill] sm:$0xff] %v10988_v3  ;;  %v10994_v37 = vld [vmem:[%s13435_s2 + $0xc] ss:$16 sps:$4 sm:$0xff]  }
 0x3c5   :  { %2213 = vmatmul.mubr.bf16.vlgmr.msra.gmra.mrb[44].mxu0 %v2178_v54  ;;  %2254 = vmatmul.mubr.bf16.vlgmr.msra.gmra.mrb[44].mxu1 %v2178_v54  ;;  %13610 = vst [vmem:[#allocation22_spill] sm:$0xff] %v10994_v37 }
 0x3c6   :  { %2615 = vmatpush1.bf16.msra.mxu0 %v10806_v61  ;;  %2656 = vmatpush1.bf16.msra.mxu1 %v10812_v48 }
 0x3c7   :  { %2616 = vmatprep.subr.bf16.mxu0 %v10818_v30  ;;  %2657 = vmatprep.subr.bf16.mxu1 %v10824_v55 }
 0x3c8   :  { %2646 = vmatprep.mubr.bf16.mxu0 %v13578_v41  ;;  %2687 = vmatprep.mubr.bf16.mxu1 %v13578_v41 }
 0x3ca   :  { %2617 = vmatpush1.bf16.msra.mxu0 %v10832_v11  ;;  %2658 = vmatpush1.bf16.msra.mxu1 %v10838_v53 }
 0x3cb   :  { %2618 = vmatprep.subr.bf16.mxu0 %v10844_v33  ;;  %2659 = vmatprep.subr.bf16.mxu1 %v10850_v18 }
 0x3ce   :  { %2619 = vmatpush1.bf16.msra.mxu0 %v10856_v10  ;;  %2660 = vmatpush1.bf16.msra.mxu1 %v10862_v31 }
 0x3cf   :  { %2620 = vmatprep.subr.bf16.mxu0 %v10868_v35  ;;  %2661 = vmatprep.subr.bf16.mxu1 %v10874_v20 }
 0x3d2   :  { %2621 = vmatpush1.bf16.msra.mxu0 %v10880_v13  ;;  %2662 = vmatpush1.bf16.msra.mxu1 %v10886_v45 }
 0x3d3   :  { %2622 = vmatprep.subr.bf16.mxu0 %v10892_v39  ;;  %2663 = vmatprep.subr.bf16.mxu1 %v10898_v50 }
 0x3d6   :  { %2623 = vmatpush1.bf16.msra.mxu0 %v10904_v0  ;;  %2664 = vmatpush1.bf16.msra.mxu1 %v10910_v59 }
 0x3d7   :  { %2624 = vmatprep.subr.bf16.mxu0 %v10916_v23  ;;  %2665 = vmatprep.subr.bf16.mxu1 %v10922_v7 }
 0x3da   :  { %2625 = vmatpush1.bf16.msra.mxu0 %v10928_v6  ;;  %2666 = vmatpush1.bf16.msra.mxu1 %v10934_v62 }
 0x3db   :  { %2626 = vmatprep.subr.bf16.mxu0 %v10940_v56  ;;  %2667 = vmatprep.subr.bf16.mxu1 %v10946_v9 }
 0x3de   :  { %2627 = vmatpush1.bf16.msra.mxu0 %v10952_v36  ;;  %2668 = vmatpush1.bf16.msra.mxu1 %v10958_v60 }
 0x3df   :  { %2628 = vmatprep.subr.bf16.mxu0 %v10964_v2  ;;  %2669 = vmatprep.subr.bf16.mxu1 %v10970_v12 }
 0x3e2   :  { %2629 = vmatpush1.bf16.msra.mxu0 %v10976_v8  ;;  %2670 = vmatpush1.bf16.msra.mxu1 %v10982_v63 }
 0x3e3   :  { %3048 = vmatprep.subr.bf16.mxu0 %v10988_v3  ;;  %3089 = vmatprep.subr.bf16.mxu1 %v10994_v37 }
 0x498   :  { %v2214_v14 = vpop.f32.mrb[44].mxu0  ;;  %v2255_v46 = vpop.f32.mrb[44].mxu1 }
 0x499   :  { %v2216_v4 = vpop.f32.mrb[45].mxu0  ;;  %v2257_v16 = vpop.f32.mrb[45].mxu1 }
 0x49a   :  { %v2266_v24 = vcombine.low %v2214_v14, %v2216_v4  ;;  %v2267_v43 = vcombine.high %v2214_v14, %v2216_v4  ;;  %v2268_v40 = vcombine.low %v2255_v46, %v2257_v16  ;;  %v2269_v17 = vcombine.high %v2255_v46, %v2257_v16  ;;  %v2218_v49 = vpop.f32.mrb[46].mxu0  ;;  %v2259_v26 = vpop.f32.mrb[46].mxu1  ;;  %v2125_v4 = vld [vmem:[#allocation4 + $0x3] ss:$8 sm:$0xf] }
 0x49b   :  { %v2219_v29 = vpop.f32.mrb[47].mxu0  ;;  %v2260_v25 = vpop.f32.mrb[47].mxu1  ;;  %v2127_v16 = vld [vmem:[#allocation4 + $0x43] ss:$8 sm:$0xf] }
 0x49c   :  { %v2276_v52 = vrot.slane %v2266_v24, %v13594_v28  ;;  %v2283_v51 = vrot.slane %v2267_v43, %v13594_v28  ;;  %v2290_v42 = vrot.slane %v2268_v40, %v13594_v28  ;;  %v2297_v58 = vrot.slane %v2269_v17, %v13594_v28  ;;  %v2129_v24 = vld [vmem:[#allocation4 + $0x83] ss:$8 sm:$0xf] }
 0x49d   :  { %v2133_v43 = vld [vmem:[#allocation4 + $0x103] ss:$8 sm:$0xf] }
 0x49e   :  { %v2298_v27 = vcombine.low %v2276_v52, %v2290_v42  ;;  %v2299_v38 = vcombine.high %v2276_v52, %v2290_v42  ;;  %v2300_v21 = vcombine.low %v2283_v51, %v2297_v58  ;;  %v2301_v22 = vcombine.high %v2283_v51, %v2297_v58  ;;  %v2131_v29 = vld [vmem:[#allocation4 + $0xc3] ss:$8 sm:$0xf] }
 0x49f   :  { %v2135_v25 = vld [vmem:[#allocation4 + $0x143] ss:$8 sm:$0xf] }
 0x4a0   :  { %v2308_v47 = vrot.slane %v2298_v27, %v13594_v28  ;;  %v2315_v54 = vrot.slane %v2300_v21, %v13594_v28  ;;  %v2322_v14 = vrot.slane %v2299_v38, %v13594_v28  ;;  %v2329_v46 = vrot.slane %v2301_v22, %v13594_v28  ;;  %v2137_v58 = vld [vmem:[#allocation4 + $0x183] ss:$8 sm:$0xf] }
 0x4a1   :  { %v2139_v27 = vld [vmem:[#allocation4 + $0x1c3] ss:$8 sm:$0xf] }
 0x4a2   :  { %v2330_v49 = vcombine.high %v2308_v47, %v2308_v47  ;;  %v2331_v40 = vcombine.high %v2315_v54, %v2315_v54  ;;  %v2332_v26 = vcombine.high %v2322_v14, %v2322_v14  ;;  %v2333_v17 = vcombine.high %v2329_v46, %v2329_v46 }
 0x4a3   :  { %v11005_v52 = vadd.f32 %v2308_v47, %v2125_v4  ;;  %v11007_v51 = vadd.f32 %v2322_v14, %v2127_v16  ;;  %v11009_v42 = vadd.f32 %v2315_v54, %v2133_v43  ;;  %v11015_v22 = vadd.f32 %v2329_v46, %v2135_v25 }
 0x4a4   :  { %v11011_v38 = vadd.f32 %v2330_v49, %v2129_v24  ;;  %v11013_v21 = vadd.f32 %v2332_v26, %v2131_v29  ;;  %v11017_v28 = vadd.f32 %v2331_v40, %v2137_v58  ;;  %v11019_v37 = vadd.f32 %v2333_v17, %v2139_v27 }
 0x4a5   :  { %v2350_v3 = vmul.f32 0.5, %v11005_v52  ;;  %v2351_v47 = vmul.f32 0.5, %v11007_v51  ;;  %v2354_v4 = vmul.f32 0.5, %v11009_v42  ;;  %v2390_v16 = vrot.slane %v11005_v52, 1 }
 0x4a6   :  { %v2352_v14 = vmul.f32 0.5, %v11011_v38  ;;  %v2353_v54 = vmul.f32 0.5, %v11013_v21  ;;  %v2355_v46 = vmul.f32 0.5, %v11015_v22  ;;  %v2391_v24 = vrot.slane %v11007_v51, 1 }
 0x4a7   :  { %8495 = vtanh.f32 %v2350_v3  ;;  %v2356_v43 = vmul.f32 0.5, %v11017_v28  ;;  %v2357_v49 = vmul.f32 0.5, %v11019_v37  ;;  %v2392_v40 = vrot.slane %v11011_v38, 1 }
 0x4a8   :  { %8497 = vtanh.f32 %v2351_v47  ;;  %v2393_v26 = vrot.slane %v11013_v21, 1  ;;  %v2394_v17 = vrot.slane %v11009_v42, 1  ;;  %v2395_v3 = vrot.slane %v11015_v22, 1 }
 0x4a9   :  { %8499 = vtanh.f32 %v2352_v14  ;;  %v2396_v29 = vrot.slane %v11017_v28, 1  ;;  %v2397_v25 = vrot.slane %v11019_v37, 1  ;;  %v2406_v58 = vmul.f32 0.5, %v2390_v16 }
 0x4aa   :  { %8501 = vtanh.f32 %v2353_v54  ;;  %v2407_v27 = vmul.f32 0.5, %v2391_v24  ;;  %v2408_v47 = vmul.f32 0.5, %v2392_v40  ;;  %v2409_v14 = vmul.f32 0.5, %v2393_v26 }
 0x4ab   :  { %8503 = vtanh.f32 %v2354_v4  ;;  %v2410_v63 = vmul.f32 0.5, %v2394_v17  ;;  %v2411_v54 = vmul.f32 0.5, %v2395_v3  ;;  %v2412_v8 = vmul.f32 0.5, %v2396_v29 }
 0x4ac   :  { %8505 = vtanh.f32 %v2355_v46  ;;  %v2413_v12 = vmul.f32 0.5, %v2397_v25  ;;  %v2438_v2 = vrot.slane %v11005_v52, 2  ;;  %v2439_v4 = vrot.slane %v11007_v51, 2 }
 0x4ad   :  { %8507 = vtanh.f32 %v2356_v43  ;;  %v2440_v60 = vrot.slane %v11011_v38, 2  ;;  %v2441_v16 = vrot.slane %v11013_v21, 2  ;;  %v2442_v24 = vrot.slane %v11009_v42, 2 }
 0x4ae   :  { %8509 = vtanh.f32 %v2357_v49  ;;  %v2443_v43 = vrot.slane %v11015_v22, 2  ;;  %v2462_v49 = vrot.slane %v11005_v52, 3  ;;  %v2444_v26 = vrot.slane %v11017_v28, 2 }
 0x4af   :  { %8511 = vtanh.f32 %v2406_v58  ;;  %v2463_v17 = vrot.slane %v11007_v51, 3  ;;  %v2464_v3 = vrot.slane %v11011_v38, 3  ;;  %v2445_v25 = vrot.slane %v11019_v37, 2 }
 0x4b0   :  { %8513 = vtanh.f32 %v2407_v27  ;;  %v2465_v58 = vrot.slane %v11013_v21, 3  ;;  %v2466_v27 = vrot.slane %v11009_v42, 3  ;;  %v2467_v52 = vrot.slane %v11015_v22, 3 }
 0x4b1   :  { %v8496_v46 = vpop.eup %8495  ;;  %8515 = vtanh.f32 %v2408_v47  ;;  %v2478_v38 = vmul.f32 0.5, %v2462_v49  ;;  %v2479_v6 = vmul.f32 0.5, %v2463_v17  ;;  %v2480_v21 = vmul.f32 0.5, %v2464_v3 }
 0x4b2   :  { %v8498_v40 = vpop.eup %8497  ;;  %8517 = vtanh.f32 %v2409_v14  ;;  %v2366_v36 = vadd.f32 1.0, %v8496_v46  ;;  %v2468_v14 = vrot.slane %v11017_v28, 3  ;;  %v2481_v46 = vmul.f32 0.5, %v2465_v58 }
 0x4b3   :  { %v8500_v29 = vpop.eup %8499  ;;  %8519 = vtanh.f32 %v2410_v63  ;;  %v2367_v56 = vadd.f32 1.0, %v8498_v40  ;;  %v2483_v28 = vmul.f32 0.5, %v2467_v52 }
 0x4b4   :  { %v8502_v47 = vpop.eup %8501  ;;  %8521 = vtanh.f32 %v2411_v54  ;;  %v2368_v62 = vadd.f32 1.0, %v8500_v29  ;;  %v2482_v54 = vmul.f32 0.5, %v2466_v27  ;;  %v2374_v59 = vmul.f32 0.5, %v2366_v36 }
 0x4b5   :  { %v8504_v9 = vpop.eup %8503  ;;  %8523 = vtanh.f32 %v2412_v8  ;;  %v2369_v42 = vadd.f32 1.0, %v8502_v47  ;;  %v2375_v0 = vmul.f32 0.5, %v2367_v56  ;;  %v2484_v49 = vmul.f32 0.5, %v2468_v14 }
 0x4b6   :  { %v8506_v63 = vpop.eup %8505  ;;  %8525 = vtanh.f32 %v2413_v12  ;;  %v2370_v22 = vadd.f32 1.0, %v8504_v9  ;;  %v2376_v12 = vmul.f32 0.5, %v2368_v62 }
 0x4b7   :  { %v8508_v7 = vpop.eup %8507  ;;  %8527 = vtanh.f32 %v2438_v2  ;;  %v2371_v8 = vadd.f32 1.0, %v8506_v63  ;;  %v2377_v2 = vmul.f32 0.5, %v2369_v42 }
 0x4b8   :  { %v8510_v23 = vpop.eup %8509  ;;  %8529 = vtanh.f32 %v2439_v4  ;;  %v2372_v29 = vadd.f32 1.0, %v8508_v7  ;;  %v2378_v9 = vmul.f32 0.5, %v2370_v22 }
 0x4b9   :  { %v8512_v40 = vpop.eup %8511  ;;  %8531 = vtanh.f32 %v2440_v60  ;;  %v2373_v47 = vadd.f32 1.0, %v8510_v23  ;;  %v2379_v63 = vmul.f32 0.5, %v2371_v8 }
 0x4ba   :  { %v8514_v51 = vpop.eup %8513  ;;  %v2422_v17 = vadd.f32 1.0, %v8512_v40  ;;  %8533 = vtanh.f32 %v2441_v16  ;;  %v2380_v7 = vmul.f32 0.5, %v2372_v29 }
 0x4bb   :  { %v8516_v3 = vpop.eup %8515  ;;  %v2423_v58 = vadd.f32 1.0, %v8514_v51  ;;  %8535 = vtanh.f32 %v2442_v24  ;;  %v2381_v23 = vmul.f32 0.5, %v2373_v47 }
 0x4bc   :  { %v8518_v27 = vpop.eup %8517  ;;  %v2424_v36 = vadd.f32 1.0, %v8516_v3  ;;  %v2430_v4 = vmul.f32 0.5, %v2422_v17  ;;  %8537 = vtanh.f32 %v2443_v43 }
 0x4bd   :  { %v8520_v52 = vpop.eup %8519  ;;  %v2425_v56 = vadd.f32 1.0, %v8518_v27  ;;  %v2431_v60 = vmul.f32 0.5, %v2423_v58  ;;  %8539 = vtanh.f32 %v2444_v26 }
 0x4be   :  { %v8522_v14 = vpop.eup %8521  ;;  %v2426_v62 = vadd.f32 1.0, %v8520_v52  ;;  %v2432_v40 = vmul.f32 0.5, %v2424_v36  ;;  %8541 = vtanh.f32 %v2445_v25  ;;  %v2510_v43 = vmul.f32 %v2430_v4, %v10767_v57 }
 0x4bf   :  { %v8524_v16 = vpop.eup %8523  ;;  %v2427_v42 = vadd.f32 1.0, %v8522_v14  ;;  %v2433_v51 = vmul.f32 0.5, %v2425_v56  ;;  %8543 = vtanh.f32 %v2478_v38  ;;  %v2511_v26 = vmul.f32 %v2431_v60, %v10770_v19 }
 0x4c0   :  { %v8526_v24 = vpop.eup %8525  ;;  %v2428_v22 = vadd.f32 1.0, %v8524_v16  ;;  %v2434_v3 = vmul.f32 0.5, %v2426_v62  ;;  %8545 = vtanh.f32 %v2479_v6  ;;  %v2512_v25 = vmul.f32 %v2432_v40, %v10773_v34 }
 0x4c1   :  { %v8528_v8 = vpop.eup %8527  ;;  %v2429_v17 = vadd.f32 1.0, %v8526_v24  ;;  %v2435_v58 = vmul.f32 0.5, %v2427_v42  ;;  %8547 = vtanh.f32 %v2480_v21  ;;  %v2513_v52 = vmul.f32 %v2433_v51, %v10777_v15 }
 0x4c2   :  { %v8530_v29 = vpop.eup %8529  ;;  %v2436_v27 = vmul.f32 0.5, %v2428_v22  ;;  %8549 = vtanh.f32 %v2481_v46  ;;  %v2518_v47 = vmul.f32 %v8528_v8, %v2374_v59  ;;  %v2514_v57 = vmul.f32 %v2434_v3, %v10782_v1 }
 0x4c3   :  { %v8532_v36 = vpop.eup %8531  ;;  %v2437_v38 = vmul.f32 0.5, %v2429_v17  ;;  %8551 = vtanh.f32 %v2482_v54  ;;  %v2519_v6 = vmul.f32 %v8530_v29, %v2375_v0  ;;  %v2515_v46 = vmul.f32 %v2435_v58, %v10785_v44 }
 0x4c4   :  { %v8534_v56 = vpop.eup %8533  ;;  %8553 = vtanh.f32 %v2483_v28  ;;  %v2520_v4 = vmul.f32 %v8532_v36, %v2376_v12  ;;  %v11058_v21 = vadd.f32 %v2518_v47, %v2510_v43  ;;  %v2516_v54 = vmul.f32 %v2436_v27, %v10788_v32 }
 0x4c5   :  { %v8536_v19 = vpop.eup %8535  ;;  %8555 = vtanh.f32 %v2484_v49  ;;  %v2521_v60 = vmul.f32 %v8534_v56, %v2377_v2  ;;  %v11061_v34 = vadd.f32 %v2519_v6, %v2511_v26  ;;  %v2517_v1 = vmul.f32 %v2437_v38, %v10791_v5 }
 0x4c6   :  { %v8538_v59 = vpop.eup %8537  ;;  %v2522_v14 = vmul.f32 %v8536_v19, %v2378_v9  ;;  %v11064_v15 = vadd.f32 %v2520_v4, %v2512_v25  ;;  %8557 = vtanh.f32 %v11058_v21  ;;  %v13611_v49 = vrot.slane %v11019_v37, 3 }
 0x4c7   :  { %v8540_v0 = vpop.eup %8539  ;;  %v2523_v28 = vmul.f32 %v8538_v59, %v2379_v63  ;;  %v11068_v12 = vadd.f32 %v2521_v60, %v2513_v52  ;;  %8559 = vtanh.f32 %v11061_v34 }
 0x4c8   :  { %v8542_v44 = vpop.eup %8541  ;;  %v2485_v2 = vmul.f32 0.5, %v13611_v49  ;;  %v2524_v62 = vmul.f32 %v8540_v0, %v2380_v7  ;;  %v11073_v40 = vadd.f32 %v2522_v14, %v2514_v57  ;;  %8561 = vtanh.f32 %v11064_v15 }
 0x4c9   :  { %v8544_v32 = vpop.eup %8543  ;;  %v2525_v9 = vmul.f32 %v8542_v44, %v2381_v23  ;;  %v11076_v16 = vadd.f32 %v2523_v28, %v2515_v46  ;;  %8563 = vtanh.f32 %v11068_v12 }
 0x4ca   :  { %v8546_v5 = vpop.eup %8545  ;;  %v11079_v63 = vadd.f32 %v2524_v62, %v2516_v54  ;;  %8565 = vtanh.f32 %v11073_v40  ;;  %v2494_v51 = vadd.f32 1.0, %v8544_v32 }
 0x4cb   :  { %v8548_v42 = vpop.eup %8547  ;;  %v11082_v37 = vadd.f32 %v2525_v9, %v2517_v1  ;;  %8567 = vtanh.f32 %v11076_v16  ;;  %v2495_v24 = vadd.f32 1.0, %v8546_v5 }
 0x4cc   :  { %v8550_v7 = vpop.eup %8549  ;;  %8569 = vtanh.f32 %v2485_v2  ;;  %v2496_v23 = vadd.f32 1.0, %v8548_v42  ;;  %v2502_v58 = vmul.f32 0.5, %v2494_v51 }
 0x4cd   :  { %v8552_v22 = vpop.eup %8551  ;;  %8571 = vtanh.f32 %v11079_v63  ;;  %v2497_v43 = vadd.f32 1.0, %v8550_v7  ;;  %v2503_v27 = vmul.f32 0.5, %v2495_v24 }
 0x4ce   :  { %v8554_v3 = vpop.eup %8553  ;;  %8573 = vtanh.f32 %v11082_v37  ;;  %v2498_v17 = vadd.f32 1.0, %v8552_v22  ;;  %v2504_v47 = vmul.f32 0.5, %v2496_v23 }
 0x4cf   :  { %v8556_v8 = vpop.eup %8555  ;;  %v2499_v29 = vadd.f32 1.0, %v8554_v3  ;;  %v2505_v52 = vmul.f32 0.5, %v2497_v43 }
 0x4d0   :  { %v8558_v26 = vpop.eup %8557  ;;  %v2500_v56 = vadd.f32 1.0, %v8556_v8  ;;  %v2506_v4 = vmul.f32 0.5, %v2498_v17 }
 0x4d1   :  { %v8560_v25 = vpop.eup %8559  ;;  %v2542_v36 = vmul.f32 %v8558_v26, %v2502_v58  ;;  %v2507_v54 = vmul.f32 0.5, %v2499_v29 }
 0x4d2   :  { %v8562_v38 = vpop.eup %8561  ;;  %v2543_v6 = vmul.f32 %v8560_v25, %v2503_v27  ;;  %v2508_v49 = vmul.f32 0.5, %v2500_v56 }
 0x4d3   :  { %v8564_v57 = vpop.eup %8563  ;;  %v2544_v19 = vmul.f32 %v8562_v38, %v2504_v47  ;;  %2550 = vst [vmem:[#allocation5 + $0x3] sm:$0x1] %v2542_v36  ;;  %v2574_v46 = vpack.c.bf16 %v2542_v36, %v2542_v36 }
 0x4d4   :  { %v8566_v60 = vpop.eup %8565  ;;  %2551 = vst [vmem:[#allocation5 + $0x13] sm:$0x1] %v2543_v6  ;;  %v2575_v59 = vpack.c.bf16 %v2543_v6, %v2543_v6  ;;  %v2545_v14 = vmul.f32 %v8564_v57, %v2505_v52 }
 0x4d5   :  { %v8568_v0 = vpop.eup %8567  ;;  %2552 = vst [vmem:[#allocation5 + $0x23] sm:$0x1] %v2544_v19  ;;  %v2546_v1 = vmul.f32 %v8566_v60, %v2506_v4  ;;  %v2576_v28 = vpack.c.bf16 %v2544_v19, %v2544_v19  ;;  %v2590_v51 = vunpack.c.l.b16 %v2574_v46 }
 0x4d6   :  { %v8570_v44 = vpop.eup %8569  ;;  %v2547_v2 = vmul.f32 %v8568_v0, %v2507_v54  ;;  %2553 = vst [vmem:[#allocation5 + $0x33] sm:$0x1] %v2545_v14  ;;  %v2577_v62 = vpack.c.bf16 %v2545_v14, %v2545_v14  ;;  %v2591_v32 = vunpack.c.l.b16 %v2575_v59 }
 0x4d7   :  { %v8572_v9 = vpop.eup %8571  ;;  %v2501_v5 = vadd.f32 1.0, %v8570_v44  ;;  %2554 = vst [vmem:[#allocation5 + $0x43] sm:$0x1] %v2546_v1  ;;  %v2578_v42 = vpack.c.bf16 %v2546_v1, %v2546_v1  ;;  %v2592_v7 = vunpack.c.l.b16 %v2576_v28 }
 0x4d8   :  { %v8574_v24 = vpop.eup %8573  ;;  %v2548_v22 = vmul.f32 %v8572_v9, %v2508_v49  ;;  %2555 = vst [vmem:[#allocation5 + $0x53] sm:$0x1] %v2547_v2  ;;  %v2579_v23 = vpack.c.bf16 %v2547_v2, %v2547_v2  ;;  %v2593_v3 = vunpack.c.l.b16 %v2577_v62  ;;  %v2598_v43 = vrot.slane %v2591_v32, 7 }
 0x4d9   :  { %v2509_v8 = vmul.f32 0.5, %v2501_v5  ;;  %v2594_v17 = vunpack.c.l.b16 %v2578_v42  ;;  %v2600_v58 = vrot.slane %v2592_v7, 6 }
 0x4da   :  { %2556 = vst [vmem:[#allocation5 + $0x63] sm:$0x1] %v2548_v22  ;;  %v2580_v26 = vpack.c.bf16 %v2548_v22, %v2548_v22  ;;  %v2595_v29 = vunpack.c.l.b16 %v2579_v23  ;;  %v2599_v27 = vsel %vm1290_vm0, %v2598_v43, %v2590_v51  ;;  %v2602_v25 = vrot.slane %v2593_v3, 5 }
 0x4db   :  { %v2549_v47 = vmul.f32 %v8574_v24, %v2509_v8  ;;  %v2601_v36 = vsel %vm1293_vm1, %v2600_v58, %v2599_v27  ;;  %v2604_v38 = vrot.slane %v2594_v17, 4  ;;  %v13628_v24 = vld [vmem:[#allocation6_spill] sm:$0xff] }
 0x4dc   :  { %v2596_v52 = vunpack.c.l.b16 %v2580_v26  ;;  %v2603_v6 = vsel %vm1296_vm2, %v2602_v25, %v2601_v36  ;;  %v2606_v56 = vrot.slane %v2595_v29, 3  ;;  %v2559_v36 = vld [vmem:[#allocation4 + $0x4] ss:$8 sm:$0xf] }
 0x4dd   :  { %2557 = vst [vmem:[#allocation5 + $0x73] sm:$0x1] %v2549_v47  ;;  %v2581_v57 = vpack.c.bf16 %v2549_v47, %v2549_v47  ;;  %v2605_v4 = vsel %vm1299_vm3, %v2604_v38, %v2603_v6  ;;  %v2561_v38 = vld [vmem:[#allocation4 + $0x44] ss:$8 sm:$0xf] }
 0x4de   :  { %v2607_v19 = vsel %vm1302_vm4, %v2606_v56, %v2605_v4  ;;  %v2608_v46 = vrot.slane %v2596_v52, 2  ;;  %v2563_v52 = vld [vmem:[#allocation4 + $0x84] ss:$8 sm:$0xf] }
 0x4df   :  { %v2597_v60 = vunpack.c.l.b16 %v2581_v57  ;;  %v2567_v6 = vld [vmem:[#allocation4 + $0x104] ss:$8 sm:$0xf] }
 0x4e0   :  { %v2609_v59 = vsel %vm1305_vm5, %v2608_v46, %v2607_v19  ;;  %v2565_v46 = vld [vmem:[#allocation4 + $0xc4] ss:$8 sm:$0xf] }
 0x4e1   :  { %v2610_v54 = vrot.slane %v2597_v60, 1  ;;  %v2569_v60 = vld [vmem:[#allocation4 + $0x144] ss:$8 sm:$0xf] }
 0x4e3   :  { %v2611_v14 = vsel %vm1308_vm6, %v2610_v54, %v2609_v59 }
 0x4e4   :  { %v2612_v0 = vpack.c.b16 %v2611_v14, %v2611_v14 }
 0x4e6   :  { %2647 = vmatmul.mubr.bf16.vlgmr.msra.gmra.mrb[48].mxu0 %v2612_v0  ;;  %2688 = vmatmul.mubr.bf16.vlgmr.msra.gmra.mrb[48].mxu1 %v2612_v0  ;;  %v2571_v0 = vld [vmem:[#allocation4 + $0x184] ss:$8 sm:$0xf] }
 0x4e7   :  { %3049 = vmatpush1.bf16.msra.mxu0 %v10806_v61  ;;  %3090 = vmatpush1.bf16.msra.mxu1 %v10812_v48  ;;  %v13612_v61 = vld [vmem:[#allocation7_spill] sm:$0xff]  ;;  %v13613_v48 = vld [vmem:[#allocation8_spill] sm:$0xff] }
 0x4e8   :  { %3050 = vmatprep.subr.bf16.mxu0 %v10818_v30  ;;  %3091 = vmatprep.subr.bf16.mxu1 %v10824_v55  ;;  %v13614_v30 = vld [vmem:[#allocation9_spill] sm:$0xff]  ;;  %v13615_v55 = vld [vmem:[#allocation10_spill] sm:$0xff] }
 0x4e9   :  { %3080 = vmatprep.mubr.bf16.mxu0 %v13578_v41  ;;  %3121 = vmatprep.mubr.bf16.mxu1 %v13578_v41 }
 0x4eb   :  { %3051 = vmatpush1.bf16.msra.mxu0 %v10832_v11  ;;  %3092 = vmatpush1.bf16.msra.mxu1 %v10838_v53  ;;  %v13616_v11 = vld [vmem:[#allocation11_spill] sm:$0xff]  ;;  %v13617_v53 = vld [vmem:[#allocation12_spill] sm:$0xff] }
 0x4ec   :  { %3052 = vmatprep.subr.bf16.mxu0 %v10844_v33  ;;  %3093 = vmatprep.subr.bf16.mxu1 %v10850_v18  ;;  %v13618_v33 = vld [vmem:[#allocation13_spill] sm:$0xff]  ;;  %v13619_v18 = vld [vmem:[#allocation14_spill] sm:$0xff] }
 0x4ef   :  { %3053 = vmatpush1.bf16.msra.mxu0 %v10856_v10  ;;  %3094 = vmatpush1.bf16.msra.mxu1 %v10862_v31  ;;  %v13620_v10 = vld [vmem:[#allocation15_spill] sm:$0xff]  ;;  %v13621_v31 = vld [vmem:[#allocation16_spill] sm:$0xff] }
 0x4f0   :  { %3054 = vmatprep.subr.bf16.mxu0 %v10868_v35  ;;  %3095 = vmatprep.subr.bf16.mxu1 %v10874_v20  ;;  %v13622_v35 = vld [vmem:[#allocation17_spill] sm:$0xff]  ;;  %v13623_v20 = vld [vmem:[#allocation18_spill] sm:$0xff] }
 0x4f3   :  { %3055 = vmatpush1.bf16.msra.mxu0 %v10880_v13  ;;  %3096 = vmatpush1.bf16.msra.mxu1 %v10886_v45  ;;  %v13624_v13 = vld [vmem:[#allocation19_spill] sm:$0xff]  ;;  %v13625_v45 = vld [vmem:[#allocation20_spill] sm:$0xff] }
 0x4f4   :  { %3056 = vmatprep.subr.bf16.mxu0 %v10892_v39  ;;  %3097 = vmatprep.subr.bf16.mxu1 %v10898_v50  ;;  %v13626_v39 = vld [vmem:[#allocation21_spill] sm:$0xff]  ;;  %v13627_v50 = vld [vmem:[#allocation22_spill] sm:$0xff] }
 0x4f7   :  { %3057 = vmatpush1.bf16.msra.mxu0 %v13612_v61  ;;  %3098 = vmatpush1.bf16.msra.mxu1 %v13613_v48  ;;  %v2573_v61 = vld [vmem:[#allocation4 + $0x1c4] ss:$8 sm:$0xf] }
 0x4f8   :  { %3058 = vmatprep.subr.bf16.mxu0 %v13614_v30  ;;  %3099 = vmatprep.subr.bf16.mxu1 %v13615_v55 }
 0x4fb   :  { %3059 = vmatpush1.bf16.msra.mxu0 %v13616_v11  ;;  %3100 = vmatpush1.bf16.msra.mxu1 %v13617_v53 }
 0x4fc   :  { %3060 = vmatprep.subr.bf16.mxu0 %v13618_v33  ;;  %3101 = vmatprep.subr.bf16.mxu1 %v13619_v18 }
 0x4ff   :  { %3061 = vmatpush1.bf16.msra.mxu0 %v13620_v10  ;;  %3102 = vmatpush1.bf16.msra.mxu1 %v13621_v31 }
 0x500   :  { %3062 = vmatprep.subr.bf16.mxu0 %v13622_v35  ;;  %3103 = vmatprep.subr.bf16.mxu1 %v13623_v20 }
 0x503   :  { %3063 = vmatpush1.bf16.msra.mxu0 %v13624_v13  ;;  %3104 = vmatpush1.bf16.msra.mxu1 %v13625_v45 }
 0x504   :  { %3482 = vmatprep.subr.bf16.mxu0 %v13626_v39  ;;  %3523 = vmatprep.subr.bf16.mxu1 %v13627_v50 }
 0x5b9   :  { %v2648_v1 = vpop.f32.mrb[48].mxu0  ;;  %v2689_v28 = vpop.f32.mrb[48].mxu1 }
 0x5ba   :  { %v2650_v44 = vpop.f32.mrb[49].mxu0  ;;  %v2691_v49 = vpop.f32.mrb[49].mxu1 }
 0x5bb   :  { %v2700_v2 = vcombine.low %v2648_v1, %v2650_v44  ;;  %v2701_v62 = vcombine.high %v2648_v1, %v2650_v44  ;;  %v2702_v32 = vcombine.low %v2689_v28, %v2691_v49  ;;  %v2703_v9 = vcombine.high %v2689_v28, %v2691_v49  ;;  %v2652_v5 = vpop.f32.mrb[50].mxu0  ;;  %v2693_v42 = vpop.f32.mrb[50].mxu1 }
 0x5bc   :  { %v2653_v51 = vpop.f32.mrb[51].mxu0  ;;  %v2694_v7 = vpop.f32.mrb[51].mxu1 }
 0x5bd   :  { %v2710_v22 = vrot.slane %v2700_v2, %v13628_v24  ;;  %v2717_v23 = vrot.slane %v2701_v62, %v13628_v24  ;;  %v2724_v3 = vrot.slane %v2702_v32, %v13628_v24  ;;  %v2731_v43 = vrot.slane %v2703_v9, %v13628_v24 }
 0x5bf   :  { %v2732_v8 = vcombine.low %v2710_v22, %v2724_v3  ;;  %v2733_v17 = vcombine.high %v2710_v22, %v2724_v3  ;;  %v2734_v58 = vcombine.low %v2717_v23, %v2731_v43  ;;  %v2735_v26 = vcombine.high %v2717_v23, %v2731_v43 }
 0x5c1   :  { %v2742_v29 = vrot.slane %v2732_v8, %v13628_v24  ;;  %v2749_v27 = vrot.slane %v2734_v58, %v13628_v24  ;;  %v2756_v25 = vrot.slane %v2733_v17, %v13628_v24  ;;  %v2763_v47 = vrot.slane %v2735_v26, %v13628_v24 }
 0x5c3   :  { %v2764_v56 = vcombine.high %v2742_v29, %v2742_v29  ;;  %v2765_v57 = vcombine.high %v2749_v27, %v2749_v27  ;;  %v2766_v4 = vcombine.high %v2756_v25, %v2756_v25  ;;  %v2767_v19 = vcombine.high %v2763_v47, %v2763_v47 }
 0x5c4   :  { %v11136_v59 = vadd.f32 %v2742_v29, %v2559_v36  ;;  %v11138_v54 = vadd.f32 %v2756_v25, %v2561_v38  ;;  %v11140_v14 = vadd.f32 %v2749_v27, %v2567_v6  ;;  %v11146_v55 = vadd.f32 %v2763_v47, %v2569_v60 }
 0x5c5   :  { %v11142_v48 = vadd.f32 %v2764_v56, %v2563_v52  ;;  %v11144_v30 = vadd.f32 %v2766_v4, %v2565_v46  ;;  %v11148_v11 = vadd.f32 %v2765_v57, %v2571_v0  ;;  %v11150_v53 = vadd.f32 %v2767_v19, %v2573_v61 }
 0x5c6   :  { %v2784_v33 = vmul.f32 0.5, %v11136_v59  ;;  %v2785_v18 = vmul.f32 0.5, %v11138_v54  ;;  %v2788_v35 = vmul.f32 0.5, %v11140_v14  ;;  %v2824_v20 = vrot.slane %v11136_v59, 1 }
 0x5c7   :  { %v2786_v10 = vmul.f32 0.5, %v11142_v48  ;;  %v2787_v31 = vmul.f32 0.5, %v11144_v30  ;;  %v2789_v13 = vmul.f32 0.5, %v11146_v55  ;;  %v2825_v45 = vrot.slane %v11138_v54, 1 }
 0x5c8   :  { %8575 = vtanh.f32 %v2784_v33  ;;  %v2790_v39 = vmul.f32 0.5, %v11148_v11  ;;  %v2791_v50 = vmul.f32 0.5, %v11150_v53  ;;  %v2826_v1 = vrot.slane %v11142_v48, 1 }
 0x5c9   :  { %8577 = vtanh.f32 %v2785_v18  ;;  %v2827_v28 = vrot.slane %v11144_v30, 1  ;;  %v2828_v44 = vrot.slane %v11140_v14, 1  ;;  %v2829_v49 = vrot.slane %v11146_v55, 1 }
 0x5ca   :  { %8579 = vtanh.f32 %v2786_v10  ;;  %v2830_v2 = vrot.slane %v11148_v11, 1  ;;  %v2831_v62 = vrot.slane %v11150_v53, 1  ;;  %v2840_v32 = vmul.f32 0.5, %v2824_v20 }
 0x5cb   :  { %8581 = vtanh.f32 %v2787_v31  ;;  %v2841_v9 = vmul.f32 0.5, %v2825_v45  ;;  %v2842_v5 = vmul.f32 0.5, %v2826_v1  ;;  %v2843_v42 = vmul.f32 0.5, %v2827_v28 }
 0x5cc   :  { %8583 = vtanh.f32 %v2788_v35  ;;  %v2844_v51 = vmul.f32 0.5, %v2828_v44  ;;  %v2845_v7 = vmul.f32 0.5, %v2829_v49  ;;  %v2846_v22 = vmul.f32 0.5, %v2830_v2 }
 0x5cd   :  { %8585 = vtanh.f32 %v2789_v13  ;;  %v2847_v23 = vmul.f32 0.5, %v2831_v62  ;;  %v2872_v3 = vrot.slane %v11136_v59, 2  ;;  %v2873_v43 = vrot.slane %v11138_v54, 2 }
 0x5ce   :  { %8587 = vtanh.f32 %v2790_v39  ;;  %v2874_v8 = vrot.slane %v11142_v48, 2  ;;  %v2875_v17 = vrot.slane %v11144_v30, 2  ;;  %v2876_v26 = vrot.slane %v11140_v14, 2 }
 0x5cf   :  { %8589 = vtanh.f32 %v2791_v50  ;;  %v2877_v29 = vrot.slane %v11146_v55, 2  ;;  %v2896_v27 = vrot.slane %v11136_v59, 3  ;;  %v2878_v47 = vrot.slane %v11148_v11, 2 }
 0x5d0   :  { %8591 = vtanh.f32 %v2840_v32  ;;  %v2897_v36 = vrot.slane %v11138_v54, 3  ;;  %v2898_v38 = vrot.slane %v11142_v48, 3  ;;  %v2879_v6 = vrot.slane %v11150_v53, 2 }
 0x5d1   :  { %8593 = vtanh.f32 %v2841_v9  ;;  %v2899_v56 = vrot.slane %v11144_v30, 3  ;;  %v2900_v57 = vrot.slane %v11140_v14, 3  ;;  %v2901_v46 = vrot.slane %v11146_v55, 3 }
 0x5d2   :  { %v8576_v58 = vpop.eup %8575  ;;  %8595 = vtanh.f32 %v2842_v5  ;;  %v2902_v60 = vrot.slane %v11148_v11, 3  ;;  %v2903_v54 = vrot.slane %v11150_v53, 3  ;;  %v2912_v61 = vmul.f32 0.5, %v2896_v27 }
 0x5d3   :  { %v8578_v25 = vpop.eup %8577  ;;  %8597 = vtanh.f32 %v2843_v42  ;;  %v2800_v19 = vadd.f32 1.0, %v8576_v58  ;;  %v2913_v18 = vmul.f32 0.5, %v2897_v36  ;;  %v2914_v30 = vmul.f32 0.5, %v2898_v38 }
 0x5d4   :  { %v8580_v52 = vpop.eup %8579  ;;  %8599 = vtanh.f32 %v2844_v51  ;;  %v2801_v0 = vadd.f32 1.0, %v8578_v25  ;;  %v2915_v31 = vmul.f32 0.5, %v2899_v56  ;;  %v2916_v35 = vmul.f32 0.5, %v2900_v57 }
 0x5d5   :  { %v8582_v4 = vpop.eup %8581  ;;  %8601 = vtanh.f32 %v2845_v7  ;;  %v2802_v33 = vadd.f32 1.0, %v8580_v52  ;;  %v2808_v13 = vmul.f32 0.5, %v2800_v19  ;;  %v2917_v11 = vmul.f32 0.5, %v2901_v46 }
 0x5d6   :  { %v8584_v59 = vpop.eup %8583  ;;  %8603 = vtanh.f32 %v2846_v22  ;;  %v2803_v14 = vadd.f32 1.0, %v8582_v4  ;;  %v2809_v50 = vmul.f32 0.5, %v2801_v0  ;;  %v2918_v1 = vmul.f32 0.5, %v2902_v60 }
 0x5d7   :  { %v8586_v48 = vpop.eup %8585  ;;  %8605 = vtanh.f32 %v2847_v23  ;;  %v2804_v55 = vadd.f32 1.0, %v8584_v59  ;;  %v2810_v49 = vmul.f32 0.5, %v2802_v33 }
 0x5d8   :  { %v8588_v10 = vpop.eup %8587  ;;  %8607 = vtanh.f32 %v2872_v3  ;;  %v2805_v39 = vadd.f32 1.0, %v8586_v48  ;;  %v2811_v9 = vmul.f32 0.5, %v2803_v14 }
 0x5d9   :  { %v8590_v20 = vpop.eup %8589  ;;  %8609 = vtanh.f32 %v2873_v43  ;;  %v2806_v44 = vadd.f32 1.0, %v8588_v10  ;;  %v2812_v51 = vmul.f32 0.5, %v2804_v55 }
 0x5da   :  { %v8592_v45 = vpop.eup %8591  ;;  %8611 = vtanh.f32 %v2874_v8  ;;  %v2807_v32 = vadd.f32 1.0, %v8590_v20  ;;  %v2813_v3 = vmul.f32 0.5, %v2805_v39 }
 0x5db   :  { %v8594_v28 = vpop.eup %8593  ;;  %v2856_v2 = vadd.f32 1.0, %v8592_v45  ;;  %8613 = vtanh.f32 %v2875_v17  ;;  %v2814_v27 = vmul.f32 0.5, %v2806_v44 }
 0x5dc   :  { %v8596_v62 = vpop.eup %8595  ;;  %v2857_v5 = vadd.f32 1.0, %v8594_v28  ;;  %8615 = vtanh.f32 %v2876_v26  ;;  %v2815_v38 = vmul.f32 0.5, %v2807_v32 }
 0x5dd   :  { %v8598_v42 = vpop.eup %8597  ;;  %v2858_v7 = vadd.f32 1.0, %v8596_v62  ;;  %v2864_v22 = vmul.f32 0.5, %v2856_v2  ;;  %8617 = vtanh.f32 %v2877_v29 }
 0x5de   :  { %v8600_v23 = vpop.eup %8599  ;;  %v2859_v43 = vadd.f32 1.0, %v8598_v42  ;;  %v2865_v8 = vmul.f32 0.5, %v2857_v5  ;;  %8619 = vtanh.f32 %v2878_v47 }
 0x5df   :  { %v8602_v58 = vpop.eup %8601  ;;  %v2860_v25 = vadd.f32 1.0, %v8600_v23  ;;  %v2866_v36 = vmul.f32 0.5, %v2858_v7  ;;  %8621 = vtanh.f32 %v2879_v6  ;;  %v2944_v29 = vmul.f32 %v2864_v22, %v11058_v21 }
 0x5e0   :  { %v8604_v17 = vpop.eup %8603  ;;  %v2861_v52 = vadd.f32 1.0, %v8602_v58  ;;  %v2867_v56 = vmul.f32 0.5, %v2859_v43  ;;  %8623 = vtanh.f32 %v2912_v61  ;;  %v2945_v47 = vmul.f32 %v2865_v8, %v11061_v34 }
 0x5e1   :  { %v8606_v26 = vpop.eup %8605  ;;  %v2862_v57 = vadd.f32 1.0, %v8604_v17  ;;  %v2868_v4 = vmul.f32 0.5, %v2860_v25  ;;  %8625 = vtanh.f32 %v2913_v18  ;;  %v2946_v6 = vmul.f32 %v2866_v36, %v11064_v15 }
 0x5e2   :  { %v8608_v19 = vpop.eup %8607  ;;  %v2863_v46 = vadd.f32 1.0, %v8606_v26  ;;  %v2869_v60 = vmul.f32 0.5, %v2861_v52  ;;  %8627 = vtanh.f32 %v2914_v30  ;;  %v2947_v10 = vmul.f32 %v2867_v56, %v11068_v12 }
 0x5e3   :  { %v8610_v59 = vpop.eup %8609  ;;  %v2870_v0 = vmul.f32 0.5, %v2862_v57  ;;  %8629 = vtanh.f32 %v2915_v31  ;;  %v2952_v48 = vmul.f32 %v8608_v19, %v2808_v13  ;;  %v2948_v21 = vmul.f32 %v2868_v4, %v11073_v40 }
 0x5e4   :  { %v8612_v33 = vpop.eup %8611  ;;  %v2871_v61 = vmul.f32 0.5, %v2863_v46  ;;  %8631 = vtanh.f32 %v2916_v35  ;;  %v2953_v18 = vmul.f32 %v8610_v59, %v2809_v50  ;;  %v2949_v31 = vmul.f32 %v2869_v60, %v11076_v16 }
 0x5e5   :  { %v8614_v14 = vpop.eup %8613  ;;  %8633 = vtanh.f32 %v2917_v11  ;;  %v2954_v20 = vmul.f32 %v8612_v33, %v2810_v49  ;;  %v11189_v30 = vadd.f32 %v2952_v48, %v2944_v29  ;;  %v2950_v35 = vmul.f32 %v2870_v0, %v11079_v63 }
 0x5e6   :  { %v8616_v34 = vpop.eup %8615  ;;  %8635 = vtanh.f32 %v2918_v1  ;;  %v2955_v55 = vmul.f32 %v8614_v14, %v2811_v9  ;;  %v11192_v15 = vadd.f32 %v2953_v18, %v2945_v47  ;;  %v2951_v40 = vmul.f32 %v2871_v61, %v11082_v37 }
 0x5e7   :  { %v8618_v13 = vpop.eup %8617  ;;  %v2956_v45 = vmul.f32 %v8616_v34, %v2812_v51  ;;  %v11195_v12 = vadd.f32 %v2954_v20, %v2946_v6  ;;  %8637 = vtanh.f32 %v11189_v30  ;;  %v2919_v1 = vmul.f32 0.5, %v2903_v54 }
 0x5e8   :  { %v8620_v11 = vpop.eup %8619  ;;  %v2957_v39 = vmul.f32 %v8618_v13, %v2813_v3  ;;  %v11199_v50 = vadd.f32 %v2955_v55, %v2947_v10  ;;  %8639 = vtanh.f32 %v11192_v15 }
 0x5e9   :  { %v8622_v16 = vpop.eup %8621  ;;  %v2958_v28 = vmul.f32 %v8620_v11, %v2814_v27  ;;  %v11204_v44 = vadd.f32 %v2956_v45, %v2948_v21  ;;  %8641 = vtanh.f32 %v11195_v12 }
 0x5ea   :  { %v8624_v63 = vpop.eup %8623  ;;  %v2959_v49 = vmul.f32 %v8622_v16, %v2815_v38  ;;  %v11207_v2 = vadd.f32 %v2957_v39, %v2949_v31  ;;  %8643 = vtanh.f32 %v11199_v50 }
 0x5eb   :  { %v8626_v37 = vpop.eup %8625  ;;  %v11210_v62 = vadd.f32 %v2958_v28, %v2950_v35  ;;  %8645 = vtanh.f32 %v11204_v44  ;;  %v2928_v9 = vadd.f32 1.0, %v8624_v63 }
 0x5ec   :  { %v8628_v32 = vpop.eup %8627  ;;  %v11213_v53 = vadd.f32 %v2959_v49, %v2951_v40  ;;  %8647 = vtanh.f32 %v11207_v2  ;;  %v2929_v5 = vadd.f32 1.0, %v8626_v37 }
 0x5ed   :  { %v8630_v54 = vpop.eup %8629  ;;  %8649 = vtanh.f32 %v2919_v1  ;;  %v2930_v51 = vadd.f32 1.0, %v8628_v32  ;;  %v2936_v43 = vmul.f32 0.5, %v2928_v9 }
 0x5ee   :  { %v8632_v42 = vpop.eup %8631  ;;  %8651 = vtanh.f32 %v11210_v62  ;;  %v2931_v22 = vadd.f32 1.0, %v8630_v54  ;;  %v2937_v27 = vmul.f32 0.5, %v2929_v5 }
 0x5ef   :  { %v8634_v7 = vpop.eup %8633  ;;  %8653 = vtanh.f32 %v11213_v53  ;;  %v2932_v3 = vadd.f32 1.0, %v8632_v42  ;;  %v2938_v36 = vmul.f32 0.5, %v2930_v51 }
 0x5f0   :  { %v8636_v23 = vpop.eup %8635  ;;  %v2933_v58 = vadd.f32 1.0, %v8634_v7  ;;  %v2939_v52 = vmul.f32 0.5, %v2931_v22 }
 0x5f1   :  { %v8638_v8 = vpop.eup %8637  ;;  %v2934_v26 = vadd.f32 1.0, %v8636_v23  ;;  %v2940_v4 = vmul.f32 0.5, %v2932_v3 }
 0x5f2   :  { %v8640_v25 = vpop.eup %8639  ;;  %v2976_v17 = vmul.f32 %v8638_v8, %v2936_v43  ;;  %v2941_v47 = vmul.f32 0.5, %v2933_v58 }
 0x5f3   :  { %v8642_v38 = vpop.eup %8641  ;;  %v2977_v56 = vmul.f32 %v8640_v25, %v2937_v27  ;;  %v2942_v61 = vmul.f32 0.5, %v2934_v26  ;;  %v11260_v26 = vld [vmem:[%s13435_s2 + $0x28] ss:$16 sps:$4 sm:$0xff]  }
 0x5f4   :  { %v8644_v57 = vpop.eup %8643  ;;  %v2978_v29 = vmul.f32 %v8642_v38, %v2938_v36  ;;  %2984 = vst [vmem:[#allocation5 + $0x4] sm:$0x1] %v2976_v17  ;;  %v3008_v19 = vpack.c.bf16 %v2976_v17, %v2976_v17  ;;  %v11228_v36 = vld [vmem:[%s13435_s2] ss:$16 sps:$4 sm:$0xff]   ;;  %v11234_v17 = vld [vmem:[%s13435_s2 + $0x8] ss:$16 sps:$4 sm:$0xff]  }
 0x5f5   :  { %v8646_v46 = vpop.eup %8645  ;;  %2985 = vst [vmem:[#allocation5 + $0x14] sm:$0x1] %v2977_v56  ;;  %v3009_v60 = vpack.c.bf16 %v2977_v56, %v2977_v56  ;;  %v2979_v59 = vmul.f32 %v8644_v57, %v2939_v52  ;;  %v11240_v38 = vld [vmem:[%s13435_s2 + $0x24] ss:$16 sps:$4 sm:$0xff]   ;;  %v11246_v52 = vld [vmem:[%s13435_s2 + $0x2c] ss:$16 sps:$4 sm:$0xff]  }
 0x5f6   :  { %v8648_v0 = vpop.eup %8647  ;;  %2986 = vst [vmem:[#allocation5 + $0x24] sm:$0x1] %v2978_v29  ;;  %v2980_v6 = vmul.f32 %v8646_v46, %v2940_v4  ;;  %v3010_v48 = vpack.c.bf16 %v2978_v29, %v2978_v29  ;;  %v3024_v31 = vunpack.c.l.b16 %v3008_v19  ;;  %v11254_v56 = vld [vmem:[%s13435_s2 + $0x20] ss:$16 sps:$4 sm:$0xff]   ;;  %v11266_v57 = vld [vmem:[%s13435_s2 + $0x44] ss:$16 sps:$4 sm:$0xff]  }
 0x5f7   :  { %v8650_v33 = vpop.eup %8649  ;;  %v2981_v10 = vmul.f32 %v8648_v0, %v2941_v47  ;;  %2987 = vst [vmem:[#allocation5 + $0x34] sm:$0x1] %v2979_v59  ;;  %v3011_v18 = vpack.c.bf16 %v2979_v59, %v2979_v59  ;;  %v3025_v14 = vunpack.c.l.b16 %v3009_v60  ;;  %v11272_v4 = vld [vmem:[%s13435_s2 + $0x4c] ss:$16 sps:$4 sm:$0xff]   ;;  %v11278_v29 = vld [vmem:[%s13435_s2 + $0x40] ss:$16 sps:$4 sm:$0xff]  }
 0x5f8   :  { %v8652_v21 = vpop.eup %8651  ;;  %v2935_v20 = vadd.f32 1.0, %v8650_v33  ;;  %2988 = vst [vmem:[#allocation5 + $0x44] sm:$0x1] %v2980_v6  ;;  %v3012_v34 = vpack.c.bf16 %v2980_v6, %v2980_v6  ;;  %v3026_v55 = vunpack.c.l.b16 %v3010_v48  ;;  %v11284_v19 = vld [vmem:[%s13435_s2 + $0x48] ss:$16 sps:$4 sm:$0xff]  }
 0x5f9   :  { %v8654_v13 = vpop.eup %8653  ;;  %v2982_v35 = vmul.f32 %v8652_v21, %v2942_v61  ;;  %2989 = vst [vmem:[#allocation5 + $0x54] sm:$0x1] %v2981_v10  ;;  %v3013_v45 = vpack.c.bf16 %v2981_v10, %v2981_v10  ;;  %v3027_v11 = vunpack.c.l.b16 %v3011_v18  ;;  %v3032_v40 = vrot.slane %v3025_v14, 7  ;;  %v11290_v46 = vld [vmem:[%s13435_s2 + $0x64] ss:$16 sps:$4 sm:$0xff]  }
 0x5fa   :  { %v2943_v39 = vmul.f32 0.5, %v2935_v20  ;;  %v3028_v16 = vunpack.c.l.b16 %v3012_v34  ;;  %v3034_v1 = vrot.slane %v3026_v55, 6  ;;  %v11296_v60 = vld [vmem:[%s13435_s2 + $0x6c] ss:$16 sps:$4 sm:$0xff]   ;;  %v11302_v47 = vld [vmem:[%s13435_s2 + $0x60] ss:$16 sps:$4 sm:$0xff]  }
 0x5fb   :  { %2990 = vst [vmem:[#allocation5 + $0x64] sm:$0x1] %v2982_v35  ;;  %v3014_v28 = vpack.c.bf16 %v2982_v35, %v2982_v35  ;;  %v3029_v63 = vunpack.c.l.b16 %v3013_v45  ;;  %v3033_v49 = vsel %vm1290_vm0, %v3032_v40, %v3024_v31  ;;  %v3036_v37 = vrot.slane %v3027_v11, 5  ;;  %v11308_v59 = vld [vmem:[%s13435_s2 + $0x68] ss:$16 sps:$4 sm:$0xff]  }
 0x5fc   :  { %v2983_v32 = vmul.f32 %v8654_v13, %v2943_v39  ;;  %v3035_v9 = vsel %vm1293_vm1, %v3034_v1, %v3033_v49  ;;  %v3038_v54 = vrot.slane %v3028_v16, 4  ;;  %v11314_v0 = vld [vmem:[%s13435_s2 + $0x84] ss:$16 sps:$4 sm:$0xff]   ;;  %v11320_v6 = vld [vmem:[%s13435_s2 + $0x8c] ss:$16 sps:$4 sm:$0xff]  }
 0x5fd   :  { %v3030_v5 = vunpack.c.l.b16 %v3014_v28  ;;  %v3037_v42 = vsel %vm1296_vm2, %v3036_v37, %v3035_v9  ;;  %v3040_v51 = vrot.slane %v3029_v63, 3  ;;  %v11326_v48 = vld [vmem:[%s13435_s2 + $0x80] ss:$16 sps:$4 sm:$0xff]   ;;  %v11332_v33 = vld [vmem:[%s13435_s2 + $0x88] ss:$16 sps:$4 sm:$0xff]  }
 0x5fe   :  { %2991 = vst [vmem:[#allocation5 + $0x74] sm:$0x1] %v2983_v32  ;;  %v3015_v7 = vpack.c.bf16 %v2983_v32, %v2983_v32  ;;  %v3039_v22 = vsel %vm1299_vm3, %v3038_v54, %v3037_v42  ;;  %13629 = vst [vmem:[#allocation7_spill] sm:$0xff] %v11326_v48  ;;  %v11338_v61 = vld [vmem:[%s13435_s2 + $0xa4] ss:$16 sps:$4 sm:$0xff]  }
 0x5ff   :  { %v3041_v23 = vsel %vm1302_vm4, %v3040_v51, %v3039_v22  ;;  %v3042_v3 = vrot.slane %v3030_v5, 2  ;;  %13630 = vst [vmem:[#allocation8_spill] sm:$0xff] %v11332_v33  ;;  %13631 = vst [vmem:[#allocation9_spill] sm:$0xff] %v11338_v61  ;;  %v11344_v10 = vld [vmem:[%s13435_s2 + $0xac] ss:$16 sps:$4 sm:$0xff]  }
 0x600   :  { %v3031_v43 = vunpack.c.l.b16 %v3015_v7  ;;  %13632 = vst [vmem:[#allocation10_spill] sm:$0xff] %v11344_v10  ;;  %v11350_v18 = vld [vmem:[%s13435_s2 + $0xa0] ss:$16 sps:$4 sm:$0xff]   ;;  %v11356_v14 = vld [vmem:[%s13435_s2 + $0xa8] ss:$16 sps:$4 sm:$0xff]  }
 0x601   :  { %v3043_v8 = vsel %vm1305_vm5, %v3042_v3, %v3041_v23  ;;  %13633 = vst [vmem:[#allocation11_spill] sm:$0xff] %v11350_v18  ;;  %13634 = vst [vmem:[#allocation12_spill] sm:$0xff] %v11356_v14  ;;  %v11362_v21 = vld [vmem:[%s13435_s2 + $0xc4] ss:$16 sps:$4 sm:$0xff]   ;;  %v11368_v20 = vld [vmem:[%s13435_s2 + $0xcc] ss:$16 sps:$4 sm:$0xff]  }
 0x602   :  { %v3044_v58 = vrot.slane %v3031_v43, 1  ;;  %13635 = vst [vmem:[#allocation13_spill] sm:$0xff] %v11362_v21  ;;  %13636 = vst [vmem:[#allocation14_spill] sm:$0xff] %v11368_v20  ;;  %v11374_v34 = vld [vmem:[%s13435_s2 + $0xc0] ss:$16 sps:$4 sm:$0xff]  }
 0x603   :  { %13637 = vst [vmem:[#allocation15_spill] sm:$0xff] %v11374_v34  ;;  %v11380_v31 = vld [vmem:[%s13435_s2 + $0xc8] ss:$16 sps:$4 sm:$0xff]   ;;  %v11386_v55 = vld [vmem:[%s13435_s2 + $0xe4] ss:$16 sps:$4 sm:$0xff]  }
 0x604   :  { %v3045_v27 = vsel %vm1308_vm6, %v3044_v58, %v3043_v8  ;;  %13638 = vst [vmem:[#allocation16_spill] sm:$0xff] %v11380_v31  ;;  %13639 = vst [vmem:[#allocation17_spill] sm:$0xff] %v11386_v55  ;;  %v11392_v13 = vld [vmem:[%s13435_s2 + $0xec] ss:$16 sps:$4 sm:$0xff]   ;;  %v11398_v35 = vld [vmem:[%s13435_s2 + $0xe0] ss:$16 sps:$4 sm:$0xff]  }
 0x605   :  { %v3046_v25 = vpack.c.b16 %v3045_v27, %v3045_v27  ;;  %13640 = vst [vmem:[#allocation18_spill] sm:$0xff] %v11392_v13  ;;  %13641 = vst [vmem:[#allocation19_spill] sm:$0xff] %v11398_v35  ;;  %v11404_v45 = vld [vmem:[%s13435_s2 + $0xe8] ss:$16 sps:$4 sm:$0xff]   ;;  %v11410_v11 = vld [vmem:[%s13435_s2 + $0x4] ss:$16 sps:$4 sm:$0xff]  }
 0x606   :  { %13642 = vst [vmem:[#allocation20_spill] sm:$0xff] %v11404_v45  ;;  %13643 = vst [vmem:[#allocation21_spill] sm:$0xff] %v11410_v11  ;;  %v11416_v40 = vld [vmem:[%s13435_s2 + $0xc] ss:$16 sps:$4 sm:$0xff]  }
 0x607   :  { %3081 = vmatmul.mubr.bf16.vlgmr.msra.gmra.mrb[52].mxu0 %v3046_v25  ;;  %3122 = vmatmul.mubr.bf16.vlgmr.msra.gmra.mrb[52].mxu1 %v3046_v25  ;;  %13644 = vst [vmem:[#allocation22_spill] sm:$0xff] %v11416_v40 }
 0x608   :  { %3483 = vmatpush1.bf16.msra.mxu0 %v11228_v36  ;;  %3524 = vmatpush1.bf16.msra.mxu1 %v11234_v17 }
 0x609   :  { %3484 = vmatprep.subr.bf16.mxu0 %v11240_v38  ;;  %3525 = vmatprep.subr.bf16.mxu1 %v11246_v52 }
 0x60a   :  { %3514 = vmatprep.mubr.bf16.mxu0 %v13578_v41  ;;  %3555 = vmatprep.mubr.bf16.mxu1 %v13578_v41 }
 0x60c   :  { %3485 = vmatpush1.bf16.msra.mxu0 %v11254_v56  ;;  %3526 = vmatpush1.bf16.msra.mxu1 %v11260_v26 }
 0x60d   :  { %3486 = vmatprep.subr.bf16.mxu0 %v11266_v57  ;;  %3527 = vmatprep.subr.bf16.mxu1 %v11272_v4 }
 0x610   :  { %3487 = vmatpush1.bf16.msra.mxu0 %v11278_v29  ;;  %3528 = vmatpush1.bf16.msra.mxu1 %v11284_v19 }
 0x611   :  { %3488 = vmatprep.subr.bf16.mxu0 %v11290_v46  ;;  %3529 = vmatprep.subr.bf16.mxu1 %v11296_v60 }
 0x614   :  { %3489 = vmatpush1.bf16.msra.mxu0 %v11302_v47  ;;  %3530 = vmatpush1.bf16.msra.mxu1 %v11308_v59 }
 0x615   :  { %3490 = vmatprep.subr.bf16.mxu0 %v11314_v0  ;;  %3531 = vmatprep.subr.bf16.mxu1 %v11320_v6 }
 0x618   :  { %3491 = vmatpush1.bf16.msra.mxu0 %v11326_v48  ;;  %3532 = vmatpush1.bf16.msra.mxu1 %v11332_v33 }
 0x619   :  { %3492 = vmatprep.subr.bf16.mxu0 %v11338_v61  ;;  %3533 = vmatprep.subr.bf16.mxu1 %v11344_v10 }
 0x61c   :  { %3493 = vmatpush1.bf16.msra.mxu0 %v11350_v18  ;;  %3534 = vmatpush1.bf16.msra.mxu1 %v11356_v14 }
 0x61d   :  { %3494 = vmatprep.subr.bf16.mxu0 %v11362_v21  ;;  %3535 = vmatprep.subr.bf16.mxu1 %v11368_v20 }
 0x620   :  { %3495 = vmatpush1.bf16.msra.mxu0 %v11374_v34  ;;  %3536 = vmatpush1.bf16.msra.mxu1 %v11380_v31 }
 0x621   :  { %3496 = vmatprep.subr.bf16.mxu0 %v11386_v55  ;;  %3537 = vmatprep.subr.bf16.mxu1 %v11392_v13 }
 0x624   :  { %3497 = vmatpush1.bf16.msra.mxu0 %v11398_v35  ;;  %3538 = vmatpush1.bf16.msra.mxu1 %v11404_v45 }
 0x625   :  { %3916 = vmatprep.subr.bf16.mxu0 %v11410_v11  ;;  %3957 = vmatprep.subr.bf16.mxu1 %v11416_v40 }
 0x6da   :  { %v3082_v39 = vpop.f32.mrb[52].mxu0  ;;  %v3123_v16 = vpop.f32.mrb[52].mxu1 }
 0x6db   :  { %v3084_v1 = vpop.f32.mrb[53].mxu0  ;;  %v3125_v28 = vpop.f32.mrb[53].mxu1 }
 0x6dc   :  { %v3134_v63 = vcombine.low %v3082_v39, %v3084_v1  ;;  %v3135_v49 = vcombine.high %v3082_v39, %v3084_v1  ;;  %v3136_v37 = vcombine.low %v3123_v16, %v3125_v28  ;;  %v3137_v32 = vcombine.high %v3123_v16, %v3125_v28  ;;  %v3086_v9 = vpop.f32.mrb[54].mxu0  ;;  %v3127_v54 = vpop.f32.mrb[54].mxu1  ;;  %v2993_v1 = vld [vmem:[#allocation4 + $0x5] ss:$8 sm:$0xf] }
 0x6dd   :  { %v3087_v5 = vpop.f32.mrb[55].mxu0  ;;  %v3128_v42 = vpop.f32.mrb[55].mxu1  ;;  %v2995_v28 = vld [vmem:[#allocation4 + $0x45] ss:$8 sm:$0xf] }
 0x6de   :  { %v3144_v51 = vrot.slane %v3134_v63, %v13628_v24  ;;  %v3151_v7 = vrot.slane %v3135_v49, %v13628_v24  ;;  %v3158_v22 = vrot.slane %v3136_v37, %v13628_v24  ;;  %v3165_v23 = vrot.slane %v3137_v32, %v13628_v24  ;;  %v2997_v63 = vld [vmem:[#allocation4 + $0x85] ss:$8 sm:$0xf] }
 0x6df   :  { %v3001_v49 = vld [vmem:[#allocation4 + $0x105] ss:$8 sm:$0xf] }
 0x6e0   :  { %v3166_v3 = vcombine.low %v3144_v51, %v3158_v22  ;;  %v3167_v43 = vcombine.high %v3144_v51, %v3158_v22  ;;  %v3168_v8 = vcombine.low %v3151_v7, %v3165_v23  ;;  %v3169_v58 = vcombine.high %v3151_v7, %v3165_v23  ;;  %v2999_v5 = vld [vmem:[#allocation4 + $0xc5] ss:$8 sm:$0xf] }
 0x6e1   :  { %v3003_v42 = vld [vmem:[#allocation4 + $0x145] ss:$8 sm:$0xf] }
 0x6e2   :  { %v3176_v27 = vrot.slane %v3166_v3, %v13628_v24  ;;  %v3183_v25 = vrot.slane %v3168_v8, %v13628_v24  ;;  %v3190_v39 = vrot.slane %v3167_v43, %v13628_v24  ;;  %v3197_v16 = vrot.slane %v3169_v58, %v13628_v24  ;;  %v3005_v23 = vld [vmem:[#allocation4 + $0x185] ss:$8 sm:$0xf] }
 0x6e3   :  { %v3007_v3 = vld [vmem:[#allocation4 + $0x1c5] ss:$8 sm:$0xf] }
 0x6e4   :  { %v3198_v9 = vcombine.high %v3176_v27, %v3176_v27  ;;  %v3199_v37 = vcombine.high %v3183_v25, %v3183_v25  ;;  %v3200_v54 = vcombine.high %v3190_v39, %v3190_v39  ;;  %v3201_v32 = vcombine.high %v3197_v16, %v3197_v16 }
 0x6e5   :  { %v11427_v51 = vadd.f32 %v3176_v27, %v2993_v1  ;;  %v11429_v7 = vadd.f32 %v3190_v39, %v2995_v28  ;;  %v11431_v22 = vadd.f32 %v3183_v25, %v3001_v49  ;;  %v11437_v58 = vadd.f32 %v3197_v16, %v3003_v42 }
 0x6e6   :  { %v11433_v43 = vadd.f32 %v3198_v9, %v2997_v63  ;;  %v11435_v8 = vadd.f32 %v3200_v54, %v2999_v5  ;;  %v11439_v24 = vadd.f32 %v3199_v37, %v3005_v23  ;;  %v11441_v40 = vadd.f32 %v3201_v32, %v3007_v3 }
 0x6e7   :  { %v3218_v11 = vmul.f32 0.5, %v11427_v51  ;;  %v3219_v27 = vmul.f32 0.5, %v11429_v7  ;;  %v3222_v1 = vmul.f32 0.5, %v11431_v22  ;;  %v3258_v28 = vrot.slane %v11427_v51, 1 }
 0x6e8   :  { %v3220_v39 = vmul.f32 0.5, %v11433_v43  ;;  %v3221_v25 = vmul.f32 0.5, %v11435_v8  ;;  %v3223_v16 = vmul.f32 0.5, %v11437_v58  ;;  %v3259_v63 = vrot.slane %v11429_v7, 1 }
 0x6e9   :  { %8655 = vtanh.f32 %v3218_v11  ;;  %v3224_v49 = vmul.f32 0.5, %v11439_v24  ;;  %v3225_v9 = vmul.f32 0.5, %v11441_v40  ;;  %v3260_v37 = vrot.slane %v11433_v43, 1 }
 0x6ea   :  { %8657 = vtanh.f32 %v3219_v27  ;;  %v3261_v54 = vrot.slane %v11435_v8, 1  ;;  %v3262_v32 = vrot.slane %v11431_v22, 1  ;;  %v3263_v11 = vrot.slane %v11437_v58, 1 }
 0x6eb   :  { %8659 = vtanh.f32 %v3220_v39  ;;  %v3264_v5 = vrot.slane %v11439_v24, 1  ;;  %v3265_v42 = vrot.slane %v11441_v40, 1  ;;  %v3274_v23 = vmul.f32 0.5, %v3258_v28 }
 0x6ec   :  { %8661 = vtanh.f32 %v3221_v25  ;;  %v3275_v3 = vmul.f32 0.5, %v3259_v63  ;;  %v3276_v27 = vmul.f32 0.5, %v3260_v37  ;;  %v3277_v39 = vmul.f32 0.5, %v3261_v54 }
 0x6ed   :  { %8663 = vtanh.f32 %v3222_v1  ;;  %v3278_v45 = vmul.f32 0.5, %v3262_v32  ;;  %v3279_v25 = vmul.f32 0.5, %v3263_v11  ;;  %v3280_v35 = vmul.f32 0.5, %v3264_v5 }
 0x6ee   :  { %8665 = vtanh.f32 %v3223_v16  ;;  %v3281_v13 = vmul.f32 0.5, %v3265_v42  ;;  %v3306_v55 = vrot.slane %v11427_v51, 2  ;;  %v3307_v1 = vrot.slane %v11429_v7, 2 }
 0x6ef   :  { %8667 = vtanh.f32 %v3224_v49  ;;  %v3308_v31 = vrot.slane %v11433_v43, 2  ;;  %v3309_v28 = vrot.slane %v11435_v8, 2  ;;  %v3310_v63 = vrot.slane %v11431_v22, 2 }
 0x6f0   :  { %8669 = vtanh.f32 %v3225_v9  ;;  %v3311_v49 = vrot.slane %v11437_v58, 2  ;;  %v3330_v9 = vrot.slane %v11427_v51, 3  ;;  %v3312_v54 = vrot.slane %v11439_v24, 2 }
 0x6f1   :  { %8671 = vtanh.f32 %v3274_v23  ;;  %v3331_v32 = vrot.slane %v11429_v7, 3  ;;  %v3332_v11 = vrot.slane %v11433_v43, 3  ;;  %v3313_v42 = vrot.slane %v11441_v40, 2 }
 0x6f2   :  { %8673 = vtanh.f32 %v3275_v3  ;;  %v3333_v23 = vrot.slane %v11435_v8, 3  ;;  %v3334_v3 = vrot.slane %v11431_v22, 3  ;;  %v3335_v51 = vrot.slane %v11437_v58, 3 }
 0x6f3   :  { %v8656_v16 = vpop.eup %8655  ;;  %8675 = vtanh.f32 %v3276_v27  ;;  %v3346_v43 = vmul.f32 0.5, %v3330_v9  ;;  %v3347_v18 = vmul.f32 0.5, %v3331_v32  ;;  %v3348_v8 = vmul.f32 0.5, %v3332_v11 }
 0x6f4   :  { %v8658_v37 = vpop.eup %8657  ;;  %8677 = vtanh.f32 %v3277_v39  ;;  %v3234_v34 = vadd.f32 1.0, %v8656_v16  ;;  %v3336_v39 = vrot.slane %v11439_v24, 3  ;;  %v3349_v16 = vmul.f32 0.5, %v3333_v23 }
 0x6f5   :  { %v8660_v5 = vpop.eup %8659  ;;  %8679 = vtanh.f32 %v3278_v45  ;;  %v3235_v21 = vadd.f32 1.0, %v8658_v37  ;;  %v3351_v24 = vmul.f32 0.5, %v3335_v51 }
 0x6f6   :  { %v8662_v27 = vpop.eup %8661  ;;  %8681 = vtanh.f32 %v3279_v25  ;;  %v3236_v14 = vadd.f32 1.0, %v8660_v5  ;;  %v3350_v25 = vmul.f32 0.5, %v3334_v3  ;;  %v3242_v33 = vmul.f32 0.5, %v3234_v34 }
 0x6f7   :  { %v8664_v20 = vpop.eup %8663  ;;  %8683 = vtanh.f32 %v3280_v35  ;;  %v3237_v22 = vadd.f32 1.0, %v8662_v27  ;;  %v3243_v48 = vmul.f32 0.5, %v3235_v21  ;;  %v3352_v9 = vmul.f32 0.5, %v3336_v39 }
 0x6f8   :  { %v8666_v45 = vpop.eup %8665  ;;  %8685 = vtanh.f32 %v3281_v13  ;;  %v3238_v58 = vadd.f32 1.0, %v8664_v20  ;;  %v3244_v13 = vmul.f32 0.5, %v3236_v14 }
 0x6f9   :  { %v8668_v10 = vpop.eup %8667  ;;  %8687 = vtanh.f32 %v3306_v55  ;;  %v3239_v35 = vadd.f32 1.0, %v8666_v45  ;;  %v3245_v55 = vmul.f32 0.5, %v3237_v22 }
 0x6fa   :  { %v8670_v61 = vpop.eup %8669  ;;  %8689 = vtanh.f32 %v3307_v1  ;;  %v3240_v5 = vadd.f32 1.0, %v8668_v10  ;;  %v3246_v20 = vmul.f32 0.5, %v3238_v58 }
 0x6fb   :  { %v8672_v37 = vpop.eup %8671  ;;  %8691 = vtanh.f32 %v3308_v31  ;;  %v3241_v27 = vadd.f32 1.0, %v8670_v61  ;;  %v3247_v45 = vmul.f32 0.5, %v3239_v35 }
 0x6fc   :  { %v8674_v7 = vpop.eup %8673  ;;  %v3290_v32 = vadd.f32 1.0, %v8672_v37  ;;  %8693 = vtanh.f32 %v3309_v28  ;;  %v3248_v10 = vmul.f32 0.5, %v3240_v5 }
 0x6fd   :  { %v8676_v11 = vpop.eup %8675  ;;  %v3291_v23 = vadd.f32 1.0, %v8674_v7  ;;  %8695 = vtanh.f32 %v3310_v63  ;;  %v3249_v61 = vmul.f32 0.5, %v3241_v27 }
 0x6fe   :  { %v8678_v3 = vpop.eup %8677  ;;  %v3292_v34 = vadd.f32 1.0, %v8676_v11  ;;  %v3298_v1 = vmul.f32 0.5, %v3290_v32  ;;  %8697 = vtanh.f32 %v3311_v49 }
 0x6ff   :  { %v8680_v51 = vpop.eup %8679  ;;  %v3293_v21 = vadd.f32 1.0, %v8678_v3  ;;  %v3299_v31 = vmul.f32 0.5, %v3291_v23  ;;  %8699 = vtanh.f32 %v3312_v54 }
 0x700   :  { %v8682_v39 = vpop.eup %8681  ;;  %v3294_v14 = vadd.f32 1.0, %v8680_v51  ;;  %v3300_v37 = vmul.f32 0.5, %v3292_v34  ;;  %8701 = vtanh.f32 %v3313_v42  ;;  %v3378_v49 = vmul.f32 %v3298_v1, %v11189_v30 }
 0x701   :  { %v8684_v28 = vpop.eup %8683  ;;  %v3295_v22 = vadd.f32 1.0, %v8682_v39  ;;  %v3301_v7 = vmul.f32 0.5, %v3293_v21  ;;  %8703 = vtanh.f32 %v3346_v43  ;;  %v3379_v54 = vmul.f32 %v3299_v31, %v11192_v15 }
 0x702   :  { %v8686_v63 = vpop.eup %8685  ;;  %v3296_v58 = vadd.f32 1.0, %v8684_v28  ;;  %v3302_v11 = vmul.f32 0.5, %v3294_v14  ;;  %8705 = vtanh.f32 %v3347_v18  ;;  %v3380_v42 = vmul.f32 %v3300_v37, %v11195_v12 }
 0x703   :  { %v8688_v35 = vpop.eup %8687  ;;  %v3297_v32 = vadd.f32 1.0, %v8686_v63  ;;  %v3303_v23 = vmul.f32 0.5, %v3295_v22  ;;  %8707 = vtanh.f32 %v3348_v8  ;;  %v3381_v51 = vmul.f32 %v3301_v7, %v11199_v50 }
 0x704   :  { %v8690_v5 = vpop.eup %8689  ;;  %v3304_v3 = vmul.f32 0.5, %v3296_v58  ;;  %8709 = vtanh.f32 %v3349_v16  ;;  %v3386_v27 = vmul.f32 %v8688_v35, %v3242_v33  ;;  %v3382_v30 = vmul.f32 %v3302_v11, %v11204_v44 }
 0x705   :  { %v8692_v34 = vpop.eup %8691  ;;  %v3305_v43 = vmul.f32 0.5, %v3297_v32  ;;  %8711 = vtanh.f32 %v3350_v25  ;;  %v3387_v18 = vmul.f32 %v8690_v5, %v3243_v48  ;;  %v3383_v16 = vmul.f32 %v3303_v23, %v11207_v2 }
 0x706   :  { %v8694_v21 = vpop.eup %8693  ;;  %8713 = vtanh.f32 %v3351_v24  ;;  %v3388_v1 = vmul.f32 %v8692_v34, %v3244_v13  ;;  %v11480_v8 = vadd.f32 %v3386_v27, %v3378_v49  ;;  %v3384_v25 = vmul.f32 %v3304_v3, %v11210_v62 }
 0x707   :  { %v8696_v15 = vpop.eup %8695  ;;  %8715 = vtanh.f32 %v3352_v9  ;;  %v3389_v31 = vmul.f32 %v8694_v21, %v3245_v55  ;;  %v11483_v12 = vadd.f32 %v3387_v18, %v3379_v54  ;;  %v3385_v44 = vmul.f32 %v3305_v43, %v11213_v53 }
 0x708   :  { %v8698_v33 = vpop.eup %8697  ;;  %v3390_v39 = vmul.f32 %v8696_v15, %v3246_v20  ;;  %v11486_v50 = vadd.f32 %v3388_v1, %v3380_v42  ;;  %8717 = vtanh.f32 %v11480_v8  ;;  %v13645_v9 = vrot.slane %v11441_v40, 3 }
 0x709   :  { %v8700_v48 = vpop.eup %8699  ;;  %v3391_v24 = vmul.f32 %v8698_v33, %v3247_v45  ;;  %v11490_v13 = vadd.f32 %v3389_v31, %v3381_v51  ;;  %8719 = vtanh.f32 %v11483_v12 }
 0x70a   :  { %v8702_v2 = vpop.eup %8701  ;;  %v3353_v55 = vmul.f32 0.5, %v13645_v9  ;;  %v3392_v14 = vmul.f32 %v8700_v48, %v3248_v10  ;;  %v11495_v37 = vadd.f32 %v3390_v39, %v3382_v30  ;;  %8721 = vtanh.f32 %v11486_v50 }
 0x70b   :  { %v8704_v62 = vpop.eup %8703  ;;  %v3393_v20 = vmul.f32 %v8702_v2, %v3249_v61  ;;  %v11498_v28 = vadd.f32 %v3391_v24, %v3383_v16  ;;  %8723 = vtanh.f32 %v11490_v13 }
 0x70c   :  { %v8706_v53 = vpop.eup %8705  ;;  %v11501_v45 = vadd.f32 %v3392_v14, %v3384_v25  ;;  %8725 = vtanh.f32 %v11495_v37  ;;  %v3362_v7 = vadd.f32 1.0, %v8704_v62 }
 0x70d   :  { %v8708_v22 = vpop.eup %8707  ;;  %v11504_v40 = vadd.f32 %v3393_v20, %v3385_v44  ;;  %8727 = vtanh.f32 %v11498_v28  ;;  %v3363_v63 = vadd.f32 1.0, %v8706_v53 }
 0x70e   :  { %v8710_v10 = vpop.eup %8709  ;;  %8729 = vtanh.f32 %v3353_v55  ;;  %v3364_v61 = vadd.f32 1.0, %v8708_v22  ;;  %v3370_v23 = vmul.f32 0.5, %v3362_v7 }
 0x70f   :  { %v8712_v58 = vpop.eup %8711  ;;  %8731 = vtanh.f32 %v11501_v45  ;;  %v3365_v49 = vadd.f32 1.0, %v8710_v10  ;;  %v3371_v3 = vmul.f32 0.5, %v3363_v63 }
 0x710   :  { %v8714_v11 = vpop.eup %8713  ;;  %8733 = vtanh.f32 %v11504_v40  ;;  %v3366_v32 = vadd.f32 1.0, %v8712_v58  ;;  %v3372_v27 = vmul.f32 0.5, %v3364_v61 }
 0x711   :  { %v8716_v35 = vpop.eup %8715  ;;  %v3367_v5 = vadd.f32 1.0, %v8714_v11  ;;  %v3373_v51 = vmul.f32 0.5, %v3365_v49 }
 0x712   :  { %v8718_v54 = vpop.eup %8717  ;;  %v3368_v21 = vadd.f32 1.0, %v8716_v35  ;;  %v3374_v1 = vmul.f32 0.5, %v3366_v32 }
 0x713   :  { %v8720_v42 = vpop.eup %8719  ;;  %v3410_v34 = vmul.f32 %v8718_v54, %v3370_v23  ;;  %v3375_v25 = vmul.f32 0.5, %v3367_v5 }
 0x714   :  { %v8722_v43 = vpop.eup %8721  ;;  %v3411_v18 = vmul.f32 %v8720_v42, %v3371_v3  ;;  %v3376_v9 = vmul.f32 0.5, %v3368_v21 }
 0x715   :  { %v8724_v30 = vpop.eup %8723  ;;  %v3412_v15 = vmul.f32 %v8722_v43, %v3372_v27  ;;  %3418 = vst [vmem:[#allocation5 + $0x5] sm:$0x1] %v3410_v34  ;;  %v3442_v16 = vpack.c.bf16 %v3410_v34, %v3410_v34 }
 0x716   :  { %v8726_v31 = vpop.eup %8725  ;;  %3419 = vst [vmem:[#allocation5 + $0x15] sm:$0x1] %v3411_v18  ;;  %v3443_v33 = vpack.c.bf16 %v3411_v18, %v3411_v18  ;;  %v3413_v39 = vmul.f32 %v8724_v30, %v3373_v51 }
 0x717   :  { %v8728_v48 = vpop.eup %8727  ;;  %3420 = vst [vmem:[#allocation5 + $0x25] sm:$0x1] %v3412_v15  ;;  %v3414_v44 = vmul.f32 %v8726_v31, %v3374_v1  ;;  %v3444_v24 = vpack.c.bf16 %v3412_v15, %v3412_v15  ;;  %v3458_v7 = vunpack.c.l.b16 %v3442_v16 }
 0x718   :  { %v8730_v2 = vpop.eup %8729  ;;  %v3415_v55 = vmul.f32 %v8728_v48, %v3375_v25  ;;  %3421 = vst [vmem:[#allocation5 + $0x35] sm:$0x1] %v3413_v39  ;;  %v3445_v14 = vpack.c.bf16 %v3413_v39, %v3413_v39  ;;  %v3459_v62 = vunpack.c.l.b16 %v3443_v33 }
 0x719   :  { %v8732_v20 = vpop.eup %8731  ;;  %v3369_v53 = vadd.f32 1.0, %v8730_v2  ;;  %3422 = vst [vmem:[#allocation5 + $0x45] sm:$0x1] %v3414_v44  ;;  %v3446_v22 = vpack.c.bf16 %v3414_v44, %v3414_v44  ;;  %v3460_v10 = vunpack.c.l.b16 %v3444_v24 }
 0x71a   :  { %v8734_v63 = vpop.eup %8733  ;;  %v3416_v58 = vmul.f32 %v8732_v20, %v3376_v9  ;;  %3423 = vst [vmem:[#allocation5 + $0x55] sm:$0x1] %v3415_v55  ;;  %v3447_v61 = vpack.c.bf16 %v3415_v55, %v3415_v55  ;;  %v3461_v11 = vunpack.c.l.b16 %v3445_v14  ;;  %v3466_v49 = vrot.slane %v3459_v62, 7 }
 0x71b   :  { %v3377_v35 = vmul.f32 0.5, %v3369_v53  ;;  %v3462_v32 = vunpack.c.l.b16 %v3446_v22  ;;  %v3468_v23 = vrot.slane %v3460_v10, 6 }
 0x71c   :  { %3424 = vst [vmem:[#allocation5 + $0x65] sm:$0x1] %v3416_v58  ;;  %v3448_v54 = vpack.c.bf16 %v3416_v58, %v3416_v58  ;;  %v3463_v5 = vunpack.c.l.b16 %v3447_v61  ;;  %v3467_v3 = vsel %vm1290_vm0, %v3466_v49, %v3458_v7  ;;  %v3470_v42 = vrot.slane %v3461_v11, 5 }
 0x71d   :  { %v3417_v27 = vmul.f32 %v8734_v63, %v3377_v35  ;;  %v3469_v34 = vsel %vm1293_vm1, %v3468_v23, %v3467_v3  ;;  %v3472_v43 = vrot.slane %v3462_v32, 4  ;;  %v13662_v63 = vld [vmem:[#allocation6_spill] sm:$0xff] }
 0x71e   :  { %v3464_v51 = vunpack.c.l.b16 %v3448_v54  ;;  %v3471_v18 = vsel %vm1296_vm2, %v3470_v42, %v3469_v34  ;;  %v3474_v21 = vrot.slane %v3463_v5, 3  ;;  %v3427_v34 = vld [vmem:[#allocation4 + $0x6] ss:$8 sm:$0xf] }
 0x71f   :  { %3425 = vst [vmem:[#allocation5 + $0x75] sm:$0x1] %v3417_v27  ;;  %v3449_v30 = vpack.c.bf16 %v3417_v27, %v3417_v27  ;;  %v3473_v1 = vsel %vm1299_vm3, %v3472_v43, %v3471_v18  ;;  %v3429_v43 = vld [vmem:[#allocation4 + $0x46] ss:$8 sm:$0xf] }
 0x720   :  { %v3475_v15 = vsel %vm1302_vm4, %v3474_v21, %v3473_v1  ;;  %v3476_v16 = vrot.slane %v3464_v51, 2  ;;  %v3431_v51 = vld [vmem:[#allocation4 + $0x86] ss:$8 sm:$0xf] }
 0x721   :  { %v3465_v31 = vunpack.c.l.b16 %v3449_v30  ;;  %v3435_v18 = vld [vmem:[#allocation4 + $0x106] ss:$8 sm:$0xf] }
 0x722   :  { %v3477_v33 = vsel %vm1305_vm5, %v3476_v16, %v3475_v15  ;;  %v3433_v16 = vld [vmem:[#allocation4 + $0xc6] ss:$8 sm:$0xf] }
 0x723   :  { %v3478_v25 = vrot.slane %v3465_v31, 1  ;;  %v3437_v31 = vld [vmem:[#allocation4 + $0x146] ss:$8 sm:$0xf] }
 0x725   :  { %v3479_v39 = vsel %vm1308_vm6, %v3478_v25, %v3477_v33 }
 0x726   :  { %v3480_v48 = vpack.c.b16 %v3479_v39, %v3479_v39 }
 0x728   :  { %3515 = vmatmul.mubr.bf16.vlgmr.msra.gmra.mrb[56].mxu0 %v3480_v48  ;;  %3556 = vmatmul.mubr.bf16.vlgmr.msra.gmra.mrb[56].mxu1 %v3480_v48  ;;  %v3439_v48 = vld [vmem:[#allocation4 + $0x186] ss:$8 sm:$0xf] }
 0x729   :  { %3917 = vmatpush1.bf16.msra.mxu0 %v11228_v36  ;;  %3958 = vmatpush1.bf16.msra.mxu1 %v11234_v17  ;;  %v13646_v36 = vld [vmem:[#allocation7_spill] sm:$0xff]  ;;  %v13647_v17 = vld [vmem:[#allocation8_spill] sm:$0xff] }
 0x72a   :  { %3918 = vmatprep.subr.bf16.mxu0 %v11240_v38  ;;  %3959 = vmatprep.subr.bf16.mxu1 %v11246_v52  ;;  %v13648_v38 = vld [vmem:[#allocation9_spill] sm:$0xff]  ;;  %v13649_v52 = vld [vmem:[#allocation10_spill] sm:$0xff] }
 0x72b   :  { %3948 = vmatprep.mubr.bf16.mxu0 %v13578_v41  ;;  %3989 = vmatprep.mubr.bf16.mxu1 %v13578_v41 }
 0x72d   :  { %3919 = vmatpush1.bf16.msra.mxu0 %v11254_v56  ;;  %3960 = vmatpush1.bf16.msra.mxu1 %v11260_v26  ;;  %v13650_v56 = vld [vmem:[#allocation11_spill] sm:$0xff]  ;;  %v13651_v26 = vld [vmem:[#allocation12_spill] sm:$0xff] }
 0x72e   :  { %3920 = vmatprep.subr.bf16.mxu0 %v11266_v57  ;;  %3961 = vmatprep.subr.bf16.mxu1 %v11272_v4  ;;  %v13652_v57 = vld [vmem:[#allocation13_spill] sm:$0xff]  ;;  %v13653_v4 = vld [vmem:[#allocation14_spill] sm:$0xff] }
 0x731   :  { %3921 = vmatpush1.bf16.msra.mxu0 %v11278_v29  ;;  %3962 = vmatpush1.bf16.msra.mxu1 %v11284_v19  ;;  %v13654_v29 = vld [vmem:[#allocation15_spill] sm:$0xff]  ;;  %v13655_v19 = vld [vmem:[#allocation16_spill] sm:$0xff] }
 0x732   :  { %3922 = vmatprep.subr.bf16.mxu0 %v11290_v46  ;;  %3963 = vmatprep.subr.bf16.mxu1 %v11296_v60  ;;  %v13656_v46 = vld [vmem:[#allocation17_spill] sm:$0xff]  ;;  %v13657_v60 = vld [vmem:[#allocation18_spill] sm:$0xff] }
 0x735   :  { %3923 = vmatpush1.bf16.msra.mxu0 %v11302_v47  ;;  %3964 = vmatpush1.bf16.msra.mxu1 %v11308_v59  ;;  %v13658_v47 = vld [vmem:[#allocation19_spill] sm:$0xff]  ;;  %v13659_v59 = vld [vmem:[#allocation20_spill] sm:$0xff] }
 0x736   :  { %3924 = vmatprep.subr.bf16.mxu0 %v11314_v0  ;;  %3965 = vmatprep.subr.bf16.mxu1 %v11320_v6  ;;  %v13660_v0 = vld [vmem:[#allocation21_spill] sm:$0xff]  ;;  %v13661_v6 = vld [vmem:[#allocation22_spill] sm:$0xff] }
 0x739   :  { %3925 = vmatpush1.bf16.msra.mxu0 %v13646_v36  ;;  %3966 = vmatpush1.bf16.msra.mxu1 %v13647_v17  ;;  %v3441_v36 = vld [vmem:[#allocation4 + $0x1c6] ss:$8 sm:$0xf] }
 0x73a   :  { %3926 = vmatprep.subr.bf16.mxu0 %v13648_v38  ;;  %3967 = vmatprep.subr.bf16.mxu1 %v13649_v52 }
 0x73d   :  { %3927 = vmatpush1.bf16.msra.mxu0 %v13650_v56  ;;  %3968 = vmatpush1.bf16.msra.mxu1 %v13651_v26 }
 0x73e   :  { %3928 = vmatprep.subr.bf16.mxu0 %v13652_v57  ;;  %3969 = vmatprep.subr.bf16.mxu1 %v13653_v4 }
 0x741   :  { %3929 = vmatpush1.bf16.msra.mxu0 %v13654_v29  ;;  %3970 = vmatpush1.bf16.msra.mxu1 %v13655_v19 }
 0x742   :  { %3930 = vmatprep.subr.bf16.mxu0 %v13656_v46  ;;  %3971 = vmatprep.subr.bf16.mxu1 %v13657_v60 }
 0x745   :  { %3931 = vmatpush1.bf16.msra.mxu0 %v13658_v47  ;;  %3972 = vmatpush1.bf16.msra.mxu1 %v13659_v59 }
 0x746   :  { %4350 = vmatprep.subr.bf16.mxu0 %v13660_v0  ;;  %4391 = vmatprep.subr.bf16.mxu1 %v13661_v6 }
 0x7fb   :  { %v3516_v44 = vpop.f32.mrb[56].mxu0  ;;  %v3557_v24 = vpop.f32.mrb[56].mxu1 }
 0x7fc   :  { %v3518_v2 = vpop.f32.mrb[57].mxu0  ;;  %v3559_v9 = vpop.f32.mrb[57].mxu1 }
 0x7fd   :  { %v3568_v55 = vcombine.low %v3516_v44, %v3518_v2  ;;  %v3569_v14 = vcombine.high %v3516_v44, %v3518_v2  ;;  %v3570_v62 = vcombine.low %v3557_v24, %v3559_v9  ;;  %v3571_v20 = vcombine.high %v3557_v24, %v3559_v9  ;;  %v3520_v53 = vpop.f32.mrb[58].mxu0  ;;  %v3561_v22 = vpop.f32.mrb[58].mxu1 }
 0x7fe   :  { %v3521_v7 = vpop.f32.mrb[59].mxu0  ;;  %v3562_v10 = vpop.f32.mrb[59].mxu1 }
 0x7ff   :  { %v3578_v58 = vrot.slane %v3568_v55, %v13662_v63  ;;  %v3585_v61 = vrot.slane %v3569_v14, %v13662_v63  ;;  %v3592_v11 = vrot.slane %v3570_v62, %v13662_v63  ;;  %v3599_v49 = vrot.slane %v3571_v20, %v13662_v63 }
 0x801   :  { %v3600_v35 = vcombine.low %v3578_v58, %v3592_v11  ;;  %v3601_v32 = vcombine.high %v3578_v58, %v3592_v11  ;;  %v3602_v23 = vcombine.low %v3585_v61, %v3599_v49  ;;  %v3603_v54 = vcombine.high %v3585_v61, %v3599_v49 }
 0x803   :  { %v3610_v5 = vrot.slane %v3600_v35, %v13662_v63  ;;  %v3617_v3 = vrot.slane %v3602_v23, %v13662_v63  ;;  %v3624_v42 = vrot.slane %v3601_v32, %v13662_v63  ;;  %v3631_v27 = vrot.slane %v3603_v54, %v13662_v63 }
 0x805   :  { %v3632_v21 = vcombine.high %v3610_v5, %v3610_v5  ;;  %v3633_v30 = vcombine.high %v3617_v3, %v3617_v3  ;;  %v3634_v1 = vcombine.high %v3624_v42, %v3624_v42  ;;  %v3635_v15 = vcombine.high %v3631_v27, %v3631_v27 }
 0x806   :  { %v11558_v33 = vadd.f32 %v3610_v5, %v3427_v34  ;;  %v11560_v25 = vadd.f32 %v3624_v42, %v3429_v43  ;;  %v11562_v39 = vadd.f32 %v3617_v3, %v3435_v18  ;;  %v11568_v52 = vadd.f32 %v3631_v27, %v3437_v31 }
 0x807   :  { %v11564_v17 = vadd.f32 %v3632_v21, %v3431_v51  ;;  %v11566_v38 = vadd.f32 %v3634_v1, %v3433_v16  ;;  %v11570_v56 = vadd.f32 %v3633_v30, %v3439_v48  ;;  %v11572_v26 = vadd.f32 %v3635_v15, %v3441_v36 }
 0x808   :  { %v3652_v57 = vmul.f32 0.5, %v11558_v33  ;;  %v3653_v4 = vmul.f32 0.5, %v11560_v25  ;;  %v3656_v46 = vmul.f32 0.5, %v11562_v39  ;;  %v3692_v60 = vrot.slane %v11558_v33, 1 }
 0x809   :  { %v3654_v29 = vmul.f32 0.5, %v11564_v17  ;;  %v3655_v19 = vmul.f32 0.5, %v11566_v38  ;;  %v3657_v47 = vmul.f32 0.5, %v11568_v52  ;;  %v3693_v59 = vrot.slane %v11560_v25, 1 }
 0x80a   :  { %8735 = vtanh.f32 %v3652_v57  ;;  %v3658_v0 = vmul.f32 0.5, %v11570_v56  ;;  %v3659_v6 = vmul.f32 0.5, %v11572_v26  ;;  %v3694_v44 = vrot.slane %v11564_v17, 1 }
 0x80b   :  { %8737 = vtanh.f32 %v3653_v4  ;;  %v3695_v24 = vrot.slane %v11566_v38, 1  ;;  %v3696_v2 = vrot.slane %v11562_v39, 1  ;;  %v3697_v9 = vrot.slane %v11568_v52, 1 }
 0x80c   :  { %8739 = vtanh.f32 %v3654_v29  ;;  %v3698_v55 = vrot.slane %v11570_v56, 1  ;;  %v3699_v14 = vrot.slane %v11572_v26, 1  ;;  %v3708_v62 = vmul.f32 0.5, %v3692_v60 }
 0x80d   :  { %8741 = vtanh.f32 %v3655_v19  ;;  %v3709_v20 = vmul.f32 0.5, %v3693_v59  ;;  %v3710_v53 = vmul.f32 0.5, %v3694_v44  ;;  %v3711_v22 = vmul.f32 0.5, %v3695_v24 }
 0x80e   :  { %8743 = vtanh.f32 %v3656_v46  ;;  %v3712_v7 = vmul.f32 0.5, %v3696_v2  ;;  %v3713_v10 = vmul.f32 0.5, %v3697_v9  ;;  %v3714_v58 = vmul.f32 0.5, %v3698_v55 }
 0x80f   :  { %8745 = vtanh.f32 %v3657_v47  ;;  %v3715_v61 = vmul.f32 0.5, %v3699_v14  ;;  %v3740_v11 = vrot.slane %v11558_v33, 2  ;;  %v3741_v49 = vrot.slane %v11560_v25, 2 }
 0x810   :  { %8747 = vtanh.f32 %v3658_v0  ;;  %v3742_v35 = vrot.slane %v11564_v17, 2  ;;  %v3743_v32 = vrot.slane %v11566_v38, 2  ;;  %v3744_v54 = vrot.slane %v11562_v39, 2 }
 0x811   :  { %8749 = vtanh.f32 %v3659_v6  ;;  %v3745_v5 = vrot.slane %v11568_v52, 2  ;;  %v3764_v3 = vrot.slane %v11558_v33, 3  ;;  %v3746_v27 = vrot.slane %v11570_v56, 2 }
 0x812   :  { %8751 = vtanh.f32 %v3708_v62  ;;  %v3765_v34 = vrot.slane %v11560_v25, 3  ;;  %v3766_v43 = vrot.slane %v11564_v17, 3  ;;  %v3747_v18 = vrot.slane %v11572_v26, 2 }
 0x813   :  { %8753 = vtanh.f32 %v3709_v20  ;;  %v3767_v21 = vrot.slane %v11566_v38, 3  ;;  %v3768_v30 = vrot.slane %v11562_v39, 3  ;;  %v3769_v16 = vrot.slane %v11568_v52, 3 }
 0x814   :  { %v8736_v23 = vpop.eup %8735  ;;  %8755 = vtanh.f32 %v3710_v53  ;;  %v3770_v31 = vrot.slane %v11570_v56, 3  ;;  %v3771_v25 = vrot.slane %v11572_v26, 3  ;;  %v3780_v36 = vmul.f32 0.5, %v3764_v3 }
 0x815   :  { %v8738_v42 = vpop.eup %8737  ;;  %8757 = vtanh.f32 %v3711_v22  ;;  %v3668_v15 = vadd.f32 1.0, %v8736_v23  ;;  %v3781_v4 = vmul.f32 0.5, %v3765_v34  ;;  %v3782_v38 = vmul.f32 0.5, %v3766_v43 }
 0x816   :  { %v8740_v51 = vpop.eup %8739  ;;  %8759 = vtanh.f32 %v3712_v7  ;;  %v3669_v48 = vadd.f32 1.0, %v8738_v42  ;;  %v3783_v19 = vmul.f32 0.5, %v3767_v21  ;;  %v3784_v46 = vmul.f32 0.5, %v3768_v30 }
 0x817   :  { %v8742_v1 = vpop.eup %8741  ;;  %8761 = vtanh.f32 %v3713_v10  ;;  %v3670_v57 = vadd.f32 1.0, %v8740_v51  ;;  %v3676_v47 = vmul.f32 0.5, %v3668_v15  ;;  %v3785_v56 = vmul.f32 0.5, %v3769_v16 }
 0x818   :  { %v8744_v33 = vpop.eup %8743  ;;  %8763 = vtanh.f32 %v3714_v58  ;;  %v3671_v39 = vadd.f32 1.0, %v8742_v1  ;;  %v3677_v6 = vmul.f32 0.5, %v3669_v48  ;;  %v3786_v44 = vmul.f32 0.5, %v3770_v31 }
 0x819   :  { %v8746_v17 = vpop.eup %8745  ;;  %8765 = vtanh.f32 %v3715_v61  ;;  %v3672_v52 = vadd.f32 1.0, %v8744_v33  ;;  %v3678_v9 = vmul.f32 0.5, %v3670_v57 }
 0x81a   :  { %v8748_v29 = vpop.eup %8747  ;;  %8767 = vtanh.f32 %v3740_v11  ;;  %v3673_v0 = vadd.f32 1.0, %v8746_v17  ;;  %v3679_v20 = vmul.f32 0.5, %v3671_v39 }
 0x81b   :  { %v8750_v60 = vpop.eup %8749  ;;  %8769 = vtanh.f32 %v3741_v49  ;;  %v3674_v2 = vadd.f32 1.0, %v8748_v29  ;;  %v3680_v7 = vmul.f32 0.5, %v3672_v52 }
 0x81c   :  { %v8752_v59 = vpop.eup %8751  ;;  %8771 = vtanh.f32 %v3742_v35  ;;  %v3675_v62 = vadd.f32 1.0, %v8750_v60  ;;  %v3681_v11 = vmul.f32 0.5, %v3673_v0 }
 0x81d   :  { %v8754_v24 = vpop.eup %8753  ;;  %v3724_v55 = vadd.f32 1.0, %v8752_v59  ;;  %8773 = vtanh.f32 %v3743_v32  ;;  %v3682_v3 = vmul.f32 0.5, %v3674_v2 }
 0x81e   :  { %v8756_v14 = vpop.eup %8755  ;;  %v3725_v53 = vadd.f32 1.0, %v8754_v24  ;;  %8775 = vtanh.f32 %v3744_v54  ;;  %v3683_v43 = vmul.f32 0.5, %v3675_v62 }
 0x81f   :  { %v8758_v22 = vpop.eup %8757  ;;  %v3726_v10 = vadd.f32 1.0, %v8756_v14  ;;  %v3732_v58 = vmul.f32 0.5, %v3724_v55  ;;  %8777 = vtanh.f32 %v3745_v5 }
 0x820   :  { %v8760_v61 = vpop.eup %8759  ;;  %v3727_v49 = vadd.f32 1.0, %v8758_v22  ;;  %v3733_v35 = vmul.f32 0.5, %v3725_v53  ;;  %8779 = vtanh.f32 %v3746_v27 }
 0x821   :  { %v8762_v23 = vpop.eup %8761  ;;  %v3728_v42 = vadd.f32 1.0, %v8760_v61  ;;  %v3734_v34 = vmul.f32 0.5, %v3726_v10  ;;  %8781 = vtanh.f32 %v3747_v18  ;;  %v3812_v5 = vmul.f32 %v3732_v58, %v11480_v8 }
 0x822   :  { %v8764_v32 = vpop.eup %8763  ;;  %v3729_v51 = vadd.f32 1.0, %v8762_v23  ;;  %v3735_v21 = vmul.f32 0.5, %v3727_v49  ;;  %8783 = vtanh.f32 %v3780_v36  ;;  %v3813_v27 = vmul.f32 %v3733_v35, %v11483_v12 }
 0x823   :  { %v8766_v54 = vpop.eup %8765  ;;  %v3730_v30 = vadd.f32 1.0, %v8764_v32  ;;  %v3736_v1 = vmul.f32 0.5, %v3728_v42  ;;  %8785 = vtanh.f32 %v3781_v4  ;;  %v3814_v18 = vmul.f32 %v3734_v34, %v11486_v50 }
 0x824   :  { %v8768_v15 = vpop.eup %8767  ;;  %v3731_v16 = vadd.f32 1.0, %v8766_v54  ;;  %v3737_v31 = vmul.f32 0.5, %v3729_v51  ;;  %8787 = vtanh.f32 %v3782_v38  ;;  %v3815_v29 = vmul.f32 %v3735_v21, %v11490_v13 }
 0x825   :  { %v8770_v33 = vpop.eup %8769  ;;  %v3738_v48 = vmul.f32 0.5, %v3730_v30  ;;  %8789 = vtanh.f32 %v3783_v19  ;;  %v3820_v17 = vmul.f32 %v8768_v15, %v3676_v47  ;;  %v3816_v8 = vmul.f32 %v3736_v1, %v11495_v37 }
 0x826   :  { %v8772_v57 = vpop.eup %8771  ;;  %v3739_v36 = vmul.f32 0.5, %v3731_v16  ;;  %8791 = vtanh.f32 %v3784_v46  ;;  %v3821_v4 = vmul.f32 %v8770_v33, %v3677_v6  ;;  %v3817_v19 = vmul.f32 %v3737_v31, %v11498_v28 }
 0x827   :  { %v8774_v39 = vpop.eup %8773  ;;  %8793 = vtanh.f32 %v3785_v56  ;;  %v3822_v60 = vmul.f32 %v8772_v57, %v3678_v9  ;;  %v11611_v38 = vadd.f32 %v3820_v17, %v3812_v5  ;;  %v3818_v46 = vmul.f32 %v3738_v48, %v11501_v45 }
 0x828   :  { %v8776_v12 = vpop.eup %8775  ;;  %8795 = vtanh.f32 %v3786_v44  ;;  %v3823_v52 = vmul.f32 %v8774_v39, %v3679_v20  ;;  %v11614_v50 = vadd.f32 %v3821_v4, %v3813_v27  ;;  %v3819_v37 = vmul.f32 %v3739_v36, %v11504_v40 }
 0x829   :  { %v8778_v47 = vpop.eup %8777  ;;  %v3824_v59 = vmul.f32 %v8776_v12, %v3680_v7  ;;  %v11617_v13 = vadd.f32 %v3822_v60, %v3814_v18  ;;  %8797 = vtanh.f32 %v11611_v38  ;;  %v3787_v44 = vmul.f32 0.5, %v3771_v25 }
 0x82a   :  { %v8780_v56 = vpop.eup %8779  ;;  %v3825_v0 = vmul.f32 %v8778_v47, %v3681_v11  ;;  %v11621_v6 = vadd.f32 %v3823_v52, %v3815_v29  ;;  %8799 = vtanh.f32 %v11614_v50 }
 0x82b   :  { %v8782_v28 = vpop.eup %8781  ;;  %v3826_v24 = vmul.f32 %v8780_v56, %v3682_v3  ;;  %v11626_v2 = vadd.f32 %v3824_v59, %v3816_v8  ;;  %8801 = vtanh.f32 %v11617_v13 }
 0x82c   :  { %v8784_v45 = vpop.eup %8783  ;;  %v3827_v9 = vmul.f32 %v8782_v28, %v3683_v43  ;;  %v11629_v55 = vadd.f32 %v3825_v0, %v3817_v19  ;;  %8803 = vtanh.f32 %v11621_v6 }
 0x82d   :  { %v8786_v40 = vpop.eup %8785  ;;  %v11632_v14 = vadd.f32 %v3826_v24, %v3818_v46  ;;  %8805 = vtanh.f32 %v11626_v2  ;;  %v3796_v20 = vadd.f32 1.0, %v8784_v45 }
 0x82e   :  { %v8788_v62 = vpop.eup %8787  ;;  %v11635_v26 = vadd.f32 %v3827_v9, %v3819_v37  ;;  %8807 = vtanh.f32 %v11629_v55  ;;  %v3797_v53 = vadd.f32 1.0, %v8786_v40 }
 0x82f   :  { %v8790_v25 = vpop.eup %8789  ;;  %8809 = vtanh.f32 %v3787_v44  ;;  %v3798_v7 = vadd.f32 1.0, %v8788_v62  ;;  %v3804_v49 = vmul.f32 0.5, %v3796_v20 }
 0x830   :  { %v8792_v22 = vpop.eup %8791  ;;  %8811 = vtanh.f32 %v11632_v14  ;;  %v3799_v58 = vadd.f32 1.0, %v8790_v25  ;;  %v3805_v3 = vmul.f32 0.5, %v3797_v53 }
 0x831   :  { %v8794_v10 = vpop.eup %8793  ;;  %8813 = vtanh.f32 %v11635_v26  ;;  %v3800_v11 = vadd.f32 1.0, %v8792_v22  ;;  %v3806_v34 = vmul.f32 0.5, %v3798_v7 }
 0x832   :  { %v8796_v61 = vpop.eup %8795  ;;  %v3801_v23 = vadd.f32 1.0, %v8794_v10  ;;  %v3807_v51 = vmul.f32 0.5, %v3799_v58 }
 0x833   :  { %v8798_v35 = vpop.eup %8797  ;;  %v3802_v54 = vadd.f32 1.0, %v8796_v61  ;;  %v3808_v1 = vmul.f32 0.5, %v3800_v11 }
 0x834   :  { %v8800_v42 = vpop.eup %8799  ;;  %v3844_v32 = vmul.f32 %v8798_v35, %v3804_v49  ;;  %v3809_v27 = vmul.f32 0.5, %v3801_v23 }
 0x835   :  { %v8802_v43 = vpop.eup %8801  ;;  %v3845_v21 = vmul.f32 %v8800_v42, %v3805_v3  ;;  %v3810_v36 = vmul.f32 0.5, %v3802_v54  ;;  %v11682_v54 = vld [vmem:[%s13435_s2 + $0x28] ss:$16 sps:$4 sm:$0xff]  }
 0x836   :  { %v8804_v30 = vpop.eup %8803  ;;  %v3846_v5 = vmul.f32 %v8802_v43, %v3806_v34  ;;  %3852 = vst [vmem:[#allocation5 + $0x6] sm:$0x1] %v3844_v32  ;;  %v3876_v15 = vpack.c.bf16 %v3844_v32, %v3844_v32  ;;  %v11650_v34 = vld [vmem:[%s13435_s2] ss:$16 sps:$4 sm:$0xff]   ;;  %v11656_v32 = vld [vmem:[%s13435_s2 + $0x8] ss:$16 sps:$4 sm:$0xff]  }
 0x837   :  { %v8806_v16 = vpop.eup %8805  ;;  %3853 = vst [vmem:[#allocation5 + $0x16] sm:$0x1] %v3845_v21  ;;  %v3877_v31 = vpack.c.bf16 %v3845_v21, %v3845_v21  ;;  %v3847_v33 = vmul.f32 %v8804_v30, %v3807_v51  ;;  %v11662_v43 = vld [vmem:[%s13435_s2 + $0x24] ss:$16 sps:$4 sm:$0xff]   ;;  %v11668_v51 = vld [vmem:[%s13435_s2 + $0x2c] ss:$16 sps:$4 sm:$0xff]  }
 0x838   :  { %v8808_v48 = vpop.eup %8807  ;;  %3854 = vst [vmem:[#allocation5 + $0x26] sm:$0x1] %v3846_v5  ;;  %v3848_v18 = vmul.f32 %v8806_v16, %v3808_v1  ;;  %v3878_v17 = vpack.c.bf16 %v3846_v5, %v3846_v5  ;;  %v3892_v19 = vunpack.c.l.b16 %v3876_v15  ;;  %v11676_v21 = vld [vmem:[%s13435_s2 + $0x20] ss:$16 sps:$4 sm:$0xff]   ;;  %v11688_v30 = vld [vmem:[%s13435_s2 + $0x44] ss:$16 sps:$4 sm:$0xff]  }
 0x839   :  { %v8810_v57 = vpop.eup %8809  ;;  %v3849_v29 = vmul.f32 %v8808_v48, %v3809_v27  ;;  %3855 = vst [vmem:[#allocation5 + $0x36] sm:$0x1] %v3847_v33  ;;  %v3879_v4 = vpack.c.bf16 %v3847_v33, %v3847_v33  ;;  %v3893_v39 = vunpack.c.l.b16 %v3877_v31  ;;  %v11694_v1 = vld [vmem:[%s13435_s2 + $0x4c] ss:$16 sps:$4 sm:$0xff]   ;;  %v11700_v5 = vld [vmem:[%s13435_s2 + $0x40] ss:$16 sps:$4 sm:$0xff]  }
 0x83a   :  { %v8812_v8 = vpop.eup %8811  ;;  %v3803_v60 = vadd.f32 1.0, %v8810_v57  ;;  %3856 = vst [vmem:[#allocation5 + $0x46] sm:$0x1] %v3848_v18  ;;  %v3880_v12 = vpack.c.bf16 %v3848_v18, %v3848_v18  ;;  %v3894_v52 = vunpack.c.l.b16 %v3878_v17  ;;  %v11706_v15 = vld [vmem:[%s13435_s2 + $0x48] ss:$16 sps:$4 sm:$0xff]  }
 0x83b   :  { %v8814_v47 = vpop.eup %8813  ;;  %v3850_v46 = vmul.f32 %v8812_v8, %v3810_v36  ;;  %3857 = vst [vmem:[#allocation5 + $0x56] sm:$0x1] %v3849_v29  ;;  %v3881_v59 = vpack.c.bf16 %v3849_v29, %v3849_v29  ;;  %v3895_v56 = vunpack.c.l.b16 %v3879_v4  ;;  %v3900_v37 = vrot.slane %v3893_v39, 7  ;;  %v11712_v16 = vld [vmem:[%s13435_s2 + $0x64] ss:$16 sps:$4 sm:$0xff]  }
 0x83c   :  { %v3811_v0 = vmul.f32 0.5, %v3803_v60  ;;  %v3896_v28 = vunpack.c.l.b16 %v3880_v12  ;;  %v3902_v44 = vrot.slane %v3894_v52, 6  ;;  %v11718_v31 = vld [vmem:[%s13435_s2 + $0x6c] ss:$16 sps:$4 sm:$0xff]   ;;  %v11724_v27 = vld [vmem:[%s13435_s2 + $0x60] ss:$16 sps:$4 sm:$0xff]  }
 0x83d   :  { %3858 = vst [vmem:[#allocation5 + $0x66] sm:$0x1] %v3850_v46  ;;  %v3882_v24 = vpack.c.bf16 %v3850_v46, %v3850_v46  ;;  %v3897_v45 = vunpack.c.l.b16 %v3881_v59  ;;  %v3901_v9 = vsel %vm1290_vm0, %v3900_v37, %v3892_v19  ;;  %v3904_v40 = vrot.slane %v3895_v56, 5  ;;  %v11730_v33 = vld [vmem:[%s13435_s2 + $0x68] ss:$16 sps:$4 sm:$0xff]  }
 0x83e   :  { %v3851_v62 = vmul.f32 %v8814_v47, %v3811_v0  ;;  %v3903_v20 = vsel %vm1293_vm1, %v3902_v44, %v3901_v9  ;;  %v3906_v25 = vrot.slane %v3896_v28, 4  ;;  %v11736_v48 = vld [vmem:[%s13435_s2 + $0x84] ss:$16 sps:$4 sm:$0xff]   ;;  %v11742_v18 = vld [vmem:[%s13435_s2 + $0x8c] ss:$16 sps:$4 sm:$0xff]  }
 0x83f   :  { %v3898_v53 = vunpack.c.l.b16 %v3882_v24  ;;  %v3905_v22 = vsel %vm1296_vm2, %v3904_v40, %v3903_v20  ;;  %v3908_v7 = vrot.slane %v3897_v45, 3  ;;  %v11748_v17 = vld [vmem:[%s13435_s2 + $0x80] ss:$16 sps:$4 sm:$0xff]   ;;  %v11754_v57 = vld [vmem:[%s13435_s2 + $0x88] ss:$16 sps:$4 sm:$0xff]  }
 0x840   :  { %3859 = vst [vmem:[#allocation5 + $0x76] sm:$0x1] %v3851_v62  ;;  %v3883_v10 = vpack.c.bf16 %v3851_v62, %v3851_v62  ;;  %v3907_v58 = vsel %vm1299_vm3, %v3906_v25, %v3905_v22  ;;  %13663 = vst [vmem:[#allocation7_spill] sm:$0xff] %v11748_v17  ;;  %v11760_v36 = vld [vmem:[%s13435_s2 + $0xa4] ss:$16 sps:$4 sm:$0xff]  }
 0x841   :  { %v3909_v61 = vsel %vm1302_vm4, %v3908_v7, %v3907_v58  ;;  %v3910_v11 = vrot.slane %v3898_v53, 2  ;;  %13664 = vst [vmem:[#allocation8_spill] sm:$0xff] %v11754_v57  ;;  %13665 = vst [vmem:[#allocation9_spill] sm:$0xff] %v11760_v36  ;;  %v11766_v29 = vld [vmem:[%s13435_s2 + $0xac] ss:$16 sps:$4 sm:$0xff]  }
 0x842   :  { %v3899_v49 = vunpack.c.l.b16 %v3883_v10  ;;  %13666 = vst [vmem:[#allocation10_spill] sm:$0xff] %v11766_v29  ;;  %v11772_v4 = vld [vmem:[%s13435_s2 + $0xa0] ss:$16 sps:$4 sm:$0xff]   ;;  %v11778_v39 = vld [vmem:[%s13435_s2 + $0xa8] ss:$16 sps:$4 sm:$0xff]  }
 0x843   :  { %v3911_v35 = vsel %vm1305_vm5, %v3910_v11, %v3909_v61  ;;  %13667 = vst [vmem:[#allocation11_spill] sm:$0xff] %v11772_v4  ;;  %13668 = vst [vmem:[#allocation12_spill] sm:$0xff] %v11778_v39  ;;  %v11784_v8 = vld [vmem:[%s13435_s2 + $0xc4] ss:$16 sps:$4 sm:$0xff]   ;;  %v11790_v60 = vld [vmem:[%s13435_s2 + $0xcc] ss:$16 sps:$4 sm:$0xff]  }
 0x844   :  { %v3912_v23 = vrot.slane %v3899_v49, 1  ;;  %13669 = vst [vmem:[#allocation13_spill] sm:$0xff] %v11784_v8  ;;  %13670 = vst [vmem:[#allocation14_spill] sm:$0xff] %v11790_v60  ;;  %v11796_v12 = vld [vmem:[%s13435_s2 + $0xc0] ss:$16 sps:$4 sm:$0xff]  }
 0x845   :  { %13671 = vst [vmem:[#allocation15_spill] sm:$0xff] %v11796_v12  ;;  %v11802_v19 = vld [vmem:[%s13435_s2 + $0xc8] ss:$16 sps:$4 sm:$0xff]   ;;  %v11808_v52 = vld [vmem:[%s13435_s2 + $0xe4] ss:$16 sps:$4 sm:$0xff]  }
 0x846   :  { %v3913_v3 = vsel %vm1308_vm6, %v3912_v23, %v3911_v35  ;;  %13672 = vst [vmem:[#allocation16_spill] sm:$0xff] %v11802_v19  ;;  %13673 = vst [vmem:[#allocation17_spill] sm:$0xff] %v11808_v52  ;;  %v11814_v47 = vld [vmem:[%s13435_s2 + $0xec] ss:$16 sps:$4 sm:$0xff]   ;;  %v11820_v46 = vld [vmem:[%s13435_s2 + $0xe0] ss:$16 sps:$4 sm:$0xff]  }
 0x847   :  { %v3914_v42 = vpack.c.b16 %v3913_v3, %v3913_v3  ;;  %13674 = vst [vmem:[#allocation18_spill] sm:$0xff] %v11814_v47  ;;  %13675 = vst [vmem:[#allocation19_spill] sm:$0xff] %v11820_v46  ;;  %v11826_v59 = vld [vmem:[%s13435_s2 + $0xe8] ss:$16 sps:$4 sm:$0xff]   ;;  %v11832_v56 = vld [vmem:[%s13435_s2 + $0x4] ss:$16 sps:$4 sm:$0xff]  }
 0x848   :  { %13676 = vst [vmem:[#allocation20_spill] sm:$0xff] %v11826_v59  ;;  %13677 = vst [vmem:[#allocation21_spill] sm:$0xff] %v11832_v56  ;;  %v11838_v37 = vld [vmem:[%s13435_s2 + $0xc] ss:$16 sps:$4 sm:$0xff]  }
 0x849   :  { %3949 = vmatmul.mubr.bf16.vlgmr.msra.gmra.mrb[60].mxu0 %v3914_v42  ;;  %3990 = vmatmul.mubr.bf16.vlgmr.msra.gmra.mrb[60].mxu1 %v3914_v42  ;;  %13678 = vst [vmem:[#allocation22_spill] sm:$0xff] %v11838_v37 }
 0x84a   :  { %4351 = vmatpush1.bf16.msra.mxu0 %v11650_v34  ;;  %4392 = vmatpush1.bf16.msra.mxu1 %v11656_v32 }
 0x84b   :  { %4352 = vmatprep.subr.bf16.mxu0 %v11662_v43  ;;  %4393 = vmatprep.subr.bf16.mxu1 %v11668_v51 }
 0x84c   :  { %4382 = vmatprep.mubr.bf16.mxu0 %v13578_v41  ;;  %4423 = vmatprep.mubr.bf16.mxu1 %v13578_v41 }
 0x84e   :  { %4353 = vmatpush1.bf16.msra.mxu0 %v11676_v21  ;;  %4394 = vmatpush1.bf16.msra.mxu1 %v11682_v54 }
 0x84f   :  { %4354 = vmatprep.subr.bf16.mxu0 %v11688_v30  ;;  %4395 = vmatprep.subr.bf16.mxu1 %v11694_v1 }
 0x852   :  { %4355 = vmatpush1.bf16.msra.mxu0 %v11700_v5  ;;  %4396 = vmatpush1.bf16.msra.mxu1 %v11706_v15 }
 0x853   :  { %4356 = vmatprep.subr.bf16.mxu0 %v11712_v16  ;;  %4397 = vmatprep.subr.bf16.mxu1 %v11718_v31 }
 0x856   :  { %4357 = vmatpush1.bf16.msra.mxu0 %v11724_v27  ;;  %4398 = vmatpush1.bf16.msra.mxu1 %v11730_v33 }
 0x857   :  { %4358 = vmatprep.subr.bf16.mxu0 %v11736_v48  ;;  %4399 = vmatprep.subr.bf16.mxu1 %v11742_v18 }
 0x85a   :  { %4359 = vmatpush1.bf16.msra.mxu0 %v11748_v17  ;;  %4400 = vmatpush1.bf16.msra.mxu1 %v11754_v57 }
 0x85b   :  { %4360 = vmatprep.subr.bf16.mxu0 %v11760_v36  ;;  %4401 = vmatprep.subr.bf16.mxu1 %v11766_v29 }
 0x85e   :  { %4361 = vmatpush1.bf16.msra.mxu0 %v11772_v4  ;;  %4402 = vmatpush1.bf16.msra.mxu1 %v11778_v39 }
 0x85f   :  { %4362 = vmatprep.subr.bf16.mxu0 %v11784_v8  ;;  %4403 = vmatprep.subr.bf16.mxu1 %v11790_v60 }
 0x862   :  { %4363 = vmatpush1.bf16.msra.mxu0 %v11796_v12  ;;  %4404 = vmatpush1.bf16.msra.mxu1 %v11802_v19 }
 0x863   :  { %4364 = vmatprep.subr.bf16.mxu0 %v11808_v52  ;;  %4405 = vmatprep.subr.bf16.mxu1 %v11814_v47 }
 0x866   :  { %4365 = vmatpush1.bf16.msra.mxu0 %v11820_v46  ;;  %4406 = vmatpush1.bf16.msra.mxu1 %v11826_v59 }
 0x867   :  { %4784 = vmatprep.subr.bf16.mxu0 %v11832_v56  ;;  %4825 = vmatprep.subr.bf16.mxu1 %v11838_v37 }
 0x91c   :  { %v3950_v0 = vpop.f32.mrb[60].mxu0  ;;  %v3991_v28 = vpop.f32.mrb[60].mxu1 }
 0x91d   :  { %v3952_v44 = vpop.f32.mrb[61].mxu0  ;;  %v3993_v24 = vpop.f32.mrb[61].mxu1 }
 0x91e   :  { %v4002_v45 = vcombine.low %v3950_v0, %v3952_v44  ;;  %v4003_v9 = vcombine.high %v3950_v0, %v3952_v44  ;;  %v4004_v40 = vcombine.low %v3991_v28, %v3993_v24  ;;  %v4005_v62 = vcombine.high %v3991_v28, %v3993_v24  ;;  %v3954_v20 = vpop.f32.mrb[62].mxu0  ;;  %v3995_v25 = vpop.f32.mrb[62].mxu1  ;;  %v3861_v44 = vld [vmem:[#allocation4 + $0x7] ss:$8 sm:$0xf] }
 0x91f   :  { %v3955_v53 = vpop.f32.mrb[63].mxu0  ;;  %v3996_v22 = vpop.f32.mrb[63].mxu1  ;;  %v3863_v24 = vld [vmem:[#allocation4 + $0x47] ss:$8 sm:$0xf] }
 0x920   :  { %v4012_v7 = vrot.slane %v4002_v45, %v13662_v63  ;;  %v4019_v10 = vrot.slane %v4003_v9, %v13662_v63  ;;  %v4026_v58 = vrot.slane %v4004_v40, %v13662_v63  ;;  %v4033_v61 = vrot.slane %v4005_v62, %v13662_v63  ;;  %v3865_v45 = vld [vmem:[#allocation4 + $0x87] ss:$8 sm:$0xf] }
 0x921   :  { %v3869_v9 = vld [vmem:[#allocation4 + $0x107] ss:$8 sm:$0xf] }
 0x922   :  { %v4034_v11 = vcombine.low %v4012_v7, %v4026_v58  ;;  %v4035_v49 = vcombine.high %v4012_v7, %v4026_v58  ;;  %v4036_v35 = vcombine.low %v4019_v10, %v4033_v61  ;;  %v4037_v23 = vcombine.high %v4019_v10, %v4033_v61  ;;  %v3867_v53 = vld [vmem:[#allocation4 + $0xc7] ss:$8 sm:$0xf] }
 0x923   :  { %v3871_v22 = vld [vmem:[#allocation4 + $0x147] ss:$8 sm:$0xf] }
 0x924   :  { %v4044_v3 = vrot.slane %v4034_v11, %v13662_v63  ;;  %v4051_v42 = vrot.slane %v4036_v35, %v13662_v63  ;;  %v4058_v0 = vrot.slane %v4035_v49, %v13662_v63  ;;  %v4065_v28 = vrot.slane %v4037_v23, %v13662_v63  ;;  %v3873_v61 = vld [vmem:[#allocation4 + $0x187] ss:$8 sm:$0xf] }
 0x925   :  { %v3875_v11 = vld [vmem:[#allocation4 + $0x1c7] ss:$8 sm:$0xf] }
 0x926   :  { %v4066_v20 = vcombine.high %v4044_v3, %v4044_v3  ;;  %v4067_v40 = vcombine.high %v4051_v42, %v4051_v42  ;;  %v4068_v25 = vcombine.high %v4058_v0, %v4058_v0  ;;  %v4069_v62 = vcombine.high %v4065_v28, %v4065_v28 }
 0x927   :  { %v11849_v7 = vadd.f32 %v4044_v3, %v3861_v44  ;;  %v11851_v10 = vadd.f32 %v4058_v0, %v3863_v24  ;;  %v11853_v58 = vadd.f32 %v4051_v42, %v3869_v9  ;;  %v11859_v23 = vadd.f32 %v4065_v28, %v3871_v22 }
 0x928   :  { %v11855_v49 = vadd.f32 %v4066_v20, %v3865_v45  ;;  %v11857_v35 = vadd.f32 %v4068_v25, %v3867_v53  ;;  %v11861_v63 = vadd.f32 %v4067_v40, %v3873_v61  ;;  %v11863_v37 = vadd.f32 %v4069_v62, %v3875_v11 }
 0x929   :  { %v4086_v56 = vmul.f32 0.5, %v11849_v7  ;;  %v4087_v3 = vmul.f32 0.5, %v11851_v10  ;;  %v4090_v44 = vmul.f32 0.5, %v11853_v58  ;;  %v4126_v24 = vrot.slane %v11849_v7, 1 }
 0x92a   :  { %v4088_v0 = vmul.f32 0.5, %v11855_v49  ;;  %v4089_v42 = vmul.f32 0.5, %v11857_v35  ;;  %v4091_v28 = vmul.f32 0.5, %v11859_v23  ;;  %v4127_v45 = vrot.slane %v11851_v10, 1 }
 0x92b   :  { %8815 = vtanh.f32 %v4086_v56  ;;  %v4092_v9 = vmul.f32 0.5, %v11861_v63  ;;  %v4093_v20 = vmul.f32 0.5, %v11863_v37  ;;  %v4128_v40 = vrot.slane %v11855_v49, 1 }
 0x92c   :  { %8817 = vtanh.f32 %v4087_v3  ;;  %v4129_v25 = vrot.slane %v11857_v35, 1  ;;  %v4130_v62 = vrot.slane %v11853_v58, 1  ;;  %v4131_v56 = vrot.slane %v11859_v23, 1 }
 0x92d   :  { %8819 = vtanh.f32 %v4088_v0  ;;  %v4132_v53 = vrot.slane %v11861_v63, 1  ;;  %v4133_v22 = vrot.slane %v11863_v37, 1  ;;  %v4142_v61 = vmul.f32 0.5, %v4126_v24 }
 0x92e   :  { %8821 = vtanh.f32 %v4089_v42  ;;  %v4143_v11 = vmul.f32 0.5, %v4127_v45  ;;  %v4144_v3 = vmul.f32 0.5, %v4128_v40  ;;  %v4145_v0 = vmul.f32 0.5, %v4129_v25 }
 0x92f   :  { %8823 = vtanh.f32 %v4090_v44  ;;  %v4146_v59 = vmul.f32 0.5, %v4130_v62  ;;  %v4147_v42 = vmul.f32 0.5, %v4131_v56  ;;  %v4148_v46 = vmul.f32 0.5, %v4132_v53 }
 0x930   :  { %8825 = vtanh.f32 %v4091_v28  ;;  %v4149_v47 = vmul.f32 0.5, %v4133_v22  ;;  %v4174_v52 = vrot.slane %v11849_v7, 2  ;;  %v4175_v44 = vrot.slane %v11851_v10, 2 }
 0x931   :  { %8827 = vtanh.f32 %v4092_v9  ;;  %v4176_v19 = vrot.slane %v11855_v49, 2  ;;  %v4177_v24 = vrot.slane %v11857_v35, 2  ;;  %v4178_v45 = vrot.slane %v11853_v58, 2 }
 0x932   :  { %8829 = vtanh.f32 %v4093_v20  ;;  %v4179_v9 = vrot.slane %v11859_v23, 2  ;;  %v4198_v20 = vrot.slane %v11849_v7, 3  ;;  %v4180_v25 = vrot.slane %v11861_v63, 2 }
 0x933   :  { %8831 = vtanh.f32 %v4142_v61  ;;  %v4199_v62 = vrot.slane %v11851_v10, 3  ;;  %v4200_v56 = vrot.slane %v11855_v49, 3  ;;  %v4181_v22 = vrot.slane %v11863_v37, 2 }
 0x934   :  { %8833 = vtanh.f32 %v4143_v11  ;;  %v4201_v61 = vrot.slane %v11857_v35, 3  ;;  %v4202_v11 = vrot.slane %v11853_v58, 3  ;;  %v4203_v7 = vrot.slane %v11859_v23, 3 }
 0x935   :  { %v8816_v28 = vpop.eup %8815  ;;  %8835 = vtanh.f32 %v4144_v3  ;;  %v4214_v49 = vmul.f32 0.5, %v4198_v20  ;;  %v4215_v4 = vmul.f32 0.5, %v4199_v62  ;;  %v4216_v35 = vmul.f32 0.5, %v4200_v56 }
 0x936   :  { %v8818_v40 = vpop.eup %8817  ;;  %8837 = vtanh.f32 %v4145_v0  ;;  %v4102_v12 = vadd.f32 1.0, %v8816_v28  ;;  %v4204_v0 = vrot.slane %v11861_v63, 3  ;;  %v4217_v28 = vmul.f32 0.5, %v4201_v61 }
 0x937   :  { %v8820_v53 = vpop.eup %8819  ;;  %8839 = vtanh.f32 %v4146_v59  ;;  %v4103_v8 = vadd.f32 1.0, %v8818_v40  ;;  %v4219_v63 = vmul.f32 0.5, %v4203_v7 }
 0x938   :  { %v8822_v3 = vpop.eup %8821  ;;  %8841 = vtanh.f32 %v4147_v42  ;;  %v4104_v39 = vadd.f32 1.0, %v8820_v53  ;;  %v4218_v42 = vmul.f32 0.5, %v4202_v11  ;;  %v4110_v57 = vmul.f32 0.5, %v4102_v12 }
 0x939   :  { %v8824_v60 = vpop.eup %8823  ;;  %8843 = vtanh.f32 %v4148_v46  ;;  %v4105_v58 = vadd.f32 1.0, %v8822_v3  ;;  %v4111_v17 = vmul.f32 0.5, %v4103_v8  ;;  %v4220_v20 = vmul.f32 0.5, %v4204_v0 }
 0x93a   :  { %v8826_v59 = vpop.eup %8825  ;;  %8845 = vtanh.f32 %v4149_v47  ;;  %v4106_v23 = vadd.f32 1.0, %v8824_v60  ;;  %v4112_v47 = vmul.f32 0.5, %v4104_v39 }
 0x93b   :  { %v8828_v29 = vpop.eup %8827  ;;  %8847 = vtanh.f32 %v4174_v52  ;;  %v4107_v46 = vadd.f32 1.0, %v8826_v59  ;;  %v4113_v52 = vmul.f32 0.5, %v4105_v58 }
 0x93c   :  { %v8830_v36 = vpop.eup %8829  ;;  %8849 = vtanh.f32 %v4175_v44  ;;  %v4108_v53 = vadd.f32 1.0, %v8828_v29  ;;  %v4114_v60 = vmul.f32 0.5, %v4106_v23 }
 0x93d   :  { %v8832_v40 = vpop.eup %8831  ;;  %8851 = vtanh.f32 %v4176_v19  ;;  %v4109_v3 = vadd.f32 1.0, %v8830_v36  ;;  %v4115_v59 = vmul.f32 0.5, %v4107_v46 }
 0x93e   :  { %v8834_v10 = vpop.eup %8833  ;;  %v4158_v62 = vadd.f32 1.0, %v8832_v40  ;;  %8853 = vtanh.f32 %v4177_v24  ;;  %v4116_v29 = vmul.f32 0.5, %v4108_v53 }
 0x93f   :  { %v8836_v56 = vpop.eup %8835  ;;  %v4159_v61 = vadd.f32 1.0, %v8834_v10  ;;  %8855 = vtanh.f32 %v4178_v45  ;;  %v4117_v36 = vmul.f32 0.5, %v4109_v3 }
 0x940   :  { %v8838_v11 = vpop.eup %8837  ;;  %v4160_v12 = vadd.f32 1.0, %v8836_v56  ;;  %v4166_v44 = vmul.f32 0.5, %v4158_v62  ;;  %8857 = vtanh.f32 %v4179_v9 }
 0x941   :  { %v8840_v7 = vpop.eup %8839  ;;  %v4161_v8 = vadd.f32 1.0, %v8838_v11  ;;  %v4167_v19 = vmul.f32 0.5, %v4159_v61  ;;  %8859 = vtanh.f32 %v4180_v25 }
 0x942   :  { %v8842_v0 = vpop.eup %8841  ;;  %v4162_v39 = vadd.f32 1.0, %v8840_v7  ;;  %v4168_v40 = vmul.f32 0.5, %v4160_v12  ;;  %8861 = vtanh.f32 %v4181_v22  ;;  %v4246_v9 = vmul.f32 %v4166_v44, %v11611_v38 }
 0x943   :  { %v8844_v24 = vpop.eup %8843  ;;  %v4163_v58 = vadd.f32 1.0, %v8842_v0  ;;  %v4169_v10 = vmul.f32 0.5, %v4161_v8  ;;  %8863 = vtanh.f32 %v4214_v49  ;;  %v4247_v25 = vmul.f32 %v4167_v19, %v11614_v50 }
 0x944   :  { %v8846_v45 = vpop.eup %8845  ;;  %v4164_v23 = vadd.f32 1.0, %v8844_v24  ;;  %v4170_v56 = vmul.f32 0.5, %v4162_v39  ;;  %8865 = vtanh.f32 %v4215_v4  ;;  %v4248_v22 = vmul.f32 %v4168_v40, %v11617_v13 }
 0x945   :  { %v8848_v46 = vpop.eup %8847  ;;  %v4165_v62 = vadd.f32 1.0, %v8846_v45  ;;  %v4171_v61 = vmul.f32 0.5, %v4163_v58  ;;  %8867 = vtanh.f32 %v4216_v35  ;;  %v4249_v7 = vmul.f32 %v4169_v10, %v11621_v6 }
 0x946   :  { %v8850_v53 = vpop.eup %8849  ;;  %v4172_v11 = vmul.f32 0.5, %v4164_v23  ;;  %8869 = vtanh.f32 %v4217_v28  ;;  %v4254_v3 = vmul.f32 %v8848_v46, %v4110_v57  ;;  %v4250_v38 = vmul.f32 %v4170_v56, %v11626_v2 }
 0x947   :  { %v8852_v12 = vpop.eup %8851  ;;  %v4173_v49 = vmul.f32 0.5, %v4165_v62  ;;  %8871 = vtanh.f32 %v4218_v42  ;;  %v4255_v4 = vmul.f32 %v8850_v53, %v4111_v17  ;;  %v4251_v28 = vmul.f32 %v4171_v61, %v11629_v55 }
 0x948   :  { %v8854_v8 = vpop.eup %8853  ;;  %8873 = vtanh.f32 %v4219_v63  ;;  %v4256_v44 = vmul.f32 %v8852_v12, %v4112_v47  ;;  %v11902_v35 = vadd.f32 %v4254_v3, %v4246_v9  ;;  %v4252_v42 = vmul.f32 %v4172_v11, %v11632_v14 }
 0x949   :  { %v8856_v50 = vpop.eup %8855  ;;  %8875 = vtanh.f32 %v4220_v20  ;;  %v4257_v19 = vmul.f32 %v8854_v8, %v4113_v52  ;;  %v11905_v13 = vadd.f32 %v4255_v4, %v4247_v25  ;;  %v4253_v2 = vmul.f32 %v4173_v49, %v11635_v26 }
 0x94a   :  { %v8858_v57 = vpop.eup %8857  ;;  %v4258_v0 = vmul.f32 %v8856_v50, %v4114_v60  ;;  %v11908_v6 = vadd.f32 %v4256_v44, %v4248_v22  ;;  %8877 = vtanh.f32 %v11902_v35  ;;  %v13679_v20 = vrot.slane %v11863_v37, 3 }
 0x94b   :  { %v8860_v17 = vpop.eup %8859  ;;  %v4259_v63 = vmul.f32 %v8858_v57, %v4115_v59  ;;  %v11912_v47 = vadd.f32 %v4257_v19, %v4249_v7  ;;  %8879 = vtanh.f32 %v11905_v13 }
 0x94c   :  { %v8862_v55 = vpop.eup %8861  ;;  %v4221_v52 = vmul.f32 0.5, %v13679_v20  ;;  %v4260_v39 = vmul.f32 %v8860_v17, %v4116_v29  ;;  %v11917_v40 = vadd.f32 %v4258_v0, %v4250_v38  ;;  %8881 = vtanh.f32 %v11908_v6 }
 0x94d   :  { %v8864_v14 = vpop.eup %8863  ;;  %v4261_v60 = vmul.f32 %v8862_v55, %v4117_v36  ;;  %v11920_v24 = vadd.f32 %v4259_v63, %v4251_v28  ;;  %8883 = vtanh.f32 %v11912_v47 }
 0x94e   :  { %v8866_v26 = vpop.eup %8865  ;;  %v11923_v59 = vadd.f32 %v4260_v39, %v4252_v42  ;;  %8885 = vtanh.f32 %v11917_v40  ;;  %v4230_v10 = vadd.f32 1.0, %v8864_v14 }
 0x94f   :  { %v8868_v58 = vpop.eup %8867  ;;  %v11926_v37 = vadd.f32 %v4261_v60, %v4253_v2  ;;  %8887 = vtanh.f32 %v11920_v24  ;;  %v4231_v45 = vadd.f32 1.0, %v8866_v26 }
 0x950   :  { %v8870_v29 = vpop.eup %8869  ;;  %8889 = vtanh.f32 %v4221_v52  ;;  %v4232_v36 = vadd.f32 1.0, %v8868_v58  ;;  %v4238_v61 = vmul.f32 0.5, %v4230_v10 }
 0x951   :  { %v8872_v23 = vpop.eup %8871  ;;  %8891 = vtanh.f32 %v11923_v59  ;;  %v4233_v9 = vadd.f32 1.0, %v8870_v29  ;;  %v4239_v11 = vmul.f32 0.5, %v4231_v45 }
 0x952   :  { %v8874_v56 = vpop.eup %8873  ;;  %8893 = vtanh.f32 %v11926_v37  ;;  %v4234_v62 = vadd.f32 1.0, %v8872_v23  ;;  %v4240_v3 = vmul.f32 0.5, %v4232_v36 }
 0x953   :  { %v8876_v46 = vpop.eup %8875  ;;  %v4235_v53 = vadd.f32 1.0, %v8874_v56  ;;  %v4241_v7 = vmul.f32 0.5, %v4233_v9 }
 0x954   :  { %v8878_v25 = vpop.eup %8877  ;;  %v4236_v8 = vadd.f32 1.0, %v8876_v46  ;;  %v4242_v44 = vmul.f32 0.5, %v4234_v62 }
 0x955   :  { %v8880_v22 = vpop.eup %8879  ;;  %v4278_v12 = vmul.f32 %v8878_v25, %v4238_v61  ;;  %v4243_v42 = vmul.f32 0.5, %v4235_v53 }
 0x956   :  { %v8882_v49 = vpop.eup %8881  ;;  %v4279_v4 = vmul.f32 %v8880_v22, %v4239_v11  ;;  %v4244_v20 = vmul.f32 0.5, %v4236_v8 }
 0x957   :  { %v8884_v38 = vpop.eup %8883  ;;  %v4280_v50 = vmul.f32 %v8882_v49, %v4240_v3  ;;  %4286 = vst [vmem:[#allocation5 + $0x7] sm:$0x1] %v4278_v12  ;;  %v4310_v28 = vpack.c.bf16 %v4278_v12, %v4278_v12 }
 0x958   :  { %v8886_v19 = vpop.eup %8885  ;;  %4287 = vst [vmem:[#allocation5 + $0x17] sm:$0x1] %v4279_v4  ;;  %v4311_v57 = vpack.c.bf16 %v4279_v4, %v4279_v4  ;;  %v4281_v0 = vmul.f32 %v8884_v38, %v4241_v7 }
 0x959   :  { %v8888_v17 = vpop.eup %8887  ;;  %4288 = vst [vmem:[#allocation5 + $0x27] sm:$0x1] %v4280_v50  ;;  %v4282_v2 = vmul.f32 %v8886_v19, %v4242_v44  ;;  %v4312_v63 = vpack.c.bf16 %v4280_v50, %v4280_v50  ;;  %v4326_v10 = vunpack.c.l.b16 %v4310_v28 }
 0x95a   :  { %v8890_v55 = vpop.eup %8889  ;;  %v4283_v52 = vmul.f32 %v8888_v17, %v4243_v42  ;;  %4289 = vst [vmem:[#allocation5 + $0x37] sm:$0x1] %v4281_v0  ;;  %v4313_v39 = vpack.c.bf16 %v4281_v0, %v4281_v0  ;;  %v4327_v14 = vunpack.c.l.b16 %v4311_v57 }
 0x95b   :  { %v8892_v60 = vpop.eup %8891  ;;  %v4237_v26 = vadd.f32 1.0, %v8890_v55  ;;  %4290 = vst [vmem:[#allocation5 + $0x47] sm:$0x1] %v4282_v2  ;;  %v4314_v58 = vpack.c.bf16 %v4282_v2, %v4282_v2  ;;  %v4328_v29 = vunpack.c.l.b16 %v4312_v63 }
 0x95c   :  { %v8894_v45 = vpop.eup %8893  ;;  %v4284_v23 = vmul.f32 %v8892_v60, %v4244_v20  ;;  %4291 = vst [vmem:[#allocation5 + $0x57] sm:$0x1] %v4283_v52  ;;  %v4315_v36 = vpack.c.bf16 %v4283_v52, %v4283_v52  ;;  %v4329_v56 = vunpack.c.l.b16 %v4313_v39  ;;  %v4334_v9 = vrot.slane %v4327_v14, 7 }
 0x95d   :  { %v4245_v46 = vmul.f32 0.5, %v4237_v26  ;;  %v4330_v62 = vunpack.c.l.b16 %v4314_v58  ;;  %v4336_v61 = vrot.slane %v4328_v29, 6 }
 0x95e   :  { %4292 = vst [vmem:[#allocation5 + $0x67] sm:$0x1] %v4284_v23  ;;  %v4316_v25 = vpack.c.bf16 %v4284_v23, %v4284_v23  ;;  %v4331_v53 = vunpack.c.l.b16 %v4315_v36  ;;  %v4335_v11 = vsel %vm1290_vm0, %v4334_v9, %v4326_v10  ;;  %v4338_v22 = vrot.slane %v4329_v56, 5 }
 0x95f   :  { %v4285_v3 = vmul.f32 %v8894_v45, %v4245_v46  ;;  %v4337_v12 = vsel %vm1293_vm1, %v4336_v61, %v4335_v11  ;;  %v4340_v49 = vrot.slane %v4330_v62, 4  ;;  %v13696_v45 = vld [vmem:[#allocation6_spill] sm:$0xff] }
 0x960   :  { %v4332_v7 = vunpack.c.l.b16 %v4316_v25  ;;  %v4339_v4 = vsel %vm1296_vm2, %v4338_v22, %v4337_v12  ;;  %v4342_v8 = vrot.slane %v4331_v53, 3  ;;  %v4295_v12 = vld [vmem:[#allocation4 + $0x20] ss:$8 sm:$0xf] }
 0x961   :  { %4293 = vst [vmem:[#allocation5 + $0x77] sm:$0x1] %v4285_v3  ;;  %v4317_v38 = vpack.c.bf16 %v4285_v3, %v4285_v3  ;;  %v4341_v44 = vsel %vm1299_vm3, %v4340_v49, %v4339_v4  ;;  %v4297_v49 = vld [vmem:[#allocation4 + $0x60] ss:$8 sm:$0xf] }
 0x962   :  { %v4343_v50 = vsel %vm1302_vm4, %v4342_v8, %v4341_v44  ;;  %v4344_v28 = vrot.slane %v4332_v7, 2  ;;  %v4299_v7 = vld [vmem:[#allocation4 + $0xa0] ss:$8 sm:$0xf] }
 0x963   :  { %v4333_v19 = vunpack.c.l.b16 %v4317_v38  ;;  %v4303_v4 = vld [vmem:[#allocation4 + $0x120] ss:$8 sm:$0xf] }
 0x964   :  { %v4345_v57 = vsel %vm1305_vm5, %v4344_v28, %v4343_v50  ;;  %v4301_v28 = vld [vmem:[#allocation4 + $0xe0] ss:$8 sm:$0xf] }
 0x965   :  { %v4346_v42 = vrot.slane %v4333_v19, 1  ;;  %v4305_v19 = vld [vmem:[#allocation4 + $0x160] ss:$8 sm:$0xf] }
 0x967   :  { %v4347_v0 = vsel %vm1308_vm6, %v4346_v42, %v4345_v57 }
 0x968   :  { %v4348_v17 = vpack.c.b16 %v4347_v0, %v4347_v0 }
 0x96a   :  { %4383 = vmatmul.mubr.bf16.vlgmr.msra.gmra.mrb[64].mxu0 %v4348_v17  ;;  %4424 = vmatmul.mubr.bf16.vlgmr.msra.gmra.mrb[64].mxu1 %v4348_v17  ;;  %v4307_v17 = vld [vmem:[#allocation4 + $0x1a0] ss:$8 sm:$0xf] }
 0x96b   :  { %4785 = vmatpush1.bf16.msra.mxu0 %v11650_v34  ;;  %4826 = vmatpush1.bf16.msra.mxu1 %v11656_v32  ;;  %v13680_v34 = vld [vmem:[#allocation7_spill] sm:$0xff]  ;;  %v13681_v32 = vld [vmem:[#allocation8_spill] sm:$0xff] }
 0x96c   :  { %4786 = vmatprep.subr.bf16.mxu0 %v11662_v43  ;;  %4827 = vmatprep.subr.bf16.mxu1 %v11668_v51  ;;  %v13682_v43 = vld [vmem:[#allocation9_spill] sm:$0xff]  ;;  %v13683_v51 = vld [vmem:[#allocation10_spill] sm:$0xff] }
 0x96d   :  { %4816 = vmatprep.mubr.bf16.mxu0 %v13578_v41  ;;  %4857 = vmatprep.mubr.bf16.mxu1 %v13578_v41 }
 0x96f   :  { %4787 = vmatpush1.bf16.msra.mxu0 %v11676_v21  ;;  %4828 = vmatpush1.bf16.msra.mxu1 %v11682_v54  ;;  %v13684_v21 = vld [vmem:[#allocation11_spill] sm:$0xff]  ;;  %v13685_v54 = vld [vmem:[#allocation12_spill] sm:$0xff] }
 0x970   :  { %4788 = vmatprep.subr.bf16.mxu0 %v11688_v30  ;;  %4829 = vmatprep.subr.bf16.mxu1 %v11694_v1  ;;  %v13686_v30 = vld [vmem:[#allocation13_spill] sm:$0xff]  ;;  %v13687_v1 = vld [vmem:[#allocation14_spill] sm:$0xff] }
 0x973   :  { %4789 = vmatpush1.bf16.msra.mxu0 %v11700_v5  ;;  %4830 = vmatpush1.bf16.msra.mxu1 %v11706_v15  ;;  %v13688_v5 = vld [vmem:[#allocation15_spill] sm:$0xff]  ;;  %v13689_v15 = vld [vmem:[#allocation16_spill] sm:$0xff] }
 0x974   :  { %4790 = vmatprep.subr.bf16.mxu0 %v11712_v16  ;;  %4831 = vmatprep.subr.bf16.mxu1 %v11718_v31  ;;  %v13690_v16 = vld [vmem:[#allocation17_spill] sm:$0xff]  ;;  %v13691_v31 = vld [vmem:[#allocation18_spill] sm:$0xff] }
 0x977   :  { %4791 = vmatpush1.bf16.msra.mxu0 %v11724_v27  ;;  %4832 = vmatpush1.bf16.msra.mxu1 %v11730_v33  ;;  %v13692_v27 = vld [vmem:[#allocation19_spill] sm:$0xff]  ;;  %v13693_v33 = vld [vmem:[#allocation20_spill] sm:$0xff] }
 0x978   :  { %4792 = vmatprep.subr.bf16.mxu0 %v11736_v48  ;;  %4833 = vmatprep.subr.bf16.mxu1 %v11742_v18  ;;  %v13694_v48 = vld [vmem:[#allocation21_spill] sm:$0xff]  ;;  %v13695_v18 = vld [vmem:[#allocation22_spill] sm:$0xff] }
 0x97b   :  { %4793 = vmatpush1.bf16.msra.mxu0 %v13680_v34  ;;  %4834 = vmatpush1.bf16.msra.mxu1 %v13681_v32  ;;  %v4309_v34 = vld [vmem:[#allocation4 + $0x1e0] ss:$8 sm:$0xf] }
 0x97c   :  { %4794 = vmatprep.subr.bf16.mxu0 %v13682_v43  ;;  %4835 = vmatprep.subr.bf16.mxu1 %v13683_v51 }
 0x97f   :  { %4795 = vmatpush1.bf16.msra.mxu0 %v13684_v21  ;;  %4836 = vmatpush1.bf16.msra.mxu1 %v13685_v54 }
 0x980   :  { %4796 = vmatprep.subr.bf16.mxu0 %v13686_v30  ;;  %4837 = vmatprep.subr.bf16.mxu1 %v13687_v1 }
 0x983   :  { %4797 = vmatpush1.bf16.msra.mxu0 %v13688_v5  ;;  %4838 = vmatpush1.bf16.msra.mxu1 %v13689_v15 }
 0x984   :  { %4798 = vmatprep.subr.bf16.mxu0 %v13690_v16  ;;  %4839 = vmatprep.subr.bf16.mxu1 %v13691_v31 }
 0x987   :  { %4799 = vmatpush1.bf16.msra.mxu0 %v13692_v27  ;;  %4840 = vmatpush1.bf16.msra.mxu1 %v13693_v33 }
 0x988   :  { %5218 = vmatprep.subr.bf16.mxu0 %v13694_v48  ;;  %5259 = vmatprep.subr.bf16.mxu1 %v13695_v18 }
 0xa3d   :  { %v4384_v2 = vpop.f32.mrb[64].mxu0  ;;  %v4425_v63 = vpop.f32.mrb[64].mxu1 }
 0xa3e   :  { %v4386_v55 = vpop.f32.mrb[65].mxu0  ;;  %v4427_v20 = vpop.f32.mrb[65].mxu1 }
 0xa3f   :  { %v4436_v52 = vcombine.low %v4384_v2, %v4386_v55  ;;  %v4437_v39 = vcombine.high %v4384_v2, %v4386_v55  ;;  %v4438_v14 = vcombine.low %v4425_v63, %v4427_v20  ;;  %v4439_v60 = vcombine.high %v4425_v63, %v4427_v20  ;;  %v4388_v26 = vpop.f32.mrb[66].mxu0  ;;  %v4429_v58 = vpop.f32.mrb[66].mxu1 }
 0xa40   :  { %v4389_v10 = vpop.f32.mrb[67].mxu0  ;;  %v4430_v29 = vpop.f32.mrb[67].mxu1 }
 0xa41   :  { %v4446_v23 = vrot.slane %v4436_v52, %v13696_v45  ;;  %v4453_v36 = vrot.slane %v4437_v39, %v13696_v45  ;;  %v4460_v56 = vrot.slane %v4438_v14, %v13696_v45  ;;  %v4467_v9 = vrot.slane %v4439_v60, %v13696_v45 }
 0xa43   :  { %v4468_v46 = vcombine.low %v4446_v23, %v4460_v56  ;;  %v4469_v62 = vcombine.high %v4446_v23, %v4460_v56  ;;  %v4470_v61 = vcombine.low %v4453_v36, %v4467_v9  ;;  %v4471_v25 = vcombine.high %v4453_v36, %v4467_v9 }
 0xa45   :  { %v4478_v53 = vrot.slane %v4468_v46, %v13696_v45  ;;  %v4485_v11 = vrot.slane %v4470_v61, %v13696_v45  ;;  %v4492_v22 = vrot.slane %v4469_v62, %v13696_v45  ;;  %v4499_v3 = vrot.slane %v4471_v25, %v13696_v45 }
 0xa47   :  { %v4500_v8 = vcombine.high %v4478_v53, %v4478_v53  ;;  %v4501_v38 = vcombine.high %v4485_v11, %v4485_v11  ;;  %v4502_v44 = vcombine.high %v4492_v22, %v4492_v22  ;;  %v4503_v50 = vcombine.high %v4499_v3, %v4499_v3 }
 0xa48   :  { %v11980_v57 = vadd.f32 %v4478_v53, %v4295_v12  ;;  %v11982_v42 = vadd.f32 %v4492_v22, %v4297_v49  ;;  %v11984_v0 = vadd.f32 %v4485_v11, %v4303_v4  ;;  %v11990_v51 = vadd.f32 %v4499_v3, %v4305_v19 }
 0xa49   :  { %v11986_v32 = vadd.f32 %v4500_v8, %v4299_v7  ;;  %v11988_v43 = vadd.f32 %v4502_v44, %v4301_v28  ;;  %v11992_v21 = vadd.f32 %v4501_v38, %v4307_v17  ;;  %v11994_v54 = vadd.f32 %v4503_v50, %v4309_v34 }
 0xa4a   :  { %v4520_v30 = vmul.f32 0.5, %v11980_v57  ;;  %v4521_v1 = vmul.f32 0.5, %v11982_v42  ;;  %v4524_v16 = vmul.f32 0.5, %v11984_v0  ;;  %v4560_v31 = vrot.slane %v11980_v57, 1 }
 0xa4b   :  { %v4522_v5 = vmul.f32 0.5, %v11986_v32  ;;  %v4523_v15 = vmul.f32 0.5, %v11988_v43  ;;  %v4525_v27 = vmul.f32 0.5, %v11990_v51  ;;  %v4561_v33 = vrot.slane %v11982_v42, 1 }
 0xa4c   :  { %8895 = vtanh.f32 %v4520_v30  ;;  %v4526_v48 = vmul.f32 0.5, %v11992_v21  ;;  %v4527_v18 = vmul.f32 0.5, %v11994_v54  ;;  %v4562_v2 = vrot.slane %v11986_v32, 1 }
 0xa4d   :  { %8897 = vtanh.f32 %v4521_v1  ;;  %v4563_v63 = vrot.slane %v11988_v43, 1  ;;  %v4564_v55 = vrot.slane %v11984_v0, 1  ;;  %v4565_v20 = vrot.slane %v11990_v51, 1 }
 0xa4e   :  { %8899 = vtanh.f32 %v4522_v5  ;;  %v4566_v52 = vrot.slane %v11992_v21, 1  ;;  %v4567_v39 = vrot.slane %v11994_v54, 1  ;;  %v4576_v14 = vmul.f32 0.5, %v4560_v31 }
 0xa4f   :  { %8901 = vtanh.f32 %v4523_v15  ;;  %v4577_v60 = vmul.f32 0.5, %v4561_v33  ;;  %v4578_v26 = vmul.f32 0.5, %v4562_v2  ;;  %v4579_v58 = vmul.f32 0.5, %v4563_v63 }
 0xa50   :  { %8903 = vtanh.f32 %v4524_v16  ;;  %v4580_v10 = vmul.f32 0.5, %v4564_v55  ;;  %v4581_v29 = vmul.f32 0.5, %v4565_v20  ;;  %v4582_v23 = vmul.f32 0.5, %v4566_v52 }
 0xa51   :  { %8905 = vtanh.f32 %v4525_v27  ;;  %v4583_v36 = vmul.f32 0.5, %v4567_v39  ;;  %v4608_v56 = vrot.slane %v11980_v57, 2  ;;  %v4609_v9 = vrot.slane %v11982_v42, 2 }
 0xa52   :  { %8907 = vtanh.f32 %v4526_v48  ;;  %v4610_v46 = vrot.slane %v11986_v32, 2  ;;  %v4611_v62 = vrot.slane %v11988_v43, 2  ;;  %v4612_v25 = vrot.slane %v11984_v0, 2 }
 0xa53   :  { %8909 = vtanh.f32 %v4527_v18  ;;  %v4613_v53 = vrot.slane %v11990_v51, 2  ;;  %v4632_v11 = vrot.slane %v11980_v57, 3  ;;  %v4614_v3 = vrot.slane %v11992_v21, 2 }
 0xa54   :  { %8911 = vtanh.f32 %v4576_v14  ;;  %v4633_v12 = vrot.slane %v11982_v42, 3  ;;  %v4634_v49 = vrot.slane %v11986_v32, 3  ;;  %v4615_v4 = vrot.slane %v11994_v54, 2 }
 0xa55   :  { %8913 = vtanh.f32 %v4577_v60  ;;  %v4635_v8 = vrot.slane %v11988_v43, 3  ;;  %v4636_v38 = vrot.slane %v11984_v0, 3  ;;  %v4637_v28 = vrot.slane %v11990_v51, 3 }
 0xa56   :  { %v8896_v61 = vpop.eup %8895  ;;  %8915 = vtanh.f32 %v4578_v26  ;;  %v4638_v19 = vrot.slane %v11992_v21, 3  ;;  %v4639_v42 = vrot.slane %v11994_v54, 3  ;;  %v4648_v34 = vmul.f32 0.5, %v4632_v11 }
 0xa57   :  { %v8898_v22 = vpop.eup %8897  ;;  %8917 = vtanh.f32 %v4579_v58  ;;  %v4536_v50 = vadd.f32 1.0, %v8896_v61  ;;  %v4649_v1 = vmul.f32 0.5, %v4633_v12  ;;  %v4650_v43 = vmul.f32 0.5, %v4634_v49 }
 0xa58   :  { %v8900_v7 = vpop.eup %8899  ;;  %8919 = vtanh.f32 %v4580_v10  ;;  %v4537_v17 = vadd.f32 1.0, %v8898_v22  ;;  %v4651_v15 = vmul.f32 0.5, %v4635_v8  ;;  %v4652_v16 = vmul.f32 0.5, %v4636_v38 }
 0xa59   :  { %v8902_v44 = vpop.eup %8901  ;;  %8921 = vtanh.f32 %v4581_v29  ;;  %v4538_v30 = vadd.f32 1.0, %v8900_v7  ;;  %v4544_v27 = vmul.f32 0.5, %v4536_v50  ;;  %v4653_v21 = vmul.f32 0.5, %v4637_v28 }
 0xa5a   :  { %v8904_v57 = vpop.eup %8903  ;;  %8923 = vtanh.f32 %v4582_v23  ;;  %v4539_v0 = vadd.f32 1.0, %v8902_v44  ;;  %v4545_v18 = vmul.f32 0.5, %v4537_v17  ;;  %v4654_v2 = vmul.f32 0.5, %v4638_v19 }
 0xa5b   :  { %v8906_v32 = vpop.eup %8905  ;;  %8925 = vtanh.f32 %v4583_v36  ;;  %v4540_v51 = vadd.f32 1.0, %v8904_v57  ;;  %v4546_v20 = vmul.f32 0.5, %v4538_v30 }
 0xa5c   :  { %v8908_v5 = vpop.eup %8907  ;;  %8927 = vtanh.f32 %v4608_v56  ;;  %v4541_v48 = vadd.f32 1.0, %v8906_v32  ;;  %v4547_v60 = vmul.f32 0.5, %v4539_v0 }
 0xa5d   :  { %v8910_v31 = vpop.eup %8909  ;;  %8929 = vtanh.f32 %v4609_v9  ;;  %v4542_v55 = vadd.f32 1.0, %v8908_v5  ;;  %v4548_v10 = vmul.f32 0.5, %v4540_v51 }
 0xa5e   :  { %v8912_v33 = vpop.eup %8911  ;;  %8931 = vtanh.f32 %v4610_v46  ;;  %v4543_v14 = vadd.f32 1.0, %v8910_v31  ;;  %v4549_v56 = vmul.f32 0.5, %v4541_v48 }
 0xa5f   :  { %v8914_v63 = vpop.eup %8913  ;;  %v4592_v52 = vadd.f32 1.0, %v8912_v33  ;;  %8933 = vtanh.f32 %v4611_v62  ;;  %v4550_v11 = vmul.f32 0.5, %v4542_v55 }
 0xa60   :  { %v8916_v39 = vpop.eup %8915  ;;  %v4593_v26 = vadd.f32 1.0, %v8914_v63  ;;  %8935 = vtanh.f32 %v4612_v25  ;;  %v4551_v49 = vmul.f32 0.5, %v4543_v14 }
 0xa61   :  { %v8918_v58 = vpop.eup %8917  ;;  %v4594_v29 = vadd.f32 1.0, %v8916_v39  ;;  %v4600_v23 = vmul.f32 0.5, %v4592_v52  ;;  %8937 = vtanh.f32 %v4613_v53 }
 0xa62   :  { %v8920_v36 = vpop.eup %8919  ;;  %v4595_v9 = vadd.f32 1.0, %v8918_v58  ;;  %v4601_v46 = vmul.f32 0.5, %v4593_v26  ;;  %8939 = vtanh.f32 %v4614_v3 }
 0xa63   :  { %v8922_v61 = vpop.eup %8921  ;;  %v4596_v22 = vadd.f32 1.0, %v8920_v36  ;;  %v4602_v12 = vmul.f32 0.5, %v4594_v29  ;;  %8941 = vtanh.f32 %v4615_v4  ;;  %v4680_v53 = vmul.f32 %v4600_v23, %v11902_v35 }
 0xa64   :  { %v8924_v62 = vpop.eup %8923  ;;  %v4597_v7 = vadd.f32 1.0, %v8922_v61  ;;  %v4603_v8 = vmul.f32 0.5, %v4595_v9  ;;  %8943 = vtanh.f32 %v4648_v34  ;;  %v4681_v3 = vmul.f32 %v4601_v46, %v11905_v13 }
 0xa65   :  { %v8926_v25 = vpop.eup %8925  ;;  %v4598_v38 = vadd.f32 1.0, %v8924_v62  ;;  %v4604_v44 = vmul.f32 0.5, %v4596_v22  ;;  %8945 = vtanh.f32 %v4649_v1  ;;  %v4682_v4 = vmul.f32 %v4602_v12, %v11908_v6 }
 0xa66   :  { %v8928_v50 = vpop.eup %8927  ;;  %v4599_v28 = vadd.f32 1.0, %v8926_v25  ;;  %v4605_v19 = vmul.f32 0.5, %v4597_v7  ;;  %8947 = vtanh.f32 %v4650_v43  ;;  %v4683_v5 = vmul.f32 %v4603_v8, %v11912_v47 }
 0xa67   :  { %v8930_v57 = vpop.eup %8929  ;;  %v4606_v17 = vmul.f32 0.5, %v4598_v38  ;;  %8949 = vtanh.f32 %v4651_v15  ;;  %v4688_v32 = vmul.f32 %v8928_v50, %v4544_v27  ;;  %v4684_v35 = vmul.f32 %v4604_v44, %v11917_v40 }
 0xa68   :  { %v8932_v30 = vpop.eup %8931  ;;  %v4607_v34 = vmul.f32 0.5, %v4599_v28  ;;  %8951 = vtanh.f32 %v4652_v16  ;;  %v4689_v1 = vmul.f32 %v8930_v57, %v4545_v18  ;;  %v4685_v15 = vmul.f32 %v4605_v19, %v11920_v24 }
 0xa69   :  { %v8934_v0 = vpop.eup %8933  ;;  %8953 = vtanh.f32 %v4653_v21  ;;  %v4690_v31 = vmul.f32 %v8932_v30, %v4546_v20  ;;  %v12033_v43 = vadd.f32 %v4688_v32, %v4680_v53  ;;  %v4686_v16 = vmul.f32 %v4606_v17, %v11923_v59 }
 0xa6a   :  { %v8936_v13 = vpop.eup %8935  ;;  %8955 = vtanh.f32 %v4654_v2  ;;  %v4691_v51 = vmul.f32 %v8934_v0, %v4547_v60  ;;  %v12036_v6 = vadd.f32 %v4689_v1, %v4681_v3  ;;  %v4687_v40 = vmul.f32 %v4607_v34, %v11926_v37 }
 0xa6b   :  { %v8938_v27 = vpop.eup %8937  ;;  %v4692_v33 = vmul.f32 %v8936_v13, %v4548_v10  ;;  %v12039_v47 = vadd.f32 %v4690_v31, %v4682_v4  ;;  %8957 = vtanh.f32 %v12033_v43  ;;  %v4655_v2 = vmul.f32 0.5, %v4639_v42 }
 0xa6c   :  { %v8940_v21 = vpop.eup %8939  ;;  %v4693_v48 = vmul.f32 %v8938_v27, %v4549_v56  ;;  %v12043_v18 = vadd.f32 %v4691_v51, %v4683_v5  ;;  %8959 = vtanh.f32 %v12036_v6 }
 0xa6d   :  { %v8942_v24 = vpop.eup %8941  ;;  %v4694_v63 = vmul.f32 %v8940_v21, %v4550_v11  ;;  %v12048_v55 = vadd.f32 %v4692_v33, %v4684_v35  ;;  %8961 = vtanh.f32 %v12039_v47 }
 0xa6e   :  { %v8944_v59 = vpop.eup %8943  ;;  %v4695_v20 = vmul.f32 %v8942_v24, %v4551_v49  ;;  %v12051_v52 = vadd.f32 %v4693_v48, %v4685_v15  ;;  %8963 = vtanh.f32 %v12043_v18 }
 0xa6f   :  { %v8946_v37 = vpop.eup %8945  ;;  %v12054_v39 = vadd.f32 %v4694_v63, %v4686_v16  ;;  %8965 = vtanh.f32 %v12048_v55  ;;  %v4664_v60 = vadd.f32 1.0, %v8944_v59 }
 0xa70   :  { %v8948_v14 = vpop.eup %8947  ;;  %v12057_v54 = vadd.f32 %v4695_v20, %v4687_v40  ;;  %8967 = vtanh.f32 %v12051_v52  ;;  %v4665_v26 = vadd.f32 1.0, %v8946_v37 }
 0xa71   :  { %v8950_v42 = vpop.eup %8949  ;;  %8969 = vtanh.f32 %v4655_v2  ;;  %v4666_v10 = vadd.f32 1.0, %v8948_v14  ;;  %v4672_v9 = vmul.f32 0.5, %v4664_v60 }
 0xa72   :  { %v8952_v58 = vpop.eup %8951  ;;  %8971 = vtanh.f32 %v12054_v39  ;;  %v4667_v23 = vadd.f32 1.0, %v8950_v42  ;;  %v4673_v11 = vmul.f32 0.5, %v4665_v26 }
 0xa73   :  { %v8954_v29 = vpop.eup %8953  ;;  %8973 = vtanh.f32 %v12057_v54  ;;  %v4668_v56 = vadd.f32 1.0, %v8952_v58  ;;  %v4674_v12 = vmul.f32 0.5, %v4666_v10 }
 0xa74   :  { %v8956_v36 = vpop.eup %8955  ;;  %v4669_v61 = vadd.f32 1.0, %v8954_v29  ;;  %v4675_v7 = vmul.f32 0.5, %v4667_v23 }
 0xa75   :  { %v8958_v46 = vpop.eup %8957  ;;  %v4670_v25 = vadd.f32 1.0, %v8956_v36  ;;  %v4676_v44 = vmul.f32 0.5, %v4668_v56 }
 0xa76   :  { %v8960_v22 = vpop.eup %8959  ;;  %v4712_v62 = vmul.f32 %v8958_v46, %v4672_v9  ;;  %v4677_v3 = vmul.f32 0.5, %v4669_v61 }
 0xa77   :  { %v8962_v49 = vpop.eup %8961  ;;  %v4713_v8 = vmul.f32 %v8960_v22, %v4673_v11  ;;  %v4678_v34 = vmul.f32 0.5, %v4670_v25  ;;  %v12104_v25 = vld [vmem:[%s13435_s2 + $0x28] ss:$16 sps:$4 sm:$0xff]  }
 0xa78   :  { %v8964_v38 = vpop.eup %8963  ;;  %v4714_v53 = vmul.f32 %v8962_v49, %v4674_v12  ;;  %4720 = vst [vmem:[#allocation5 + $0x8] sm:$0x1] %v4712_v62  ;;  %v4744_v50 = vpack.c.bf16 %v4712_v62, %v4712_v62  ;;  %v12072_v12 = vld [vmem:[%s13435_s2] ss:$16 sps:$4 sm:$0xff]   ;;  %v12078_v62 = vld [vmem:[%s13435_s2 + $0x8] ss:$16 sps:$4 sm:$0xff]  }
 0xa79   :  { %v8966_v28 = vpop.eup %8965  ;;  %4721 = vst [vmem:[#allocation5 + $0x18] sm:$0x1] %v4713_v8  ;;  %v4745_v19 = vpack.c.bf16 %v4713_v8, %v4713_v8  ;;  %v4715_v57 = vmul.f32 %v8964_v38, %v4675_v7  ;;  %v12084_v49 = vld [vmem:[%s13435_s2 + $0x24] ss:$16 sps:$4 sm:$0xff]   ;;  %v12090_v7 = vld [vmem:[%s13435_s2 + $0x2c] ss:$16 sps:$4 sm:$0xff]  }
 0xa7a   :  { %v8968_v17 = vpop.eup %8967  ;;  %4722 = vst [vmem:[#allocation5 + $0x28] sm:$0x1] %v4714_v53  ;;  %v4716_v4 = vmul.f32 %v8966_v28, %v4676_v44  ;;  %v4746_v32 = vpack.c.bf16 %v4714_v53, %v4714_v53  ;;  %v4760_v15 = vunpack.c.l.b16 %v4744_v50  ;;  %v12098_v8 = vld [vmem:[%s13435_s2 + $0x20] ss:$16 sps:$4 sm:$0xff]   ;;  %v12110_v38 = vld [vmem:[%s13435_s2 + $0x44] ss:$16 sps:$4 sm:$0xff]  }
 0xa7b   :  { %v8970_v30 = vpop.eup %8969  ;;  %v4717_v5 = vmul.f32 %v8968_v17, %v4677_v3  ;;  %4723 = vst [vmem:[#allocation5 + $0x38] sm:$0x1] %v4715_v57  ;;  %v4747_v1 = vpack.c.bf16 %v4715_v57, %v4715_v57  ;;  %v4761_v0 = vunpack.c.l.b16 %v4745_v19  ;;  %v12116_v44 = vld [vmem:[%s13435_s2 + $0x4c] ss:$16 sps:$4 sm:$0xff]   ;;  %v12122_v53 = vld [vmem:[%s13435_s2 + $0x40] ss:$16 sps:$4 sm:$0xff]  }
 0xa7c   :  { %v8972_v35 = vpop.eup %8971  ;;  %v4671_v31 = vadd.f32 1.0, %v8970_v30  ;;  %4724 = vst [vmem:[#allocation5 + $0x48] sm:$0x1] %v4716_v4  ;;  %v4748_v13 = vpack.c.bf16 %v4716_v4, %v4716_v4  ;;  %v4762_v51 = vunpack.c.l.b16 %v4746_v32  ;;  %v12128_v50 = vld [vmem:[%s13435_s2 + $0x48] ss:$16 sps:$4 sm:$0xff]  }
 0xa7d   :  { %v8974_v27 = vpop.eup %8973  ;;  %v4718_v16 = vmul.f32 %v8972_v35, %v4678_v34  ;;  %4725 = vst [vmem:[#allocation5 + $0x58] sm:$0x1] %v4717_v5  ;;  %v4749_v33 = vpack.c.bf16 %v4717_v5, %v4717_v5  ;;  %v4763_v21 = vunpack.c.l.b16 %v4747_v1  ;;  %v4768_v40 = vrot.slane %v4761_v0, 7  ;;  %v12134_v28 = vld [vmem:[%s13435_s2 + $0x64] ss:$16 sps:$4 sm:$0xff]  }
 0xa7e   :  { %v4679_v48 = vmul.f32 0.5, %v4671_v31  ;;  %v4764_v24 = vunpack.c.l.b16 %v4748_v13  ;;  %v4770_v2 = vrot.slane %v4762_v51, 6  ;;  %v12140_v19 = vld [vmem:[%s13435_s2 + $0x6c] ss:$16 sps:$4 sm:$0xff]   ;;  %v12146_v3 = vld [vmem:[%s13435_s2 + $0x60] ss:$16 sps:$4 sm:$0xff]  }
 0xa7f   :  { %4726 = vst [vmem:[#allocation5 + $0x68] sm:$0x1] %v4718_v16  ;;  %v4750_v63 = vpack.c.bf16 %v4718_v16, %v4718_v16  ;;  %v4765_v59 = vunpack.c.l.b16 %v4749_v33  ;;  %v4769_v20 = vsel %vm1290_vm0, %v4768_v40, %v4760_v15  ;;  %v4772_v37 = vrot.slane %v4763_v21, 5  ;;  %v12152_v57 = vld [vmem:[%s13435_s2 + $0x68] ss:$16 sps:$4 sm:$0xff]  }
 0xa80   :  { %v4719_v14 = vmul.f32 %v8974_v27, %v4679_v48  ;;  %v4771_v60 = vsel %vm1293_vm1, %v4770_v2, %v4769_v20  ;;  %v4774_v42 = vrot.slane %v4764_v24, 4  ;;  %v12158_v17 = vld [vmem:[%s13435_s2 + $0x84] ss:$16 sps:$4 sm:$0xff]   ;;  %v12164_v4 = vld [vmem:[%s13435_s2 + $0x8c] ss:$16 sps:$4 sm:$0xff]  }
 0xa81   :  { %v4766_v26 = vunpack.c.l.b16 %v4750_v63  ;;  %v4773_v58 = vsel %vm1296_vm2, %v4772_v37, %v4771_v60  ;;  %v4776_v10 = vrot.slane %v4765_v59, 3  ;;  %v12170_v32 = vld [vmem:[%s13435_s2 + $0x80] ss:$16 sps:$4 sm:$0xff]   ;;  %v12176_v30 = vld [vmem:[%s13435_s2 + $0x88] ss:$16 sps:$4 sm:$0xff]  }
 0xa82   :  { %4727 = vst [vmem:[#allocation5 + $0x78] sm:$0x1] %v4719_v14  ;;  %v4751_v29 = vpack.c.bf16 %v4719_v14, %v4719_v14  ;;  %v4775_v23 = vsel %vm1299_vm3, %v4774_v42, %v4773_v58  ;;  %13697 = vst [vmem:[#allocation7_spill] sm:$0xff] %v12170_v32  ;;  %v12182_v34 = vld [vmem:[%s13435_s2 + $0xa4] ss:$16 sps:$4 sm:$0xff]  }
 0xa83   :  { %v4777_v36 = vsel %vm1302_vm4, %v4776_v10, %v4775_v23  ;;  %v4778_v56 = vrot.slane %v4766_v26, 2  ;;  %13698 = vst [vmem:[#allocation8_spill] sm:$0xff] %v12176_v30  ;;  %13699 = vst [vmem:[#allocation9_spill] sm:$0xff] %v12182_v34  ;;  %v12188_v5 = vld [vmem:[%s13435_s2 + $0xac] ss:$16 sps:$4 sm:$0xff]  }
 0xa84   :  { %v4767_v9 = vunpack.c.l.b16 %v4751_v29  ;;  %13700 = vst [vmem:[#allocation10_spill] sm:$0xff] %v12188_v5  ;;  %v12194_v1 = vld [vmem:[%s13435_s2 + $0xa0] ss:$16 sps:$4 sm:$0xff]   ;;  %v12200_v0 = vld [vmem:[%s13435_s2 + $0xa8] ss:$16 sps:$4 sm:$0xff]  }
 0xa85   :  { %v4779_v46 = vsel %vm1305_vm5, %v4778_v56, %v4777_v36  ;;  %13701 = vst [vmem:[#allocation11_spill] sm:$0xff] %v12194_v1  ;;  %13702 = vst [vmem:[#allocation12_spill] sm:$0xff] %v12200_v0  ;;  %v12206_v35 = vld [vmem:[%s13435_s2 + $0xc4] ss:$16 sps:$4 sm:$0xff]   ;;  %v12212_v31 = vld [vmem:[%s13435_s2 + $0xcc] ss:$16 sps:$4 sm:$0xff]  }
 0xa86   :  { %v4780_v61 = vrot.slane %v4767_v9, 1  ;;  %13703 = vst [vmem:[#allocation13_spill] sm:$0xff] %v12206_v35  ;;  %13704 = vst [vmem:[#allocation14_spill] sm:$0xff] %v12212_v31  ;;  %v12218_v13 = vld [vmem:[%s13435_s2 + $0xc0] ss:$16 sps:$4 sm:$0xff]  }
 0xa87   :  { %13705 = vst [vmem:[#allocation15_spill] sm:$0xff] %v12218_v13  ;;  %v12224_v15 = vld [vmem:[%s13435_s2 + $0xc8] ss:$16 sps:$4 sm:$0xff]   ;;  %v12230_v51 = vld [vmem:[%s13435_s2 + $0xe4] ss:$16 sps:$4 sm:$0xff]  }
 0xa88   :  { %v4781_v11 = vsel %vm1308_vm6, %v4780_v61, %v4779_v46  ;;  %13706 = vst [vmem:[#allocation16_spill] sm:$0xff] %v12224_v15  ;;  %13707 = vst [vmem:[#allocation17_spill] sm:$0xff] %v12230_v51  ;;  %v12236_v27 = vld [vmem:[%s13435_s2 + $0xec] ss:$16 sps:$4 sm:$0xff]   ;;  %v12242_v16 = vld [vmem:[%s13435_s2 + $0xe0] ss:$16 sps:$4 sm:$0xff]  }
 0xa89   :  { %v4782_v22 = vpack.c.b16 %v4781_v11, %v4781_v11  ;;  %13708 = vst [vmem:[#allocation18_spill] sm:$0xff] %v12236_v27  ;;  %13709 = vst [vmem:[#allocation19_spill] sm:$0xff] %v12242_v16  ;;  %v12248_v33 = vld [vmem:[%s13435_s2 + $0xe8] ss:$16 sps:$4 sm:$0xff]   ;;  %v12254_v21 = vld [vmem:[%s13435_s2 + $0x4] ss:$16 sps:$4 sm:$0xff]  }
 0xa8a   :  { %13710 = vst [vmem:[#allocation20_spill] sm:$0xff] %v12248_v33  ;;  %13711 = vst [vmem:[#allocation21_spill] sm:$0xff] %v12254_v21  ;;  %v12260_v40 = vld [vmem:[%s13435_s2 + $0xc] ss:$16 sps:$4 sm:$0xff]  }
 0xa8b   :  { %4817 = vmatmul.mubr.bf16.vlgmr.msra.gmra.mrb[68].mxu0 %v4782_v22  ;;  %4858 = vmatmul.mubr.bf16.vlgmr.msra.gmra.mrb[68].mxu1 %v4782_v22  ;;  %13712 = vst [vmem:[#allocation22_spill] sm:$0xff] %v12260_v40 }
 0xa8c   :  { %5219 = vmatpush1.bf16.msra.mxu0 %v12072_v12  ;;  %5260 = vmatpush1.bf16.msra.mxu1 %v12078_v62 }
 0xa8d   :  { %5220 = vmatprep.subr.bf16.mxu0 %v12084_v49  ;;  %5261 = vmatprep.subr.bf16.mxu1 %v12090_v7 }
 0xa8e   :  { %5250 = vmatprep.mubr.bf16.mxu0 %v13578_v41  ;;  %5291 = vmatprep.mubr.bf16.mxu1 %v13578_v41 }
 0xa90   :  { %5221 = vmatpush1.bf16.msra.mxu0 %v12098_v8  ;;  %5262 = vmatpush1.bf16.msra.mxu1 %v12104_v25 }
 0xa91   :  { %5222 = vmatprep.subr.bf16.mxu0 %v12110_v38  ;;  %5263 = vmatprep.subr.bf16.mxu1 %v12116_v44 }
 0xa94   :  { %5223 = vmatpush1.bf16.msra.mxu0 %v12122_v53  ;;  %5264 = vmatpush1.bf16.msra.mxu1 %v12128_v50 }
 0xa95   :  { %5224 = vmatprep.subr.bf16.mxu0 %v12134_v28  ;;  %5265 = vmatprep.subr.bf16.mxu1 %v12140_v19 }
 0xa98   :  { %5225 = vmatpush1.bf16.msra.mxu0 %v12146_v3  ;;  %5266 = vmatpush1.bf16.msra.mxu1 %v12152_v57 }
 0xa99   :  { %5226 = vmatprep.subr.bf16.mxu0 %v12158_v17  ;;  %5267 = vmatprep.subr.bf16.mxu1 %v12164_v4 }
 0xa9c   :  { %5227 = vmatpush1.bf16.msra.mxu0 %v12170_v32  ;;  %5268 = vmatpush1.bf16.msra.mxu1 %v12176_v30 }
 0xa9d   :  { %5228 = vmatprep.subr.bf16.mxu0 %v12182_v34  ;;  %5269 = vmatprep.subr.bf16.mxu1 %v12188_v5 }
 0xaa0   :  { %5229 = vmatpush1.bf16.msra.mxu0 %v12194_v1  ;;  %5270 = vmatpush1.bf16.msra.mxu1 %v12200_v0 }
 0xaa1   :  { %5230 = vmatprep.subr.bf16.mxu0 %v12206_v35  ;;  %5271 = vmatprep.subr.bf16.mxu1 %v12212_v31 }
 0xaa4   :  { %5231 = vmatpush1.bf16.msra.mxu0 %v12218_v13  ;;  %5272 = vmatpush1.bf16.msra.mxu1 %v12224_v15 }
 0xaa5   :  { %5232 = vmatprep.subr.bf16.mxu0 %v12230_v51  ;;  %5273 = vmatprep.subr.bf16.mxu1 %v12236_v27 }
 0xaa8   :  { %5233 = vmatpush1.bf16.msra.mxu0 %v12242_v16  ;;  %5274 = vmatpush1.bf16.msra.mxu1 %v12248_v33 }
 0xaa9   :  { %5652 = vmatprep.subr.bf16.mxu0 %v12254_v21  ;;  %5693 = vmatprep.subr.bf16.mxu1 %v12260_v40 }
 0xb5e   :  { %v4818_v48 = vpop.f32.mrb[68].mxu0  ;;  %v4859_v24 = vpop.f32.mrb[68].mxu1 }
 0xb5f   :  { %v4820_v2 = vpop.f32.mrb[69].mxu0  ;;  %v4861_v63 = vpop.f32.mrb[69].mxu1 }
 0xb60   :  { %v4870_v59 = vcombine.low %v4818_v48, %v4820_v2  ;;  %v4871_v20 = vcombine.high %v4818_v48, %v4820_v2  ;;  %v4872_v37 = vcombine.low %v4859_v24, %v4861_v63  ;;  %v4873_v14 = vcombine.high %v4859_v24, %v4861_v63  ;;  %v4822_v60 = vpop.f32.mrb[70].mxu0  ;;  %v4863_v42 = vpop.f32.mrb[70].mxu1  ;;  %v4729_v2 = vld [vmem:[#allocation4 + $0x21] ss:$8 sm:$0xf] }
 0xb61   :  { %v4823_v26 = vpop.f32.mrb[71].mxu0  ;;  %v4864_v58 = vpop.f32.mrb[71].mxu1  ;;  %v4731_v63 = vld [vmem:[#allocation4 + $0x61] ss:$8 sm:$0xf] }
 0xb62   :  { %v4880_v10 = vrot.slane %v4870_v59, %v13696_v45  ;;  %v4887_v29 = vrot.slane %v4871_v20, %v13696_v45  ;;  %v4894_v23 = vrot.slane %v4872_v37, %v13696_v45  ;;  %v4901_v36 = vrot.slane %v4873_v14, %v13696_v45  ;;  %v4733_v59 = vld [vmem:[#allocation4 + $0xa1] ss:$8 sm:$0xf] }
 0xb63   :  { %v4737_v20 = vld [vmem:[#allocation4 + $0x121] ss:$8 sm:$0xf] }
 0xb64   :  { %v4902_v56 = vcombine.low %v4880_v10, %v4894_v23  ;;  %v4903_v9 = vcombine.high %v4880_v10, %v4894_v23  ;;  %v4904_v46 = vcombine.low %v4887_v29, %v4901_v36  ;;  %v4905_v61 = vcombine.high %v4887_v29, %v4901_v36  ;;  %v4735_v26 = vld [vmem:[#allocation4 + $0xe1] ss:$8 sm:$0xf] }
 0xb65   :  { %v4739_v58 = vld [vmem:[#allocation4 + $0x161] ss:$8 sm:$0xf] }
 0xb66   :  { %v4912_v11 = vrot.slane %v4902_v56, %v13696_v45  ;;  %v4919_v22 = vrot.slane %v4904_v46, %v13696_v45  ;;  %v4926_v48 = vrot.slane %v4903_v9, %v13696_v45  ;;  %v4933_v24 = vrot.slane %v4905_v61, %v13696_v45  ;;  %v4741_v36 = vld [vmem:[#allocation4 + $0x1a1] ss:$8 sm:$0xf] }
 0xb67   :  { %v4743_v56 = vld [vmem:[#allocation4 + $0x1e1] ss:$8 sm:$0xf] }
 0xb68   :  { %v4934_v60 = vcombine.high %v4912_v11, %v4912_v11  ;;  %v4935_v37 = vcombine.high %v4919_v22, %v4919_v22  ;;  %v4936_v42 = vcombine.high %v4926_v48, %v4926_v48  ;;  %v4937_v14 = vcombine.high %v4933_v24, %v4933_v24 }
 0xb69   :  { %v12271_v10 = vadd.f32 %v4912_v11, %v4729_v2  ;;  %v12273_v29 = vadd.f32 %v4926_v48, %v4731_v63  ;;  %v12275_v23 = vadd.f32 %v4919_v22, %v4737_v20  ;;  %v12281_v61 = vadd.f32 %v4933_v24, %v4739_v58 }
 0xb6a   :  { %v12277_v9 = vadd.f32 %v4934_v60, %v4733_v59  ;;  %v12279_v46 = vadd.f32 %v4936_v42, %v4735_v26  ;;  %v12283_v45 = vadd.f32 %v4935_v37, %v4741_v36  ;;  %v12285_v40 = vadd.f32 %v4937_v14, %v4743_v56 }
 0xb6b   :  { %v4954_v21 = vmul.f32 0.5, %v12271_v10  ;;  %v4955_v11 = vmul.f32 0.5, %v12273_v29  ;;  %v4958_v2 = vmul.f32 0.5, %v12275_v23  ;;  %v4994_v63 = vrot.slane %v12271_v10, 1 }
 0xb6c   :  { %v4956_v48 = vmul.f32 0.5, %v12277_v9  ;;  %v4957_v22 = vmul.f32 0.5, %v12279_v46  ;;  %v4959_v24 = vmul.f32 0.5, %v12281_v61  ;;  %v4995_v59 = vrot.slane %v12273_v29, 1 }
 0xb6d   :  { %8975 = vtanh.f32 %v4954_v21  ;;  %v4960_v20 = vmul.f32 0.5, %v12283_v45  ;;  %v4961_v60 = vmul.f32 0.5, %v12285_v40  ;;  %v4996_v37 = vrot.slane %v12277_v9, 1 }
 0xb6e   :  { %8977 = vtanh.f32 %v4955_v11  ;;  %v4997_v42 = vrot.slane %v12279_v46, 1  ;;  %v4998_v14 = vrot.slane %v12275_v23, 1  ;;  %v4999_v21 = vrot.slane %v12281_v61, 1 }
 0xb6f   :  { %8979 = vtanh.f32 %v4956_v48  ;;  %v5000_v26 = vrot.slane %v12283_v45, 1  ;;  %v5001_v58 = vrot.slane %v12285_v40, 1  ;;  %v5010_v36 = vmul.f32 0.5, %v4994_v63 }
 0xb70   :  { %8981 = vtanh.f32 %v4957_v22  ;;  %v5011_v56 = vmul.f32 0.5, %v4995_v59  ;;  %v5012_v11 = vmul.f32 0.5, %v4996_v37  ;;  %v5013_v48 = vmul.f32 0.5, %v4997_v42 }
 0xb71   :  { %8983 = vtanh.f32 %v4958_v2  ;;  %v5014_v33 = vmul.f32 0.5, %v4998_v14  ;;  %v5015_v22 = vmul.f32 0.5, %v4999_v21  ;;  %v5016_v16 = vmul.f32 0.5, %v5000_v26 }
 0xb72   :  { %8985 = vtanh.f32 %v4959_v24  ;;  %v5017_v27 = vmul.f32 0.5, %v5001_v58  ;;  %v5042_v51 = vrot.slane %v12271_v10, 2  ;;  %v5043_v2 = vrot.slane %v12273_v29, 2 }
 0xb73   :  { %8987 = vtanh.f32 %v4960_v20  ;;  %v5044_v15 = vrot.slane %v12277_v9, 2  ;;  %v5045_v63 = vrot.slane %v12279_v46, 2  ;;  %v5046_v59 = vrot.slane %v12275_v23, 2 }
 0xb74   :  { %8989 = vtanh.f32 %v4961_v60  ;;  %v5047_v20 = vrot.slane %v12281_v61, 2  ;;  %v5066_v60 = vrot.slane %v12271_v10, 3  ;;  %v5048_v42 = vrot.slane %v12283_v45, 2 }
 0xb75   :  { %8991 = vtanh.f32 %v5010_v36  ;;  %v5067_v14 = vrot.slane %v12273_v29, 3  ;;  %v5068_v21 = vrot.slane %v12277_v9, 3  ;;  %v5049_v58 = vrot.slane %v12285_v40, 2 }
 0xb76   :  { %8993 = vtanh.f32 %v5011_v56  ;;  %v5069_v36 = vrot.slane %v12279_v46, 3  ;;  %v5070_v56 = vrot.slane %v12275_v23, 3  ;;  %v5071_v10 = vrot.slane %v12281_v61, 3 }
 0xb77   :  { %v8976_v24 = vpop.eup %8975  ;;  %8995 = vtanh.f32 %v5012_v11  ;;  %v5082_v9 = vmul.f32 0.5, %v5066_v60  ;;  %v5083_v1 = vmul.f32 0.5, %v5067_v14  ;;  %v5084_v46 = vmul.f32 0.5, %v5068_v21 }
 0xb78   :  { %v8978_v37 = vpop.eup %8977  ;;  %8997 = vtanh.f32 %v5013_v48  ;;  %v4970_v13 = vadd.f32 1.0, %v8976_v24  ;;  %v5072_v48 = vrot.slane %v12283_v45, 3  ;;  %v5085_v24 = vmul.f32 0.5, %v5069_v36 }
 0xb79   :  { %v8980_v26 = vpop.eup %8979  ;;  %8999 = vtanh.f32 %v5014_v33  ;;  %v4971_v35 = vadd.f32 1.0, %v8978_v37  ;;  %v5087_v45 = vmul.f32 0.5, %v5071_v10 }
 0xb7a   :  { %v8982_v11 = vpop.eup %8981  ;;  %9001 = vtanh.f32 %v5015_v22  ;;  %v4972_v0 = vadd.f32 1.0, %v8980_v26  ;;  %v5086_v22 = vmul.f32 0.5, %v5070_v56  ;;  %v4978_v30 = vmul.f32 0.5, %v4970_v13 }
 0xb7b   :  { %v8984_v31 = vpop.eup %8983  ;;  %9003 = vtanh.f32 %v5016_v16  ;;  %v4973_v23 = vadd.f32 1.0, %v8982_v11  ;;  %v4979_v32 = vmul.f32 0.5, %v4971_v35  ;;  %v5088_v60 = vmul.f32 0.5, %v5072_v48 }
 0xb7c   :  { %v8986_v33 = vpop.eup %8985  ;;  %9005 = vtanh.f32 %v5017_v27  ;;  %v4974_v61 = vadd.f32 1.0, %v8984_v31  ;;  %v4980_v27 = vmul.f32 0.5, %v4972_v0 }
 0xb7d   :  { %v8988_v5 = vpop.eup %8987  ;;  %9007 = vtanh.f32 %v5042_v51  ;;  %v4975_v16 = vadd.f32 1.0, %v8986_v33  ;;  %v4981_v51 = vmul.f32 0.5, %v4973_v23 }
 0xb7e   :  { %v8990_v34 = vpop.eup %8989  ;;  %9009 = vtanh.f32 %v5043_v2  ;;  %v4976_v26 = vadd.f32 1.0, %v8988_v5  ;;  %v4982_v31 = vmul.f32 0.5, %v4974_v61 }
 0xb7f   :  { %v8992_v37 = vpop.eup %8991  ;;  %9011 = vtanh.f32 %v5044_v15  ;;  %v4977_v11 = vadd.f32 1.0, %v8990_v34  ;;  %v4983_v33 = vmul.f32 0.5, %v4975_v16 }
 0xb80   :  { %v8994_v29 = vpop.eup %8993  ;;  %v5026_v14 = vadd.f32 1.0, %v8992_v37  ;;  %9013 = vtanh.f32 %v5045_v63  ;;  %v4984_v5 = vmul.f32 0.5, %v4976_v26 }
 0xb81   :  { %v8996_v21 = vpop.eup %8995  ;;  %v5027_v36 = vadd.f32 1.0, %v8994_v29  ;;  %9015 = vtanh.f32 %v5046_v59  ;;  %v4985_v34 = vmul.f32 0.5, %v4977_v11 }
 0xb82   :  { %v8998_v56 = vpop.eup %8997  ;;  %v5028_v13 = vadd.f32 1.0, %v8996_v21  ;;  %v5034_v2 = vmul.f32 0.5, %v5026_v14  ;;  %9017 = vtanh.f32 %v5047_v20 }
 0xb83   :  { %v9000_v10 = vpop.eup %8999  ;;  %v5029_v35 = vadd.f32 1.0, %v8998_v56  ;;  %v5035_v15 = vmul.f32 0.5, %v5027_v36  ;;  %9019 = vtanh.f32 %v5048_v42 }
 0xb84   :  { %v9002_v48 = vpop.eup %9001  ;;  %v5030_v0 = vadd.f32 1.0, %v9000_v10  ;;  %v5036_v37 = vmul.f32 0.5, %v5028_v13  ;;  %9021 = vtanh.f32 %v5049_v58  ;;  %v5114_v20 = vmul.f32 %v5034_v2, %v12033_v43 }
 0xb85   :  { %v9004_v63 = vpop.eup %9003  ;;  %v5031_v23 = vadd.f32 1.0, %v9002_v48  ;;  %v5037_v29 = vmul.f32 0.5, %v5029_v35  ;;  %9023 = vtanh.f32 %v5082_v9  ;;  %v5115_v42 = vmul.f32 %v5035_v15, %v12036_v6 }
 0xb86   :  { %v9006_v59 = vpop.eup %9005  ;;  %v5032_v61 = vadd.f32 1.0, %v9004_v63  ;;  %v5038_v21 = vmul.f32 0.5, %v5030_v0  ;;  %9025 = vtanh.f32 %v5083_v1  ;;  %v5116_v58 = vmul.f32 %v5036_v37, %v12039_v47 }
 0xb87   :  { %v9008_v16 = vpop.eup %9007  ;;  %v5033_v14 = vadd.f32 1.0, %v9006_v59  ;;  %v5039_v36 = vmul.f32 0.5, %v5031_v23  ;;  %9027 = vtanh.f32 %v5084_v46  ;;  %v5117_v10 = vmul.f32 %v5037_v29, %v12043_v18 }
 0xb88   :  { %v9010_v26 = vpop.eup %9009  ;;  %v5040_v56 = vmul.f32 0.5, %v5032_v61  ;;  %9029 = vtanh.f32 %v5085_v24  ;;  %v5122_v11 = vmul.f32 %v9008_v16, %v4978_v30  ;;  %v5118_v43 = vmul.f32 %v5038_v21, %v12048_v55 }
 0xb89   :  { %v9012_v13 = vpop.eup %9011  ;;  %v5041_v9 = vmul.f32 0.5, %v5033_v14  ;;  %9031 = vtanh.f32 %v5086_v22  ;;  %v5123_v1 = vmul.f32 %v9010_v26, %v4979_v32  ;;  %v5119_v24 = vmul.f32 %v5039_v36, %v12051_v52 }
 0xb8a   :  { %v9014_v35 = vpop.eup %9013  ;;  %9033 = vtanh.f32 %v5087_v45  ;;  %v5124_v2 = vmul.f32 %v9012_v13, %v4980_v27  ;;  %v12324_v46 = vadd.f32 %v5122_v11, %v5114_v20  ;;  %v5120_v22 = vmul.f32 %v5040_v56, %v12054_v39 }
 0xb8b   :  { %v9016_v6 = vpop.eup %9015  ;;  %9035 = vtanh.f32 %v5088_v60  ;;  %v5125_v15 = vmul.f32 %v9014_v35, %v4981_v51  ;;  %v12327_v47 = vadd.f32 %v5123_v1, %v5115_v42  ;;  %v5121_v55 = vmul.f32 %v5041_v9, %v12057_v54 }
 0xb8c   :  { %v9018_v30 = vpop.eup %9017  ;;  %v5126_v48 = vmul.f32 %v9016_v6, %v4982_v31  ;;  %v12330_v18 = vadd.f32 %v5124_v2, %v5116_v58  ;;  %9037 = vtanh.f32 %v12324_v46  ;;  %v13713_v60 = vrot.slane %v12285_v40, 3 }
 0xb8d   :  { %v9020_v32 = vpop.eup %9019  ;;  %v5127_v45 = vmul.f32 %v9018_v30, %v4983_v33  ;;  %v12334_v27 = vadd.f32 %v5125_v15, %v5117_v10  ;;  %9039 = vtanh.f32 %v12327_v47 }
 0xb8e   :  { %v9022_v52 = vpop.eup %9021  ;;  %v5089_v51 = vmul.f32 0.5, %v13713_v60  ;;  %v5128_v0 = vmul.f32 %v9020_v32, %v4984_v5  ;;  %v12339_v37 = vadd.f32 %v5126_v48, %v5118_v43  ;;  %9041 = vtanh.f32 %v12330_v18 }
 0xb8f   :  { %v9024_v39 = vpop.eup %9023  ;;  %v5129_v31 = vmul.f32 %v9022_v52, %v4985_v34  ;;  %v12342_v63 = vadd.f32 %v5127_v45, %v5119_v24  ;;  %9043 = vtanh.f32 %v12334_v27 }
 0xb90   :  { %v9026_v54 = vpop.eup %9025  ;;  %v12345_v33 = vadd.f32 %v5128_v0, %v5120_v22  ;;  %9045 = vtanh.f32 %v12339_v37  ;;  %v5098_v29 = vadd.f32 1.0, %v9024_v39 }
 0xb91   :  { %v9028_v23 = vpop.eup %9027  ;;  %v12348_v40 = vadd.f32 %v5129_v31, %v5121_v55  ;;  %9047 = vtanh.f32 %v12342_v63  ;;  %v5099_v59 = vadd.f32 1.0, %v9026_v54 }
 0xb92   :  { %v9030_v5 = vpop.eup %9029  ;;  %9049 = vtanh.f32 %v5089_v51  ;;  %v5100_v34 = vadd.f32 1.0, %v9028_v23  ;;  %v5106_v36 = vmul.f32 0.5, %v5098_v29 }
 0xb93   :  { %v9032_v61 = vpop.eup %9031  ;;  %9051 = vtanh.f32 %v12345_v33  ;;  %v5101_v20 = vadd.f32 1.0, %v9030_v5  ;;  %v5107_v56 = vmul.f32 0.5, %v5099_v59 }
 0xb94   :  { %v9034_v21 = vpop.eup %9033  ;;  %9053 = vtanh.f32 %v12348_v40  ;;  %v5102_v14 = vadd.f32 1.0, %v9032_v61  ;;  %v5108_v11 = vmul.f32 0.5, %v5100_v34 }
 0xb95   :  { %v9036_v16 = vpop.eup %9035  ;;  %v5103_v26 = vadd.f32 1.0, %v9034_v21  ;;  %v5109_v10 = vmul.f32 0.5, %v5101_v20 }
 0xb96   :  { %v9038_v42 = vpop.eup %9037  ;;  %v5104_v35 = vadd.f32 1.0, %v9036_v16  ;;  %v5110_v2 = vmul.f32 0.5, %v5102_v14 }
 0xb97   :  { %v9040_v58 = vpop.eup %9039  ;;  %v5146_v13 = vmul.f32 %v9038_v42, %v5106_v36  ;;  %v5111_v22 = vmul.f32 0.5, %v5103_v26 }
 0xb98   :  { %v9042_v9 = vpop.eup %9041  ;;  %v5147_v1 = vmul.f32 %v9040_v58, %v5107_v56  ;;  %v5112_v60 = vmul.f32 0.5, %v5104_v35 }
 0xb99   :  { %v9044_v43 = vpop.eup %9043  ;;  %v5148_v6 = vmul.f32 %v9042_v9, %v5108_v11  ;;  %5154 = vst [vmem:[#allocation5 + $0x9] sm:$0x1] %v5146_v13  ;;  %v5178_v24 = vpack.c.bf16 %v5146_v13, %v5146_v13 }
 0xb9a   :  { %v9046_v15 = vpop.eup %9045  ;;  %5155 = vst [vmem:[#allocation5 + $0x19] sm:$0x1] %v5147_v1  ;;  %v5179_v30 = vpack.c.bf16 %v5147_v1, %v5147_v1  ;;  %v5149_v48 = vmul.f32 %v9044_v43, %v5109_v10 }
 0xb9b   :  { %v9048_v32 = vpop.eup %9047  ;;  %5156 = vst [vmem:[#allocation5 + $0x29] sm:$0x1] %v5148_v6  ;;  %v5150_v55 = vmul.f32 %v9046_v15, %v5110_v2  ;;  %v5180_v45 = vpack.c.bf16 %v5148_v6, %v5148_v6  ;;  %v5194_v29 = vunpack.c.l.b16 %v5178_v24 }
 0xb9c   :  { %v9050_v52 = vpop.eup %9049  ;;  %v5151_v51 = vmul.f32 %v9048_v32, %v5111_v22  ;;  %5157 = vst [vmem:[#allocation5 + $0x39] sm:$0x1] %v5149_v48  ;;  %v5181_v0 = vpack.c.bf16 %v5149_v48, %v5149_v48  ;;  %v5195_v39 = vunpack.c.l.b16 %v5179_v30 }
 0xb9d   :  { %v9052_v31 = vpop.eup %9051  ;;  %v5105_v54 = vadd.f32 1.0, %v9050_v52  ;;  %5158 = vst [vmem:[#allocation5 + $0x49] sm:$0x1] %v5150_v55  ;;  %v5182_v23 = vpack.c.bf16 %v5150_v55, %v5150_v55  ;;  %v5196_v5 = vunpack.c.l.b16 %v5180_v45 }
 0xb9e   :  { %v9054_v59 = vpop.eup %9053  ;;  %v5152_v61 = vmul.f32 %v9052_v31, %v5112_v60  ;;  %5159 = vst [vmem:[#allocation5 + $0x59] sm:$0x1] %v5151_v51  ;;  %v5183_v34 = vpack.c.bf16 %v5151_v51, %v5151_v51  ;;  %v5197_v21 = vunpack.c.l.b16 %v5181_v0  ;;  %v5202_v20 = vrot.slane %v5195_v39, 7 }
 0xb9f   :  { %v5113_v16 = vmul.f32 0.5, %v5105_v54  ;;  %v5198_v14 = vunpack.c.l.b16 %v5182_v23  ;;  %v5204_v36 = vrot.slane %v5196_v5, 6 }
 0xba0   :  { %5160 = vst [vmem:[#allocation5 + $0x69] sm:$0x1] %v5152_v61  ;;  %v5184_v42 = vpack.c.bf16 %v5152_v61, %v5152_v61  ;;  %v5199_v26 = vunpack.c.l.b16 %v5183_v34  ;;  %v5203_v56 = vsel %vm1290_vm0, %v5202_v20, %v5194_v29  ;;  %v5206_v58 = vrot.slane %v5197_v21, 5 }
 0xba1   :  { %v5153_v11 = vmul.f32 %v9054_v59, %v5113_v16  ;;  %v5205_v13 = vsel %vm1293_vm1, %v5204_v36, %v5203_v56  ;;  %v5208_v9 = vrot.slane %v5198_v14, 4  ;;  %v13730_v59 = vld [vmem:[#allocation6_spill] sm:$0xff] }
 0xba2   :  { %v5200_v10 = vunpack.c.l.b16 %v5184_v42  ;;  %v5207_v1 = vsel %vm1296_vm2, %v5206_v58, %v5205_v13  ;;  %v5210_v35 = vrot.slane %v5199_v26, 3  ;;  %v5163_v13 = vld [vmem:[#allocation4 + $0x22] ss:$8 sm:$0xf] }
 0xba3   :  { %5161 = vst [vmem:[#allocation5 + $0x79] sm:$0x1] %v5153_v11  ;;  %v5185_v43 = vpack.c.bf16 %v5153_v11, %v5153_v11  ;;  %v5209_v2 = vsel %vm1299_vm3, %v5208_v9, %v5207_v1  ;;  %v5165_v9 = vld [vmem:[#allocation4 + $0x62] ss:$8 sm:$0xf] }
 0xba4   :  { %v5211_v6 = vsel %vm1302_vm4, %v5210_v35, %v5209_v2  ;;  %v5212_v24 = vrot.slane %v5200_v10, 2  ;;  %v5167_v10 = vld [vmem:[#allocation4 + $0xa2] ss:$8 sm:$0xf] }
 0xba5   :  { %v5201_v15 = vunpack.c.l.b16 %v5185_v43  ;;  %v5171_v1 = vld [vmem:[#allocation4 + $0x122] ss:$8 sm:$0xf] }
 0xba6   :  { %v5213_v30 = vsel %vm1305_vm5, %v5212_v24, %v5211_v6  ;;  %v5169_v24 = vld [vmem:[#allocation4 + $0xe2] ss:$8 sm:$0xf] }
 0xba7   :  { %v5214_v22 = vrot.slane %v5201_v15, 1  ;;  %v5173_v15 = vld [vmem:[#allocation4 + $0x162] ss:$8 sm:$0xf] }
 0xba9   :  { %v5215_v48 = vsel %vm1308_vm6, %v5214_v22, %v5213_v30 }
 0xbaa   :  { %v5216_v32 = vpack.c.b16 %v5215_v48, %v5215_v48 }
 0xbac   :  { %5251 = vmatmul.mubr.bf16.vlgmr.msra.gmra.mrb[72].mxu0 %v5216_v32  ;;  %5292 = vmatmul.mubr.bf16.vlgmr.msra.gmra.mrb[72].mxu1 %v5216_v32  ;;  %v5175_v32 = vld [vmem:[#allocation4 + $0x1a2] ss:$8 sm:$0xf] }
 0xbad   :  { %5653 = vmatpush1.bf16.msra.mxu0 %v12072_v12  ;;  %5694 = vmatpush1.bf16.msra.mxu1 %v12078_v62  ;;  %v13714_v12 = vld [vmem:[#allocation7_spill] sm:$0xff]  ;;  %v13715_v62 = vld [vmem:[#allocation8_spill] sm:$0xff] }
 0xbae   :  { %5654 = vmatprep.subr.bf16.mxu0 %v12084_v49  ;;  %5695 = vmatprep.subr.bf16.mxu1 %v12090_v7  ;;  %v13716_v49 = vld [vmem:[#allocation9_spill] sm:$0xff]  ;;  %v13717_v7 = vld [vmem:[#allocation10_spill] sm:$0xff] }
 0xbaf   :  { %5684 = vmatprep.mubr.bf16.mxu0 %v13578_v41  ;;  %5725 = vmatprep.mubr.bf16.mxu1 %v13578_v41 }
 0xbb1   :  { %5655 = vmatpush1.bf16.msra.mxu0 %v12098_v8  ;;  %5696 = vmatpush1.bf16.msra.mxu1 %v12104_v25  ;;  %v13718_v8 = vld [vmem:[#allocation11_spill] sm:$0xff]  ;;  %v13719_v25 = vld [vmem:[#allocation12_spill] sm:$0xff] }
 0xbb2   :  { %5656 = vmatprep.subr.bf16.mxu0 %v12110_v38  ;;  %5697 = vmatprep.subr.bf16.mxu1 %v12116_v44  ;;  %v13720_v38 = vld [vmem:[#allocation13_spill] sm:$0xff]  ;;  %v13721_v44 = vld [vmem:[#allocation14_spill] sm:$0xff] }
 0xbb5   :  { %5657 = vmatpush1.bf16.msra.mxu0 %v12122_v53  ;;  %5698 = vmatpush1.bf16.msra.mxu1 %v12128_v50  ;;  %v13722_v53 = vld [vmem:[#allocation15_spill] sm:$0xff]  ;;  %v13723_v50 = vld [vmem:[#allocation16_spill] sm:$0xff] }
 0xbb6   :  { %5658 = vmatprep.subr.bf16.mxu0 %v12134_v28  ;;  %5699 = vmatprep.subr.bf16.mxu1 %v12140_v19  ;;  %v13724_v28 = vld [vmem:[#allocation17_spill] sm:$0xff]  ;;  %v13725_v19 = vld [vmem:[#allocation18_spill] sm:$0xff] }
 0xbb9   :  { %5659 = vmatpush1.bf16.msra.mxu0 %v12146_v3  ;;  %5700 = vmatpush1.bf16.msra.mxu1 %v12152_v57  ;;  %v13726_v3 = vld [vmem:[#allocation19_spill] sm:$0xff]  ;;  %v13727_v57 = vld [vmem:[#allocation20_spill] sm:$0xff] }
 0xbba   :  { %5660 = vmatprep.subr.bf16.mxu0 %v12158_v17  ;;  %5701 = vmatprep.subr.bf16.mxu1 %v12164_v4  ;;  %v13728_v17 = vld [vmem:[#allocation21_spill] sm:$0xff]  ;;  %v13729_v4 = vld [vmem:[#allocation22_spill] sm:$0xff] }
 0xbbd   :  { %5661 = vmatpush1.bf16.msra.mxu0 %v13714_v12  ;;  %5702 = vmatpush1.bf16.msra.mxu1 %v13715_v62  ;;  %v5177_v12 = vld [vmem:[#allocation4 + $0x1e2] ss:$8 sm:$0xf] }
 0xbbe   :  { %5662 = vmatprep.subr.bf16.mxu0 %v13716_v49  ;;  %5703 = vmatprep.subr.bf16.mxu1 %v13717_v7 }
 0xbc1   :  { %5663 = vmatpush1.bf16.msra.mxu0 %v13718_v8  ;;  %5704 = vmatpush1.bf16.msra.mxu1 %v13719_v25 }
 0xbc2   :  { %5664 = vmatprep.subr.bf16.mxu0 %v13720_v38  ;;  %5705 = vmatprep.subr.bf16.mxu1 %v13721_v44 }
 0xbc5   :  { %5665 = vmatpush1.bf16.msra.mxu0 %v13722_v53  ;;  %5706 = vmatpush1.bf16.msra.mxu1 %v13723_v50 }
 0xbc6   :  { %5666 = vmatprep.subr.bf16.mxu0 %v13724_v28  ;;  %5707 = vmatprep.subr.bf16.mxu1 %v13725_v19 }
 0xbc9   :  { %5667 = vmatpush1.bf16.msra.mxu0 %v13726_v3  ;;  %5708 = vmatpush1.bf16.msra.mxu1 %v13727_v57 }
 0xbca   :  { %6086 = vmatprep.subr.bf16.mxu0 %v13728_v17  ;;  %6127 = vmatprep.subr.bf16.mxu1 %v13729_v4 }
 0xc7f   :  { %v5252_v55 = vpop.f32.mrb[72].mxu0  ;;  %v5293_v45 = vpop.f32.mrb[72].mxu1 }
 0xc80   :  { %v5254_v52 = vpop.f32.mrb[73].mxu0  ;;  %v5295_v60 = vpop.f32.mrb[73].mxu1 }
 0xc81   :  { %v5304_v51 = vcombine.low %v5252_v55, %v5254_v52  ;;  %v5305_v0 = vcombine.high %v5252_v55, %v5254_v52  ;;  %v5306_v39 = vcombine.low %v5293_v45, %v5295_v60  ;;  %v5307_v31 = vcombine.high %v5293_v45, %v5295_v60  ;;  %v5256_v54 = vpop.f32.mrb[74].mxu0  ;;  %v5297_v23 = vpop.f32.mrb[74].mxu1 }
 0xc82   :  { %v5257_v29 = vpop.f32.mrb[75].mxu0  ;;  %v5298_v5 = vpop.f32.mrb[75].mxu1 }
 0xc83   :  { %v5314_v61 = vrot.slane %v5304_v51, %v13730_v59  ;;  %v5321_v34 = vrot.slane %v5305_v0, %v13730_v59  ;;  %v5328_v21 = vrot.slane %v5306_v39, %v13730_v59  ;;  %v5335_v20 = vrot.slane %v5307_v31, %v13730_v59 }
 0xc85   :  { %v5336_v16 = vcombine.low %v5314_v61, %v5328_v21  ;;  %v5337_v14 = vcombine.high %v5314_v61, %v5328_v21  ;;  %v5338_v36 = vcombine.low %v5321_v34, %v5335_v20  ;;  %v5339_v42 = vcombine.high %v5321_v34, %v5335_v20 }
 0xc87   :  { %v5346_v26 = vrot.slane %v5336_v16, %v13730_v59  ;;  %v5353_v56 = vrot.slane %v5338_v36, %v13730_v59  ;;  %v5360_v58 = vrot.slane %v5337_v14, %v13730_v59  ;;  %v5367_v11 = vrot.slane %v5339_v42, %v13730_v59 }
 0xc89   :  { %v5368_v35 = vcombine.high %v5346_v26, %v5346_v26  ;;  %v5369_v43 = vcombine.high %v5353_v56, %v5353_v56  ;;  %v5370_v2 = vcombine.high %v5360_v58, %v5360_v58  ;;  %v5371_v6 = vcombine.high %v5367_v11, %v5367_v11 }
 0xc8a   :  { %v12402_v30 = vadd.f32 %v5346_v26, %v5163_v13  ;;  %v12404_v22 = vadd.f32 %v5360_v58, %v5165_v9  ;;  %v12406_v48 = vadd.f32 %v5353_v56, %v5171_v1  ;;  %v12412_v7 = vadd.f32 %v5367_v11, %v5173_v15 }
 0xc8b   :  { %v12408_v62 = vadd.f32 %v5368_v35, %v5167_v10  ;;  %v12410_v49 = vadd.f32 %v5370_v2, %v5169_v24  ;;  %v12414_v8 = vadd.f32 %v5369_v43, %v5175_v32  ;;  %v12416_v25 = vadd.f32 %v5371_v6, %v5177_v12 }
 0xc8c   :  { %v5388_v38 = vmul.f32 0.5, %v12402_v30  ;;  %v5389_v44 = vmul.f32 0.5, %v12404_v22  ;;  %v5392_v28 = vmul.f32 0.5, %v12406_v48  ;;  %v5428_v19 = vrot.slane %v12402_v30, 1 }
 0xc8d   :  { %v5390_v53 = vmul.f32 0.5, %v12408_v62  ;;  %v5391_v50 = vmul.f32 0.5, %v12410_v49  ;;  %v5393_v3 = vmul.f32 0.5, %v12412_v7  ;;  %v5429_v57 = vrot.slane %v12404_v22, 1 }
 0xc8e   :  { %9055 = vtanh.f32 %v5388_v38  ;;  %v5394_v17 = vmul.f32 0.5, %v12414_v8  ;;  %v5395_v4 = vmul.f32 0.5, %v12416_v25  ;;  %v5430_v55 = vrot.slane %v12408_v62, 1 }
 0xc8f   :  { %9057 = vtanh.f32 %v5389_v44  ;;  %v5431_v45 = vrot.slane %v12410_v49, 1  ;;  %v5432_v52 = vrot.slane %v12406_v48, 1  ;;  %v5433_v60 = vrot.slane %v12412_v7, 1 }
 0xc90   :  { %9059 = vtanh.f32 %v5390_v53  ;;  %v5434_v51 = vrot.slane %v12414_v8, 1  ;;  %v5435_v0 = vrot.slane %v12416_v25, 1  ;;  %v5444_v39 = vmul.f32 0.5, %v5428_v19 }
 0xc91   :  { %9061 = vtanh.f32 %v5391_v50  ;;  %v5445_v31 = vmul.f32 0.5, %v5429_v57  ;;  %v5446_v54 = vmul.f32 0.5, %v5430_v55  ;;  %v5447_v23 = vmul.f32 0.5, %v5431_v45 }
 0xc92   :  { %9063 = vtanh.f32 %v5392_v28  ;;  %v5448_v29 = vmul.f32 0.5, %v5432_v52  ;;  %v5449_v5 = vmul.f32 0.5, %v5433_v60  ;;  %v5450_v61 = vmul.f32 0.5, %v5434_v51 }
 0xc93   :  { %9065 = vtanh.f32 %v5393_v3  ;;  %v5451_v34 = vmul.f32 0.5, %v5435_v0  ;;  %v5476_v21 = vrot.slane %v12402_v30, 2  ;;  %v5477_v20 = vrot.slane %v12404_v22, 2 }
 0xc94   :  { %9067 = vtanh.f32 %v5394_v17  ;;  %v5478_v16 = vrot.slane %v12408_v62, 2  ;;  %v5479_v14 = vrot.slane %v12410_v49, 2  ;;  %v5480_v42 = vrot.slane %v12406_v48, 2 }
 0xc95   :  { %9069 = vtanh.f32 %v5395_v4  ;;  %v5481_v26 = vrot.slane %v12412_v7, 2  ;;  %v5500_v56 = vrot.slane %v12402_v30, 3  ;;  %v5482_v11 = vrot.slane %v12414_v8, 2 }
 0xc96   :  { %9071 = vtanh.f32 %v5444_v39  ;;  %v5501_v13 = vrot.slane %v12404_v22, 3  ;;  %v5502_v9 = vrot.slane %v12408_v62, 3  ;;  %v5483_v1 = vrot.slane %v12416_v25, 2 }
 0xc97   :  { %9073 = vtanh.f32 %v5445_v31  ;;  %v5503_v35 = vrot.slane %v12410_v49, 3  ;;  %v5504_v43 = vrot.slane %v12406_v48, 3  ;;  %v5505_v24 = vrot.slane %v12412_v7, 3 }
 0xc98   :  { %v9056_v36 = vpop.eup %9055  ;;  %9075 = vtanh.f32 %v5446_v54  ;;  %v5506_v15 = vrot.slane %v12414_v8, 3  ;;  %v5507_v22 = vrot.slane %v12416_v25, 3  ;;  %v5516_v12 = vmul.f32 0.5, %v5500_v56 }
 0xc99   :  { %v9058_v58 = vpop.eup %9057  ;;  %9077 = vtanh.f32 %v5447_v23  ;;  %v5404_v6 = vadd.f32 1.0, %v9056_v36  ;;  %v5517_v44 = vmul.f32 0.5, %v5501_v13  ;;  %v5518_v49 = vmul.f32 0.5, %v5502_v9 }
 0xc9a   :  { %v9060_v10 = vpop.eup %9059  ;;  %9079 = vtanh.f32 %v5448_v29  ;;  %v5405_v32 = vadd.f32 1.0, %v9058_v58  ;;  %v5519_v50 = vmul.f32 0.5, %v5503_v35  ;;  %v5520_v28 = vmul.f32 0.5, %v5504_v43 }
 0xc9b   :  { %v9062_v2 = vpop.eup %9061  ;;  %9081 = vtanh.f32 %v5449_v5  ;;  %v5406_v38 = vadd.f32 1.0, %v9060_v10  ;;  %v5412_v3 = vmul.f32 0.5, %v5404_v6  ;;  %v5521_v8 = vmul.f32 0.5, %v5505_v24 }
 0xc9c   :  { %v9064_v30 = vpop.eup %9063  ;;  %9083 = vtanh.f32 %v5450_v61  ;;  %v5407_v48 = vadd.f32 1.0, %v9062_v2  ;;  %v5413_v4 = vmul.f32 0.5, %v5405_v32  ;;  %v5522_v55 = vmul.f32 0.5, %v5506_v15 }
 0xc9d   :  { %v9066_v62 = vpop.eup %9065  ;;  %9085 = vtanh.f32 %v5451_v34  ;;  %v5408_v7 = vadd.f32 1.0, %v9064_v30  ;;  %v5414_v60 = vmul.f32 0.5, %v5406_v38 }
 0xc9e   :  { %v9068_v53 = vpop.eup %9067  ;;  %9087 = vtanh.f32 %v5476_v21  ;;  %v5409_v17 = vadd.f32 1.0, %v9066_v62  ;;  %v5415_v31 = vmul.f32 0.5, %v5407_v48 }
 0xc9f   :  { %v9070_v19 = vpop.eup %9069  ;;  %9089 = vtanh.f32 %v5477_v20  ;;  %v5410_v52 = vadd.f32 1.0, %v9068_v53  ;;  %v5416_v29 = vmul.f32 0.5, %v5408_v7 }
 0xca0   :  { %v9072_v57 = vpop.eup %9071  ;;  %9091 = vtanh.f32 %v5478_v16  ;;  %v5411_v39 = vadd.f32 1.0, %v9070_v19  ;;  %v5417_v21 = vmul.f32 0.5, %v5409_v17 }
 0xca1   :  { %v9074_v45 = vpop.eup %9073  ;;  %v5460_v51 = vadd.f32 1.0, %v9072_v57  ;;  %9093 = vtanh.f32 %v5479_v14  ;;  %v5418_v56 = vmul.f32 0.5, %v5410_v52 }
 0xca2   :  { %v9076_v0 = vpop.eup %9075  ;;  %v5461_v54 = vadd.f32 1.0, %v9074_v45  ;;  %9095 = vtanh.f32 %v5480_v42  ;;  %v5419_v9 = vmul.f32 0.5, %v5411_v39 }
 0xca3   :  { %v9078_v23 = vpop.eup %9077  ;;  %v5462_v5 = vadd.f32 1.0, %v9076_v0  ;;  %v5468_v61 = vmul.f32 0.5, %v5460_v51  ;;  %9097 = vtanh.f32 %v5481_v26 }
 0xca4   :  { %v9080_v34 = vpop.eup %9079  ;;  %v5463_v20 = vadd.f32 1.0, %v9078_v23  ;;  %v5469_v16 = vmul.f32 0.5, %v5461_v54  ;;  %9099 = vtanh.f32 %v5482_v11 }
 0xca5   :  { %v9082_v36 = vpop.eup %9081  ;;  %v5464_v58 = vadd.f32 1.0, %v9080_v34  ;;  %v5470_v13 = vmul.f32 0.5, %v5462_v5  ;;  %9101 = vtanh.f32 %v5483_v1  ;;  %v5548_v26 = vmul.f32 %v5468_v61, %v12324_v46 }
 0xca6   :  { %v9084_v14 = vpop.eup %9083  ;;  %v5465_v10 = vadd.f32 1.0, %v9082_v36  ;;  %v5471_v35 = vmul.f32 0.5, %v5463_v20  ;;  %9103 = vtanh.f32 %v5516_v12  ;;  %v5549_v11 = vmul.f32 %v5469_v16, %v12327_v47 }
 0xca7   :  { %v9086_v42 = vpop.eup %9085  ;;  %v5466_v43 = vadd.f32 1.0, %v9084_v14  ;;  %v5472_v2 = vmul.f32 0.5, %v5464_v58  ;;  %9105 = vtanh.f32 %v5517_v44  ;;  %v5550_v1 = vmul.f32 %v5470_v13, %v12330_v18 }
 0xca8   :  { %v9088_v6 = vpop.eup %9087  ;;  %v5467_v24 = vadd.f32 1.0, %v9086_v42  ;;  %v5473_v15 = vmul.f32 0.5, %v5465_v10  ;;  %9107 = vtanh.f32 %v5518_v49  ;;  %v5551_v53 = vmul.f32 %v5471_v35, %v12334_v27 }
 0xca9   :  { %v9090_v30 = vpop.eup %9089  ;;  %v5474_v32 = vmul.f32 0.5, %v5466_v43  ;;  %9109 = vtanh.f32 %v5519_v50  ;;  %v5556_v62 = vmul.f32 %v9088_v6, %v5412_v3  ;;  %v5552_v46 = vmul.f32 %v5472_v2, %v12339_v37 }
 0xcaa   :  { %v9092_v38 = vpop.eup %9091  ;;  %v5475_v12 = vmul.f32 0.5, %v5467_v24  ;;  %9111 = vtanh.f32 %v5520_v28  ;;  %v5557_v44 = vmul.f32 %v9090_v30, %v5413_v4  ;;  %v5553_v50 = vmul.f32 %v5473_v15, %v12342_v63 }
 0xcab   :  { %v9094_v48 = vpop.eup %9093  ;;  %9113 = vtanh.f32 %v5521_v8  ;;  %v5558_v19 = vmul.f32 %v9092_v38, %v5414_v60  ;;  %v12455_v49 = vadd.f32 %v5556_v62, %v5548_v26  ;;  %v5554_v28 = vmul.f32 %v5474_v32, %v12345_v33 }
 0xcac   :  { %v9096_v47 = vpop.eup %9095  ;;  %9115 = vtanh.f32 %v5522_v55  ;;  %v5559_v7 = vmul.f32 %v9094_v48, %v5415_v31  ;;  %v12458_v18 = vadd.f32 %v5557_v44, %v5549_v11  ;;  %v5555_v37 = vmul.f32 %v5475_v12, %v12348_v40 }
 0xcad   :  { %v9098_v3 = vpop.eup %9097  ;;  %v5560_v57 = vmul.f32 %v9096_v47, %v5416_v29  ;;  %v12461_v27 = vadd.f32 %v5558_v19, %v5550_v1  ;;  %9117 = vtanh.f32 %v12455_v49  ;;  %v5523_v55 = vmul.f32 0.5, %v5507_v22 }
 0xcae   :  { %v9100_v8 = vpop.eup %9099  ;;  %v5561_v17 = vmul.f32 %v9098_v3, %v5417_v21  ;;  %v12465_v4 = vadd.f32 %v5559_v7, %v5551_v53  ;;  %9119 = vtanh.f32 %v12458_v18 }
 0xcaf   :  { %v9102_v63 = vpop.eup %9101  ;;  %v5562_v45 = vmul.f32 %v9100_v8, %v5418_v56  ;;  %v12470_v52 = vadd.f32 %v5560_v57, %v5552_v46  ;;  %9121 = vtanh.f32 %v12461_v27 }
 0xcb0   :  { %v9104_v33 = vpop.eup %9103  ;;  %v5563_v60 = vmul.f32 %v9102_v63, %v5419_v9  ;;  %v12473_v51 = vadd.f32 %v5561_v17, %v5553_v50  ;;  %9123 = vtanh.f32 %v12465_v4 }
 0xcb1   :  { %v9106_v40 = vpop.eup %9105  ;;  %v12476_v0 = vadd.f32 %v5562_v45, %v5554_v28  ;;  %9125 = vtanh.f32 %v12470_v52  ;;  %v5532_v31 = vadd.f32 1.0, %v9104_v33 }
 0xcb2   :  { %v9108_v39 = vpop.eup %9107  ;;  %v12479_v25 = vadd.f32 %v5563_v60, %v5555_v37  ;;  %9127 = vtanh.f32 %v12473_v51  ;;  %v5533_v54 = vadd.f32 1.0, %v9106_v40 }
 0xcb3   :  { %v9110_v22 = vpop.eup %9109  ;;  %9129 = vtanh.f32 %v5523_v55  ;;  %v5534_v29 = vadd.f32 1.0, %v9108_v39  ;;  %v5540_v20 = vmul.f32 0.5, %v5532_v31 }
 0xcb4   :  { %v9112_v23 = vpop.eup %9111  ;;  %9131 = vtanh.f32 %v12476_v0  ;;  %v5535_v61 = vadd.f32 1.0, %v9110_v22  ;;  %v5541_v56 = vmul.f32 0.5, %v5533_v54 }
 0xcb5   :  { %v9114_v5 = vpop.eup %9113  ;;  %9133 = vtanh.f32 %v12479_v25  ;;  %v5536_v21 = vadd.f32 1.0, %v9112_v23  ;;  %v5542_v13 = vmul.f32 0.5, %v5534_v29 }
 0xcb6   :  { %v9116_v34 = vpop.eup %9115  ;;  %v5537_v36 = vadd.f32 1.0, %v9114_v5  ;;  %v5543_v10 = vmul.f32 0.5, %v5535_v61 }
 0xcb7   :  { %v9118_v16 = vpop.eup %9117  ;;  %v5538_v42 = vadd.f32 1.0, %v9116_v34  ;;  %v5544_v2 = vmul.f32 0.5, %v5536_v21 }
 0xcb8   :  { %v9120_v58 = vpop.eup %9119  ;;  %v5580_v14 = vmul.f32 %v9118_v16, %v5540_v20  ;;  %v5545_v11 = vmul.f32 0.5, %v5537_v36 }
 0xcb9   :  { %v9122_v9 = vpop.eup %9121  ;;  %v5581_v35 = vmul.f32 %v9120_v58, %v5541_v56  ;;  %v5546_v12 = vmul.f32 0.5, %v5538_v42  ;;  %v12526_v42 = vld [vmem:[%s13435_s2 + $0x28] ss:$16 sps:$4 sm:$0xff]  }
 0xcba   :  { %v9124_v43 = vpop.eup %9123  ;;  %v5582_v26 = vmul.f32 %v9122_v9, %v5542_v13  ;;  %5588 = vst [vmem:[#allocation5 + $0xa] sm:$0x1] %v5580_v14  ;;  %v5612_v6 = vpack.c.bf16 %v5580_v14, %v5580_v14  ;;  %v12494_v13 = vld [vmem:[%s13435_s2] ss:$16 sps:$4 sm:$0xff]   ;;  %v12500_v14 = vld [vmem:[%s13435_s2 + $0x8] ss:$16 sps:$4 sm:$0xff]  }
 0xcbb   :  { %v9126_v24 = vpop.eup %9125  ;;  %5589 = vst [vmem:[#allocation5 + $0x1a] sm:$0x1] %v5581_v35  ;;  %v5613_v15 = vpack.c.bf16 %v5581_v35, %v5581_v35  ;;  %v5583_v30 = vmul.f32 %v9124_v43, %v5543_v10  ;;  %v12506_v9 = vld [vmem:[%s13435_s2 + $0x24] ss:$16 sps:$4 sm:$0xff]   ;;  %v12512_v10 = vld [vmem:[%s13435_s2 + $0x2c] ss:$16 sps:$4 sm:$0xff]  }
 0xcbc   :  { %v9128_v32 = vpop.eup %9127  ;;  %5590 = vst [vmem:[#allocation5 + $0x2a] sm:$0x1] %v5582_v26  ;;  %v5584_v1 = vmul.f32 %v9126_v24, %v5544_v2  ;;  %v5614_v62 = vpack.c.bf16 %v5582_v26, %v5582_v26  ;;  %v5628_v50 = vunpack.c.l.b16 %v5612_v6  ;;  %v12520_v35 = vld [vmem:[%s13435_s2 + $0x20] ss:$16 sps:$4 sm:$0xff]   ;;  %v12532_v43 = vld [vmem:[%s13435_s2 + $0x44] ss:$16 sps:$4 sm:$0xff]  }
 0xcbd   :  { %v9130_v38 = vpop.eup %9129  ;;  %v5585_v53 = vmul.f32 %v9128_v32, %v5545_v11  ;;  %5591 = vst [vmem:[#allocation5 + $0x3a] sm:$0x1] %v5583_v30  ;;  %v5615_v44 = vpack.c.bf16 %v5583_v30, %v5583_v30  ;;  %v5629_v48 = vunpack.c.l.b16 %v5613_v15  ;;  %v12538_v2 = vld [vmem:[%s13435_s2 + $0x4c] ss:$16 sps:$4 sm:$0xff]   ;;  %v12544_v26 = vld [vmem:[%s13435_s2 + $0x40] ss:$16 sps:$4 sm:$0xff]  }
 0xcbe   :  { %v9132_v46 = vpop.eup %9131  ;;  %v5539_v19 = vadd.f32 1.0, %v9130_v38  ;;  %5592 = vst [vmem:[#allocation5 + $0x4a] sm:$0x1] %v5584_v1  ;;  %v5616_v47 = vpack.c.bf16 %v5584_v1, %v5584_v1  ;;  %v5630_v7 = vunpack.c.l.b16 %v5614_v62  ;;  %v12550_v6 = vld [vmem:[%s13435_s2 + $0x48] ss:$16 sps:$4 sm:$0xff]  }
 0xcbf   :  { %v9134_v3 = vpop.eup %9133  ;;  %v5586_v28 = vmul.f32 %v9132_v46, %v5546_v12  ;;  %5593 = vst [vmem:[#allocation5 + $0x5a] sm:$0x1] %v5585_v53  ;;  %v5617_v57 = vpack.c.bf16 %v5585_v53, %v5585_v53  ;;  %v5631_v8 = vunpack.c.l.b16 %v5615_v44  ;;  %v5636_v37 = vrot.slane %v5629_v48, 7  ;;  %v12556_v24 = vld [vmem:[%s13435_s2 + $0x64] ss:$16 sps:$4 sm:$0xff]  }
 0xcc0   :  { %v5547_v17 = vmul.f32 0.5, %v5539_v19  ;;  %v5632_v63 = vunpack.c.l.b16 %v5616_v47  ;;  %v5638_v55 = vrot.slane %v5630_v7, 6  ;;  %v12562_v15 = vld [vmem:[%s13435_s2 + $0x6c] ss:$16 sps:$4 sm:$0xff]   ;;  %v12568_v11 = vld [vmem:[%s13435_s2 + $0x60] ss:$16 sps:$4 sm:$0xff]  }
 0xcc1   :  { %5594 = vst [vmem:[#allocation5 + $0x6a] sm:$0x1] %v5586_v28  ;;  %v5618_v45 = vpack.c.bf16 %v5586_v28, %v5586_v28  ;;  %v5633_v33 = vunpack.c.l.b16 %v5617_v57  ;;  %v5637_v60 = vsel %vm1290_vm0, %v5636_v37, %v5628_v50  ;;  %v5640_v40 = vrot.slane %v5631_v8, 5  ;;  %v12574_v30 = vld [vmem:[%s13435_s2 + $0x68] ss:$16 sps:$4 sm:$0xff]  }
 0xcc2   :  { %v5587_v39 = vmul.f32 %v9134_v3, %v5547_v17  ;;  %v5639_v31 = vsel %vm1293_vm1, %v5638_v55, %v5637_v60  ;;  %v5642_v22 = vrot.slane %v5632_v63, 4  ;;  %v12580_v32 = vld [vmem:[%s13435_s2 + $0x84] ss:$16 sps:$4 sm:$0xff]   ;;  %v12586_v1 = vld [vmem:[%s13435_s2 + $0x8c] ss:$16 sps:$4 sm:$0xff]  }
 0xcc3   :  { %v5634_v54 = vunpack.c.l.b16 %v5618_v45  ;;  %v5641_v23 = vsel %vm1296_vm2, %v5640_v40, %v5639_v31  ;;  %v5644_v29 = vrot.slane %v5633_v33, 3  ;;  %v12592_v62 = vld [vmem:[%s13435_s2 + $0x80] ss:$16 sps:$4 sm:$0xff]   ;;  %v12598_v38 = vld [vmem:[%s13435_s2 + $0x88] ss:$16 sps:$4 sm:$0xff]  }
 0xcc4   :  { %5595 = vst [vmem:[#allocation5 + $0x7a] sm:$0x1] %v5587_v39  ;;  %v5619_v5 = vpack.c.bf16 %v5587_v39, %v5587_v39  ;;  %v5643_v61 = vsel %vm1299_vm3, %v5642_v22, %v5641_v23  ;;  %13731 = vst [vmem:[#allocation7_spill] sm:$0xff] %v12592_v62  ;;  %v12604_v12 = vld [vmem:[%s13435_s2 + $0xa4] ss:$16 sps:$4 sm:$0xff]  }
 0xcc5   :  { %v5645_v34 = vsel %vm1302_vm4, %v5644_v29, %v5643_v61  ;;  %v5646_v21 = vrot.slane %v5634_v54, 2  ;;  %13732 = vst [vmem:[#allocation8_spill] sm:$0xff] %v12598_v38  ;;  %13733 = vst [vmem:[#allocation9_spill] sm:$0xff] %v12604_v12  ;;  %v12610_v53 = vld [vmem:[%s13435_s2 + $0xac] ss:$16 sps:$4 sm:$0xff]  }
 0xcc6   :  { %v5635_v20 = vunpack.c.l.b16 %v5619_v5  ;;  %13734 = vst [vmem:[#allocation10_spill] sm:$0xff] %v12610_v53  ;;  %v12616_v44 = vld [vmem:[%s13435_s2 + $0xa0] ss:$16 sps:$4 sm:$0xff]   ;;  %v12622_v48 = vld [vmem:[%s13435_s2 + $0xa8] ss:$16 sps:$4 sm:$0xff]  }
 0xcc7   :  { %v5647_v16 = vsel %vm1305_vm5, %v5646_v21, %v5645_v34  ;;  %13735 = vst [vmem:[#allocation11_spill] sm:$0xff] %v12616_v44  ;;  %13736 = vst [vmem:[#allocation12_spill] sm:$0xff] %v12622_v48  ;;  %v12628_v46 = vld [vmem:[%s13435_s2 + $0xc4] ss:$16 sps:$4 sm:$0xff]   ;;  %v12634_v19 = vld [vmem:[%s13435_s2 + $0xcc] ss:$16 sps:$4 sm:$0xff]  }
 0xcc8   :  { %v5648_v36 = vrot.slane %v5635_v20, 1  ;;  %13737 = vst [vmem:[#allocation13_spill] sm:$0xff] %v12628_v46  ;;  %13738 = vst [vmem:[#allocation14_spill] sm:$0xff] %v12634_v19  ;;  %v12640_v47 = vld [vmem:[%s13435_s2 + $0xc0] ss:$16 sps:$4 sm:$0xff]  }
 0xcc9   :  { %13739 = vst [vmem:[#allocation15_spill] sm:$0xff] %v12640_v47  ;;  %v12646_v50 = vld [vmem:[%s13435_s2 + $0xc8] ss:$16 sps:$4 sm:$0xff]   ;;  %v12652_v7 = vld [vmem:[%s13435_s2 + $0xe4] ss:$16 sps:$4 sm:$0xff]  }
 0xcca   :  { %v5649_v56 = vsel %vm1308_vm6, %v5648_v36, %v5647_v16  ;;  %13740 = vst [vmem:[#allocation16_spill] sm:$0xff] %v12646_v50  ;;  %13741 = vst [vmem:[#allocation17_spill] sm:$0xff] %v12652_v7  ;;  %v12658_v3 = vld [vmem:[%s13435_s2 + $0xec] ss:$16 sps:$4 sm:$0xff]   ;;  %v12664_v28 = vld [vmem:[%s13435_s2 + $0xe0] ss:$16 sps:$4 sm:$0xff]  }
 0xccb   :  { %v5650_v58 = vpack.c.b16 %v5649_v56, %v5649_v56  ;;  %13742 = vst [vmem:[#allocation18_spill] sm:$0xff] %v12658_v3  ;;  %13743 = vst [vmem:[#allocation19_spill] sm:$0xff] %v12664_v28  ;;  %v12670_v57 = vld [vmem:[%s13435_s2 + $0xe8] ss:$16 sps:$4 sm:$0xff]   ;;  %v12676_v8 = vld [vmem:[%s13435_s2 + $0x4] ss:$16 sps:$4 sm:$0xff]  }
 0xccc   :  { %13744 = vst [vmem:[#allocation20_spill] sm:$0xff] %v12670_v57  ;;  %13745 = vst [vmem:[#allocation21_spill] sm:$0xff] %v12676_v8  ;;  %v12682_v37 = vld [vmem:[%s13435_s2 + $0xc] ss:$16 sps:$4 sm:$0xff]  }
 0xccd   :  { %5685 = vmatmul.mubr.bf16.vlgmr.msra.gmra.mrb[76].mxu0 %v5650_v58  ;;  %5726 = vmatmul.mubr.bf16.vlgmr.msra.gmra.mrb[76].mxu1 %v5650_v58  ;;  %13746 = vst [vmem:[#allocation22_spill] sm:$0xff] %v12682_v37 }
 0xcce   :  { %6087 = vmatpush1.bf16.msra.mxu0 %v12494_v13  ;;  %6128 = vmatpush1.bf16.msra.mxu1 %v12500_v14 }
 0xccf   :  { %6088 = vmatprep.subr.bf16.mxu0 %v12506_v9  ;;  %6129 = vmatprep.subr.bf16.mxu1 %v12512_v10 }
 0xcd0   :  { %6118 = vmatprep.mubr.bf16.mxu0 %v13578_v41  ;;  %6159 = vmatprep.mubr.bf16.mxu1 %v13578_v41 }
 0xcd2   :  { %6089 = vmatpush1.bf16.msra.mxu0 %v12520_v35  ;;  %6130 = vmatpush1.bf16.msra.mxu1 %v12526_v42 }
 0xcd3   :  { %6090 = vmatprep.subr.bf16.mxu0 %v12532_v43  ;;  %6131 = vmatprep.subr.bf16.mxu1 %v12538_v2 }
 0xcd6   :  { %6091 = vmatpush1.bf16.msra.mxu0 %v12544_v26  ;;  %6132 = vmatpush1.bf16.msra.mxu1 %v12550_v6 }
 0xcd7   :  { %6092 = vmatprep.subr.bf16.mxu0 %v12556_v24  ;;  %6133 = vmatprep.subr.bf16.mxu1 %v12562_v15 }
 0xcda   :  { %6093 = vmatpush1.bf16.msra.mxu0 %v12568_v11  ;;  %6134 = vmatpush1.bf16.msra.mxu1 %v12574_v30 }
 0xcdb   :  { %6094 = vmatprep.subr.bf16.mxu0 %v12580_v32  ;;  %6135 = vmatprep.subr.bf16.mxu1 %v12586_v1 }
 0xcde   :  { %6095 = vmatpush1.bf16.msra.mxu0 %v12592_v62  ;;  %6136 = vmatpush1.bf16.msra.mxu1 %v12598_v38 }
 0xcdf   :  { %6096 = vmatprep.subr.bf16.mxu0 %v12604_v12  ;;  %6137 = vmatprep.subr.bf16.mxu1 %v12610_v53 }
 0xce2   :  { %6097 = vmatpush1.bf16.msra.mxu0 %v12616_v44  ;;  %6138 = vmatpush1.bf16.msra.mxu1 %v12622_v48 }
 0xce3   :  { %6098 = vmatprep.subr.bf16.mxu0 %v12628_v46  ;;  %6139 = vmatprep.subr.bf16.mxu1 %v12634_v19 }
 0xce6   :  { %6099 = vmatpush1.bf16.msra.mxu0 %v12640_v47  ;;  %6140 = vmatpush1.bf16.msra.mxu1 %v12646_v50 }
 0xce7   :  { %6100 = vmatprep.subr.bf16.mxu0 %v12652_v7  ;;  %6141 = vmatprep.subr.bf16.mxu1 %v12658_v3 }
 0xcea   :  { %6101 = vmatpush1.bf16.msra.mxu0 %v12664_v28  ;;  %6142 = vmatpush1.bf16.msra.mxu1 %v12670_v57 }
 0xceb   :  { %6520 = vmatprep.subr.bf16.mxu0 %v12676_v8  ;;  %6561 = vmatprep.subr.bf16.mxu1 %v12682_v37 }
 0xda0   :  { %v5686_v17 = vpop.f32.mrb[76].mxu0  ;;  %v5727_v63 = vpop.f32.mrb[76].mxu1 }
 0xda1   :  { %v5688_v55 = vpop.f32.mrb[77].mxu0  ;;  %v5729_v45 = vpop.f32.mrb[77].mxu1 }
 0xda2   :  { %v5738_v33 = vcombine.low %v5686_v17, %v5688_v55  ;;  %v5739_v60 = vcombine.high %v5686_v17, %v5688_v55  ;;  %v5740_v40 = vcombine.low %v5727_v63, %v5729_v45  ;;  %v5741_v39 = vcombine.high %v5727_v63, %v5729_v45  ;;  %v5690_v31 = vpop.f32.mrb[78].mxu0  ;;  %v5731_v22 = vpop.f32.mrb[78].mxu1  ;;  %v5597_v55 = vld [vmem:[#allocation4 + $0x23] ss:$8 sm:$0xf] }
 0xda3   :  { %v5691_v54 = vpop.f32.mrb[79].mxu0  ;;  %v5732_v23 = vpop.f32.mrb[79].mxu1  ;;  %v5599_v45 = vld [vmem:[#allocation4 + $0x63] ss:$8 sm:$0xf] }
 0xda4   :  { %v5748_v29 = vrot.slane %v5738_v33, %v13730_v59  ;;  %v5755_v5 = vrot.slane %v5739_v60, %v13730_v59  ;;  %v5762_v61 = vrot.slane %v5740_v40, %v13730_v59  ;;  %v5769_v34 = vrot.slane %v5741_v39, %v13730_v59  ;;  %v5601_v33 = vld [vmem:[#allocation4 + $0xa3] ss:$8 sm:$0xf] }
 0xda5   :  { %v5605_v60 = vld [vmem:[#allocation4 + $0x123] ss:$8 sm:$0xf] }
 0xda6   :  { %v5770_v21 = vcombine.low %v5748_v29, %v5762_v61  ;;  %v5771_v20 = vcombine.high %v5748_v29, %v5762_v61  ;;  %v5772_v16 = vcombine.low %v5755_v5, %v5769_v34  ;;  %v5773_v36 = vcombine.high %v5755_v5, %v5769_v34  ;;  %v5603_v54 = vld [vmem:[#allocation4 + $0xe3] ss:$8 sm:$0xf] }
 0xda7   :  { %v5607_v23 = vld [vmem:[#allocation4 + $0x163] ss:$8 sm:$0xf] }
 0xda8   :  { %v5780_v56 = vrot.slane %v5770_v21, %v13730_v59  ;;  %v5787_v58 = vrot.slane %v5772_v16, %v13730_v59  ;;  %v5794_v17 = vrot.slane %v5771_v20, %v13730_v59  ;;  %v5801_v63 = vrot.slane %v5773_v36, %v13730_v59  ;;  %v5609_v34 = vld [vmem:[#allocation4 + $0x1a3] ss:$8 sm:$0xf] }
 0xda9   :  { %v5611_v21 = vld [vmem:[#allocation4 + $0x1e3] ss:$8 sm:$0xf] }
 0xdaa   :  { %v5802_v31 = vcombine.high %v5780_v56, %v5780_v56  ;;  %v5803_v40 = vcombine.high %v5787_v58, %v5787_v58  ;;  %v5804_v22 = vcombine.high %v5794_v17, %v5794_v17  ;;  %v5805_v39 = vcombine.high %v5801_v63, %v5801_v63 }
 0xdab   :  { %v12693_v29 = vadd.f32 %v5780_v56, %v5597_v55  ;;  %v12695_v5 = vadd.f32 %v5794_v17, %v5599_v45  ;;  %v12697_v61 = vadd.f32 %v5787_v58, %v5605_v60  ;;  %v12703_v36 = vadd.f32 %v5801_v63, %v5607_v23 }
 0xdac   :  { %v12699_v20 = vadd.f32 %v5802_v31, %v5601_v33  ;;  %v12701_v16 = vadd.f32 %v5804_v22, %v5603_v54  ;;  %v12705_v59 = vadd.f32 %v5803_v40, %v5609_v34  ;;  %v12707_v37 = vadd.f32 %v5805_v39, %v5611_v21 }
 0xdad   :  { %v5822_v8 = vmul.f32 0.5, %v12693_v29  ;;  %v5823_v56 = vmul.f32 0.5, %v12695_v5  ;;  %v5826_v55 = vmul.f32 0.5, %v12697_v61  ;;  %v5862_v45 = vrot.slane %v12693_v29, 1 }
 0xdae   :  { %v5824_v17 = vmul.f32 0.5, %v12699_v20  ;;  %v5825_v58 = vmul.f32 0.5, %v12701_v16  ;;  %v5827_v63 = vmul.f32 0.5, %v12703_v36  ;;  %v5863_v33 = vrot.slane %v12695_v5, 1 }
 0xdaf   :  { %9135 = vtanh.f32 %v5822_v8  ;;  %v5828_v60 = vmul.f32 0.5, %v12705_v59  ;;  %v5829_v31 = vmul.f32 0.5, %v12707_v37  ;;  %v5864_v40 = vrot.slane %v12699_v20, 1 }
 0xdb0   :  { %9137 = vtanh.f32 %v5823_v56  ;;  %v5865_v22 = vrot.slane %v12701_v16, 1  ;;  %v5866_v39 = vrot.slane %v12697_v61, 1  ;;  %v5867_v8 = vrot.slane %v12703_v36, 1 }
 0xdb1   :  { %9139 = vtanh.f32 %v5824_v17  ;;  %v5868_v54 = vrot.slane %v12705_v59, 1  ;;  %v5869_v23 = vrot.slane %v12707_v37, 1  ;;  %v5878_v34 = vmul.f32 0.5, %v5862_v45 }
 0xdb2   :  { %9141 = vtanh.f32 %v5825_v58  ;;  %v5879_v21 = vmul.f32 0.5, %v5863_v33  ;;  %v5880_v56 = vmul.f32 0.5, %v5864_v40  ;;  %v5881_v17 = vmul.f32 0.5, %v5865_v22 }
 0xdb3   :  { %9143 = vtanh.f32 %v5826_v55  ;;  %v5882_v57 = vmul.f32 0.5, %v5866_v39  ;;  %v5883_v58 = vmul.f32 0.5, %v5867_v8  ;;  %v5884_v28 = vmul.f32 0.5, %v5868_v54 }
 0xdb4   :  { %9145 = vtanh.f32 %v5827_v63  ;;  %v5885_v3 = vmul.f32 0.5, %v5869_v23  ;;  %v5910_v7 = vrot.slane %v12693_v29, 2  ;;  %v5911_v55 = vrot.slane %v12695_v5, 2 }
 0xdb5   :  { %9147 = vtanh.f32 %v5828_v60  ;;  %v5912_v50 = vrot.slane %v12699_v20, 2  ;;  %v5913_v45 = vrot.slane %v12701_v16, 2  ;;  %v5914_v33 = vrot.slane %v12697_v61, 2 }
 0xdb6   :  { %9149 = vtanh.f32 %v5829_v31  ;;  %v5915_v60 = vrot.slane %v12703_v36, 2  ;;  %v5934_v31 = vrot.slane %v12693_v29, 3  ;;  %v5916_v22 = vrot.slane %v12705_v59, 2 }
 0xdb7   :  { %9151 = vtanh.f32 %v5878_v34  ;;  %v5935_v39 = vrot.slane %v12695_v5, 3  ;;  %v5936_v8 = vrot.slane %v12699_v20, 3  ;;  %v5917_v23 = vrot.slane %v12707_v37, 2 }
 0xdb8   :  { %9153 = vtanh.f32 %v5879_v21  ;;  %v5937_v34 = vrot.slane %v12701_v16, 3  ;;  %v5938_v21 = vrot.slane %v12697_v61, 3  ;;  %v5939_v29 = vrot.slane %v12703_v36, 3 }
 0xdb9   :  { %v9136_v63 = vpop.eup %9135  ;;  %9155 = vtanh.f32 %v5880_v56  ;;  %v5950_v20 = vmul.f32 0.5, %v5934_v31  ;;  %v5951_v44 = vmul.f32 0.5, %v5935_v39  ;;  %v5952_v16 = vmul.f32 0.5, %v5936_v8 }
 0xdba   :  { %v9138_v40 = vpop.eup %9137  ;;  %9157 = vtanh.f32 %v5881_v17  ;;  %v5838_v47 = vadd.f32 1.0, %v9136_v63  ;;  %v5940_v17 = vrot.slane %v12705_v59, 3  ;;  %v5953_v63 = vmul.f32 0.5, %v5937_v34 }
 0xdbb   :  { %v9140_v54 = vpop.eup %9139  ;;  %9159 = vtanh.f32 %v5882_v57  ;;  %v5839_v46 = vadd.f32 1.0, %v9138_v40  ;;  %v5955_v59 = vmul.f32 0.5, %v5939_v29 }
 0xdbc   :  { %v9142_v56 = vpop.eup %9141  ;;  %9161 = vtanh.f32 %v5883_v58  ;;  %v5840_v48 = vadd.f32 1.0, %v9140_v54  ;;  %v5954_v58 = vmul.f32 0.5, %v5938_v21  ;;  %v5846_v38 = vmul.f32 0.5, %v5838_v47 }
 0xdbd   :  { %v9144_v19 = vpop.eup %9143  ;;  %9163 = vtanh.f32 %v5884_v28  ;;  %v5841_v61 = vadd.f32 1.0, %v9142_v56  ;;  %v5847_v62 = vmul.f32 0.5, %v5839_v46  ;;  %v5956_v31 = vmul.f32 0.5, %v5940_v17 }
 0xdbe   :  { %v9146_v57 = vpop.eup %9145  ;;  %9165 = vtanh.f32 %v5885_v3  ;;  %v5842_v36 = vadd.f32 1.0, %v9144_v19  ;;  %v5848_v3 = vmul.f32 0.5, %v5840_v48 }
 0xdbf   :  { %v9148_v53 = vpop.eup %9147  ;;  %9167 = vtanh.f32 %v5910_v7  ;;  %v5843_v28 = vadd.f32 1.0, %v9146_v57  ;;  %v5849_v7 = vmul.f32 0.5, %v5841_v61 }
 0xdc0   :  { %v9150_v12 = vpop.eup %9149  ;;  %9169 = vtanh.f32 %v5911_v55  ;;  %v5844_v54 = vadd.f32 1.0, %v9148_v53  ;;  %v5850_v19 = vmul.f32 0.5, %v5842_v36 }
 0xdc1   :  { %v9152_v40 = vpop.eup %9151  ;;  %9171 = vtanh.f32 %v5912_v50  ;;  %v5845_v56 = vadd.f32 1.0, %v9150_v12  ;;  %v5851_v57 = vmul.f32 0.5, %v5843_v28 }
 0xdc2   :  { %v9154_v5 = vpop.eup %9153  ;;  %v5894_v39 = vadd.f32 1.0, %v9152_v40  ;;  %9173 = vtanh.f32 %v5913_v45  ;;  %v5852_v53 = vmul.f32 0.5, %v5844_v54 }
 0xdc3   :  { %v9156_v8 = vpop.eup %9155  ;;  %v5895_v34 = vadd.f32 1.0, %v9154_v5  ;;  %9175 = vtanh.f32 %v5914_v33  ;;  %v5853_v12 = vmul.f32 0.5, %v5845_v56 }
 0xdc4   :  { %v9158_v21 = vpop.eup %9157  ;;  %v5896_v47 = vadd.f32 1.0, %v9156_v8  ;;  %v5902_v55 = vmul.f32 0.5, %v5894_v39  ;;  %9177 = vtanh.f32 %v5915_v60 }
 0xdc5   :  { %v9160_v29 = vpop.eup %9159  ;;  %v5897_v46 = vadd.f32 1.0, %v9158_v21  ;;  %v5903_v50 = vmul.f32 0.5, %v5895_v34  ;;  %9179 = vtanh.f32 %v5916_v22 }
 0xdc6   :  { %v9162_v17 = vpop.eup %9161  ;;  %v5898_v48 = vadd.f32 1.0, %v9160_v29  ;;  %v5904_v40 = vmul.f32 0.5, %v5896_v47  ;;  %9181 = vtanh.f32 %v5917_v23  ;;  %v5982_v60 = vmul.f32 %v5902_v55, %v12455_v49 }
 0xdc7   :  { %v9164_v45 = vpop.eup %9163  ;;  %v5899_v61 = vadd.f32 1.0, %v9162_v17  ;;  %v5905_v5 = vmul.f32 0.5, %v5897_v46  ;;  %9183 = vtanh.f32 %v5950_v20  ;;  %v5983_v22 = vmul.f32 %v5903_v50, %v12458_v18 }
 0xdc8   :  { %v9166_v33 = vpop.eup %9165  ;;  %v5900_v36 = vadd.f32 1.0, %v9164_v45  ;;  %v5906_v8 = vmul.f32 0.5, %v5898_v48  ;;  %9185 = vtanh.f32 %v5951_v44  ;;  %v5984_v23 = vmul.f32 %v5904_v40, %v12461_v27 }
 0xdc9   :  { %v9168_v28 = vpop.eup %9167  ;;  %v5901_v39 = vadd.f32 1.0, %v9166_v33  ;;  %v5907_v34 = vmul.f32 0.5, %v5899_v61  ;;  %9187 = vtanh.f32 %v5952_v16  ;;  %v5985_v29 = vmul.f32 %v5905_v5, %v12465_v4 }
 0xdca   :  { %v9170_v54 = vpop.eup %9169  ;;  %v5908_v21 = vmul.f32 0.5, %v5900_v36  ;;  %9189 = vtanh.f32 %v5953_v63  ;;  %v5990_v56 = vmul.f32 %v9168_v28, %v5846_v38  ;;  %v5986_v49 = vmul.f32 %v5906_v8, %v12470_v52 }
 0xdcb   :  { %v9172_v47 = vpop.eup %9171  ;;  %v5909_v20 = vmul.f32 0.5, %v5901_v39  ;;  %9191 = vtanh.f32 %v5954_v58  ;;  %v5991_v44 = vmul.f32 %v9170_v54, %v5847_v62  ;;  %v5987_v63 = vmul.f32 %v5907_v34, %v12473_v51 }
 0xdcc   :  { %v9174_v46 = vpop.eup %9173  ;;  %9193 = vtanh.f32 %v5955_v59  ;;  %v5992_v55 = vmul.f32 %v9172_v47, %v5848_v3  ;;  %v12746_v16 = vadd.f32 %v5990_v56, %v5982_v60  ;;  %v5988_v58 = vmul.f32 %v5908_v21, %v12476_v0 }
 0xdcd   :  { %v9176_v18 = vpop.eup %9175  ;;  %9195 = vtanh.f32 %v5956_v31  ;;  %v5993_v50 = vmul.f32 %v9174_v46, %v5849_v7  ;;  %v12749_v27 = vadd.f32 %v5991_v44, %v5983_v22  ;;  %v5989_v52 = vmul.f32 %v5909_v20, %v12479_v25 }
 0xdce   :  { %v9178_v38 = vpop.eup %9177  ;;  %v5994_v17 = vmul.f32 %v9176_v18, %v5850_v19  ;;  %v12752_v4 = vadd.f32 %v5992_v55, %v5984_v23  ;;  %9197 = vtanh.f32 %v12746_v16  ;;  %v13747_v31 = vrot.slane %v12707_v37, 3 }
 0xdcf   :  { %v9180_v62 = vpop.eup %9179  ;;  %v5995_v59 = vmul.f32 %v9178_v38, %v5851_v57  ;;  %v12756_v3 = vadd.f32 %v5993_v50, %v5985_v29  ;;  %9199 = vtanh.f32 %v12749_v27 }
 0xdd0   :  { %v9182_v51 = vpop.eup %9181  ;;  %v5957_v7 = vmul.f32 0.5, %v13747_v31  ;;  %v5996_v48 = vmul.f32 %v9180_v62, %v5852_v53  ;;  %v12761_v40 = vadd.f32 %v5994_v17, %v5986_v49  ;;  %9201 = vtanh.f32 %v12752_v4 }
 0xdd1   :  { %v9184_v0 = vpop.eup %9183  ;;  %v5997_v19 = vmul.f32 %v9182_v51, %v5853_v12  ;;  %v12764_v45 = vadd.f32 %v5995_v59, %v5987_v63  ;;  %9203 = vtanh.f32 %v12756_v3 }
 0xdd2   :  { %v9186_v25 = vpop.eup %9185  ;;  %v12767_v57 = vadd.f32 %v5996_v48, %v5988_v58  ;;  %9205 = vtanh.f32 %v12761_v40  ;;  %v5966_v5 = vadd.f32 1.0, %v9184_v0 }
 0xdd3   :  { %v9188_v61 = vpop.eup %9187  ;;  %v12770_v37 = vadd.f32 %v5997_v19, %v5989_v52  ;;  %9207 = vtanh.f32 %v12764_v45  ;;  %v5967_v33 = vadd.f32 1.0, %v9186_v25 }
 0xdd4   :  { %v9190_v53 = vpop.eup %9189  ;;  %9209 = vtanh.f32 %v5957_v7  ;;  %v5968_v12 = vadd.f32 1.0, %v9188_v61  ;;  %v5974_v34 = vmul.f32 0.5, %v5966_v5 }
 0xdd5   :  { %v9192_v36 = vpop.eup %9191  ;;  %9211 = vtanh.f32 %v12767_v57  ;;  %v5969_v60 = vadd.f32 1.0, %v9190_v53  ;;  %v5975_v21 = vmul.f32 0.5, %v5967_v33 }
 0xdd6   :  { %v9194_v8 = vpop.eup %9193  ;;  %9213 = vtanh.f32 %v12770_v37  ;;  %v5970_v39 = vadd.f32 1.0, %v9192_v36  ;;  %v5976_v56 = vmul.f32 0.5, %v5968_v12 }
 0xdd7   :  { %v9196_v28 = vpop.eup %9195  ;;  %v5971_v54 = vadd.f32 1.0, %v9194_v8  ;;  %v5977_v29 = vmul.f32 0.5, %v5969_v60 }
 0xdd8   :  { %v9198_v22 = vpop.eup %9197  ;;  %v5972_v46 = vadd.f32 1.0, %v9196_v28  ;;  %v5978_v55 = vmul.f32 0.5, %v5970_v39 }
 0xdd9   :  { %v9200_v23 = vpop.eup %9199  ;;  %v6014_v47 = vmul.f32 %v9198_v22, %v5974_v34  ;;  %v5979_v58 = vmul.f32 0.5, %v5971_v54 }
 0xdda   :  { %v9202_v20 = vpop.eup %9201  ;;  %v6015_v44 = vmul.f32 %v9200_v23, %v5975_v21  ;;  %v5980_v31 = vmul.f32 0.5, %v5972_v46 }
 0xddb   :  { %v9204_v49 = vpop.eup %9203  ;;  %v6016_v18 = vmul.f32 %v9202_v20, %v5976_v56  ;;  %6022 = vst [vmem:[#allocation5 + $0xb] sm:$0x1] %v6014_v47  ;;  %v6046_v63 = vpack.c.bf16 %v6014_v47, %v6014_v47 }
 0xddc   :  { %v9206_v50 = vpop.eup %9205  ;;  %6023 = vst [vmem:[#allocation5 + $0x1b] sm:$0x1] %v6015_v44  ;;  %v6047_v38 = vpack.c.bf16 %v6015_v44, %v6015_v44  ;;  %v6017_v17 = vmul.f32 %v9204_v49, %v5977_v29 }
 0xddd   :  { %v9208_v62 = vpop.eup %9207  ;;  %6024 = vst [vmem:[#allocation5 + $0x2b] sm:$0x1] %v6016_v18  ;;  %v6018_v52 = vmul.f32 %v9206_v50, %v5978_v55  ;;  %v6048_v59 = vpack.c.bf16 %v6016_v18, %v6016_v18  ;;  %v6062_v5 = vunpack.c.l.b16 %v6046_v63 }
 0xdde   :  { %v9210_v51 = vpop.eup %9209  ;;  %v6019_v7 = vmul.f32 %v9208_v62, %v5979_v58  ;;  %6025 = vst [vmem:[#allocation5 + $0x3b] sm:$0x1] %v6017_v17  ;;  %v6049_v48 = vpack.c.bf16 %v6017_v17, %v6017_v17  ;;  %v6063_v0 = vunpack.c.l.b16 %v6047_v38 }
 0xddf   :  { %v9212_v19 = vpop.eup %9211  ;;  %v5973_v25 = vadd.f32 1.0, %v9210_v51  ;;  %6026 = vst [vmem:[#allocation5 + $0x4b] sm:$0x1] %v6018_v52  ;;  %v6050_v61 = vpack.c.bf16 %v6018_v52, %v6018_v52  ;;  %v6064_v53 = vunpack.c.l.b16 %v6048_v59 }
 0xde0   :  { %v9214_v33 = vpop.eup %9213  ;;  %v6020_v36 = vmul.f32 %v9212_v19, %v5980_v31  ;;  %6027 = vst [vmem:[#allocation5 + $0x5b] sm:$0x1] %v6019_v7  ;;  %v6051_v12 = vpack.c.bf16 %v6019_v7, %v6019_v7  ;;  %v6065_v8 = vunpack.c.l.b16 %v6049_v48  ;;  %v6070_v60 = vrot.slane %v6063_v0, 7 }
 0xde1   :  { %v5981_v28 = vmul.f32 0.5, %v5973_v25  ;;  %v6066_v39 = vunpack.c.l.b16 %v6050_v61  ;;  %v6072_v34 = vrot.slane %v6064_v53, 6 }
 0xde2   :  { %6028 = vst [vmem:[#allocation5 + $0x6b] sm:$0x1] %v6020_v36  ;;  %v6052_v22 = vpack.c.bf16 %v6020_v36, %v6020_v36  ;;  %v6067_v54 = vunpack.c.l.b16 %v6051_v12  ;;  %v6071_v21 = vsel %vm1290_vm0, %v6070_v60, %v6062_v5  ;;  %v6074_v23 = vrot.slane %v6065_v8, 5 }
 0xde3   :  { %v6021_v56 = vmul.f32 %v9214_v33, %v5981_v28  ;;  %v6073_v47 = vsel %vm1293_vm1, %v6072_v34, %v6071_v21  ;;  %v6076_v20 = vrot.slane %v6066_v39, 4  ;;  %v13764_v33 = vld [vmem:[#allocation6_spill] sm:$0xff] }
 0xde4   :  { %v6068_v29 = vunpack.c.l.b16 %v6052_v22  ;;  %v6075_v44 = vsel %vm1296_vm2, %v6074_v23, %v6073_v47  ;;  %v6078_v46 = vrot.slane %v6067_v54, 3  ;;  %v6031_v47 = vld [vmem:[#allocation4 + $0x24] ss:$8 sm:$0xf] }
 0xde5   :  { %6029 = vst [vmem:[#allocation5 + $0x7b] sm:$0x1] %v6021_v56  ;;  %v6053_v49 = vpack.c.bf16 %v6021_v56, %v6021_v56  ;;  %v6077_v55 = vsel %vm1299_vm3, %v6076_v20, %v6075_v44  ;;  %v6033_v20 = vld [vmem:[#allocation4 + $0x64] ss:$8 sm:$0xf] }
 0xde6   :  { %v6079_v18 = vsel %vm1302_vm4, %v6078_v46, %v6077_v55  ;;  %v6080_v63 = vrot.slane %v6068_v29, 2  ;;  %v6035_v29 = vld [vmem:[#allocation4 + $0xa4] ss:$8 sm:$0xf] }
 0xde7   :  { %v6069_v50 = vunpack.c.l.b16 %v6053_v49  ;;  %v6039_v44 = vld [vmem:[#allocation4 + $0x124] ss:$8 sm:$0xf] }
 0xde8   :  { %v6081_v38 = vsel %vm1305_vm5, %v6080_v63, %v6079_v18  ;;  %v6037_v63 = vld [vmem:[#allocation4 + $0xe4] ss:$8 sm:$0xf] }
 0xde9   :  { %v6082_v58 = vrot.slane %v6069_v50, 1  ;;  %v6041_v50 = vld [vmem:[#allocation4 + $0x164] ss:$8 sm:$0xf] }
 0xdeb   :  { %v6083_v17 = vsel %vm1308_vm6, %v6082_v58, %v6081_v38 }
 0xdec   :  { %v6084_v62 = vpack.c.b16 %v6083_v17, %v6083_v17 }
 0xdee   :  { %6119 = vmatmul.mubr.bf16.vlgmr.msra.gmra.mrb[80].mxu0 %v6084_v62  ;;  %6160 = vmatmul.mubr.bf16.vlgmr.msra.gmra.mrb[80].mxu1 %v6084_v62  ;;  %v6043_v62 = vld [vmem:[#allocation4 + $0x1a4] ss:$8 sm:$0xf] }
 0xdef   :  { %6521 = vmatpush1.bf16.msra.mxu0 %v12494_v13  ;;  %6562 = vmatpush1.bf16.msra.mxu1 %v12500_v14  ;;  %v13748_v13 = vld [vmem:[#allocation7_spill] sm:$0xff]  ;;  %v13749_v14 = vld [vmem:[#allocation8_spill] sm:$0xff] }
 0xdf0   :  { %6522 = vmatprep.subr.bf16.mxu0 %v12506_v9  ;;  %6563 = vmatprep.subr.bf16.mxu1 %v12512_v10  ;;  %v13750_v9 = vld [vmem:[#allocation9_spill] sm:$0xff]  ;;  %v13751_v10 = vld [vmem:[#allocation10_spill] sm:$0xff] }
 0xdf1   :  { %6552 = vmatprep.mubr.bf16.mxu0 %v13578_v41  ;;  %6593 = vmatprep.mubr.bf16.mxu1 %v13578_v41 }
 0xdf3   :  { %6523 = vmatpush1.bf16.msra.mxu0 %v12520_v35  ;;  %6564 = vmatpush1.bf16.msra.mxu1 %v12526_v42  ;;  %v13752_v35 = vld [vmem:[#allocation11_spill] sm:$0xff]  ;;  %v13753_v42 = vld [vmem:[#allocation12_spill] sm:$0xff] }
 0xdf4   :  { %6524 = vmatprep.subr.bf16.mxu0 %v12532_v43  ;;  %6565 = vmatprep.subr.bf16.mxu1 %v12538_v2  ;;  %v13754_v43 = vld [vmem:[#allocation13_spill] sm:$0xff]  ;;  %v13755_v2 = vld [vmem:[#allocation14_spill] sm:$0xff] }
 0xdf7   :  { %6525 = vmatpush1.bf16.msra.mxu0 %v12544_v26  ;;  %6566 = vmatpush1.bf16.msra.mxu1 %v12550_v6  ;;  %v13756_v26 = vld [vmem:[#allocation15_spill] sm:$0xff]  ;;  %v13757_v6 = vld [vmem:[#allocation16_spill] sm:$0xff] }
 0xdf8   :  { %6526 = vmatprep.subr.bf16.mxu0 %v12556_v24  ;;  %6567 = vmatprep.subr.bf16.mxu1 %v12562_v15  ;;  %v13758_v24 = vld [vmem:[#allocation17_spill] sm:$0xff]  ;;  %v13759_v15 = vld [vmem:[#allocation18_spill] sm:$0xff] }
 0xdfb   :  { %6527 = vmatpush1.bf16.msra.mxu0 %v12568_v11  ;;  %6568 = vmatpush1.bf16.msra.mxu1 %v12574_v30  ;;  %v13760_v11 = vld [vmem:[#allocation19_spill] sm:$0xff]  ;;  %v13761_v30 = vld [vmem:[#allocation20_spill] sm:$0xff] }
 0xdfc   :  { %6528 = vmatprep.subr.bf16.mxu0 %v12580_v32  ;;  %6569 = vmatprep.subr.bf16.mxu1 %v12586_v1  ;;  %v13762_v32 = vld [vmem:[#allocation21_spill] sm:$0xff]  ;;  %v13763_v1 = vld [vmem:[#allocation22_spill] sm:$0xff] }
 0xdff   :  { %6529 = vmatpush1.bf16.msra.mxu0 %v13748_v13  ;;  %6570 = vmatpush1.bf16.msra.mxu1 %v13749_v14  ;;  %v6045_v13 = vld [vmem:[#allocation4 + $0x1e4] ss:$8 sm:$0xf] }
 0xe00   :  { %6530 = vmatprep.subr.bf16.mxu0 %v13750_v9  ;;  %6571 = vmatprep.subr.bf16.mxu1 %v13751_v10 }
 0xe03   :  { %6531 = vmatpush1.bf16.msra.mxu0 %v13752_v35  ;;  %6572 = vmatpush1.bf16.msra.mxu1 %v13753_v42 }
 0xe04   :  { %6532 = vmatprep.subr.bf16.mxu0 %v13754_v43  ;;  %6573 = vmatprep.subr.bf16.mxu1 %v13755_v2 }
 0xe07   :  { %6533 = vmatpush1.bf16.msra.mxu0 %v13756_v26  ;;  %6574 = vmatpush1.bf16.msra.mxu1 %v13757_v6 }
 0xe08   :  { %6534 = vmatprep.subr.bf16.mxu0 %v13758_v24  ;;  %6575 = vmatprep.subr.bf16.mxu1 %v13759_v15 }
 0xe0b   :  { %6535 = vmatpush1.bf16.msra.mxu0 %v13760_v11  ;;  %6576 = vmatpush1.bf16.msra.mxu1 %v13761_v30 }
 0xe0c   :  { %6954 = vmatprep.subr.bf16.mxu0 %v13762_v32  ;;  %6995 = vmatprep.subr.bf16.mxu1 %v13763_v1 }
 0xec1   :  { %v6120_v52 = vpop.f32.mrb[80].mxu0  ;;  %v6161_v59 = vpop.f32.mrb[80].mxu1 }
 0xec2   :  { %v6122_v51 = vpop.f32.mrb[81].mxu0  ;;  %v6163_v31 = vpop.f32.mrb[81].mxu1 }
 0xec3   :  { %v6172_v7 = vcombine.low %v6120_v52, %v6122_v51  ;;  %v6173_v48 = vcombine.high %v6120_v52, %v6122_v51  ;;  %v6174_v0 = vcombine.low %v6161_v59, %v6163_v31  ;;  %v6175_v19 = vcombine.high %v6161_v59, %v6163_v31  ;;  %v6124_v25 = vpop.f32.mrb[82].mxu0  ;;  %v6165_v61 = vpop.f32.mrb[82].mxu1 }
 0xec4   :  { %v6125_v5 = vpop.f32.mrb[83].mxu0  ;;  %v6166_v53 = vpop.f32.mrb[83].mxu1 }
 0xec5   :  { %v6182_v36 = vrot.slane %v6172_v7, %v13764_v33  ;;  %v6189_v12 = vrot.slane %v6173_v48, %v13764_v33  ;;  %v6196_v8 = vrot.slane %v6174_v0, %v13764_v33  ;;  %v6203_v60 = vrot.slane %v6175_v19, %v13764_v33 }
 0xec7   :  { %v6204_v28 = vcombine.low %v6182_v36, %v6196_v8  ;;  %v6205_v39 = vcombine.high %v6182_v36, %v6196_v8  ;;  %v6206_v34 = vcombine.low %v6189_v12, %v6203_v60  ;;  %v6207_v22 = vcombine.high %v6189_v12, %v6203_v60 }
 0xec9   :  { %v6214_v54 = vrot.slane %v6204_v28, %v13764_v33  ;;  %v6221_v21 = vrot.slane %v6206_v34, %v13764_v33  ;;  %v6228_v23 = vrot.slane %v6205_v39, %v13764_v33  ;;  %v6235_v56 = vrot.slane %v6207_v22, %v13764_v33 }
 0xecb   :  { %v6236_v46 = vcombine.high %v6214_v54, %v6214_v54  ;;  %v6237_v49 = vcombine.high %v6221_v21, %v6221_v21  ;;  %v6238_v55 = vcombine.high %v6228_v23, %v6228_v23  ;;  %v6239_v18 = vcombine.high %v6235_v56, %v6235_v56 }
 0xecc   :  { %v12824_v38 = vadd.f32 %v6214_v54, %v6031_v47  ;;  %v12826_v58 = vadd.f32 %v6228_v23, %v6033_v20  ;;  %v12828_v17 = vadd.f32 %v6221_v21, %v6039_v44  ;;  %v12834_v10 = vadd.f32 %v6235_v56, %v6041_v50 }
 0xecd   :  { %v12830_v14 = vadd.f32 %v6236_v46, %v6035_v29  ;;  %v12832_v9 = vadd.f32 %v6238_v55, %v6037_v63  ;;  %v12836_v35 = vadd.f32 %v6237_v49, %v6043_v62  ;;  %v12838_v42 = vadd.f32 %v6239_v18, %v6045_v13 }
 0xece   :  { %v6256_v43 = vmul.f32 0.5, %v12824_v38  ;;  %v6257_v2 = vmul.f32 0.5, %v12826_v58  ;;  %v6260_v24 = vmul.f32 0.5, %v12828_v17  ;;  %v6296_v15 = vrot.slane %v12824_v38, 1 }
 0xecf   :  { %v6258_v26 = vmul.f32 0.5, %v12830_v14  ;;  %v6259_v6 = vmul.f32 0.5, %v12832_v9  ;;  %v6261_v11 = vmul.f32 0.5, %v12834_v10  ;;  %v6297_v30 = vrot.slane %v12826_v58, 1 }
 0xed0   :  { %9215 = vtanh.f32 %v6256_v43  ;;  %v6262_v32 = vmul.f32 0.5, %v12836_v35  ;;  %v6263_v1 = vmul.f32 0.5, %v12838_v42  ;;  %v6298_v52 = vrot.slane %v12830_v14, 1 }
 0xed1   :  { %9217 = vtanh.f32 %v6257_v2  ;;  %v6299_v59 = vrot.slane %v12832_v9, 1  ;;  %v6300_v51 = vrot.slane %v12828_v17, 1  ;;  %v6301_v31 = vrot.slane %v12834_v10, 1 }
 0xed2   :  { %9219 = vtanh.f32 %v6258_v26  ;;  %v6302_v7 = vrot.slane %v12836_v35, 1  ;;  %v6303_v48 = vrot.slane %v12838_v42, 1  ;;  %v6312_v0 = vmul.f32 0.5, %v6296_v15 }
 0xed3   :  { %9221 = vtanh.f32 %v6259_v6  ;;  %v6313_v19 = vmul.f32 0.5, %v6297_v30  ;;  %v6314_v25 = vmul.f32 0.5, %v6298_v52  ;;  %v6315_v61 = vmul.f32 0.5, %v6299_v59 }
 0xed4   :  { %9223 = vtanh.f32 %v6260_v24  ;;  %v6316_v5 = vmul.f32 0.5, %v6300_v51  ;;  %v6317_v53 = vmul.f32 0.5, %v6301_v31  ;;  %v6318_v36 = vmul.f32 0.5, %v6302_v7 }
 0xed5   :  { %9225 = vtanh.f32 %v6261_v11  ;;  %v6319_v12 = vmul.f32 0.5, %v6303_v48  ;;  %v6344_v8 = vrot.slane %v12824_v38, 2  ;;  %v6345_v60 = vrot.slane %v12826_v58, 2 }
 0xed6   :  { %9227 = vtanh.f32 %v6262_v32  ;;  %v6346_v28 = vrot.slane %v12830_v14, 2  ;;  %v6347_v39 = vrot.slane %v12832_v9, 2  ;;  %v6348_v22 = vrot.slane %v12828_v17, 2 }
 0xed7   :  { %9229 = vtanh.f32 %v6263_v1  ;;  %v6349_v54 = vrot.slane %v12834_v10, 2  ;;  %v6368_v21 = vrot.slane %v12824_v38, 3  ;;  %v6350_v56 = vrot.slane %v12836_v35, 2 }
 0xed8   :  { %9231 = vtanh.f32 %v6312_v0  ;;  %v6369_v47 = vrot.slane %v12826_v58, 3  ;;  %v6370_v20 = vrot.slane %v12830_v14, 3  ;;  %v6351_v44 = vrot.slane %v12838_v42, 2 }
 0xed9   :  { %9233 = vtanh.f32 %v6313_v19  ;;  %v6371_v46 = vrot.slane %v12832_v9, 3  ;;  %v6372_v49 = vrot.slane %v12828_v17, 3  ;;  %v6373_v63 = vrot.slane %v12834_v10, 3 }
 0xeda   :  { %v9216_v34 = vpop.eup %9215  ;;  %9235 = vtanh.f32 %v6314_v25  ;;  %v6374_v50 = vrot.slane %v12836_v35, 3  ;;  %v6375_v58 = vrot.slane %v12838_v42, 3  ;;  %v6384_v13 = vmul.f32 0.5, %v6368_v21 }
 0xedb   :  { %v9218_v23 = vpop.eup %9217  ;;  %9237 = vtanh.f32 %v6315_v61  ;;  %v6272_v18 = vadd.f32 1.0, %v9216_v34  ;;  %v6385_v2 = vmul.f32 0.5, %v6369_v47  ;;  %v6386_v9 = vmul.f32 0.5, %v6370_v20 }
 0xedc   :  { %v9220_v29 = vpop.eup %9219  ;;  %9239 = vtanh.f32 %v6316_v5  ;;  %v6273_v62 = vadd.f32 1.0, %v9218_v23  ;;  %v6387_v6 = vmul.f32 0.5, %v6371_v46  ;;  %v6388_v24 = vmul.f32 0.5, %v6372_v49 }
 0xedd   :  { %v9222_v55 = vpop.eup %9221  ;;  %9241 = vtanh.f32 %v6317_v53  ;;  %v6274_v43 = vadd.f32 1.0, %v9220_v29  ;;  %v6280_v11 = vmul.f32 0.5, %v6272_v18  ;;  %v6389_v35 = vmul.f32 0.5, %v6373_v63 }
 0xede   :  { %v9224_v38 = vpop.eup %9223  ;;  %9243 = vtanh.f32 %v6318_v36  ;;  %v6275_v17 = vadd.f32 1.0, %v9222_v55  ;;  %v6281_v1 = vmul.f32 0.5, %v6273_v62  ;;  %v6390_v52 = vmul.f32 0.5, %v6374_v50 }
 0xedf   :  { %v9226_v14 = vpop.eup %9225  ;;  %9245 = vtanh.f32 %v6319_v12  ;;  %v6276_v10 = vadd.f32 1.0, %v9224_v38  ;;  %v6282_v31 = vmul.f32 0.5, %v6274_v43 }
 0xee0   :  { %v9228_v26 = vpop.eup %9227  ;;  %9247 = vtanh.f32 %v6344_v8  ;;  %v6277_v32 = vadd.f32 1.0, %v9226_v14  ;;  %v6283_v19 = vmul.f32 0.5, %v6275_v17 }
 0xee1   :  { %v9230_v15 = vpop.eup %9229  ;;  %9249 = vtanh.f32 %v6345_v60  ;;  %v6278_v51 = vadd.f32 1.0, %v9228_v26  ;;  %v6284_v5 = vmul.f32 0.5, %v6276_v10 }
 0xee2   :  { %v9232_v30 = vpop.eup %9231  ;;  %9251 = vtanh.f32 %v6346_v28  ;;  %v6279_v0 = vadd.f32 1.0, %v9230_v15  ;;  %v6285_v8 = vmul.f32 0.5, %v6277_v32 }
 0xee3   :  { %v9234_v59 = vpop.eup %9233  ;;  %v6328_v7 = vadd.f32 1.0, %v9232_v30  ;;  %9253 = vtanh.f32 %v6347_v39  ;;  %v6286_v21 = vmul.f32 0.5, %v6278_v51 }
 0xee4   :  { %v9236_v48 = vpop.eup %9235  ;;  %v6329_v25 = vadd.f32 1.0, %v9234_v59  ;;  %9255 = vtanh.f32 %v6348_v22  ;;  %v6287_v20 = vmul.f32 0.5, %v6279_v0 }
 0xee5   :  { %v9238_v61 = vpop.eup %9237  ;;  %v6330_v53 = vadd.f32 1.0, %v9236_v48  ;;  %v6336_v36 = vmul.f32 0.5, %v6328_v7  ;;  %9257 = vtanh.f32 %v6349_v54 }
 0xee6   :  { %v9240_v12 = vpop.eup %9239  ;;  %v6331_v60 = vadd.f32 1.0, %v9238_v61  ;;  %v6337_v28 = vmul.f32 0.5, %v6329_v25  ;;  %9259 = vtanh.f32 %v6350_v56 }
 0xee7   :  { %v9242_v34 = vpop.eup %9241  ;;  %v6332_v23 = vadd.f32 1.0, %v9240_v12  ;;  %v6338_v47 = vmul.f32 0.5, %v6330_v53  ;;  %9261 = vtanh.f32 %v6351_v44  ;;  %v6416_v54 = vmul.f32 %v6336_v36, %v12746_v16 }
 0xee8   :  { %v9244_v39 = vpop.eup %9243  ;;  %v6333_v29 = vadd.f32 1.0, %v9242_v34  ;;  %v6339_v46 = vmul.f32 0.5, %v6331_v60  ;;  %9263 = vtanh.f32 %v6384_v13  ;;  %v6417_v56 = vmul.f32 %v6337_v28, %v12749_v27 }
 0xee9   :  { %v9246_v22 = vpop.eup %9245  ;;  %v6334_v49 = vadd.f32 1.0, %v9244_v39  ;;  %v6340_v55 = vmul.f32 0.5, %v6332_v23  ;;  %9265 = vtanh.f32 %v6385_v2  ;;  %v6418_v44 = vmul.f32 %v6338_v47, %v12752_v4 }
 0xeea   :  { %v9248_v18 = vpop.eup %9247  ;;  %v6335_v63 = vadd.f32 1.0, %v9246_v22  ;;  %v6341_v50 = vmul.f32 0.5, %v6333_v29  ;;  %9267 = vtanh.f32 %v6386_v9  ;;  %v6419_v26 = vmul.f32 %v6339_v46, %v12756_v3 }
 0xeeb   :  { %v9250_v38 = vpop.eup %9249  ;;  %v6342_v62 = vmul.f32 0.5, %v6334_v49  ;;  %9269 = vtanh.f32 %v6387_v6  ;;  %v6424_v14 = vmul.f32 %v9248_v18, %v6280_v11  ;;  %v6420_v16 = vmul.f32 %v6340_v55, %v12761_v40 }
 0xeec   :  { %v9252_v43 = vpop.eup %9251  ;;  %v6343_v13 = vmul.f32 0.5, %v6335_v63  ;;  %9271 = vtanh.f32 %v6388_v24  ;;  %v6425_v2 = vmul.f32 %v9250_v38, %v6281_v1  ;;  %v6421_v6 = vmul.f32 %v6341_v50, %v12764_v45 }
 0xeed   :  { %v9254_v17 = vpop.eup %9253  ;;  %9273 = vtanh.f32 %v6389_v35  ;;  %v6426_v15 = vmul.f32 %v9252_v43, %v6282_v31  ;;  %v12877_v9 = vadd.f32 %v6424_v14, %v6416_v54  ;;  %v6422_v24 = vmul.f32 %v6342_v62, %v12767_v57 }
 0xeee   :  { %v9256_v27 = vpop.eup %9255  ;;  %9275 = vtanh.f32 %v6390_v52  ;;  %v6427_v10 = vmul.f32 %v9254_v17, %v6283_v19  ;;  %v12880_v4 = vadd.f32 %v6425_v2, %v6417_v56  ;;  %v6423_v40 = vmul.f32 %v6343_v13, %v12770_v37 }
 0xeef   :  { %v9258_v11 = vpop.eup %9257  ;;  %v6428_v30 = vmul.f32 %v9256_v27, %v6284_v5  ;;  %v12883_v3 = vadd.f32 %v6426_v15, %v6418_v44  ;;  %9277 = vtanh.f32 %v12877_v9  ;;  %v6391_v52 = vmul.f32 0.5, %v6375_v58 }
 0xef0   :  { %v9260_v35 = vpop.eup %9259  ;;  %v6429_v32 = vmul.f32 %v9258_v11, %v6285_v8  ;;  %v12887_v1 = vadd.f32 %v6427_v10, %v6419_v26  ;;  %9279 = vtanh.f32 %v12880_v4 }
 0xef1   :  { %v9262_v45 = vpop.eup %9261  ;;  %v6430_v59 = vmul.f32 %v9260_v35, %v6286_v21  ;;  %v12892_v51 = vadd.f32 %v6428_v30, %v6420_v16  ;;  %9281 = vtanh.f32 %v12883_v3 }
 0xef2   :  { %v9264_v57 = vpop.eup %9263  ;;  %v6431_v31 = vmul.f32 %v9262_v45, %v6287_v20  ;;  %v12895_v7 = vadd.f32 %v6429_v32, %v6421_v6  ;;  %9283 = vtanh.f32 %v12887_v1 }
 0xef3   :  { %v9266_v37 = vpop.eup %9265  ;;  %v12898_v48 = vadd.f32 %v6430_v59, %v6422_v24  ;;  %9285 = vtanh.f32 %v12892_v51  ;;  %v6400_v19 = vadd.f32 1.0, %v9264_v57 }
 0xef4   :  { %v9268_v0 = vpop.eup %9267  ;;  %v12901_v42 = vadd.f32 %v6431_v31, %v6423_v40  ;;  %9287 = vtanh.f32 %v12895_v7  ;;  %v6401_v25 = vadd.f32 1.0, %v9266_v37 }
 0xef5   :  { %v9270_v58 = vpop.eup %9269  ;;  %9289 = vtanh.f32 %v6391_v52  ;;  %v6402_v5 = vadd.f32 1.0, %v9268_v0  ;;  %v6408_v60 = vmul.f32 0.5, %v6400_v19 }
 0xef6   :  { %v9272_v61 = vpop.eup %9271  ;;  %9291 = vtanh.f32 %v12898_v48  ;;  %v6403_v36 = vadd.f32 1.0, %v9270_v58  ;;  %v6409_v21 = vmul.f32 0.5, %v6401_v25 }
 0xef7   :  { %v9274_v53 = vpop.eup %9273  ;;  %9293 = vtanh.f32 %v12901_v42  ;;  %v6404_v8 = vadd.f32 1.0, %v9272_v61  ;;  %v6410_v47 = vmul.f32 0.5, %v6402_v5 }
 0xef8   :  { %v9276_v12 = vpop.eup %9275  ;;  %v6405_v34 = vadd.f32 1.0, %v9274_v53  ;;  %v6411_v29 = vmul.f32 0.5, %v6403_v36 }
 0xef9   :  { %v9278_v28 = vpop.eup %9277  ;;  %v6406_v22 = vadd.f32 1.0, %v9276_v12  ;;  %v6412_v55 = vmul.f32 0.5, %v6404_v8 }
 0xefa   :  { %v9280_v23 = vpop.eup %9279  ;;  %v6448_v39 = vmul.f32 %v9278_v28, %v6408_v60  ;;  %v6413_v56 = vmul.f32 0.5, %v6405_v34 }
 0xefb   :  { %v9282_v20 = vpop.eup %9281  ;;  %v6449_v46 = vmul.f32 %v9280_v23, %v6409_v21  ;;  %v6414_v13 = vmul.f32 0.5, %v6406_v22  ;;  %v12948_v22 = vld [vmem:[%s13435_s2 + $0x28] ss:$16 sps:$4 sm:$0xff]  }
 0xefc   :  { %v9284_v49 = vpop.eup %9283  ;;  %v6450_v54 = vmul.f32 %v9282_v20, %v6410_v47  ;;  %6456 = vst [vmem:[#allocation5 + $0xc] sm:$0x1] %v6448_v39  ;;  %v6480_v18 = vpack.c.bf16 %v6448_v39, %v6448_v39  ;;  %v12916_v47 = vld [vmem:[%s13435_s2] ss:$16 sps:$4 sm:$0xff]   ;;  %v12922_v39 = vld [vmem:[%s13435_s2 + $0x8] ss:$16 sps:$4 sm:$0xff]  }
 0xefd   :  { %v9286_v63 = vpop.eup %9285  ;;  %6457 = vst [vmem:[#allocation5 + $0x1c] sm:$0x1] %v6449_v46  ;;  %v6481_v50 = vpack.c.bf16 %v6449_v46, %v6449_v46  ;;  %v6451_v38 = vmul.f32 %v9284_v49, %v6411_v29  ;;  %v12928_v20 = vld [vmem:[%s13435_s2 + $0x24] ss:$16 sps:$4 sm:$0xff]   ;;  %v12934_v29 = vld [vmem:[%s13435_s2 + $0x2c] ss:$16 sps:$4 sm:$0xff]  }
 0xefe   :  { %v9288_v62 = vpop.eup %9287  ;;  %6458 = vst [vmem:[#allocation5 + $0x2c] sm:$0x1] %v6450_v54  ;;  %v6452_v44 = vmul.f32 %v9286_v63, %v6412_v55  ;;  %v6482_v14 = vpack.c.bf16 %v6450_v54, %v6450_v54  ;;  %v6496_v6 = vunpack.c.l.b16 %v6480_v18  ;;  %v12942_v46 = vld [vmem:[%s13435_s2 + $0x20] ss:$16 sps:$4 sm:$0xff]   ;;  %v12954_v49 = vld [vmem:[%s13435_s2 + $0x44] ss:$16 sps:$4 sm:$0xff]  }
 0xeff   :  { %v9290_v43 = vpop.eup %9289  ;;  %v6453_v26 = vmul.f32 %v9288_v62, %v6413_v56  ;;  %6459 = vst [vmem:[#allocation5 + $0x3c] sm:$0x1] %v6451_v38  ;;  %v6483_v2 = vpack.c.bf16 %v6451_v38, %v6451_v38  ;;  %v6497_v17 = vunpack.c.l.b16 %v6481_v50  ;;  %v12960_v55 = vld [vmem:[%s13435_s2 + $0x4c] ss:$16 sps:$4 sm:$0xff]   ;;  %v12966_v54 = vld [vmem:[%s13435_s2 + $0x40] ss:$16 sps:$4 sm:$0xff]  }
 0xf00   :  { %v9292_v16 = vpop.eup %9291  ;;  %v6407_v15 = vadd.f32 1.0, %v9290_v43  ;;  %6460 = vst [vmem:[#allocation5 + $0x4c] sm:$0x1] %v6452_v44  ;;  %v6484_v27 = vpack.c.bf16 %v6452_v44, %v6452_v44  ;;  %v6498_v10 = vunpack.c.l.b16 %v6482_v14  ;;  %v12972_v18 = vld [vmem:[%s13435_s2 + $0x48] ss:$16 sps:$4 sm:$0xff]  }
 0xf01   :  { %v9294_v11 = vpop.eup %9293  ;;  %v6454_v24 = vmul.f32 %v9292_v16, %v6414_v13  ;;  %6461 = vst [vmem:[#allocation5 + $0x5c] sm:$0x1] %v6453_v26  ;;  %v6485_v30 = vpack.c.bf16 %v6453_v26, %v6453_v26  ;;  %v6499_v35 = vunpack.c.l.b16 %v6483_v2  ;;  %v6504_v40 = vrot.slane %v6497_v17, 7  ;;  %v12978_v63 = vld [vmem:[%s13435_s2 + $0x64] ss:$16 sps:$4 sm:$0xff]  }
 0xf02   :  { %v6415_v32 = vmul.f32 0.5, %v6407_v15  ;;  %v6500_v45 = vunpack.c.l.b16 %v6484_v27  ;;  %v6506_v52 = vrot.slane %v6498_v10, 6  ;;  %v12984_v50 = vld [vmem:[%s13435_s2 + $0x6c] ss:$16 sps:$4 sm:$0xff]   ;;  %v12990_v56 = vld [vmem:[%s13435_s2 + $0x60] ss:$16 sps:$4 sm:$0xff]  }
 0xf03   :  { %6462 = vst [vmem:[#allocation5 + $0x6c] sm:$0x1] %v6454_v24  ;;  %v6486_v59 = vpack.c.bf16 %v6454_v24, %v6454_v24  ;;  %v6501_v57 = vunpack.c.l.b16 %v6485_v30  ;;  %v6505_v31 = vsel %vm1290_vm0, %v6504_v40, %v6496_v6  ;;  %v6508_v37 = vrot.slane %v6499_v35, 5  ;;  %v12996_v38 = vld [vmem:[%s13435_s2 + $0x68] ss:$16 sps:$4 sm:$0xff]  }
 0xf04   :  { %v6455_v0 = vmul.f32 %v9294_v11, %v6415_v32  ;;  %v6507_v19 = vsel %vm1293_vm1, %v6506_v52, %v6505_v31  ;;  %v6510_v58 = vrot.slane %v6500_v45, 4  ;;  %v13002_v62 = vld [vmem:[%s13435_s2 + $0x84] ss:$16 sps:$4 sm:$0xff]   ;;  %v13008_v44 = vld [vmem:[%s13435_s2 + $0x8c] ss:$16 sps:$4 sm:$0xff]  }
 0xf05   :  { %v6502_v25 = vunpack.c.l.b16 %v6486_v59  ;;  %v6509_v61 = vsel %vm1296_vm2, %v6508_v37, %v6507_v19  ;;  %v6512_v5 = vrot.slane %v6501_v57, 3  ;;  %v13014_v14 = vld [vmem:[%s13435_s2 + $0x80] ss:$16 sps:$4 sm:$0xff]   ;;  %v13020_v43 = vld [vmem:[%s13435_s2 + $0x88] ss:$16 sps:$4 sm:$0xff]  }
 0xf06   :  { %6463 = vst [vmem:[#allocation5 + $0x7c] sm:$0x1] %v6455_v0  ;;  %v6487_v53 = vpack.c.bf16 %v6455_v0, %v6455_v0  ;;  %v6511_v36 = vsel %vm1299_vm3, %v6510_v58, %v6509_v61  ;;  %13765 = vst [vmem:[#allocation7_spill] sm:$0xff] %v13014_v14  ;;  %v13026_v13 = vld [vmem:[%s13435_s2 + $0xa4] ss:$16 sps:$4 sm:$0xff]  }
 0xf07   :  { %v6513_v12 = vsel %vm1302_vm4, %v6512_v5, %v6511_v36  ;;  %v6514_v8 = vrot.slane %v6502_v25, 2  ;;  %13766 = vst [vmem:[#allocation8_spill] sm:$0xff] %v13020_v43  ;;  %13767 = vst [vmem:[#allocation9_spill] sm:$0xff] %v13026_v13  ;;  %v13032_v26 = vld [vmem:[%s13435_s2 + $0xac] ss:$16 sps:$4 sm:$0xff]  }
 0xf08   :  { %v6503_v60 = vunpack.c.l.b16 %v6487_v53  ;;  %13768 = vst [vmem:[#allocation10_spill] sm:$0xff] %v13032_v26  ;;  %v13038_v2 = vld [vmem:[%s13435_s2 + $0xa0] ss:$16 sps:$4 sm:$0xff]   ;;  %v13044_v17 = vld [vmem:[%s13435_s2 + $0xa8] ss:$16 sps:$4 sm:$0xff]  }
 0xf09   :  { %v6515_v28 = vsel %vm1305_vm5, %v6514_v8, %v6513_v12  ;;  %13769 = vst [vmem:[#allocation11_spill] sm:$0xff] %v13038_v2  ;;  %13770 = vst [vmem:[#allocation12_spill] sm:$0xff] %v13044_v17  ;;  %v13050_v16 = vld [vmem:[%s13435_s2 + $0xc4] ss:$16 sps:$4 sm:$0xff]   ;;  %v13056_v15 = vld [vmem:[%s13435_s2 + $0xcc] ss:$16 sps:$4 sm:$0xff]  }
 0xf0a   :  { %v6516_v34 = vrot.slane %v6503_v60, 1  ;;  %13771 = vst [vmem:[#allocation13_spill] sm:$0xff] %v13050_v16  ;;  %13772 = vst [vmem:[#allocation14_spill] sm:$0xff] %v13056_v15  ;;  %v13062_v27 = vld [vmem:[%s13435_s2 + $0xc0] ss:$16 sps:$4 sm:$0xff]  }
 0xf0b   :  { %13773 = vst [vmem:[#allocation15_spill] sm:$0xff] %v13062_v27  ;;  %v13068_v6 = vld [vmem:[%s13435_s2 + $0xc8] ss:$16 sps:$4 sm:$0xff]   ;;  %v13074_v10 = vld [vmem:[%s13435_s2 + $0xe4] ss:$16 sps:$4 sm:$0xff]  }
 0xf0c   :  { %v6517_v21 = vsel %vm1308_vm6, %v6516_v34, %v6515_v28  ;;  %13774 = vst [vmem:[#allocation16_spill] sm:$0xff] %v13068_v6  ;;  %13775 = vst [vmem:[#allocation17_spill] sm:$0xff] %v13074_v10  ;;  %v13080_v11 = vld [vmem:[%s13435_s2 + $0xec] ss:$16 sps:$4 sm:$0xff]   ;;  %v13086_v24 = vld [vmem:[%s13435_s2 + $0xe0] ss:$16 sps:$4 sm:$0xff]  }
 0xf0d   :  { %v6518_v23 = vpack.c.b16 %v6517_v21, %v6517_v21  ;;  %13776 = vst [vmem:[#allocation18_spill] sm:$0xff] %v13080_v11  ;;  %13777 = vst [vmem:[#allocation19_spill] sm:$0xff] %v13086_v24  ;;  %v13092_v30 = vld [vmem:[%s13435_s2 + $0xe8] ss:$16 sps:$4 sm:$0xff]   ;;  %v9757_v35 = vld [vmem:[%s13435_s2 + $0x4] ss:$16 sps:$4 sm:$0xff]  }
 0xf0e   :  { %13778 = vst [vmem:[#allocation20_spill] sm:$0xff] %v13092_v30  ;;  %v9758_v40 = vld [vmem:[%s13435_s2 + $0xc] ss:$16 sps:$4 sm:$0xff]  }
 0xf0f   :  { %6553 = vmatmul.mubr.bf16.vlgmr.msra.gmra.mrb[84].mxu0 %v6518_v23  ;;  %6594 = vmatmul.mubr.bf16.vlgmr.msra.gmra.mrb[84].mxu1 %v6518_v23 }
 0xf10   :  { %6955 = vmatpush1.bf16.msra.mxu0 %v12916_v47  ;;  %6996 = vmatpush1.bf16.msra.mxu1 %v12922_v39 }
 0xf11   :  { %6956 = vmatprep.subr.bf16.mxu0 %v12928_v20  ;;  %6997 = vmatprep.subr.bf16.mxu1 %v12934_v29 }
 0xf12   :  { %6986 = vmatprep.mubr.bf16.mxu0 %v13578_v41  ;;  %7027 = vmatprep.mubr.bf16.mxu1 %v13578_v41 }
 0xf14   :  { %6957 = vmatpush1.bf16.msra.mxu0 %v12942_v46  ;;  %6998 = vmatpush1.bf16.msra.mxu1 %v12948_v22 }
 0xf15   :  { %6958 = vmatprep.subr.bf16.mxu0 %v12954_v49  ;;  %6999 = vmatprep.subr.bf16.mxu1 %v12960_v55 }
 0xf18   :  { %6959 = vmatpush1.bf16.msra.mxu0 %v12966_v54  ;;  %7000 = vmatpush1.bf16.msra.mxu1 %v12972_v18 }
 0xf19   :  { %6960 = vmatprep.subr.bf16.mxu0 %v12978_v63  ;;  %7001 = vmatprep.subr.bf16.mxu1 %v12984_v50 }
 0xf1c   :  { %6961 = vmatpush1.bf16.msra.mxu0 %v12990_v56  ;;  %7002 = vmatpush1.bf16.msra.mxu1 %v12996_v38 }
 0xf1d   :  { %6962 = vmatprep.subr.bf16.mxu0 %v13002_v62  ;;  %7003 = vmatprep.subr.bf16.mxu1 %v13008_v44 }
 0xf20   :  { %6963 = vmatpush1.bf16.msra.mxu0 %v13014_v14  ;;  %7004 = vmatpush1.bf16.msra.mxu1 %v13020_v43 }
 0xf21   :  { %6964 = vmatprep.subr.bf16.mxu0 %v13026_v13  ;;  %7005 = vmatprep.subr.bf16.mxu1 %v13032_v26 }
 0xf24   :  { %6965 = vmatpush1.bf16.msra.mxu0 %v13038_v2  ;;  %7006 = vmatpush1.bf16.msra.mxu1 %v13044_v17 }
 0xf25   :  { %6966 = vmatprep.subr.bf16.mxu0 %v13050_v16  ;;  %7007 = vmatprep.subr.bf16.mxu1 %v13056_v15 }
 0xf28   :  { %6967 = vmatpush1.bf16.msra.mxu0 %v13062_v27  ;;  %7008 = vmatpush1.bf16.msra.mxu1 %v13068_v6 }
 0xf29   :  { %6968 = vmatprep.subr.bf16.mxu0 %v13074_v10  ;;  %7009 = vmatprep.subr.bf16.mxu1 %v13080_v11 }
 0xf2c   :  { %6969 = vmatpush1.bf16.msra.mxu0 %v13086_v24  ;;  %7010 = vmatpush1.bf16.msra.mxu1 %v13092_v30 }
 0xf2d   :  { %7388 = vmatprep.subr.bf16.mxu0 %v9757_v35  ;;  %7429 = vmatprep.subr.bf16.mxu1 %v9758_v40 }
 0xfe2   :  { %v6554_v32 = vpop.f32.mrb[84].mxu0  ;;  %v6595_v45 = vpop.f32.mrb[84].mxu1 }
 0xfe3   :  { %v6556_v52 = vpop.f32.mrb[85].mxu0  ;;  %v6597_v59 = vpop.f32.mrb[85].mxu1 }
 0xfe4   :  { %v6606_v57 = vcombine.low %v6554_v32, %v6556_v52  ;;  %v6607_v31 = vcombine.high %v6554_v32, %v6556_v52  ;;  %v6608_v37 = vcombine.low %v6595_v45, %v6597_v59  ;;  %v6609_v0 = vcombine.high %v6595_v45, %v6597_v59  ;;  %v6558_v19 = vpop.f32.mrb[86].mxu0  ;;  %v6599_v58 = vpop.f32.mrb[86].mxu1  ;;  %v6465_v32 = vld [vmem:[#allocation4 + $0x25] ss:$8 sm:$0xf] }
 0xfe5   :  { %v6559_v25 = vpop.f32.mrb[87].mxu0  ;;  %v6600_v61 = vpop.f32.mrb[87].mxu1  ;;  %v6467_v45 = vld [vmem:[#allocation4 + $0x65] ss:$8 sm:$0xf] }
 0xfe6   :  { %v6616_v5 = vrot.slane %v6606_v57, %v13764_v33  ;;  %v6623_v53 = vrot.slane %v6607_v31, %v13764_v33  ;;  %v6630_v36 = vrot.slane %v6608_v37, %v13764_v33  ;;  %v6637_v12 = vrot.slane %v6609_v0, %v13764_v33  ;;  %v6469_v52 = vld [vmem:[#allocation4 + $0xa5] ss:$8 sm:$0xf] }
 0xfe7   :  { %v6473_v59 = vld [vmem:[#allocation4 + $0x125] ss:$8 sm:$0xf] }
 0xfe8   :  { %v6638_v8 = vcombine.low %v6616_v5, %v6630_v36  ;;  %v6639_v60 = vcombine.high %v6616_v5, %v6630_v36  ;;  %v6640_v28 = vcombine.low %v6623_v53, %v6637_v12  ;;  %v6641_v34 = vcombine.high %v6623_v53, %v6637_v12  ;;  %v6471_v19 = vld [vmem:[#allocation4 + $0xe5] ss:$8 sm:$0xf] }
 0xfe9   :  { %v6475_v58 = vld [vmem:[#allocation4 + $0x165] ss:$8 sm:$0xf] }
 0xfea   :  { %v6648_v21 = vrot.slane %v6638_v8, %v13764_v33  ;;  %v6655_v23 = vrot.slane %v6640_v28, %v13764_v33  ;;  %v6662_v35 = vrot.slane %v6639_v60, %v13764_v33  ;;  %v6669_v40 = vrot.slane %v6641_v34, %v13764_v33  ;;  %v6477_v53 = vld [vmem:[#allocation4 + $0x1a5] ss:$8 sm:$0xf] }
 0xfeb   :  { %v6479_v36 = vld [vmem:[#allocation4 + $0x1e5] ss:$8 sm:$0xf] }
 0xfec   :  { %v6670_v57 = vcombine.high %v6648_v21, %v6648_v21  ;;  %v6671_v31 = vcombine.high %v6655_v23, %v6655_v23  ;;  %v6672_v37 = vcombine.high %v6662_v35, %v6662_v35  ;;  %v6673_v0 = vcombine.high %v6669_v40, %v6669_v40 }
 0xfed   :  { %v13109_v25 = vadd.f32 %v6648_v21, %v6465_v32  ;;  %v13111_v61 = vadd.f32 %v6662_v35, %v6467_v45  ;;  %v13113_v5 = vadd.f32 %v6655_v23, %v6473_v59  ;;  %v13119_v60 = vadd.f32 %v6669_v40, %v6475_v58 }
 0xfee   :  { %v13115_v12 = vadd.f32 %v6670_v57, %v6469_v52  ;;  %v13117_v8 = vadd.f32 %v6672_v37, %v6471_v19  ;;  %v13121_v28 = vadd.f32 %v6671_v31, %v6477_v53  ;;  %v13123_v34 = vadd.f32 %v6673_v0, %v6479_v36 }
 0xfef   :  { %v6690_v33 = vmul.f32 0.5, %v13109_v25  ;;  %v6691_v21 = vmul.f32 0.5, %v13111_v61  ;;  %v6694_v32 = vmul.f32 0.5, %v13113_v5  ;;  %v6730_v45 = vrot.slane %v13109_v25, 1 }
 0xff0   :  { %v6692_v35 = vmul.f32 0.5, %v13115_v12  ;;  %v6693_v23 = vmul.f32 0.5, %v13117_v8  ;;  %v6695_v40 = vmul.f32 0.5, %v13119_v60  ;;  %v6731_v52 = vrot.slane %v13111_v61, 1 }
 0xff1   :  { %9295 = vtanh.f32 %v6690_v33  ;;  %v6696_v59 = vmul.f32 0.5, %v13121_v28  ;;  %v6697_v57 = vmul.f32 0.5, %v13123_v34  ;;  %v6732_v31 = vrot.slane %v13115_v12, 1 }
 0xff2   :  { %9297 = vtanh.f32 %v6691_v21  ;;  %v6733_v37 = vrot.slane %v13117_v8, 1  ;;  %v6734_v0 = vrot.slane %v13113_v5, 1  ;;  %v6735_v33 = vrot.slane %v13119_v60, 1 }
 0xff3   :  { %9299 = vtanh.f32 %v6692_v35  ;;  %v6736_v19 = vrot.slane %v13121_v28, 1  ;;  %v6737_v58 = vrot.slane %v13123_v34, 1  ;;  %v6746_v53 = vmul.f32 0.5, %v6730_v45 }
 0xff4   :  { %9301 = vtanh.f32 %v6693_v23  ;;  %v6747_v36 = vmul.f32 0.5, %v6731_v52  ;;  %v6748_v21 = vmul.f32 0.5, %v6732_v31  ;;  %v6749_v35 = vmul.f32 0.5, %v6733_v37 }
 0xff5   :  { %9303 = vtanh.f32 %v6694_v32  ;;  %v6750_v30 = vmul.f32 0.5, %v6734_v0  ;;  %v6751_v23 = vmul.f32 0.5, %v6735_v33  ;;  %v6752_v24 = vmul.f32 0.5, %v6736_v19 }
 0xff6   :  { %9305 = vtanh.f32 %v6695_v40  ;;  %v6753_v11 = vmul.f32 0.5, %v6737_v58  ;;  %v6778_v10 = vrot.slane %v13109_v25, 2  ;;  %v6779_v32 = vrot.slane %v13111_v61, 2 }
 0xff7   :  { %9307 = vtanh.f32 %v6696_v59  ;;  %v6780_v6 = vrot.slane %v13115_v12, 2  ;;  %v6781_v45 = vrot.slane %v13117_v8, 2  ;;  %v6782_v52 = vrot.slane %v13113_v5, 2 }
 0xff8   :  { %9309 = vtanh.f32 %v6697_v57  ;;  %v6783_v59 = vrot.slane %v13119_v60, 2  ;;  %v6802_v57 = vrot.slane %v13109_v25, 3  ;;  %v6784_v37 = vrot.slane %v13121_v28, 2 }
 0xff9   :  { %9311 = vtanh.f32 %v6746_v53  ;;  %v6803_v0 = vrot.slane %v13111_v61, 3  ;;  %v6804_v33 = vrot.slane %v13115_v12, 3  ;;  %v6785_v58 = vrot.slane %v13123_v34, 2 }
 0xffa   :  { %9313 = vtanh.f32 %v6747_v36  ;;  %v6805_v53 = vrot.slane %v13117_v8, 3  ;;  %v6806_v36 = vrot.slane %v13113_v5, 3  ;;  %v6807_v25 = vrot.slane %v13119_v60, 3 }
 0xffb   :  { %v9296_v40 = vpop.eup %9295  ;;  %9315 = vtanh.f32 %v6748_v21  ;;  %v6818_v12 = vmul.f32 0.5, %v6802_v57  ;;  %v6819_v2 = vmul.f32 0.5, %v6803_v0  ;;  %v6820_v8 = vmul.f32 0.5, %v6804_v33 }
 0xffc   :  { %v9298_v31 = vpop.eup %9297  ;;  %9317 = vtanh.f32 %v6749_v35  ;;  %v6706_v27 = vadd.f32 1.0, %v9296_v40  ;;  %v6808_v35 = vrot.slane %v13121_v28, 3  ;;  %v6821_v40 = vmul.f32 0.5, %v6805_v53 }
 0xffd   :  { %v9300_v19 = vpop.eup %9299  ;;  %9319 = vtanh.f32 %v6750_v30  ;;  %v6707_v16 = vadd.f32 1.0, %v9298_v31  ;;  %v6823_v28 = vmul.f32 0.5, %v6807_v25 }
 0xffe   :  { %v9302_v21 = vpop.eup %9301  ;;  %9321 = vtanh.f32 %v6751_v23  ;;  %v6708_v17 = vadd.f32 1.0, %v9300_v19  ;;  %v6822_v23 = vmul.f32 0.5, %v6806_v36  ;;  %v6714_v43 = vmul.f32 0.5, %v6706_v27 }
 0xfff   :  { %v9304_v15 = vpop.eup %9303  ;;  %9323 = vtanh.f32 %v6752_v24  ;;  %v6709_v5 = vadd.f32 1.0, %v9302_v21  ;;  %v6715_v14 = vmul.f32 0.5, %v6707_v16  ;;  %v6824_v57 = vmul.f32 0.5, %v6808_v35 }
0x1000   :  { %v9306_v30 = vpop.eup %9305  ;;  %9325 = vtanh.f32 %v6753_v11  ;;  %v6710_v60 = vadd.f32 1.0, %v9304_v15  ;;  %v6716_v11 = vmul.f32 0.5, %v6708_v17 }
0x1001   :  { %v9308_v26 = vpop.eup %9307  ;;  %9327 = vtanh.f32 %v6778_v10  ;;  %v6711_v24 = vadd.f32 1.0, %v9306_v30  ;;  %v6717_v10 = vmul.f32 0.5, %v6709_v5 }
0x1002   :  { %v9310_v13 = vpop.eup %9309  ;;  %9329 = vtanh.f32 %v6779_v32  ;;  %v6712_v19 = vadd.f32 1.0, %v9308_v26  ;;  %v6718_v15 = vmul.f32 0.5, %v6710_v60 }
0x1003   :  { %v9312_v31 = vpop.eup %9311  ;;  %9331 = vtanh.f32 %v6780_v6  ;;  %v6713_v21 = vadd.f32 1.0, %v9310_v13  ;;  %v6719_v30 = vmul.f32 0.5, %v6711_v24 }
0x1004   :  { %v9314_v61 = vpop.eup %9313  ;;  %v6762_v0 = vadd.f32 1.0, %v9312_v31  ;;  %9333 = vtanh.f32 %v6781_v45  ;;  %v6720_v26 = vmul.f32 0.5, %v6712_v19 }
0x1005   :  { %v9316_v33 = vpop.eup %9315  ;;  %v6763_v53 = vadd.f32 1.0, %v9314_v61  ;;  %9335 = vtanh.f32 %v6782_v52  ;;  %v6721_v13 = vmul.f32 0.5, %v6713_v21 }
0x1006   :  { %v9318_v36 = vpop.eup %9317  ;;  %v6764_v27 = vadd.f32 1.0, %v9316_v33  ;;  %v6770_v32 = vmul.f32 0.5, %v6762_v0  ;;  %9337 = vtanh.f32 %v6783_v59 }
0x1007   :  { %v9320_v25 = vpop.eup %9319  ;;  %v6765_v16 = vadd.f32 1.0, %v9318_v36  ;;  %v6771_v6 = vmul.f32 0.5, %v6763_v53  ;;  %9339 = vtanh.f32 %v6784_v37 }
0x1008   :  { %v9322_v35 = vpop.eup %9321  ;;  %v6766_v17 = vadd.f32 1.0, %v9320_v25  ;;  %v6772_v31 = vmul.f32 0.5, %v6764_v27  ;;  %9341 = vtanh.f32 %v6785_v58  ;;  %v6850_v59 = vmul.f32 %v6770_v32, %v12877_v9 }
0x1009   :  { %v9324_v45 = vpop.eup %9323  ;;  %v6767_v5 = vadd.f32 1.0, %v9322_v35  ;;  %v6773_v61 = vmul.f32 0.5, %v6765_v16  ;;  %9343 = vtanh.f32 %v6818_v12  ;;  %v6851_v37 = vmul.f32 %v6771_v6, %v12880_v4 }
0x100a   :  { %v9326_v52 = vpop.eup %9325  ;;  %v6768_v60 = vadd.f32 1.0, %v9324_v45  ;;  %v6774_v33 = vmul.f32 0.5, %v6766_v17  ;;  %9345 = vtanh.f32 %v6819_v2  ;;  %v6852_v58 = vmul.f32 %v6772_v31, %v12883_v3 }
0x100b   :  { %v9328_v24 = vpop.eup %9327  ;;  %v6769_v0 = vadd.f32 1.0, %v9326_v52  ;;  %v6775_v53 = vmul.f32 0.5, %v6767_v5  ;;  %9347 = vtanh.f32 %v6820_v8  ;;  %v6853_v25 = vmul.f32 %v6773_v61, %v12887_v1 }
0x100c   :  { %v9330_v19 = vpop.eup %9329  ;;  %v6776_v36 = vmul.f32 0.5, %v6768_v60  ;;  %9349 = vtanh.f32 %v6821_v40  ;;  %v6858_v21 = vmul.f32 %v9328_v24, %v6714_v43  ;;  %v6854_v9 = vmul.f32 %v6774_v33, %v12892_v51 }
0x100d   :  { %v9332_v27 = vpop.eup %9331  ;;  %v6777_v12 = vmul.f32 0.5, %v6769_v0  ;;  %9351 = vtanh.f32 %v6822_v23  ;;  %v6859_v2 = vmul.f32 %v9330_v19, %v6715_v14  ;;  %v6855_v40 = vmul.f32 %v6775_v53, %v12895_v7 }
0x100e   :  { %v9334_v16 = vpop.eup %9333  ;;  %9353 = vtanh.f32 %v6823_v28  ;;  %v6860_v32 = vmul.f32 %v9332_v27, %v6716_v11  ;;  %v13162_v8 = vadd.f32 %v6858_v21, %v6850_v59  ;;  %v6856_v23 = vmul.f32 %v6776_v36, %v12898_v48 }
0x100f   :  { %v9336_v4 = vpop.eup %9335  ;;  %9355 = vtanh.f32 %v6824_v57  ;;  %v6861_v6 = vmul.f32 %v9334_v16, %v6717_v10  ;;  %v13165_v3 = vadd.f32 %v6859_v2, %v6851_v37  ;;  %v6857_v51 = vmul.f32 %v6777_v12, %v12901_v42 }
0x1010   :  { %v9338_v43 = vpop.eup %9337  ;;  %v6862_v35 = vmul.f32 %v9336_v4, %v6718_v15  ;;  %v13168_v1 = vadd.f32 %v6860_v32, %v6852_v58  ;;  %9357 = vtanh.f32 %v13162_v8  ;;  %v13779_v57 = vrot.slane %v13123_v34, 3 }
0x1011   :  { %v9340_v14 = vpop.eup %9339  ;;  %v6863_v28 = vmul.f32 %v9338_v43, %v6719_v30  ;;  %v13172_v11 = vadd.f32 %v6861_v6, %v6853_v25  ;;  %9359 = vtanh.f32 %v13165_v3 }
0x1012   :  { %v9342_v7 = vpop.eup %9341  ;;  %v6825_v10 = vmul.f32 0.5, %v13779_v57  ;;  %v6864_v17 = vmul.f32 %v9340_v14, %v6720_v26  ;;  %v13177_v31 = vadd.f32 %v6862_v35, %v6854_v9  ;;  %9361 = vtanh.f32 %v13168_v1 }
0x1013   :  { %v9344_v48 = vpop.eup %9343  ;;  %v6865_v15 = vmul.f32 %v9342_v7, %v6721_v13  ;;  %v13180_v45 = vadd.f32 %v6863_v28, %v6855_v40  ;;  %9363 = vtanh.f32 %v13172_v11 }
0x1014   :  { %v9346_v42 = vpop.eup %9345  ;;  %v13183_v30 = vadd.f32 %v6864_v17, %v6856_v23  ;;  %9365 = vtanh.f32 %v13177_v31  ;;  %v6834_v61 = vadd.f32 1.0, %v9344_v48 }
0x1015   :  { %v9348_v5 = vpop.eup %9347  ;;  %v13186_v34 = vadd.f32 %v6865_v15, %v6857_v51  ;;  %9367 = vtanh.f32 %v13180_v45  ;;  %v6835_v52 = vadd.f32 1.0, %v9346_v42 }
0x1016   :  { %v9350_v26 = vpop.eup %9349  ;;  %9369 = vtanh.f32 %v6825_v10  ;;  %v6836_v13 = vadd.f32 1.0, %v9348_v5  ;;  %v6842_v53 = vmul.f32 0.5, %v6834_v61 }
0x1017   :  { %v9352_v60 = vpop.eup %9351  ;;  %9371 = vtanh.f32 %v13183_v30  ;;  %v6837_v59 = vadd.f32 1.0, %v9350_v26  ;;  %v6843_v36 = vmul.f32 0.5, %v6835_v52 }
0x1018   :  { %v9354_v33 = vpop.eup %9353  ;;  %9373 = vtanh.f32 %v13186_v34  ;;  %v6838_v0 = vadd.f32 1.0, %v9352_v60  ;;  %v6844_v21 = vmul.f32 0.5, %v6836_v13 }
0x1019   :  { %v9356_v24 = vpop.eup %9355  ;;  %v6839_v19 = vadd.f32 1.0, %v9354_v33  ;;  %v6845_v25 = vmul.f32 0.5, %v6837_v59 }
0x101a   :  { %v9358_v37 = vpop.eup %9357  ;;  %v6840_v16 = vadd.f32 1.0, %v9356_v24  ;;  %v6846_v32 = vmul.f32 0.5, %v6838_v0 }
0x101b   :  { %v9360_v58 = vpop.eup %9359  ;;  %v6882_v27 = vmul.f32 %v9358_v37, %v6842_v53  ;;  %v6847_v23 = vmul.f32 0.5, %v6839_v19 }
0x101c   :  { %v9362_v12 = vpop.eup %9361  ;;  %v6883_v2 = vmul.f32 %v9360_v58, %v6843_v36  ;;  %v6848_v57 = vmul.f32 0.5, %v6840_v16 }
0x101d   :  { %v9364_v9 = vpop.eup %9363  ;;  %v6884_v4 = vmul.f32 %v9362_v12, %v6844_v21  ;;  %6890 = vst [vmem:[#allocation5 + $0xd] sm:$0x1] %v6882_v27  ;;  %v6914_v40 = vpack.c.bf16 %v6882_v27, %v6882_v27 }
0x101e   :  { %v9366_v6 = vpop.eup %9365  ;;  %6891 = vst [vmem:[#allocation5 + $0x1d] sm:$0x1] %v6883_v2  ;;  %v6915_v43 = vpack.c.bf16 %v6883_v2, %v6883_v2  ;;  %v6885_v35 = vmul.f32 %v9364_v9, %v6845_v25 }
0x101f   :  { %v9368_v14 = vpop.eup %9367  ;;  %6892 = vst [vmem:[#allocation5 + $0x2d] sm:$0x1] %v6884_v4  ;;  %v6886_v51 = vmul.f32 %v9366_v6, %v6846_v32  ;;  %v6916_v28 = vpack.c.bf16 %v6884_v4, %v6884_v4  ;;  %v6930_v61 = vunpack.c.l.b16 %v6914_v40 }
0x1020   :  { %v9370_v7 = vpop.eup %9369  ;;  %v6887_v10 = vmul.f32 %v9368_v14, %v6847_v23  ;;  %6893 = vst [vmem:[#allocation5 + $0x3d] sm:$0x1] %v6885_v35  ;;  %v6917_v17 = vpack.c.bf16 %v6885_v35, %v6885_v35  ;;  %v6931_v48 = vunpack.c.l.b16 %v6915_v43 }
0x1021   :  { %v9372_v15 = vpop.eup %9371  ;;  %v6841_v42 = vadd.f32 1.0, %v9370_v7  ;;  %6894 = vst [vmem:[#allocation5 + $0x4d] sm:$0x1] %v6886_v51  ;;  %v6918_v5 = vpack.c.bf16 %v6886_v51, %v6886_v51  ;;  %v6932_v26 = vunpack.c.l.b16 %v6916_v28 }
0x1022   :  { %v9374_v52 = vpop.eup %9373  ;;  %v6888_v60 = vmul.f32 %v9372_v15, %v6848_v57  ;;  %6895 = vst [vmem:[#allocation5 + $0x5d] sm:$0x1] %v6887_v10  ;;  %v6919_v13 = vpack.c.bf16 %v6887_v10, %v6887_v10  ;;  %v6933_v33 = vunpack.c.l.b16 %v6917_v17  ;;  %v6938_v59 = vrot.slane %v6931_v48, 7 }
0x1023   :  { %v6849_v24 = vmul.f32 0.5, %v6841_v42  ;;  %v6934_v0 = vunpack.c.l.b16 %v6918_v5  ;;  %v6940_v53 = vrot.slane %v6932_v26, 6  ;;  %v13794_v5 = vld [vmem:[#allocation6_spill] sm:$0xff] }
0x1024   :  { %6896 = vst [vmem:[#allocation5 + $0x6d] sm:$0x1] %v6888_v60  ;;  %v6920_v37 = vpack.c.bf16 %v6888_v60, %v6888_v60  ;;  %v6935_v19 = vunpack.c.l.b16 %v6919_v13  ;;  %v6939_v36 = vsel %vm1290_vm0, %v6938_v59, %v6930_v61  ;;  %v6942_v58 = vrot.slane %v6933_v33, 5 }
0x1025   :  { %v6889_v21 = vmul.f32 %v9374_v52, %v6849_v24  ;;  %v6941_v27 = vsel %vm1293_vm1, %v6940_v53, %v6939_v36  ;;  %v6944_v12 = vrot.slane %v6934_v0, 4  ;;  %v6899_v36 = vld [vmem:[#allocation4 + $0x26] ss:$8 sm:$0xf] }
0x1026   :  { %v6936_v25 = vunpack.c.l.b16 %v6920_v37  ;;  %v6943_v2 = vsel %vm1296_vm2, %v6942_v58, %v6941_v27  ;;  %v6946_v16 = vrot.slane %v6935_v19, 3  ;;  %v6901_v58 = vld [vmem:[#allocation4 + $0x66] ss:$8 sm:$0xf] }
0x1027   :  { %6897 = vst [vmem:[#allocation5 + $0x7d] sm:$0x1] %v6889_v21  ;;  %v6921_v9 = vpack.c.bf16 %v6889_v21, %v6889_v21  ;;  %v6945_v32 = vsel %vm1299_vm3, %v6944_v12, %v6943_v2  ;;  %v6903_v21 = vld [vmem:[#allocation4 + $0xa6] ss:$8 sm:$0xf] }
0x1028   :  { %v6947_v4 = vsel %vm1302_vm4, %v6946_v16, %v6945_v32  ;;  %v6948_v40 = vrot.slane %v6936_v25, 2  ;;  %v6907_v27 = vld [vmem:[#allocation4 + $0x126] ss:$8 sm:$0xf] }
0x1029   :  { %v6937_v6 = vunpack.c.l.b16 %v6921_v9  ;;  %v6905_v9 = vld [vmem:[#allocation4 + $0xe6] ss:$8 sm:$0xf] }
0x102a   :  { %v6949_v43 = vsel %vm1305_vm5, %v6948_v40, %v6947_v4  ;;  %v6909_v32 = vld [vmem:[#allocation4 + $0x166] ss:$8 sm:$0xf] }
0x102b   :  { %v6950_v23 = vrot.slane %v6937_v6, 1 }
0x102d   :  { %v6951_v35 = vsel %vm1308_vm6, %v6950_v23, %v6949_v43  ;;  %v6911_v43 = vld [vmem:[#allocation4 + $0x1a6] ss:$8 sm:$0xf] }
0x102e   :  { %v6952_v14 = vpack.c.b16 %v6951_v35, %v6951_v35  ;;  %v6913_v23 = vld [vmem:[#allocation4 + $0x1e6] ss:$8 sm:$0xf] }
0x1030   :  { %6987 = vmatmul.mubr.bf16.vlgmr.msra.gmra.mrb[88].mxu0 %v6952_v14  ;;  %7028 = vmatmul.mubr.bf16.vlgmr.msra.gmra.mrb[88].mxu1 %v6952_v14 }
0x1031   :  { %7389 = vmatpush1.bf16.msra.mxu0 %v12916_v47  ;;  %7430 = vmatpush1.bf16.msra.mxu1 %v12922_v39  ;;  %v13781_v47 = vld [vmem:[#allocation8_spill] sm:$0xff]  ;;  %v13782_v39 = vld [vmem:[#allocation9_spill] sm:$0xff] }
0x1032   :  { %7390 = vmatprep.subr.bf16.mxu0 %v12928_v20  ;;  %7431 = vmatprep.subr.bf16.mxu1 %v12934_v29  ;;  %v13783_v20 = vld [vmem:[#allocation10_spill] sm:$0xff]  ;;  %v13784_v29 = vld [vmem:[#allocation11_spill] sm:$0xff] }
0x1033   :  { %7420 = vmatprep.mubr.bf16.mxu0 %v13578_v41  ;;  %7461 = vmatprep.mubr.bf16.mxu1 %v13578_v41  ;;  %v13780_v41 = vld [vmem:[#allocation7_spill] sm:$0xff] }
0x1035   :  { %7391 = vmatpush1.bf16.msra.mxu0 %v12942_v46  ;;  %7432 = vmatpush1.bf16.msra.mxu1 %v12948_v22  ;;  %v13785_v46 = vld [vmem:[#allocation12_spill] sm:$0xff]  ;;  %v13786_v22 = vld [vmem:[#allocation13_spill] sm:$0xff] }
0x1036   :  { %7392 = vmatprep.subr.bf16.mxu0 %v12954_v49  ;;  %7433 = vmatprep.subr.bf16.mxu1 %v12960_v55  ;;  %v13787_v49 = vld [vmem:[#allocation14_spill] sm:$0xff]  ;;  %v13788_v55 = vld [vmem:[#allocation15_spill] sm:$0xff] }
0x1039   :  { %7393 = vmatpush1.bf16.msra.mxu0 %v12966_v54  ;;  %7434 = vmatpush1.bf16.msra.mxu1 %v12972_v18  ;;  %v13789_v54 = vld [vmem:[#allocation16_spill] sm:$0xff]  ;;  %v13790_v18 = vld [vmem:[#allocation17_spill] sm:$0xff] }
0x103a   :  { %7394 = vmatprep.subr.bf16.mxu0 %v12978_v63  ;;  %7435 = vmatprep.subr.bf16.mxu1 %v12984_v50  ;;  %v13791_v63 = vld [vmem:[#allocation18_spill] sm:$0xff]  ;;  %v13792_v50 = vld [vmem:[#allocation19_spill] sm:$0xff] }
0x103d   :  { %7395 = vmatpush1.bf16.msra.mxu0 %v12990_v56  ;;  %7436 = vmatpush1.bf16.msra.mxu1 %v12996_v38  ;;  %v13793_v56 = vld [vmem:[#allocation20_spill] sm:$0xff] }
0x103e   :  { %7396 = vmatprep.subr.bf16.mxu0 %v13002_v62  ;;  %7437 = vmatprep.subr.bf16.mxu1 %v13008_v44 }
0x1041   :  { %7397 = vmatpush1.bf16.msra.mxu0 %v13780_v41  ;;  %7438 = vmatpush1.bf16.msra.mxu1 %v13781_v47 }
0x1042   :  { %7398 = vmatprep.subr.bf16.mxu0 %v13782_v39  ;;  %7439 = vmatprep.subr.bf16.mxu1 %v13783_v20 }
0x1045   :  { %7399 = vmatpush1.bf16.msra.mxu0 %v13784_v29  ;;  %7440 = vmatpush1.bf16.msra.mxu1 %v13785_v46 }
0x1046   :  { %7400 = vmatprep.subr.bf16.mxu0 %v13786_v22  ;;  %7441 = vmatprep.subr.bf16.mxu1 %v13787_v49 }
0x1049   :  { %7401 = vmatpush1.bf16.msra.mxu0 %v13788_v55  ;;  %7442 = vmatpush1.bf16.msra.mxu1 %v13789_v54 }
0x104a   :  { %7402 = vmatprep.subr.bf16.mxu0 %v13790_v18  ;;  %7443 = vmatprep.subr.bf16.mxu1 %v13791_v63 }
0x104d   :  { %7403 = vmatpush1.bf16.msra.mxu0 %v13792_v50  ;;  %7444 = vmatpush1.bf16.msra.mxu1 %v13793_v56 }
0x1103   :  { %v6988_v38 = vpop.f32.mrb[88].mxu0  ;;  %v7029_v62 = vpop.f32.mrb[88].mxu1 }
0x1104   :  { %v6990_v44 = vpop.f32.mrb[89].mxu0  ;;  %v7031_v51 = vpop.f32.mrb[89].mxu1 }
0x1105   :  { %v7040_v28 = vcombine.low %v6988_v38, %v6990_v44  ;;  %v7041_v7 = vcombine.high %v6988_v38, %v6990_v44  ;;  %v7042_v57 = vcombine.low %v7029_v62, %v7031_v51  ;;  %v7043_v10 = vcombine.high %v7029_v62, %v7031_v51  ;;  %v6992_v17 = vpop.f32.mrb[90].mxu0  ;;  %v7033_v48 = vpop.f32.mrb[90].mxu1 }
0x1106   :  { %v6993_v15 = vpop.f32.mrb[91].mxu0  ;;  %v7034_v42 = vpop.f32.mrb[91].mxu1 }
0x1107   :  { %v7050_v61 = vrot.slane %v7040_v28, %v13794_v5  ;;  %v7057_v26 = vrot.slane %v7041_v7, %v13794_v5  ;;  %v7064_v52 = vrot.slane %v7042_v57, %v13794_v5  ;;  %v7071_v60 = vrot.slane %v7043_v10, %v13794_v5 }
0x1109   :  { %v7072_v13 = vcombine.low %v7050_v61, %v7064_v52  ;;  %v7073_v33 = vcombine.high %v7050_v61, %v7064_v52  ;;  %v7074_v59 = vcombine.low %v7057_v26, %v7071_v60  ;;  %v7075_v24 = vcombine.high %v7057_v26, %v7071_v60 }
0x110b   :  { %v7082_v0 = vrot.slane %v7072_v13, %v13794_v5  ;;  %v7089_v53 = vrot.slane %v7074_v59, %v13794_v5  ;;  %v7096_v37 = vrot.slane %v7073_v33, %v13794_v5  ;;  %v7103_v19 = vrot.slane %v7075_v24, %v13794_v5 }
0x110d   :  { %v7104_v12 = vcombine.high %v7082_v0, %v7082_v0  ;;  %v7105_v25 = vcombine.high %v7089_v53, %v7089_v53  ;;  %v7106_v2 = vcombine.high %v7096_v37, %v7096_v37  ;;  %v7107_v16 = vcombine.high %v7103_v19, %v7103_v19 }
0x110e   :  { %v13238_v4 = vadd.f32 %v7082_v0, %v6899_v36  ;;  %v13240_v40 = vadd.f32 %v7096_v37, %v6901_v58  ;;  %v13242_v6 = vadd.f32 %v7089_v53, %v6907_v27  ;;  %v13248_v41 = vadd.f32 %v7103_v19, %v6909_v32 }
0x110f   :  { %v13244_v35 = vadd.f32 %v7104_v12, %v6903_v21  ;;  %v13246_v14 = vadd.f32 %v7106_v2, %v6905_v9  ;;  %v13250_v47 = vadd.f32 %v7105_v25, %v6911_v43  ;;  %v13252_v39 = vadd.f32 %v7107_v16, %v6913_v23 }
0x1110   :  { %v7124_v20 = vmul.f32 0.5, %v13238_v4  ;;  %v7125_v29 = vmul.f32 0.5, %v13240_v40  ;;  %v7128_v49 = vmul.f32 0.5, %v13242_v6  ;;  %v7164_v55 = vrot.slane %v13238_v4, 1 }
0x1111   :  { %v7126_v46 = vmul.f32 0.5, %v13244_v35  ;;  %v7127_v22 = vmul.f32 0.5, %v13246_v14  ;;  %v7129_v54 = vmul.f32 0.5, %v13248_v41  ;;  %v7165_v18 = vrot.slane %v13240_v40, 1 }
0x1112   :  { %9375 = vtanh.f32 %v7124_v20  ;;  %v7130_v63 = vmul.f32 0.5, %v13250_v47  ;;  %v7131_v50 = vmul.f32 0.5, %v13252_v39  ;;  %v7166_v56 = vrot.slane %v13244_v35, 1 }
0x1113   :  { %9377 = vtanh.f32 %v7125_v29  ;;  %v7167_v38 = vrot.slane %v13246_v14, 1  ;;  %v7168_v62 = vrot.slane %v13242_v6, 1  ;;  %v7169_v44 = vrot.slane %v13248_v41, 1 }
0x1114   :  { %9379 = vtanh.f32 %v7126_v46  ;;  %v7170_v51 = vrot.slane %v13250_v47, 1  ;;  %v7171_v28 = vrot.slane %v13252_v39, 1  ;;  %v7180_v7 = vmul.f32 0.5, %v7164_v55 }
0x1115   :  { %9381 = vtanh.f32 %v7127_v22  ;;  %v7181_v57 = vmul.f32 0.5, %v7165_v18  ;;  %v7182_v10 = vmul.f32 0.5, %v7166_v56  ;;  %v7183_v17 = vmul.f32 0.5, %v7167_v38 }
0x1116   :  { %9383 = vtanh.f32 %v7128_v49  ;;  %v7184_v48 = vmul.f32 0.5, %v7168_v62  ;;  %v7185_v15 = vmul.f32 0.5, %v7169_v44  ;;  %v7186_v42 = vmul.f32 0.5, %v7170_v51 }
0x1117   :  { %9385 = vtanh.f32 %v7129_v54  ;;  %v7187_v61 = vmul.f32 0.5, %v7171_v28  ;;  %v7212_v26 = vrot.slane %v13238_v4, 2  ;;  %v7213_v52 = vrot.slane %v13240_v40, 2 }
0x1118   :  { %9387 = vtanh.f32 %v7130_v63  ;;  %v7214_v60 = vrot.slane %v13244_v35, 2  ;;  %v7215_v13 = vrot.slane %v13246_v14, 2  ;;  %v7216_v59 = vrot.slane %v13242_v6, 2 }
0x1119   :  { %9389 = vtanh.f32 %v7131_v50  ;;  %v7217_v24 = vrot.slane %v13248_v41, 2  ;;  %v7236_v0 = vrot.slane %v13238_v4, 3  ;;  %v7218_v37 = vrot.slane %v13250_v47, 2 }
0x111a   :  { %9391 = vtanh.f32 %v7180_v7  ;;  %v7237_v19 = vrot.slane %v13240_v40, 3  ;;  %v7238_v36 = vrot.slane %v13244_v35, 3  ;;  %v7219_v21 = vrot.slane %v13252_v39, 2 }
0x111b   :  { %9393 = vtanh.f32 %v7181_v57  ;;  %v7239_v27 = vrot.slane %v13246_v14, 3  ;;  %v7240_v12 = vrot.slane %v13242_v6, 3  ;;  %v7241_v16 = vrot.slane %v13248_v41, 3 }
0x111c   :  { %v9376_v33 = vpop.eup %9375  ;;  %9395 = vtanh.f32 %v7182_v10  ;;  %v7242_v9 = vrot.slane %v13250_v47, 3  ;;  %v7243_v40 = vrot.slane %v13252_v39, 3  ;;  %v7252_v43 = vmul.f32 0.5, %v7236_v0 }
0x111d   :  { %v9378_v53 = vpop.eup %9377  ;;  %9397 = vtanh.f32 %v7183_v17  ;;  %v7140_v2 = vadd.f32 1.0, %v9376_v33  ;;  %v7253_v20 = vmul.f32 0.5, %v7237_v19  ;;  %v7254_v14 = vmul.f32 0.5, %v7238_v36 }
0x111e   :  { %v9380_v58 = vpop.eup %9379  ;;  %9399 = vtanh.f32 %v7184_v48  ;;  %v7141_v4 = vadd.f32 1.0, %v9378_v53  ;;  %v7255_v46 = vmul.f32 0.5, %v7239_v27  ;;  %v7256_v22 = vmul.f32 0.5, %v7240_v12 }
0x111f   :  { %v9382_v25 = vpop.eup %9381  ;;  %9401 = vtanh.f32 %v7185_v15  ;;  %v7142_v35 = vadd.f32 1.0, %v9380_v58  ;;  %v7148_v55 = vmul.f32 0.5, %v7140_v2  ;;  %v7257_v47 = vmul.f32 0.5, %v7241_v16 }
0x1120   :  { %v9384_v32 = vpop.eup %9383  ;;  %9403 = vtanh.f32 %v7186_v42  ;;  %v7143_v6 = vadd.f32 1.0, %v9382_v25  ;;  %v7149_v63 = vmul.f32 0.5, %v7141_v4  ;;  %v7258_v50 = vmul.f32 0.5, %v7242_v9 }
0x1121   :  { %v9386_v23 = vpop.eup %9385  ;;  %9405 = vtanh.f32 %v7187_v61  ;;  %v7144_v41 = vadd.f32 1.0, %v9384_v32  ;;  %v7150_v62 = vmul.f32 0.5, %v7142_v35 }
0x1122   :  { %v9388_v29 = vpop.eup %9387  ;;  %9407 = vtanh.f32 %v7212_v26  ;;  %v7145_v18 = vadd.f32 1.0, %v9386_v23  ;;  %v7151_v7 = vmul.f32 0.5, %v7143_v6 }
0x1123   :  { %v9390_v49 = vpop.eup %9389  ;;  %9409 = vtanh.f32 %v7213_v52  ;;  %v7146_v38 = vadd.f32 1.0, %v9388_v29  ;;  %v7152_v17 = vmul.f32 0.5, %v7144_v41 }
0x1124   :  { %v9392_v54 = vpop.eup %9391  ;;  %9411 = vtanh.f32 %v7214_v60  ;;  %v7147_v28 = vadd.f32 1.0, %v9390_v49  ;;  %v7153_v61 = vmul.f32 0.5, %v7145_v18 }
0x1125   :  { %v9394_v56 = vpop.eup %9393  ;;  %v7196_v44 = vadd.f32 1.0, %v9392_v54  ;;  %9413 = vtanh.f32 %v7215_v13  ;;  %v7154_v33 = vmul.f32 0.5, %v7146_v38 }
0x1126   :  { %v9396_v51 = vpop.eup %9395  ;;  %v7197_v57 = vadd.f32 1.0, %v9394_v56  ;;  %9415 = vtanh.f32 %v7216_v59  ;;  %v7155_v19 = vmul.f32 0.5, %v7147_v28 }
0x1127   :  { %v9398_v10 = vpop.eup %9397  ;;  %v7198_v48 = vadd.f32 1.0, %v9396_v51  ;;  %v7204_v15 = vmul.f32 0.5, %v7196_v44  ;;  %9417 = vtanh.f32 %v7217_v24 }
0x1128   :  { %v9400_v42 = vpop.eup %9399  ;;  %v7199_v26 = vadd.f32 1.0, %v9398_v10  ;;  %v7205_v52 = vmul.f32 0.5, %v7197_v57  ;;  %9419 = vtanh.f32 %v7218_v37 }
0x1129   :  { %v9402_v60 = vpop.eup %9401  ;;  %v7200_v0 = vadd.f32 1.0, %v9400_v42  ;;  %v7206_v53 = vmul.f32 0.5, %v7198_v48  ;;  %9421 = vtanh.f32 %v7219_v21  ;;  %v7284_v24 = vmul.f32 %v7204_v15, %v13162_v8 }
0x112a   :  { %v9404_v13 = vpop.eup %9403  ;;  %v7201_v36 = vadd.f32 1.0, %v9402_v60  ;;  %v7207_v58 = vmul.f32 0.5, %v7199_v26  ;;  %9423 = vtanh.f32 %v7252_v43  ;;  %v7285_v37 = vmul.f32 %v7205_v52, %v13165_v3 }
0x112b   :  { %v9406_v59 = vpop.eup %9405  ;;  %v7202_v27 = vadd.f32 1.0, %v9404_v13  ;;  %v7208_v12 = vmul.f32 0.5, %v7200_v0  ;;  %9425 = vtanh.f32 %v7253_v20  ;;  %v7286_v21 = vmul.f32 %v7206_v53, %v13168_v1 }
0x112c   :  { %v9408_v25 = vpop.eup %9407  ;;  %v7203_v2 = vadd.f32 1.0, %v9406_v59  ;;  %v7209_v16 = vmul.f32 0.5, %v7201_v36  ;;  %9427 = vtanh.f32 %v7254_v14  ;;  %v7287_v35 = vmul.f32 %v7207_v58, %v13172_v11 }
0x112d   :  { %v9410_v9 = vpop.eup %9409  ;;  %v7210_v32 = vmul.f32 0.5, %v7202_v27  ;;  %9429 = vtanh.f32 %v7255_v46  ;;  %v7292_v4 = vmul.f32 %v9408_v25, %v7148_v55  ;;  %v7288_v8 = vmul.f32 %v7208_v12, %v13177_v31 }
0x112e   :  { %v9412_v23 = vpop.eup %9411  ;;  %v7211_v43 = vmul.f32 0.5, %v7203_v2  ;;  %9431 = vtanh.f32 %v7256_v22  ;;  %v7293_v20 = vmul.f32 %v9410_v9, %v7149_v63  ;;  %v7289_v46 = vmul.f32 %v7209_v16, %v13180_v45 }
0x112f   :  { %v9414_v29 = vpop.eup %9413  ;;  %9433 = vtanh.f32 %v7257_v47  ;;  %v7294_v6 = vmul.f32 %v9412_v23, %v7150_v62  ;;  %v13291_v14 = vadd.f32 %v7292_v4, %v7284_v24  ;;  %v7290_v22 = vmul.f32 %v7210_v32, %v13183_v30 }
0x1130   :  { %v9416_v3 = vpop.eup %9415  ;;  %9435 = vtanh.f32 %v7258_v50  ;;  %v7295_v49 = vmul.f32 %v9414_v29, %v7151_v7  ;;  %v13294_v1 = vadd.f32 %v7293_v20, %v7285_v37  ;;  %v7291_v31 = vmul.f32 %v7211_v43, %v13186_v34 }
0x1131   :  { %v9418_v41 = vpop.eup %9417  ;;  %v7296_v55 = vmul.f32 %v9416_v3, %v7152_v17  ;;  %v13297_v11 = vadd.f32 %v7294_v6, %v7286_v21  ;;  %9437 = vtanh.f32 %v13291_v14  ;;  %v7259_v63 = vmul.f32 0.5, %v7243_v40 }
0x1132   :  { %v9420_v47 = vpop.eup %9419  ;;  %v7297_v54 = vmul.f32 %v9418_v41, %v7153_v61  ;;  %v13301_v18 = vadd.f32 %v7295_v49, %v7287_v35  ;;  %9439 = vtanh.f32 %v13294_v1 }
0x1133   :  { %v9422_v45 = vpop.eup %9421  ;;  %v7298_v50 = vmul.f32 %v9420_v47, %v7154_v33  ;;  %v13306_v56 = vadd.f32 %v7296_v55, %v7288_v8  ;;  %9441 = vtanh.f32 %v13297_v11 }
0x1134   :  { %v9424_v30 = vpop.eup %9423  ;;  %v7299_v38 = vmul.f32 %v9422_v45, %v7155_v19  ;;  %v13309_v62 = vadd.f32 %v7297_v54, %v7289_v46  ;;  %9443 = vtanh.f32 %v13301_v18 }
0x1135   :  { %v9426_v34 = vpop.eup %9425  ;;  %v13312_v44 = vadd.f32 %v7298_v50, %v7290_v22  ;;  %9445 = vtanh.f32 %v13306_v56  ;;  %v7268_v28 = vadd.f32 1.0, %v9424_v30 }
0x1136   :  { %v9428_v51 = vpop.eup %9427  ;;  %v13315_v39 = vadd.f32 %v7299_v38, %v7291_v31  ;;  %9447 = vtanh.f32 %v13309_v62  ;;  %v7269_v7 = vadd.f32 1.0, %v9426_v34 }
0x1137   :  { %v9430_v40 = vpop.eup %9429  ;;  %9449 = vtanh.f32 %v7259_v63  ;;  %v7270_v10 = vadd.f32 1.0, %v9428_v51  ;;  %v7276_v61 = vmul.f32 0.5, %v7268_v28 }
0x1138   :  { %v9432_v57 = vpop.eup %9431  ;;  %9451 = vtanh.f32 %v13312_v44  ;;  %v7271_v48 = vadd.f32 1.0, %v9430_v40  ;;  %v7277_v60 = vmul.f32 0.5, %v7269_v7 }
0x1139   :  { %v9434_v17 = vpop.eup %9433  ;;  %9453 = vtanh.f32 %v13315_v39  ;;  %v7272_v42 = vadd.f32 1.0, %v9432_v57  ;;  %v7278_v0 = vmul.f32 0.5, %v7270_v10 }
0x113a   :  { %v9436_v15 = vpop.eup %9435  ;;  %v7273_v52 = vadd.f32 1.0, %v9434_v17  ;;  %v7279_v19 = vmul.f32 0.5, %v7271_v48 }
0x113b   :  { %v9438_v26 = vpop.eup %9437  ;;  %v7274_v58 = vadd.f32 1.0, %v9436_v15  ;;  %v7280_v27 = vmul.f32 0.5, %v7272_v42 }
0x113c   :  { %v9440_v33 = vpop.eup %9439  ;;  %v7316_v53 = vmul.f32 %v9438_v26, %v7276_v61  ;;  %v7281_v16 = vmul.f32 0.5, %v7273_v52 }
0x113d   :  { %v9442_v13 = vpop.eup %9441  ;;  %v7317_v36 = vmul.f32 %v9440_v33, %v7277_v60  ;;  %v7282_v23 = vmul.f32 0.5, %v7274_v58 }
0x113e   :  { %v9444_v59 = vpop.eup %9443  ;;  %v7318_v12 = vmul.f32 %v9442_v13, %v7278_v0  ;;  %7324 = vst [vmem:[#allocation5 + $0xe] sm:$0x1] %v7316_v53  ;;  %v7348_v24 = vpack.c.bf16 %v7316_v53, %v7316_v53 }
0x113f   :  { %v9446_v25 = vpop.eup %9445  ;;  %7325 = vst [vmem:[#allocation5 + $0x1e] sm:$0x1] %v7317_v36  ;;  %v7349_v2 = vpack.c.bf16 %v7317_v36, %v7317_v36  ;;  %v7319_v37 = vmul.f32 %v9444_v59, %v7279_v19 }
0x1140   :  { %v9448_v9 = vpop.eup %9447  ;;  %7326 = vst [vmem:[#allocation5 + $0x2e] sm:$0x1] %v7318_v12  ;;  %v7320_v32 = vmul.f32 %v9446_v25, %v7280_v27  ;;  %v7350_v21 = vpack.c.bf16 %v7318_v12, %v7318_v12  ;;  %v7364_v3 = vunpack.c.l.b16 %v7348_v24 }
0x1141   :  { %v9450_v4 = vpop.eup %9449  ;;  %v7321_v43 = vmul.f32 %v9448_v9, %v7281_v16  ;;  %7327 = vst [vmem:[#allocation5 + $0x3e] sm:$0x1] %v7319_v37  ;;  %v7351_v35 = vpack.c.bf16 %v7319_v37, %v7319_v37  ;;  %v7365_v20 = vunpack.c.l.b16 %v7349_v2 }
0x1142   :  { %v9452_v29 = vpop.eup %9451  ;;  %v7275_v8 = vadd.f32 1.0, %v9450_v4  ;;  %7328 = vst [vmem:[#allocation5 + $0x4e] sm:$0x1] %v7320_v32  ;;  %v7352_v6 = vpack.c.bf16 %v7320_v32, %v7320_v32  ;;  %v7366_v46 = vunpack.c.l.b16 %v7350_v21 }
0x1143   :  { %v9454_v49 = vpop.eup %9453  ;;  %v7322_v41 = vmul.f32 %v9452_v29, %v7282_v23  ;;  %7329 = vst [vmem:[#allocation5 + $0x5e] sm:$0x1] %v7321_v43  ;;  %v7353_v22 = vpack.c.bf16 %v7321_v43, %v7321_v43  ;;  %v7367_v55 = vunpack.c.l.b16 %v7351_v35  ;;  %v7372_v47 = vrot.slane %v7365_v20, 7  ;;  %v7333_v43 = vld [vmem:[#allocation4 + $0x27] ss:$8 sm:$0xf] }
0x1144   :  { %v7283_v31 = vmul.f32 0.5, %v7275_v8  ;;  %v7368_v54 = vunpack.c.l.b16 %v7352_v6  ;;  %v7374_v45 = vrot.slane %v7366_v46, 6  ;;  %v7335_v35 = vld [vmem:[#allocation4 + $0x67] ss:$8 sm:$0xf] }
0x1145   :  { %7330 = vst [vmem:[#allocation5 + $0x6e] sm:$0x1] %v7322_v41  ;;  %v7354_v63 = vpack.c.bf16 %v7322_v41, %v7322_v41  ;;  %v7369_v50 = vunpack.c.l.b16 %v7353_v22  ;;  %v7373_v30 = vsel %vm1290_vm0, %v7372_v47, %v7364_v3  ;;  %v7376_v38 = vrot.slane %v7367_v55, 5  ;;  %v7337_v3 = vld [vmem:[#allocation4 + $0xa7] ss:$8 sm:$0xf] }
0x1146   :  { %v7323_v34 = vmul.f32 %v9454_v49, %v7283_v31  ;;  %v7375_v51 = vsel %vm1293_vm1, %v7374_v45, %v7373_v30  ;;  %v7378_v28 = vrot.slane %v7368_v54, 4  ;;  %v7339_v46 = vld [vmem:[#allocation4 + $0xe7] ss:$8 sm:$0xf] }
0x1147   :  { %v7370_v40 = vunpack.c.l.b16 %v7354_v63  ;;  %v7377_v7 = vsel %vm1296_vm2, %v7376_v38, %v7375_v51  ;;  %v7380_v57 = vrot.slane %v7369_v50, 3  ;;  %v7341_v49 = vld [vmem:[#allocation4 + $0x127] ss:$8 sm:$0xf] }
0x1148   :  { %7331 = vst [vmem:[#allocation5 + $0x7e] sm:$0x1] %v7323_v34  ;;  %v7355_v10 = vpack.c.bf16 %v7323_v34, %v7323_v34  ;;  %v7379_v17 = vsel %vm1299_vm3, %v7378_v28, %v7377_v7  ;;  %v7343_v41 = vld [vmem:[#allocation4 + $0x167] ss:$8 sm:$0xf] }
0x1149   :  { %v7381_v48 = vsel %vm1302_vm4, %v7380_v57, %v7379_v17  ;;  %v7382_v15 = vrot.slane %v7370_v40, 2  ;;  %v7345_v54 = vld [vmem:[#allocation4 + $0x1a7] ss:$8 sm:$0xf] }
0x114a   :  { %v7371_v42 = vunpack.c.l.b16 %v7355_v10  ;;  %v7347_v45 = vld [vmem:[#allocation4 + $0x1e7] ss:$8 sm:$0xf] }
0x114b   :  { %v7383_v61 = vsel %vm1305_vm5, %v7382_v15, %v7381_v48 }
0x114c   :  { %v7384_v26 = vrot.slane %v7371_v42, 1 }
0x114e   :  { %v7385_v52 = vsel %vm1308_vm6, %v7384_v26, %v7383_v61 }
0x114f   :  { %v7386_v60 = vpack.c.b16 %v7385_v52, %v7385_v52 }
0x1151   :  { %7421 = vmatmul.mubr.bf16.vlgmr.msra.gmra.mrb[92].mxu0 %v7386_v60  ;;  %7462 = vmatmul.mubr.bf16.vlgmr.msra.gmra.mrb[92].mxu1 %v7386_v60 }
0x1224   :  { %v7422_v33 = vpop.f32.mrb[92].mxu0  ;;  %v7463_v0 = vpop.f32.mrb[92].mxu1 }
0x1225   :  { %v7424_v53 = vpop.f32.mrb[93].mxu0  ;;  %v7465_v13 = vpop.f32.mrb[93].mxu1 }
0x1226   :  { %v7474_v19 = vcombine.low %v7422_v33, %v7424_v53  ;;  %v7475_v36 = vcombine.high %v7422_v33, %v7424_v53  ;;  %v7476_v58 = vcombine.low %v7463_v0, %v7465_v13  ;;  %v7477_v59 = vcombine.high %v7463_v0, %v7465_v13  ;;  %v7426_v27 = vpop.f32.mrb[94].mxu0  ;;  %v7467_v12 = vpop.f32.mrb[94].mxu1 }
0x1227   :  { %v7427_v24 = vpop.f32.mrb[95].mxu0  ;;  %v7468_v25 = vpop.f32.mrb[95].mxu1 }
0x1228   :  { %v7484_v2 = vrot.slane %v7474_v19, %v13794_v5  ;;  %v7491_v16 = vrot.slane %v7475_v36, %v13794_v5  ;;  %v7498_v37 = vrot.slane %v7476_v58, %v13794_v5  ;;  %v7505_v9 = vrot.slane %v7477_v59, %v13794_v5 }
0x122a   :  { %v7506_v32 = vcombine.low %v7484_v2, %v7498_v37  ;;  %v7507_v21 = vcombine.high %v7484_v2, %v7498_v37  ;;  %v7508_v4 = vcombine.low %v7491_v16, %v7505_v9  ;;  %v7509_v23 = vcombine.high %v7491_v16, %v7505_v9 }
0x122c   :  { %v7516_v20 = vrot.slane %v7506_v32, %v13794_v5  ;;  %v7523_v29 = vrot.slane %v7508_v4, %v13794_v5  ;;  %v7530_v8 = vrot.slane %v7507_v21, %v13794_v5  ;;  %v7537_v6 = vrot.slane %v7509_v23, %v13794_v5 }
0x122e   :  { %v7538_v22 = vcombine.high %v7516_v20, %v7516_v20  ;;  %v7539_v55 = vcombine.high %v7523_v29, %v7523_v29  ;;  %v7540_v47 = vcombine.high %v7530_v8, %v7530_v8  ;;  %v7541_v31 = vcombine.high %v7537_v6, %v7537_v6 }
0x122f   :  { %v13335_v63 = vadd.f32 %v7516_v20, %v7333_v43  ;;  %v13337_v50 = vadd.f32 %v7530_v8, %v7335_v35  ;;  %v13339_v30 = vadd.f32 %v7523_v29, %v7341_v49  ;;  %v13341_v38 = vadd.f32 %v7537_v6, %v7343_v41 }
0x1230   :  { %v13343_v34 = vadd.f32 %v7538_v22, %v7337_v3  ;;  %v13345_v51 = vadd.f32 %v7540_v47, %v7339_v46  ;;  %v13347_v28 = vadd.f32 %v7539_v55, %v7345_v54  ;;  %v13349_v40 = vadd.f32 %v7541_v31, %v7347_v45 }
0x1231   :  { %v7558_v7 = vmul.f32 0.5, %v13335_v63  ;;  %v7559_v57 = vmul.f32 0.5, %v13337_v50  ;;  %v7562_v48 = vmul.f32 0.5, %v13339_v30  ;;  %v7563_v15 = vmul.f32 0.5, %v13341_v38 }
0x1232   :  { %v7560_v10 = vmul.f32 0.5, %v13343_v34  ;;  %v7561_v17 = vmul.f32 0.5, %v13345_v51  ;;  %v7598_v42 = vrot.slane %v13335_v63, 1  ;;  %v7564_v61 = vmul.f32 0.5, %v13347_v28 }
0x1233   :  { %9455 = vtanh.f32 %v7558_v7  ;;  %v7565_v26 = vmul.f32 0.5, %v13349_v40  ;;  %v7599_v52 = vrot.slane %v13337_v50, 1  ;;  %v7600_v60 = vrot.slane %v13343_v34, 1 }
0x1234   :  { %9457 = vtanh.f32 %v7559_v57  ;;  %v7601_v33 = vrot.slane %v13345_v51, 1  ;;  %v7602_v0 = vrot.slane %v13339_v30, 1  ;;  %v7603_v53 = vrot.slane %v13341_v38, 1 }
0x1235   :  { %9459 = vtanh.f32 %v7560_v10  ;;  %v7604_v13 = vrot.slane %v13347_v28, 1  ;;  %v7605_v19 = vrot.slane %v13349_v40, 1  ;;  %v7614_v36 = vmul.f32 0.5, %v7598_v42 }
0x1236   :  { %9461 = vtanh.f32 %v7561_v17  ;;  %v7615_v58 = vmul.f32 0.5, %v7599_v52  ;;  %v7616_v59 = vmul.f32 0.5, %v7600_v60  ;;  %v7617_v27 = vmul.f32 0.5, %v7601_v33 }
0x1237   :  { %9463 = vtanh.f32 %v7562_v48  ;;  %v7618_v12 = vmul.f32 0.5, %v7602_v0  ;;  %v7619_v24 = vmul.f32 0.5, %v7603_v53  ;;  %v7620_v25 = vmul.f32 0.5, %v7604_v13 }
0x1238   :  { %9465 = vtanh.f32 %v7563_v15  ;;  %v7621_v2 = vmul.f32 0.5, %v7605_v19  ;;  %v7646_v16 = vrot.slane %v13335_v63, 2  ;;  %v7647_v37 = vrot.slane %v13337_v50, 2 }
0x1239   :  { %9467 = vtanh.f32 %v7564_v61  ;;  %v7648_v9 = vrot.slane %v13343_v34, 2  ;;  %v7649_v32 = vrot.slane %v13345_v51, 2  ;;  %v7650_v21 = vrot.slane %v13339_v30, 2 }
0x123a   :  { %9469 = vtanh.f32 %v7565_v26  ;;  %v7651_v4 = vrot.slane %v13341_v38, 2  ;;  %v7652_v43 = vrot.slane %v13347_v28, 2  ;;  %v7670_v35 = vrot.slane %v13335_v63, 3 }
0x123b   :  { %9471 = vtanh.f32 %v7614_v36  ;;  %v7671_v20 = vrot.slane %v13337_v50, 3  ;;  %v7672_v8 = vrot.slane %v13343_v34, 3  ;;  %v7673_v6 = vrot.slane %v13345_v51, 3 }
0x123c   :  { %9473 = vtanh.f32 %v7615_v58  ;;  %v7674_v3 = vrot.slane %v13339_v30, 3  ;;  %v7653_v41 = vrot.slane %v13349_v40, 2  ;;  %v7675_v22 = vrot.slane %v13341_v38, 3 }
0x123d   :  { %v9456_v23 = vpop.eup %9455  ;;  %9475 = vtanh.f32 %v7616_v59  ;;  %v7676_v31 = vrot.slane %v13347_v28, 3  ;;  %v7677_v54 = vrot.slane %v13349_v40, 3  ;;  %v7686_v50 = vmul.f32 0.5, %v7670_v35 }
0x123e   :  { %v9458_v29 = vpop.eup %9457  ;;  %9477 = vtanh.f32 %v7617_v27  ;;  %v7574_v49 = vadd.f32 1.0, %v9456_v23  ;;  %v7687_v34 = vmul.f32 0.5, %v7671_v20  ;;  %v7688_v51 = vmul.f32 0.5, %v7672_v8 }
0x123f   :  { %v9460_v46 = vpop.eup %9459  ;;  %9479 = vtanh.f32 %v7618_v12  ;;  %v7575_v47 = vadd.f32 1.0, %v9458_v29  ;;  %v7689_v7 = vmul.f32 0.5, %v7673_v6  ;;  %v7690_v57 = vmul.f32 0.5, %v7674_v3 }
0x1240   :  { %v9462_v55 = vpop.eup %9461  ;;  %9481 = vtanh.f32 %v7619_v24  ;;  %v7576_v63 = vadd.f32 1.0, %v9460_v46  ;;  %v7582_v48 = vmul.f32 0.5, %v7574_v49  ;;  %v7691_v40 = vmul.f32 0.5, %v7675_v22 }
0x1241   :  { %v9464_v45 = vpop.eup %9463  ;;  %9483 = vtanh.f32 %v7620_v25  ;;  %v7577_v17 = vadd.f32 1.0, %v9462_v55  ;;  %v7583_v28 = vmul.f32 0.5, %v7575_v47  ;;  %v7692_v60 = vmul.f32 0.5, %v7676_v31 }
0x1242   :  { %v9466_v30 = vpop.eup %9465  ;;  %9485 = vtanh.f32 %v7621_v2  ;;  %v7578_v38 = vadd.f32 1.0, %v9464_v45  ;;  %v7584_v52 = vmul.f32 0.5, %v7576_v63  ;;  %v7693_v13 = vmul.f32 0.5, %v7677_v54 }
0x1243   :  { %v9468_v10 = vpop.eup %9467  ;;  %9487 = vtanh.f32 %v7646_v16  ;;  %v7579_v42 = vadd.f32 1.0, %v9466_v30  ;;  %v7585_v36 = vmul.f32 0.5, %v7577_v17 }
0x1244   :  { %v9470_v15 = vpop.eup %9469  ;;  %9489 = vtanh.f32 %v7647_v37  ;;  %v7580_v26 = vadd.f32 1.0, %v9468_v10  ;;  %v7586_v58 = vmul.f32 0.5, %v7578_v38 }
0x1245   :  { %v9472_v61 = vpop.eup %9471  ;;  %9491 = vtanh.f32 %v7648_v9  ;;  %v7581_v0 = vadd.f32 1.0, %v9470_v15  ;;  %v7587_v12 = vmul.f32 0.5, %v7579_v42 }
0x1246   :  { %v9474_v33 = vpop.eup %9473  ;;  %v7630_v53 = vadd.f32 1.0, %v9472_v61  ;;  %9493 = vtanh.f32 %v7649_v32  ;;  %v7588_v16 = vmul.f32 0.5, %v7580_v26 }
0x1247   :  { %v9476_v19 = vpop.eup %9475  ;;  %v7631_v59 = vadd.f32 1.0, %v9474_v33  ;;  %9495 = vtanh.f32 %v7650_v21  ;;  %v7589_v35 = vmul.f32 0.5, %v7581_v0 }
0x1248   :  { %v9478_v27 = vpop.eup %9477  ;;  %v7632_v24 = vadd.f32 1.0, %v9476_v19  ;;  %v7638_v25 = vmul.f32 0.5, %v7630_v53  ;;  %9497 = vtanh.f32 %v7651_v4 }
0x1249   :  { %v9480_v2 = vpop.eup %9479  ;;  %v7633_v37 = vadd.f32 1.0, %v9478_v27  ;;  %v7639_v9 = vmul.f32 0.5, %v7631_v59  ;;  %9499 = vtanh.f32 %v7652_v43 }
0x124a   :  { %v9482_v23 = vpop.eup %9481  ;;  %v7634_v20 = vadd.f32 1.0, %v9480_v2  ;;  %v7640_v32 = vmul.f32 0.5, %v7632_v24  ;;  %9501 = vtanh.f32 %v7653_v41  ;;  %v7718_v21 = vmul.f32 %v7638_v25, %v13291_v14 }
0x124b   :  { %v9484_v29 = vpop.eup %9483  ;;  %v7635_v8 = vadd.f32 1.0, %v9482_v23  ;;  %v7641_v6 = vmul.f32 0.5, %v7633_v37  ;;  %9503 = vtanh.f32 %v7686_v50  ;;  %v7719_v4 = vmul.f32 %v7639_v9, %v13294_v1 }
0x124c   :  { %v9486_v3 = vpop.eup %9485  ;;  %v7636_v46 = vadd.f32 1.0, %v9484_v29  ;;  %v7642_v49 = vmul.f32 0.5, %v7634_v20  ;;  %9505 = vtanh.f32 %v7687_v34  ;;  %v7720_v47 = vmul.f32 %v7640_v32, %v13297_v11 }
0x124d   :  { %v9488_v22 = vpop.eup %9487  ;;  %v7637_v55 = vadd.f32 1.0, %v9486_v3  ;;  %v7643_v43 = vmul.f32 0.5, %v7635_v8  ;;  %9507 = vtanh.f32 %v7688_v51  ;;  %v7721_v54 = vmul.f32 %v7641_v6, %v13301_v18 }
0x124e   :  { %v9490_v31 = vpop.eup %9489  ;;  %v7644_v41 = vmul.f32 0.5, %v7636_v46  ;;  %9509 = vtanh.f32 %v7689_v7  ;;  %v7726_v45 = vmul.f32 %v9488_v22, %v7582_v48  ;;  %v7722_v50 = vmul.f32 %v7642_v49, %v13306_v56 }
0x124f   :  { %v9492_v63 = vpop.eup %9491  ;;  %v7645_v14 = vmul.f32 0.5, %v7637_v55  ;;  %9511 = vtanh.f32 %v7690_v57  ;;  %v7727_v34 = vmul.f32 %v9490_v31, %v7583_v28  ;;  %v7723_v1 = vmul.f32 %v7643_v43, %v13309_v62 }
0x1250   :  { %v9494_v30 = vpop.eup %9493  ;;  %9513 = vtanh.f32 %v7691_v40  ;;  %v7728_v10 = vmul.f32 %v9492_v63, %v7584_v52  ;;  %v7734_v51 = vadd.f32 %v7726_v45, %v7718_v21  ;;  %v7724_v11 = vmul.f32 %v7644_v41, %v13312_v44 }
0x1251   :  { %v9496_v17 = vpop.eup %9495  ;;  %9515 = vtanh.f32 %v7692_v60  ;;  %v7729_v7 = vmul.f32 %v9494_v30, %v7585_v36  ;;  %v7735_v38 = vadd.f32 %v7727_v34, %v7719_v4  ;;  %v7725_v48 = vmul.f32 %v7645_v14, %v13315_v39 }
0x1252   :  { %v9498_v18 = vpop.eup %9497  ;;  %9517 = vtanh.f32 %v7693_v13  ;;  %v7730_v57 = vmul.f32 %v9496_v17, %v7586_v58  ;;  %v7736_v15 = vadd.f32 %v7728_v10, %v7720_v47 }
0x1253   :  { %v9500_v56 = vpop.eup %9499  ;;  %v7731_v42 = vmul.f32 %v9498_v18, %v7587_v12  ;;  %v7737_v28 = vadd.f32 %v7729_v7, %v7721_v54  ;;  %9519 = vtanh.f32 %v7734_v51  ;;  %v7929_v40 = vcombine.low %v7734_v51, %v7735_v38 }
0x1254   :  { %v9502_v62 = vpop.eup %9501  ;;  %v7732_v61 = vmul.f32 %v9500_v56, %v7588_v16  ;;  %v7738_v26 = vadd.f32 %v7730_v57, %v7722_v50  ;;  %9521 = vtanh.f32 %v7735_v38 }
0x1255   :  { %v9504_v52 = vpop.eup %9503  ;;  %v7733_v60 = vmul.f32 %v9502_v62, %v7589_v35  ;;  %v7739_v44 = vadd.f32 %v7731_v42, %v7723_v1  ;;  %9523 = vtanh.f32 %v7736_v15  ;;  %v7930_v33 = vcombine.low %v7736_v15, %v7737_v28 }
0x1256   :  { %v9506_v0 = vpop.eup %9505  ;;  %v7740_v53 = vadd.f32 %v7732_v61, %v7724_v11  ;;  %9525 = vtanh.f32 %v7737_v28  ;;  %v7702_v58 = vadd.f32 1.0, %v9504_v52  ;;  %v7939_v25 = vrot.slane %v7929_v40, %v13794_v5  ;;  %v7766_v61 = vld [vmem:[#allocation5] sm:$0xff] }
0x1257   :  { %v9508_v39 = vpop.eup %9507  ;;  %v7741_v13 = vadd.f32 %v7733_v60, %v7725_v48  ;;  %9527 = vtanh.f32 %v7738_v26  ;;  %v7931_v19 = vcombine.low %v7738_v26, %v7739_v44  ;;  %v7946_v59 = vrot.slane %v7930_v33, %v13794_v5 }
0x1258   :  { %v9510_v36 = vpop.eup %9509  ;;  %9529 = vtanh.f32 %v7739_v44  ;;  %v7703_v12 = vadd.f32 1.0, %v9506_v0  ;;  %v7704_v16 = vadd.f32 1.0, %v9508_v39  ;;  %v7710_v8 = vmul.f32 0.5, %v7702_v58  ;;  %v7768_v44 = vld [vmem:[#allocation5 + $0x10] sm:$0xff] }
0x1259   :  { %v9512_v27 = vpop.eup %9511  ;;  %9531 = vtanh.f32 %v7740_v53  ;;  %v7932_v24 = vcombine.low %v7740_v53, %v7741_v13  ;;  %v7705_v9 = vadd.f32 1.0, %v9510_v36  ;;  %v7953_v23 = vrot.slane %v7931_v19, %v13794_v5  ;;  %v7770_v53 = vld [vmem:[#allocation5 + $0x20] sm:$0xff]  ;;  %v7772_v58 = vld [vmem:[#allocation5 + $0x30] sm:$0xff] }
0x125a   :  { %v9514_v2 = vpop.eup %9513  ;;  %9533 = vtanh.f32 %v7741_v13  ;;  %v7961_v20 = vcombine.low %v7939_v25, %v7946_v59  ;;  %v7706_v29 = vadd.f32 1.0, %v9512_v27  ;;  %v7711_v3 = vmul.f32 0.5, %v7703_v12  ;;  %v7774_v12 = vld [vmem:[#allocation5 + $0x40] sm:$0xff] }
0x125b   :  { %v9516_v37 = vpop.eup %9515  ;;  %v7960_v35 = vrot.slane %v7932_v24, %v13794_v5  ;;  %v7707_v21 = vadd.f32 1.0, %v9514_v2  ;;  %v7712_v55 = vmul.f32 0.5, %v7704_v16  ;;  %v7713_v41 = vmul.f32 0.5, %v7705_v9 }
0x125c   :  { %v9518_v32 = vpop.eup %9517  ;;  %v7969_v49 = vrot.slane %v7961_v20, %v13794_v5  ;;  %v7708_v22 = vadd.f32 1.0, %v9516_v37  ;;  %v7714_v14 = vmul.f32 0.5, %v7706_v29  ;;  %v7776_v37 = vld [vmem:[#allocation5 + $0x50] sm:$0xff] }
0x125d   :  { %v9520_v6 = vpop.eup %9519  ;;  %v7962_v46 = vcombine.low %v7953_v23, %v7960_v35  ;;  %v7709_v31 = vadd.f32 1.0, %v9518_v32  ;;  %v7715_v30 = vmul.f32 0.5, %v7707_v21  ;;  %v7778_v35 = vld [vmem:[#allocation5 + $0x60] sm:$0xff] }
0x125e   :  { %v9522_v4 = vpop.eup %9521  ;;  %v7750_v43 = vmul.f32 %v9520_v6, %v7710_v8  ;;  %v7716_v11 = vmul.f32 0.5, %v7708_v22  ;;  %v7780_v8 = vld [vmem:[#allocation5 + $0x70] sm:$0xff] }
0x125f   :  { %v9524_v47 = vpop.eup %9523  ;;  %v7751_v54 = vmul.f32 %v9522_v4, %v7711_v3  ;;  %v7976_v45 = vrot.slane %v7962_v46, %v13794_v5  ;;  %v7717_v18 = vmul.f32 0.5, %v7709_v31 }
0x1260   :  { %v9526_v63 = vpop.eup %9525  ;;  %v7752_v50 = vmul.f32 %v9524_v47, %v7712_v55  ;;  %7758 = vst [vmem:[#allocation5 + $0xf] sm:$0x1] %v7750_v43 }
0x1261   :  { %v9528_v34 = vpop.eup %9527  ;;  %v7753_v1 = vmul.f32 %v9526_v63, %v7713_v41  ;;  %7759 = vst [vmem:[#allocation5 + $0x1f] sm:$0x1] %v7751_v54  ;;  %v7870_v10 = vcombine.low %v7750_v43, %v7751_v54  ;;  %v7977_v51 = vcombine.low %v7969_v49, %v7976_v45 }
0x1262   :  { %v9530_v17 = vpop.eup %9529  ;;  %v7754_v7 = vmul.f32 %v9528_v34, %v7714_v14  ;;  %7760 = vst [vmem:[#allocation5 + $0x2f] sm:$0x1] %v7752_v50 }
0x1263   :  { %v9532_v38 = vpop.eup %9531  ;;  %v7755_v48 = vmul.f32 %v9530_v17, %v7715_v30  ;;  %7761 = vst [vmem:[#allocation5 + $0x3f] sm:$0x1] %v7753_v1  ;;  %v7871_v57 = vcombine.low %v7752_v50, %v7753_v1  ;;  %7984 = vst [vmem:[%s13439_s8] sm:$0xff] %v7977_v51  ;;  %v7880_v40 = vrot.slane %v7870_v10, %v13794_v5 }
0x1264   :  { %v9534_v15 = vpop.eup %9533  ;;  %v7756_v56 = vmul.f32 %v9532_v38, %v7716_v11  ;;  %7762 = vst [vmem:[#allocation5 + $0x4f] sm:$0x1] %v7754_v7 }
0x1265   :  { %v7757_v42 = vmul.f32 %v9534_v15, %v7717_v18  ;;  %7763 = vst [vmem:[#allocation5 + $0x5f] sm:$0x1] %v7755_v48  ;;  %v7872_v28 = vcombine.low %v7754_v7, %v7755_v48  ;;  %v7887_v62 = vrot.slane %v7871_v57, %v13794_v5 }
0x1266   :  { %7764 = vst [vmem:[#allocation5 + $0x6f] sm:$0x1] %v7756_v56 }
0x1267   :  { %7765 = vst [vmem:[#allocation5 + $0x7f] sm:$0x1] %v7757_v42  ;;  %v7767_v26 = vld [vmem:[#allocation5 + $0x8] sm:$0xff]  ;;  %v7873_v52 = vcombine.low %v7756_v56, %v7757_v42  ;;  %v7902_v60 = vcombine.low %v7880_v40, %v7887_v62  ;;  %v7894_v19 = vrot.slane %v7872_v28, %v13794_v5 }
0x1268   :  { %v7769_v33 = vld [vmem:[#allocation5 + $0x18] sm:$0xff]  ;;  %v8104_v0 = vpack.c.bf16 %v7767_v26, %v7766_v61 }
0x1269   :  { %v7771_v39 = vld [vmem:[#allocation5 + $0x28] sm:$0xff]  ;;  %v8109_v13 = vpack.c.bf16 %v7769_v33, %v7768_v44  ;;  %v7901_v36 = vrot.slane %v7873_v52, %v13794_v5  ;;  %v7910_v16 = vrot.slane %v7902_v60, %v13794_v5 }
0x126a   :  { %v7773_v59 = vld [vmem:[#allocation5 + $0x38] sm:$0xff]  ;;  %8105 = vst [vmem:[%s13440_s6] sm:$0xff] %v8104_v0   ;;  %v8114_v27 = vpack.c.bf16 %v7771_v39, %v7770_v53 }
0x126b   :  { %v7775_v24 = vld [vmem:[#allocation5 + $0x48] sm:$0xff]  ;;  %8141 = vst [vmem:[%s13440_s6 + $0x8] sm:$0xff] %v8109_v13   ;;  %v8119_v25 = vpack.c.bf16 %v7773_v59, %v7772_v58  ;;  %v7903_v2 = vcombine.low %v7894_v19, %v7901_v36 }
0x126c   :  { %v7777_v9 = vld [vmem:[#allocation5 + $0x58] sm:$0xff]  ;;  %8142 = vst [vmem:[%s13440_s6 + $0x10] sm:$0xff] %v8114_v27   ;;  %v8124_v23 = vpack.c.bf16 %v7775_v24, %v7774_v12 }
0x126d   :  { %v7779_v20 = vld [vmem:[#allocation5 + $0x68] sm:$0xff]  ;;  %8143 = vst [vmem:[%s13440_s6 + $0x18] sm:$0xff] %v8119_v25   ;;  %v8129_v32 = vpack.c.bf16 %v7777_v9, %v7776_v37  ;;  %v7917_v29 = vrot.slane %v7903_v2, %v13794_v5 }
0x126e   :  { %v7781_v6 = vld [vmem:[#allocation5 + $0x78] sm:$0xff]  ;;  %8144 = vst [vmem:[%s13440_s6 + $0x20] sm:$0xff] %v8124_v23   ;;  %v8134_v21 = vpack.c.bf16 %v7779_v20, %v7778_v35 }
0x126f   :  { %8145 = vst [vmem:[%s13440_s6 + $0x28] sm:$0xff] %v8129_v32   ;;  %v8139_v3 = vpack.c.bf16 %v7781_v6, %v7780_v8  ;;  %v7918_v46 = vcombine.low %v7910_v16, %v7917_v29 }
0x1270   :  { %8146 = vst [vmem:[%s13440_s6 + $0x30] sm:$0xff] %v8134_v21  }
0x1271   :  { %8147 = vst [vmem:[%s13440_s6 + $0x38] sm:$0xff] %v8139_v3   ;;  %7983 = vst [vmem:[%s13441_s7] sm:$0xff] %v7918_v46 }

</bundles_post_ra>
